<compile_context>
chip_gen: v5e
topology: v5e:2x2
jax: 0.10.0
libtpu: 0.0.40
codegen_flags: <defaults>
</compile_context>

<pallas_src>
import functools

import jax
import jax.numpy as jnp
from jax import lax
from jax.experimental import pallas as pl
from jax.experimental.pallas import tpu as pltpu


# ----------------------------------------------------------------------------
# In-kernel helpers (traced inside Pallas kernels)
# ----------------------------------------------------------------------------
def _topk_softmax(s, k):
    """Keep exactly top-k entries along the last axis of `s` (ties -> lowest
    index, like torch.topk), set the rest to -inf, then softmax.  `k` is a
    static Python int, so the selection loop is fully unrolled."""
    n = s.shape[-1]
    col = lax.broadcasted_iota(jnp.int32, s.shape, dimension=s.ndim - 1)
    neg_inf = jnp.float32(-jnp.inf)

    selected = jnp.zeros_like(s)
    cur = s
    for _ in range(k):                      # static unroll (LLO-visible)
        row_max = jnp.max(cur, axis=-1, keepdims=True)
        is_max = cur == row_max
        idx = jnp.min(jnp.where(is_max, col, n), axis=-1, keepdims=True)
        hit = col == idx
        selected = jnp.where(hit, jnp.float32(1.0), selected)
        cur = jnp.where(hit, neg_inf, cur)

    masked = jnp.where(selected > 0, s, neg_inf)
    m = jnp.max(masked, axis=-1, keepdims=True)
    e = jnp.exp(masked - m)
    denom = jnp.sum(e, axis=-1, keepdims=True)
    return e * pl.reciprocal(denom, approx=True)


def _layernorm(y, g, b):
    """LayerNorm over the last axis, eps=1e-5 (PyTorch default)."""
    mu = jnp.mean(y, axis=-1, keepdims=True)
    var = jnp.mean((y - mu) ** 2, axis=-1, keepdims=True)
    return (y - mu) * lax.rsqrt(var + 1e-5) * g + b


# ----------------------------------------------------------------------------
# Pallas kernels
# ----------------------------------------------------------------------------
def _linear_kernel(x_ref, w_ref, b_ref, o_ref):
    o_ref[...] = (
        jnp.dot(x_ref[...], w_ref[...], preferred_element_type=jnp.float32)
        + b_ref[...]
    )


def _ffn_kernel(x_ref, w1_ref, b1_ref, w2_ref, b2_ref, o_ref):
    h = jnp.dot(x_ref[...], w1_ref[...], preferred_element_type=jnp.float32) + b1_ref[...]
    h = jnp.maximum(h, 0.0)
    o_ref[...] = (
        jnp.dot(h, w2_ref[...], preferred_element_type=jnp.float32) + b2_ref[...]
    )


def _adjacency_kernel(nv1_ref, nv2_ref, o_ref, *, topk):
    # adj = softmax(topk(nv1 @ nv2^T)) -- parameter-only, computed ONCE per pair.
    adj = lax.dot_general(
        nv1_ref[...], nv2_ref[...],
        dimension_numbers=(((1,), (1,)), ((), ())),   # contract last dims (no .T)
        preferred_element_type=jnp.float32,
    )
    o_ref[...] = _topk_softmax(adj, topk)


def _conv_layer_kernel(adj_ref, src_ref, tgt_ref,
                       n1g_ref, n1b_ref, w1_ref, b1_ref, w2_ref, b2_ref,
                       n2g_ref, n2b_ref, o_ref):
    """Fused GraphConvolutionLayer: conv -> LN -> FFN -> LN, one batch element."""
    src = src_ref[0]                                    # [N, H]
    tgt = tgt_ref[0]                                    # [N, H]
    conv = jnp.dot(adj_ref[...], src, preferred_element_type=jnp.float32)
    y1 = _layernorm(tgt + conv, n1g_ref[...], n1b_ref[...])
    h1 = jnp.maximum(
        jnp.dot(y1, w1_ref[...], preferred_element_type=jnp.float32) + b1_ref[...], 0.0)
    ff = jnp.dot(h1, w2_ref[...], preferred_element_type=jnp.float32) + b2_ref[...]
    o_ref[0] = _layernorm(y1 + ff, n2g_ref[...], n2b_ref[...])


def _attn_layer_kernel(src_ref, tgt_ref, wq_ref, bq_ref, wkv_ref, bkv_ref,
                       n1g_ref, n1b_ref, w1_ref, b1_ref, w2_ref, b2_ref,
                       n2g_ref, n2b_ref, o_ref, *,
                       head_dim, num_heads, hidden_dim, topk):
    """Fused GraphAttentionLayer: QKV -> sparse attention -> LN -> FFN -> LN."""
    src = src_ref[0]                                    # [N, H]
    tgt = tgt_ref[0]                                    # [N, H]
    scale = 1.0 / (hidden_dim ** 0.5)                   # matches reference (1/sqrt(H))

    q = (jnp.dot(tgt, wq_ref[...], preferred_element_type=jnp.float32)
         + bq_ref[...]) * scale                         # [N, H]
    kv = jnp.dot(src, wkv_ref[...], preferred_element_type=jnp.float32) + bkv_ref[...]
    k = kv[:, :hidden_dim]                              # [N, H]
    v = kv[:, hidden_dim:]                              # [N, H]

    # Head split -> [num_heads, N, head_dim]; batched contraction over heads.
    q3 = jnp.stack([q[:, i * head_dim:(i + 1) * head_dim] for i in range(num_heads)], 0)
    k3 = jnp.stack([k[:, i * head_dim:(i + 1) * head_dim] for i in range(num_heads)], 0)
    v3 = jnp.stack([v[:, i * head_dim:(i + 1) * head_dim] for i in range(num_heads)], 0)

    s = jnp.einsum('hnd,hmd->hnm', q3, k3, preferred_element_type=jnp.float32)
    a = _topk_softmax(s, topk)                          # single top-k loop, all heads
    o3 = jnp.einsum('hnm,hmd->hnd', a, v3, preferred_element_type=jnp.float32)
    attn = jnp.concatenate([o3[i] for i in range(num_heads)], axis=-1)   # [N, H]

    y1 = _layernorm(tgt + attn, n1g_ref[...], n1b_ref[...])
    h1 = jnp.maximum(
        jnp.dot(y1, w1_ref[...], preferred_element_type=jnp.float32) + b1_ref[...], 0.0)
    ff = jnp.dot(h1, w2_ref[...], preferred_element_type=jnp.float32) + b2_ref[...]
    o_ref[0] = _layernorm(y1 + ff, n2g_ref[...], n2b_ref[...])


# ----------------------------------------------------------------------------
# Python wrappers around pallas_call
# ----------------------------------------------------------------------------
def _choose_tile_m(m, max_tile=512):
    """Biggest M tile <= max_tile that divides m (keeps VMEM bounded on v7x)."""
    if m <= max_tile:
        return m
    for t in (512, 256, 128, 64, 32, 16, 8):
        if m % t == 0:
            return t
    return m


def linear(x, w, b):
    """x: [..., K]  w: [K, Kout]  b: [1, Kout]  ->  [..., Kout]"""
    shape = x.shape
    kin, kout = w.shape
    x2 = x.reshape(-1, kin)
    m = x2.shape[0]
    tm = _choose_tile_m(m)
    out = pl.pallas_call(
        _linear_kernel,
        out_shape=jax.ShapeDtypeStruct((m, kout), jnp.float32),
        grid=(m // tm,),
        in_specs=[
            pl.BlockSpec((tm, kin), lambda i: (i, 0)),
            pl.BlockSpec((kin, kout), lambda i: (0, 0)),
            pl.BlockSpec((1, kout), lambda i: (0, 0)),
        ],
        out_specs=pl.BlockSpec((tm, kout), lambda i: (i, 0)),
        compiler_params=pltpu.CompilerParams(dimension_semantics=("parallel",)),
    )(x2, w, b)
    return out.reshape(shape[:-1] + (kout,))


def ffn(x, w1, b1, w2, b2):
    """linear2(relu(linear1(x)))  (dropout = identity)."""
    shape = x.shape
    kin = shape[-1]
    kmid = w1.shape[1]
    kout = w2.shape[1]
    x2 = x.reshape(-1, kin)
    m = x2.shape[0]
    tm = _choose_tile_m(m)
    out = pl.pallas_call(
        _ffn_kernel,
        out_shape=jax.ShapeDtypeStruct((m, kout), jnp.float32),
        grid=(m // tm,),
        in_specs=[
            pl.BlockSpec((tm, kin), lambda i: (i, 0)),
            pl.BlockSpec((kin, kmid), lambda i: (0, 0)),
            pl.BlockSpec((1, kmid), lambda i: (0, 0)),
            pl.BlockSpec((kmid, kout), lambda i: (0, 0)),
            pl.BlockSpec((1, kout), lambda i: (0, 0)),
        ],
        out_specs=pl.BlockSpec((tm, kout), lambda i: (i, 0)),
        compiler_params=pltpu.CompilerParams(dimension_semantics=("parallel",)),
    )(x2, w1, b1, w2, b2)
    return out.reshape(shape[:-1] + (kout,))


def sparse_adjacency(nv1, nv2, topk):
    """softmax(topk(nv1 @ nv2^T)) -- computed once per nodevec pair."""
    n, h = nv1.shape
    kernel = functools.partial(_adjacency_kernel, topk=topk)
    return pl.pallas_call(
        kernel,
        out_shape=jax.ShapeDtypeStruct((n, n), jnp.float32),
        grid=(1,),
        in_specs=[
            pl.BlockSpec((n, h), lambda i: (0, 0)),
            pl.BlockSpec((n, h), lambda i: (0, 0)),
        ],
        out_specs=pl.BlockSpec((n, n), lambda i: (0, 0)),
    )(nv1, nv2)


def graph_conv_layer_fwd(p, adj, src, tgt):
    b, n, h = src.shape
    spec_bnh = pl.BlockSpec((1, n, h), lambda i: (i, 0, 0))
    spec_1h = pl.BlockSpec((1, h), lambda i: (0, 0))
    spec_hh = pl.BlockSpec((h, h), lambda i: (0, 0))
    return pl.pallas_call(
        _conv_layer_kernel,
        out_shape=jax.ShapeDtypeStruct((b, n, h), jnp.float32),
        grid=(b,),
        in_specs=[
            pl.BlockSpec((n, n), lambda i: (0, 0)),
            spec_bnh, spec_bnh,
            spec_1h, spec_1h,
            spec_hh, spec_1h, spec_hh, spec_1h,
            spec_1h, spec_1h,
        ],
        out_specs=spec_bnh,
        compiler_params=pltpu.CompilerParams(dimension_semantics=("parallel",)),
    )(adj, src, tgt,
      p["n1_g"], p["n1_b"], p["w1"], p["b1"], p["w2"], p["b2"],
      p["n2_g"], p["n2_b"])


def graph_attention_layer_fwd(p, src, tgt, head_dim, topk):
    b, n, h = src.shape
    num_heads = h // head_dim
    kernel = functools.partial(
        _attn_layer_kernel,
        head_dim=head_dim, num_heads=num_heads, hidden_dim=h, topk=topk,
    )
    spec_bnh = pl.BlockSpec((1, n, h), lambda i: (i, 0, 0))
    spec_1h = pl.BlockSpec((1, h), lambda i: (0, 0))
    spec_hh = pl.BlockSpec((h, h), lambda i: (0, 0))
    return pl.pallas_call(
        kernel,
        out_shape=jax.ShapeDtypeStruct((b, n, h), jnp.float32),
        grid=(b,),
        in_specs=[
            spec_bnh, spec_bnh,
            spec_hh, spec_1h,
            pl.BlockSpec((h, 2 * h), lambda i: (0, 0)),
            pl.BlockSpec((1, 2 * h), lambda i: (0, 0)),
            spec_1h, spec_1h,
            spec_hh, spec_1h, spec_hh, spec_1h,
            spec_1h, spec_1h,
        ],
        out_specs=spec_bnh,
        compiler_params=pltpu.CompilerParams(dimension_semantics=("parallel",)),
    )(src, tgt, p["wq"], p["bq"], p["wkv"], p["bkv"],
      p["n1_g"], p["n1_b"], p["w1"], p["b1"], p["w2"], p["b2"],
      p["n2_g"], p["n2_b"])


# ----------------------------------------------------------------------------
# Module-level forward (glue in plain JAX, hot paths in fused Pallas kernels)
# ----------------------------------------------------------------------------
def ssg_block_fwd(bp, adj, src, tgt, head_dim, topk):
    tgt = graph_conv_layer_fwd(bp["conv"], adj, src, tgt)
    tgt = graph_attention_layer_fwd(bp["attn"], src, tgt, head_dim, topk)
    return tgt


def tag_encoder_fwd(params, src, tgt, head_dim, topk):
    src = linear(src, params["src_emb_w"], params["src_emb_b"])
    tgt = linear(tgt, params["tgt_emb_w"], params["tgt_emb_b"])

    # Adjacency depends only on parameters: compute once per nodevec pair and
    # reuse across all batch elements and all blocks sharing that pair.
    adj_hist = sparse_adjacency(params["src_nv1"], params["src_nv2"], topk)
    adj_trans = sparse_adjacency(params["tgt_nv1"], params["src_nv2"], topk)
    adj_fut = sparse_adjacency(params["tgt_nv1"], params["tgt_nv2"], topk)

    for bp in params["history_blocks"]:
        src = ssg_block_fwd(bp, adj_hist, src, src, head_dim, topk)
    for bp in params["transition_blocks"]:
        tgt = ssg_block_fwd(bp, adj_trans, src, tgt, head_dim, topk)
    for bp in params["future_blocks"]:
        tgt = ssg_block_fwd(bp, adj_fut, tgt, tgt, head_dim, topk)

    # final feed_forward: linear2(relu(linear1(x))), dropout = identity
    return ffn(tgt, params["lin1_w"], params["lin1_b"],
               params["lin2_w"], params["lin2_b"])


# ----------------------------------------------------------------------------
# Deterministic parameter initialization (mirrors module shapes)
# ----------------------------------------------------------------------------
def _init_dense(key, fan_in, fan_out):
    k1, k2 = jax.random.split(key)
    bound = 1.0 / (fan_in ** 0.5)
    w = jax.random.uniform(k1, (fan_in, fan_out), jnp.float32, -bound, bound)
    b = jax.random.uniform(k2, (1, fan_out), jnp.float32, -bound, bound)
    return w, b


def _xavier_uniform(key, shape):
    bound = (6.0 / (shape[0] + shape[1])) ** 0.5
    return jax.random.uniform(key, shape, jnp.float32, -bound, bound)


def _init_conv_layer(key, h):
    ks = jax.random.split(key, 2)
    w1, b1 = _init_dense(ks[0], h, h)
    w2, b2 = _init_dense(ks[1], h, h)
    ones = jnp.ones((1, h), jnp.float32)
    zeros = jnp.zeros((1, h), jnp.float32)
    return dict(w1=w1, b1=b1, w2=w2, b2=b2,
                n1_g=ones, n1_b=zeros, n2_g=ones, n2_b=zeros)


def _init_attn_layer(key, h):
    ks = jax.random.split(key, 5)
    wq, bq = _init_dense(ks[0], h, h)
    wk, bk = _init_dense(ks[1], h, h)
    wv, bv = _init_dense(ks[2], h, h)
    w1, b1 = _init_dense(ks[3], h, h)
    w2, b2 = _init_dense(ks[4], h, h)
    ones = jnp.ones((1, h), jnp.float32)
    zeros = jnp.zeros((1, h), jnp.float32)
    return dict(wq=wq, bq=bq,
                wkv=jnp.concatenate([wk, wv], axis=1),     # fused K|V projection
                bkv=jnp.concatenate([bk, bv], axis=1),
                w1=w1, b1=b1, w2=w2, b2=b2,
                n1_g=ones, n1_b=zeros, n2_g=ones, n2_b=zeros)


def _init_ssg_block(key, h):
    kc, ka = jax.random.split(key)
    return dict(conv=_init_conv_layer(kc, h), attn=_init_attn_layer(ka, h))


def init_tag_encoder(key, input_dim, hidden_dim, output_dim, num_blocks, num_nodes):
    keys = jax.random.split(key, 8 + 3 * num_blocks)
    src_emb_w, src_emb_b = _init_dense(keys[0], input_dim, hidden_dim)
    tgt_emb_w, tgt_emb_b = _init_dense(keys[1], input_dim, hidden_dim)
    params = dict(
        src_emb_w=src_emb_w, src_emb_b=src_emb_b,
        tgt_emb_w=tgt_emb_w, tgt_emb_b=tgt_emb_b,
        src_nv1=_xavier_uniform(keys[2], (num_nodes, hidden_dim)),
        src_nv2=_xavier_uniform(keys[3], (num_nodes, hidden_dim)),
        tgt_nv1=_xavier_uniform(keys[4], (num_nodes, hidden_dim)),
        tgt_nv2=_xavier_uniform(keys[5], (num_nodes, hidden_dim)),
    )
    lin1_w, lin1_b = _init_dense(keys[6], hidden_dim, hidden_dim)
    lin2_w, lin2_b = _init_dense(keys[7], hidden_dim, output_dim)
    params.update(lin1_w=lin1_w, lin1_b=lin1_b, lin2_w=lin2_w, lin2_b=lin2_b)
    params["history_blocks"] = [
        _init_ssg_block(keys[8 + i], hidden_dim) for i in range(num_blocks)]
    params["transition_blocks"] = [
        _init_ssg_block(keys[8 + num_blocks + i], hidden_dim) for i in range(num_blocks)]
    params["future_blocks"] = [
        _init_ssg_block(keys[8 + 2 * num_blocks + i], hidden_dim) for i in range(num_blocks)]
    return params


# ----------------------------------------------------------------------------
# Demo
# ----------------------------------------------------------------------------
if __name__ == "__main__":
    # TODO(synk): dropout is treated as identity (eval mode); training-mode
    # stochastic dropout is not implemented.
    batch = 2
    num_nodes = 8
    input_dim = 4
    hidden_dim = 32
    output_dim = 16
    num_blocks = 2
    num_attention_heads = 8   # chunk size per head (as in the PyTorch split)
    topk = 3

    key = jax.random.PRNGKey(0)
    kp, ks, kt = jax.random.split(key, 3)
    params = init_tag_encoder(kp, input_dim, hidden_dim, output_dim,
                              num_blocks, num_nodes)

    src = jax.random.normal(ks, (batch, num_nodes, input_dim), jnp.float32)
    tgt = jax.random.normal(kt, (batch, num_nodes, input_dim), jnp.float32)

    fwd = jax.jit(tag_encoder_fwd, static_argnames=("head_dim", "topk"))
    out = fwd(params, src, tgt, head_dim=num_attention_heads, topk=topk)
    out = jax.block_until_ready(out)
    assert out.shape == (batch, num_nodes, output_dim)
    assert bool(jnp.all(jnp.isfinite(out)))
    print("KERNEL_OK")
</pallas_src>

<mosaic_0001>
module attributes {stable_mosaic.version = 11 : i64} {
  func.func @_adjacency_kernel(%arg0: i32, %arg1: memref<8x32xf32, #tpu.memory_space<vmem>>, %arg2: memref<8x32xf32, #tpu.memory_space<vmem>>, %arg3: memref<8x8xf32, #tpu.memory_space<vmem>>) attributes {dimension_semantics = [#tpu.dimension_semantics<arbitrary>], iteration_bounds = array<i64: 1>, scalar_prefetch = 0 : i64, scratch_operands = 0 : i64, tpu.core_type = #tpu.core_type<tc>, window_params = [{pipeline_mode = #tpu.pipeline_mode<synchronous>, transform_indices = @transform_0, window_bounds = array<i64: 8, 32>}, {pipeline_mode = #tpu.pipeline_mode<synchronous>, transform_indices = @transform_1, window_bounds = array<i64: 8, 32>}, {pipeline_mode = #tpu.pipeline_mode<synchronous>, transform_indices = @transform_2, window_bounds = array<i64: 8, 8>}]} {
    %c0 = arith.constant 0 : index
    %c0_0 = arith.constant 0 : index
    %0 = vector.load %arg1[%c0, %c0_0] : memref<8x32xf32, #tpu.memory_space<vmem>>, vector<8x32xf32>
    %c0_1 = arith.constant 0 : index
    %c0_2 = arith.constant 0 : index
    %1 = vector.load %arg2[%c0_1, %c0_2] : memref<8x32xf32, #tpu.memory_space<vmem>>, vector<8x32xf32>
    %cst = arith.constant dense<0.000000e+00> : vector<8x8xf32>
    %2 = tpu.matmul %0, %1, %cst {dimension_numbers = #tpu.dot_dimension_numbers<[1], [1], [0], [0], [0, 0, 1, 0], [], []>} : vector<8x32xf32>, vector<8x32xf32>, vector<8x8xf32> -> vector<8x8xf32>
    %3 = tpu.iota {dimensions = array<i32: 1>} : vector<8x8xi32>
    %cst_3 = arith.constant 0.000000e+00 : f32
    %4 = vector.broadcast %cst_3 : f32 to vector<8x8xf32>
    %cst_4 = arith.constant dense<0xFF800000> : vector<8xf32>
    %5 = vector.multi_reduction <maximumf>, %2, %cst_4 [1] : vector<8x8xf32> to vector<8xf32>
    %6 = vector.shape_cast %5 : vector<8xf32> to vector<8x1xf32>
    %7 = vector.broadcast %6 : vector<8x1xf32> to vector<8x8xf32>
    %8 = arith.cmpf oeq, %2, %7 : vector<8x8xf32>
    %c8_i32 = arith.constant 8 : i32
    %9 = vector.broadcast %c8_i32 : i32 to vector<8x8xi32>
    %10 = arith.select %8, %3, %9 : vector<8x8xi1>, vector<8x8xi32>
    %cst_5 = arith.constant dense<2147483647> : vector<8xi32>
    %11 = vector.multi_reduction <minsi>, %10, %cst_5 [1] : vector<8x8xi32> to vector<8xi32>
    %12 = vector.shape_cast %11 : vector<8xi32> to vector<8x1xi32>
    %13 = vector.broadcast %12 : vector<8x1xi32> to vector<8x8xi32>
    %14 = arith.cmpi eq, %3, %13 : vector<8x8xi32>
    %cst_6 = arith.constant 1.000000e+00 : f32
    %15 = vector.broadcast %cst_6 : f32 to vector<8x8xf32>
    %16 = arith.select %14, %15, %4 : vector<8x8xi1>, vector<8x8xf32>
    %cst_7 = arith.constant 0xFF800000 : f32
    %17 = vector.broadcast %cst_7 : f32 to vector<8x8xf32>
    %18 = arith.select %14, %17, %2 : vector<8x8xi1>, vector<8x8xf32>
    %cst_8 = arith.constant dense<0xFF800000> : vector<8xf32>
    %19 = vector.multi_reduction <maximumf>, %18, %cst_8 [1] : vector<8x8xf32> to vector<8xf32>
    %20 = vector.shape_cast %19 : vector<8xf32> to vector<8x1xf32>
    %21 = vector.broadcast %20 : vector<8x1xf32> to vector<8x8xf32>
    %22 = arith.cmpf oeq, %18, %21 : vector<8x8xf32>
    %c8_i32_9 = arith.constant 8 : i32
    %23 = vector.broadcast %c8_i32_9 : i32 to vector<8x8xi32>
    %24 = arith.select %22, %3, %23 : vector<8x8xi1>, vector<8x8xi32>
    %cst_10 = arith.constant dense<2147483647> : vector<8xi32>
    %25 = vector.multi_reduction <minsi>, %24, %cst_10 [1] : vector<8x8xi32> to vector<8xi32>
    %26 = vector.shape_cast %25 : vector<8xi32> to vector<8x1xi32>
    %27 = vector.broadcast %26 : vector<8x1xi32> to vector<8x8xi32>
    %28 = arith.cmpi eq, %3, %27 : vector<8x8xi32>
    %cst_11 = arith.constant 1.000000e+00 : f32
    %29 = vector.broadcast %cst_11 : f32 to vector<8x8xf32>
    %30 = arith.select %28, %29, %16 : vector<8x8xi1>, vector<8x8xf32>
    %cst_12 = arith.constant 0xFF800000 : f32
    %31 = vector.broadcast %cst_12 : f32 to vector<8x8xf32>
    %32 = arith.select %28, %31, %18 : vector<8x8xi1>, vector<8x8xf32>
    %cst_13 = arith.constant dense<0xFF800000> : vector<8xf32>
    %33 = vector.multi_reduction <maximumf>, %32, %cst_13 [1] : vector<8x8xf32> to vector<8xf32>
    %34 = vector.shape_cast %33 : vector<8xf32> to vector<8x1xf32>
    %35 = vector.broadcast %34 : vector<8x1xf32> to vector<8x8xf32>
    %36 = arith.cmpf oeq, %32, %35 : vector<8x8xf32>
    %c8_i32_14 = arith.constant 8 : i32
    %37 = vector.broadcast %c8_i32_14 : i32 to vector<8x8xi32>
    %38 = arith.select %36, %3, %37 : vector<8x8xi1>, vector<8x8xi32>
    %cst_15 = arith.constant dense<2147483647> : vector<8xi32>
    %39 = vector.multi_reduction <minsi>, %38, %cst_15 [1] : vector<8x8xi32> to vector<8xi32>
    %40 = vector.shape_cast %39 : vector<8xi32> to vector<8x1xi32>
    %41 = vector.broadcast %40 : vector<8x1xi32> to vector<8x8xi32>
    %42 = arith.cmpi eq, %3, %41 : vector<8x8xi32>
    %cst_16 = arith.constant 1.000000e+00 : f32
    %43 = vector.broadcast %cst_16 : f32 to vector<8x8xf32>
    %44 = arith.select %42, %43, %30 : vector<8x8xi1>, vector<8x8xf32>
    %cst_17 = arith.constant 0.000000e+00 : f32
    %45 = vector.broadcast %cst_17 : f32 to vector<8x8xf32>
    %46 = arith.cmpf ogt, %44, %45 : vector<8x8xf32>
    %cst_18 = arith.constant 0xFF800000 : f32
    %47 = vector.broadcast %cst_18 : f32 to vector<8x8xf32>
    %48 = arith.select %46, %2, %47 : vector<8x8xi1>, vector<8x8xf32>
    %cst_19 = arith.constant dense<0xFF800000> : vector<8xf32>
    %49 = vector.multi_reduction <maximumf>, %48, %cst_19 [1] : vector<8x8xf32> to vector<8xf32>
    %50 = vector.shape_cast %49 : vector<8xf32> to vector<8x1xf32>
    %51 = vector.broadcast %50 : vector<8x1xf32> to vector<8x8xf32>
    %52 = arith.subf %48, %51 : vector<8x8xf32>
    %53 = math.exp %52 : vector<8x8xf32>
    %cst_20 = arith.constant dense<0.000000e+00> : vector<8xf32>
    %54 = vector.multi_reduction <add>, %53, %cst_20 [1] : vector<8x8xf32> to vector<8xf32>
    %55 = vector.shape_cast %54 : vector<8xf32> to vector<8x1xf32>
    %56 = tpu.reciprocal %55 {approx = true} : vector<8x1xf32> -> vector<8x1xf32>
    %57 = vector.broadcast %56 : vector<8x1xf32> to vector<8x8xf32>
    %58 = arith.mulf %53, %57 : vector<8x8xf32>
    %c0_21 = arith.constant 0 : index
    %c0_22 = arith.constant 0 : index
    %59 = vector.load %arg3[%c0_21, %c0_22] : memref<8x8xf32, #tpu.memory_space<vmem>>, vector<8x8xf32>
    tpu.vector_store %arg3[%c0_21, %c0_22], %58 {strides = array<i32>} : memref<8x8xf32, #tpu.memory_space<vmem>>, vector<8x8xf32>,
    return
  }
  func.func @transform_0(%arg0: i32) -> (i32, i32) {
    %c0_i32 = arith.constant 0 : i32
    %c0_i32_0 = arith.constant 0 : i32
    %c0_i32_1 = arith.constant 0 : i32
    return %c0_i32, %c0_i32_0 : i32, i32
  }
  func.func @transform_1(%arg0: i32) -> (i32, i32) {
    %c0_i32 = arith.constant 0 : i32
    %c0_i32_0 = arith.constant 0 : i32
    %c0_i32_1 = arith.constant 0 : i32
    return %c0_i32, %c0_i32_0 : i32, i32
  }
  func.func @transform_2(%arg0: i32) -> (i32, i32) {
    %c0_i32 = arith.constant 0 : i32
    %c0_i32_0 = arith.constant 0 : i32
    %c0_i32_1 = arith.constant 0 : i32
    return %c0_i32, %c0_i32_0 : i32, i32
  }
}

module attributes {stable_mosaic.version = 11 : i64} {
  func.func @_conv_layer_kernel(%arg0: i32, %arg1: memref<8x8xf32, #tpu.memory_space<vmem>>, %arg2: memref<1x8x32xf32, #tpu.memory_space<vmem>>, %arg3: memref<1x8x32xf32, #tpu.memory_space<vmem>>, %arg4: memref<1x32xf32, #tpu.memory_space<vmem>>, %arg5: memref<1x32xf32, #tpu.memory_space<vmem>>, %arg6: memref<32x32xf32, #tpu.memory_space<vmem>>, %arg7: memref<1x32xf32, #tpu.memory_space<vmem>>, %arg8: memref<32x32xf32, #tpu.memory_space<vmem>>, %arg9: memref<1x32xf32, #tpu.memory_space<vmem>>, %arg10: memref<1x32xf32, #tpu.memory_space<vmem>>, %arg11: memref<1x32xf32, #tpu.memory_space<vmem>>, %arg12: memref<1x8x32xf32, #tpu.memory_space<vmem>>) attributes {dimension_semantics = [#tpu.dimension_semantics<parallel>], iteration_bounds = array<i64: 2>, scalar_prefetch = 0 : i64, scratch_operands = 0 : i64, tpu.core_type = #tpu.core_type<tc>, window_params = [{pipeline_mode = #tpu.pipeline_mode<synchronous>, transform_indices = @transform_0, window_bounds = array<i64: 8, 8>}, {transform_indices = @transform_1, window_bounds = array<i64: 1, 8, 32>}, {transform_indices = @transform_2, window_bounds = array<i64: 1, 8, 32>}, {pipeline_mode = #tpu.pipeline_mode<synchronous>, transform_indices = @transform_3, window_bounds = array<i64: 1, 32>}, {pipeline_mode = #tpu.pipeline_mode<synchronous>, transform_indices = @transform_4, window_bounds = array<i64: 1, 32>}, {pipeline_mode = #tpu.pipeline_mode<synchronous>, transform_indices = @transform_5, window_bounds = array<i64: 32, 32>}, {pipeline_mode = #tpu.pipeline_mode<synchronous>, transform_indices = @transform_6, window_bounds = array<i64: 1, 32>}, {pipeline_mode = #tpu.pipeline_mode<synchronous>, transform_indices = @transform_7, window_bounds = array<i64: 32, 32>}, {pipeline_mode = #tpu.pipeline_mode<synchronous>, transform_indices = @transform_8, window_bounds = array<i64: 1, 32>}, {pipeline_mode = #tpu.pipeline_mode<synchronous>, transform_indices = @transform_9, window_bounds = array<i64: 1, 32>}, {pipeline_mode = #tpu.pipeline_mode<synchronous>, transform_indices = @transform_10, window_bounds = array<i64: 1, 32>}, {transform_indices = @transform_11, window_bounds = array<i64: 1, 8, 32>}]} {
    %c0 = arith.constant 0 : index
    %c0_0 = arith.constant 0 : index
    %c0_1 = arith.constant 0 : index
    %0 = vector.load %arg2[%c0, %c0_0, %c0_1] : memref<1x8x32xf32, #tpu.memory_space<vmem>>, vector<1x8x32xf32>
    %1 = vector.shape_cast %0 : vector<1x8x32xf32> to vector<8x32xf32>
    %c0_2 = arith.constant 0 : index
    %c0_3 = arith.constant 0 : index
    %c0_4 = arith.constant 0 : index
    %2 = vector.load %arg3[%c0_2, %c0_3, %c0_4] : memref<1x8x32xf32, #tpu.memory_space<vmem>>, vector<1x8x32xf32>
    %3 = vector.shape_cast %2 : vector<1x8x32xf32> to vector<8x32xf32>
    %c0_5 = arith.constant 0 : index
    %c0_6 = arith.constant 0 : index
    %4 = vector.load %arg1[%c0_5, %c0_6] : memref<8x8xf32, #tpu.memory_space<vmem>>, vector<8x8xf32>
    %cst = arith.constant dense<0.000000e+00> : vector<8x32xf32>
    %5 = tpu.matmul %4, %1, %cst {dimension_numbers = #tpu.dot_dimension_numbers<[1], [0], [0], [1], [0, 0, 1, 1], [], []>} : vector<8x8xf32>, vector<8x32xf32>, vector<8x32xf32> -> vector<8x32xf32>
    %6 = arith.addf %3, %5 : vector<8x32xf32>
    %c0_7 = arith.constant 0 : index
    %c0_8 = arith.constant 0 : index
    %7 = vector.load %arg4[%c0_7, %c0_8] : memref<1x32xf32, #tpu.memory_space<vmem>>, vector<1x32xf32>
    %c0_9 = arith.constant 0 : index
    %c0_10 = arith.constant 0 : index
    %8 = vector.load %arg5[%c0_9, %c0_10] : memref<1x32xf32, #tpu.memory_space<vmem>>, vector<1x32xf32>
    %cst_11 = arith.constant dense<0.000000e+00> : vector<8xf32>
    %9 = vector.multi_reduction <add>, %6, %cst_11 [1] : vector<8x32xf32> to vector<8xf32>
    %10 = vector.shape_cast %9 : vector<8xf32> to vector<8x1xf32>
    %cst_12 = arith.constant 3.200000e+01 : f32
    %11 = vector.broadcast %cst_12 : f32 to vector<8x1xf32>
    %12 = arith.divf %10, %11 : vector<8x1xf32>
    %13 = vector.broadcast %12 : vector<8x1xf32> to vector<8x32xf32>
    %14 = arith.subf %6, %13 : vector<8x32xf32>
    %15 = arith.mulf %14, %14 : vector<8x32xf32>
    %cst_13 = arith.constant dense<0.000000e+00> : vector<8xf32>
    %16 = vector.multi_reduction <add>, %15, %cst_13 [1] : vector<8x32xf32> to vector<8xf32>
    %17 = vector.shape_cast %16 : vector<8xf32> to vector<8x1xf32>
    %cst_14 = arith.constant 3.200000e+01 : f32
    %18 = vector.broadcast %cst_14 : f32 to vector<8x1xf32>
    %19 = arith.divf %17, %18 : vector<8x1xf32>
    %20 = vector.broadcast %12 : vector<8x1xf32> to vector<8x32xf32>
    %21 = arith.subf %6, %20 : vector<8x32xf32>
    %cst_15 = arith.constant 9.99999974E-6 : f32
    %22 = vector.broadcast %cst_15 : f32 to vector<8x1xf32>
    %23 = arith.addf %19, %22 : vector<8x1xf32>
    %24 = math.rsqrt %23 : vector<8x1xf32>
    %25 = vector.broadcast %24 : vector<8x1xf32> to vector<8x32xf32>
    %26 = arith.mulf %21, %25 : vector<8x32xf32>
    %27 = vector.broadcast %7 : vector<1x32xf32> to vector<8x32xf32>
    %28 = arith.mulf %26, %27 : vector<8x32xf32>
    %29 = vector.broadcast %8 : vector<1x32xf32> to vector<8x32xf32>
    %30 = arith.addf %28, %29 : vector<8x32xf32>
    %c0_16 = arith.constant 0 : index
    %c0_17 = arith.constant 0 : index
    %31 = vector.load %arg6[%c0_16, %c0_17] : memref<32x32xf32, #tpu.memory_space<vmem>>, vector<32x32xf32>
    %cst_18 = arith.constant dense<0.000000e+00> : vector<8x32xf32>
    %32 = tpu.matmul %30, %31, %cst_18 {dimension_numbers = #tpu.dot_dimension_numbers<[1], [0], [0], [1], [0, 0, 1, 1], [], []>} : vector<8x32xf32>, vector<32x32xf32>, vector<8x32xf32> -> vector<8x32xf32>
    %c0_19 = arith.constant 0 : index
    %c0_20 = arith.constant 0 : index
    %33 = vector.load %arg7[%c0_19, %c0_20] : memref<1x32xf32, #tpu.memory_space<vmem>>, vector<1x32xf32>
    %34 = vector.broadcast %33 : vector<1x32xf32> to vector<8x32xf32>
    %35 = arith.addf %32, %34 : vector<8x32xf32>
    %cst_21 = arith.constant 0.000000e+00 : f32
    %36 = vector.broadcast %cst_21 : f32 to vector<8x32xf32>
    %37 = arith.maximumf %35, %36 : vector<8x32xf32>
    %c0_22 = arith.constant 0 : index
    %c0_23 = arith.constant 0 : index
    %38 = vector.load %arg8[%c0_22, %c0_23] : memref<32x32xf32, #tpu.memory_space<vmem>>, vector<32x32xf32>
    %cst_24 = arith.constant dense<0.000000e+00> : vector<8x32xf32>
    %39 = tpu.matmul %37, %38, %cst_24 {dimension_numbers = #tpu.dot_dimension_numbers<[1], [0], [0], [1], [0, 0, 1, 1], [], []>} : vector<8x32xf32>, vector<32x32xf32>, vector<8x32xf32> -> vector<8x32xf32>
    %c0_25 = arith.constant 0 : index
    %c0_26 = arith.constant 0 : index
    %40 = vector.load %arg9[%c0_25, %c0_26] : memref<1x32xf32, #tpu.memory_space<vmem>>, vector<1x32xf32>
    %41 = vector.broadcast %40 : vector<1x32xf32> to vector<8x32xf32>
    %42 = arith.addf %39, %41 : vector<8x32xf32>
    %43 = arith.addf %30, %42 : vector<8x32xf32>
    %c0_27 = arith.constant 0 : index
    %c0_28 = arith.constant 0 : index
    %44 = vector.load %arg10[%c0_27, %c0_28] : memref<1x32xf32, #tpu.memory_space<vmem>>, vector<1x32xf32>
    %c0_29 = arith.constant 0 : index
    %c0_30 = arith.constant 0 : index
    %45 = vector.load %arg11[%c0_29, %c0_30] : memref<1x32xf32, #tpu.memory_space<vmem>>, vector<1x32xf32>
    %cst_31 = arith.constant dense<0.000000e+00> : vector<8xf32>
    %46 = vector.multi_reduction <add>, %43, %cst_31 [1] : vector<8x32xf32> to vector<8xf32>
    %47 = vector.shape_cast %46 : vector<8xf32> to vector<8x1xf32>
    %cst_32 = arith.constant 3.200000e+01 : f32
    %48 = vector.broadcast %cst_32 : f32 to vector<8x1xf32>
    %49 = arith.divf %47, %48 : vector<8x1xf32>
    %50 = vector.broadcast %49 : vector<8x1xf32> to vector<8x32xf32>
    %51 = arith.subf %43, %50 : vector<8x32xf32>
    %52 = arith.mulf %51, %51 : vector<8x32xf32>
    %cst_33 = arith.constant dense<0.000000e+00> : vector<8xf32>
    %53 = vector.multi_reduction <add>, %52, %cst_33 [1] : vector<8x32xf32> to vector<8xf32>
    %54 = vector.shape_cast %53 : vector<8xf32> to vector<8x1xf32>
    %cst_34 = arith.constant 3.200000e+01 : f32
    %55 = vector.broadcast %cst_34 : f32 to vector<8x1xf32>
    %56 = arith.divf %54, %55 : vector<8x1xf32>
    %57 = vector.broadcast %49 : vector<8x1xf32> to vector<8x32xf32>
    %58 = arith.subf %43, %57 : vector<8x32xf32>
    %cst_35 = arith.constant 9.99999974E-6 : f32
    %59 = vector.broadcast %cst_35 : f32 to vector<8x1xf32>
    %60 = arith.addf %56, %59 : vector<8x1xf32>
    %61 = math.rsqrt %60 : vector<8x1xf32>
    %62 = vector.broadcast %61 : vector<8x1xf32> to vector<8x32xf32>
    %63 = arith.mulf %58, %62 : vector<8x32xf32>
    %64 = vector.broadcast %44 : vector<1x32xf32> to vector<8x32xf32>
    %65 = arith.mulf %63, %64 : vector<8x32xf32>
    %66 = vector.broadcast %45 : vector<1x32xf32> to vector<8x32xf32>
    %67 = arith.addf %65, %66 : vector<8x32xf32>
    %c0_36 = arith.constant 0 : index
    %c0_37 = arith.constant 0 : index
    %c0_38 = arith.constant 0 : index
    %68 = vector.load %arg12[%c0_36, %c0_37, %c0_38] : memref<1x8x32xf32, #tpu.memory_space<vmem>>, vector<1x8x32xf32>
    %69 = vector.shape_cast %68 : vector<1x8x32xf32> to vector<8x32xf32>
    %70 = vector.shape_cast %67 : vector<8x32xf32> to vector<1x8x32xf32>
    tpu.vector_store %arg12[%c0_36, %c0_37, %c0_38], %70 {strides = array<i32>} : memref<1x8x32xf32, #tpu.memory_space<vmem>>, vector<1x8x32xf32>,
    return
  }
  func.func @transform_0(%arg0: i32) -> (i32, i32) {
    %c0_i32 = arith.constant 0 : i32
    %c0_i32_0 = arith.constant 0 : i32
    %c0_i32_1 = arith.constant 0 : i32
    return %c0_i32, %c0_i32_0 : i32, i32
  }
  func.func @transform_1(%arg0: i32) -> (i32, i32, i32) {
    %c0_i32 = arith.constant 0 : i32
    %c0_i32_0 = arith.constant 0 : i32
    %c0_i32_1 = arith.constant 0 : i32
    return %arg0, %c0_i32, %c0_i32_0 : i32, i32, i32
  }
  func.func @transform_2(%arg0: i32) -> (i32, i32, i32) {
    %c0_i32 = arith.constant 0 : i32
    %c0_i32_0 = arith.constant 0 : i32
    %c0_i32_1 = arith.constant 0 : i32
    return %arg0, %c0_i32, %c0_i32_0 : i32, i32, i32
  }
  func.func @transform_3(%arg0: i32) -> (i32, i32) {
    %c0_i32 = arith.constant 0 : i32
    %c0_i32_0 = arith.constant 0 : i32
    %c0_i32_1 = arith.constant 0 : i32
    return %c0_i32, %c0_i32_0 : i32, i32
  }
  func.func @transform_4(%arg0: i32) -> (i32, i32) {
    %c0_i32 = arith.constant 0 : i32
    %c0_i32_0 = arith.constant 0 : i32
    %c0_i32_1 = arith.constant 0 : i32
    return %c0_i32, %c0_i32_0 : i32, i32
  }
  func.func @transform_5(%arg0: i32) -> (i32, i32) {
    %c0_i32 = arith.constant 0 : i32
    %c0_i32_0 = arith.constant 0 : i32
    %c0_i32_1 = arith.constant 0 : i32
    return %c0_i32, %c0_i32_0 : i32, i32
  }
  func.func @transform_6(%arg0: i32) -> (i32, i32) {
    %c0_i32 = arith.constant 0 : i32
    %c0_i32_0 = arith.constant 0 : i32
    %c0_i32_1 = arith.constant 0 : i32
    return %c0_i32, %c0_i32_0 : i32, i32
  }
  func.func @transform_7(%arg0: i32) -> (i32, i32) {
    %c0_i32 = arith.constant 0 : i32
    %c0_i32_0 = arith.constant 0 : i32
    %c0_i32_1 = arith.constant 0 : i32
    return %c0_i32, %c0_i32_0 : i32, i32
  }
  func.func @transform_8(%arg0: i32) -> (i32, i32) {
    %c0_i32 = arith.constant 0 : i32
    %c0_i32_0 = arith.constant 0 : i32
    %c0_i32_1 = arith.constant 0 : i32
    return %c0_i32, %c0_i32_0 : i32, i32
  }
  func.func @transform_9(%arg0: i32) -> (i32, i32) {
    %c0_i32 = arith.constant 0 : i32
    %c0_i32_0 = arith.constant 0 : i32
    %c0_i32_1 = arith.constant 0 : i32
    return %c0_i32, %c0_i32_0 : i32, i32
  }
  func.func @transform_10(%arg0: i32) -> (i32, i32) {
    %c0_i32 = arith.constant 0 : i32
    %c0_i32_0 = arith.constant 0 : i32
    %c0_i32_1 = arith.constant 0 : i32
    return %c0_i32, %c0_i32_0 : i32, i32
  }
  func.func @transform_11(%arg0: i32) -> (i32, i32, i32) {
    %c0_i32 = arith.constant 0 : i32
    %c0_i32_0 = arith.constant 0 : i32
    %c0_i32_1 = arith.constant 0 : i32
    return %arg0, %c0_i32, %c0_i32_0 : i32, i32, i32
  }
}

module attributes {stable_mosaic.version = 11 : i64} {
  func.func @_linear_kernel(%arg0: i32, %arg1: memref<16x4xf32, #tpu.memory_space<vmem>>, %arg2: memref<4x32xf32, #tpu.memory_space<vmem>>, %arg3: memref<1x32xf32, #tpu.memory_space<vmem>>, %arg4: memref<16x32xf32, #tpu.memory_space<vmem>>) attributes {dimension_semantics = [#tpu.dimension_semantics<parallel>], iteration_bounds = array<i64: 1>, scalar_prefetch = 0 : i64, scratch_operands = 0 : i64, tpu.core_type = #tpu.core_type<tc>, window_params = [{transform_indices = @transform_0, window_bounds = array<i64: 16, 4>}, {pipeline_mode = #tpu.pipeline_mode<synchronous>, transform_indices = @transform_1, window_bounds = array<i64: 4, 32>}, {pipeline_mode = #tpu.pipeline_mode<synchronous>, transform_indices = @transform_2, window_bounds = array<i64: 1, 32>}, {transform_indices = @transform_3, window_bounds = array<i64: 16, 32>}]} {
    %c0 = arith.constant 0 : index
    %c0_0 = arith.constant 0 : index
    %0 = vector.load %arg1[%c0, %c0_0] : memref<16x4xf32, #tpu.memory_space<vmem>>, vector<16x4xf32>
    %c0_1 = arith.constant 0 : index
    %c0_2 = arith.constant 0 : index
    %1 = vector.load %arg2[%c0_1, %c0_2] : memref<4x32xf32, #tpu.memory_space<vmem>>, vector<4x32xf32>
    %cst = arith.constant dense<0.000000e+00> : vector<16x32xf32>
    %2 = tpu.matmul %0, %1, %cst {dimension_numbers = #tpu.dot_dimension_numbers<[1], [0], [0], [1], [0, 0, 1, 1], [], []>} : vector<16x4xf32>, vector<4x32xf32>, vector<16x32xf32> -> vector<16x32xf32>
    %c0_3 = arith.constant 0 : index
    %c0_4 = arith.constant 0 : index
    %3 = vector.load %arg3[%c0_3, %c0_4] : memref<1x32xf32, #tpu.memory_space<vmem>>, vector<1x32xf32>
    %4 = vector.broadcast %3 : vector<1x32xf32> to vector<16x32xf32>
    %5 = arith.addf %2, %4 : vector<16x32xf32>
    %c0_5 = arith.constant 0 : index
    %c0_6 = arith.constant 0 : index
    %6 = vector.load %arg4[%c0_5, %c0_6] : memref<16x32xf32, #tpu.memory_space<vmem>>, vector<16x32xf32>
    tpu.vector_store %arg4[%c0_5, %c0_6], %5 {strides = array<i32>} : memref<16x32xf32, #tpu.memory_space<vmem>>, vector<16x32xf32>,
    return
  }
  func.func @transform_0(%arg0: i32) -> (i32, i32) {
    %c0_i32 = arith.constant 0 : i32
    %c0_i32_0 = arith.constant 0 : i32
    return %arg0, %c0_i32 : i32, i32
  }
  func.func @transform_1(%arg0: i32) -> (i32, i32) {
    %c0_i32 = arith.constant 0 : i32
    %c0_i32_0 = arith.constant 0 : i32
    %c0_i32_1 = arith.constant 0 : i32
    return %c0_i32, %c0_i32_0 : i32, i32
  }
  func.func @transform_2(%arg0: i32) -> (i32, i32) {
    %c0_i32 = arith.constant 0 : i32
    %c0_i32_0 = arith.constant 0 : i32
    %c0_i32_1 = arith.constant 0 : i32
    return %c0_i32, %c0_i32_0 : i32, i32
  }
  func.func @transform_3(%arg0: i32) -> (i32, i32) {
    %c0_i32 = arith.constant 0 : i32
    %c0_i32_0 = arith.constant 0 : i32
    return %arg0, %c0_i32 : i32, i32
  }
}

module attributes {stable_mosaic.version = 11 : i64} {
  func.func @_attn_layer_kernel(%arg0: i32, %arg1: memref<1x8x32xf32, #tpu.memory_space<vmem>>, %arg2: memref<1x8x32xf32, #tpu.memory_space<vmem>>, %arg3: memref<32x32xf32, #tpu.memory_space<vmem>>, %arg4: memref<1x32xf32, #tpu.memory_space<vmem>>, %arg5: memref<32x64xf32, #tpu.memory_space<vmem>>, %arg6: memref<1x64xf32, #tpu.memory_space<vmem>>, %arg7: memref<1x32xf32, #tpu.memory_space<vmem>>, %arg8: memref<1x32xf32, #tpu.memory_space<vmem>>, %arg9: memref<32x32xf32, #tpu.memory_space<vmem>>, %arg10: memref<1x32xf32, #tpu.memory_space<vmem>>, %arg11: memref<32x32xf32, #tpu.memory_space<vmem>>, %arg12: memref<1x32xf32, #tpu.memory_space<vmem>>, %arg13: memref<1x32xf32, #tpu.memory_space<vmem>>, %arg14: memref<1x32xf32, #tpu.memory_space<vmem>>, %arg15: memref<1x8x32xf32, #tpu.memory_space<vmem>>) attributes {dimension_semantics = [#tpu.dimension_semantics<parallel>], iteration_bounds = array<i64: 2>, scalar_prefetch = 0 : i64, scratch_operands = 0 : i64, tpu.core_type = #tpu.core_type<tc>, window_params = [{transform_indices = @transform_0, window_bounds = array<i64: 1, 8, 32>}, {transform_indices = @transform_1, window_bounds = array<i64: 1, 8, 32>}, {pipeline_mode = #tpu.pipeline_mode<synchronous>, transform_indices = @transform_2, window_bounds = array<i64: 32, 32>}, {pipeline_mode = #tpu.pipeline_mode<synchronous>, transform_indices = @transform_3, window_bounds = array<i64: 1, 32>}, {pipeline_mode = #tpu.pipeline_mode<synchronous>, transform_indices = @transform_4, window_bounds = array<i64: 32, 64>}, {pipeline_mode = #tpu.pipeline_mode<synchronous>, transform_indices = @transform_5, window_bounds = array<i64: 1, 64>}, {pipeline_mode = #tpu.pipeline_mode<synchronous>, transform_indices = @transform_6, window_bounds = array<i64: 1, 32>}, {pipeline_mode = #tpu.pipeline_mode<synchronous>, transform_indices = @transform_7, window_bounds = array<i64: 1, 32>}, {pipeline_mode = #tpu.pipeline_mode<synchronous>, transform_indices = @transform_8, window_bounds = array<i64: 32, 32>}, {pipeline_mode = #tpu.pipeline_mode<synchronous>, transform_indices = @transform_9, window_bounds = array<i64: 1, 32>}, {pipeline_mode = #tpu.pipeline_mode<synchronous>, transform_indices = @transform_10, window_bounds = array<i64: 32, 32>}, {pipeline_mode = #tpu.pipeline_mode<synchronous>, transform_indices = @transform_11, window_bounds = array<i64: 1, 32>}, {pipeline_mode = #tpu.pipeline_mode<synchronous>, transform_indices = @transform_12, window_bounds = array<i64: 1, 32>}, {pipeline_mode = #tpu.pipeline_mode<synchronous>, transform_indices = @transform_13, window_bounds = array<i64: 1, 32>}, {transform_indices = @transform_14, window_bounds = array<i64: 1, 8, 32>}]} {
    %c0 = arith.constant 0 : index
    %c0_0 = arith.constant 0 : index
    %c0_1 = arith.constant 0 : index
    %0 = vector.load %arg1[%c0, %c0_0, %c0_1] : memref<1x8x32xf32, #tpu.memory_space<vmem>>, vector<1x8x32xf32>
    %1 = vector.shape_cast %0 : vector<1x8x32xf32> to vector<8x32xf32>
    %c0_2 = arith.constant 0 : index
    %c0_3 = arith.constant 0 : index
    %c0_4 = arith.constant 0 : index
    %2 = vector.load %arg2[%c0_2, %c0_3, %c0_4] : memref<1x8x32xf32, #tpu.memory_space<vmem>>, vector<1x8x32xf32>
    %3 = vector.shape_cast %2 : vector<1x8x32xf32> to vector<8x32xf32>
    %c0_5 = arith.constant 0 : index
    %c0_6 = arith.constant 0 : index
    %4 = vector.load %arg3[%c0_5, %c0_6] : memref<32x32xf32, #tpu.memory_space<vmem>>, vector<32x32xf32>
    %cst = arith.constant dense<0.000000e+00> : vector<8x32xf32>
    %5 = tpu.matmul %3, %4, %cst {dimension_numbers = #tpu.dot_dimension_numbers<[1], [0], [0], [1], [0, 0, 1, 1], [], []>} : vector<8x32xf32>, vector<32x32xf32>, vector<8x32xf32> -> vector<8x32xf32>
    %c0_7 = arith.constant 0 : index
    %c0_8 = arith.constant 0 : index
    %6 = vector.load %arg4[%c0_7, %c0_8] : memref<1x32xf32, #tpu.memory_space<vmem>>, vector<1x32xf32>
    %7 = vector.broadcast %6 : vector<1x32xf32> to vector<8x32xf32>
    %8 = arith.addf %5, %7 : vector<8x32xf32>
    %cst_9 = arith.constant 0.176776692 : f32
    %9 = vector.broadcast %cst_9 : f32 to vector<8x32xf32>
    %10 = arith.mulf %8, %9 : vector<8x32xf32>
    %c0_10 = arith.constant 0 : index
    %c0_11 = arith.constant 0 : index
    %11 = vector.load %arg5[%c0_10, %c0_11] : memref<32x64xf32, #tpu.memory_space<vmem>>, vector<32x64xf32>
    %cst_12 = arith.constant dense<0.000000e+00> : vector<8x64xf32>
    %12 = tpu.matmul %1, %11, %cst_12 {dimension_numbers = #tpu.dot_dimension_numbers<[1], [0], [0], [1], [0, 0, 1, 1], [], []>} : vector<8x32xf32>, vector<32x64xf32>, vector<8x64xf32> -> vector<8x64xf32>
    %c0_13 = arith.constant 0 : index
    %c0_14 = arith.constant 0 : index
    %13 = vector.load %arg6[%c0_13, %c0_14] : memref<1x64xf32, #tpu.memory_space<vmem>>, vector<1x64xf32>
    %14 = vector.broadcast %13 : vector<1x64xf32> to vector<8x64xf32>
    %15 = arith.addf %12, %14 : vector<8x64xf32>
    %16 = vector.extract_strided_slice %15 {offsets = [0, 0], sizes = [8, 32], strides = [1, 1]} : vector<8x64xf32> to vector<8x32xf32>
    %17 = vector.extract_strided_slice %15 {offsets = [0, 32], sizes = [8, 32], strides = [1, 1]} : vector<8x64xf32> to vector<8x32xf32>
    %18 = vector.extract_strided_slice %10 {offsets = [0, 0], sizes = [8, 8], strides = [1, 1]} : vector<8x32xf32> to vector<8x8xf32>
    %19 = vector.extract_strided_slice %10 {offsets = [0, 8], sizes = [8, 8], strides = [1, 1]} : vector<8x32xf32> to vector<8x8xf32>
    %20 = vector.extract_strided_slice %10 {offsets = [0, 16], sizes = [8, 8], strides = [1, 1]} : vector<8x32xf32> to vector<8x8xf32>
    %21 = vector.extract_strided_slice %10 {offsets = [0, 24], sizes = [8, 8], strides = [1, 1]} : vector<8x32xf32> to vector<8x8xf32>
    %22 = vector.shape_cast %18 : vector<8x8xf32> to vector<1x8x8xf32>
    %23 = vector.shape_cast %19 : vector<8x8xf32> to vector<1x8x8xf32>
    %24 = vector.shape_cast %20 : vector<8x8xf32> to vector<1x8x8xf32>
    %25 = vector.shape_cast %21 : vector<8x8xf32> to vector<1x8x8xf32>
    %26 = tpu.concatenate %22, %23, %24, %25 in 0 : vector<1x8x8xf32>, vector<1x8x8xf32>, vector<1x8x8xf32>, vector<1x8x8xf32> -> vector<4x8x8xf32>
    %27 = vector.extract_strided_slice %16 {offsets = [0, 0], sizes = [8, 8], strides = [1, 1]} : vector<8x32xf32> to vector<8x8xf32>
    %28 = vector.extract_strided_slice %16 {offsets = [0, 8], sizes = [8, 8], strides = [1, 1]} : vector<8x32xf32> to vector<8x8xf32>
    %29 = vector.extract_strided_slice %16 {offsets = [0, 16], sizes = [8, 8], strides = [1, 1]} : vector<8x32xf32> to vector<8x8xf32>
    %30 = vector.extract_strided_slice %16 {offsets = [0, 24], sizes = [8, 8], strides = [1, 1]} : vector<8x32xf32> to vector<8x8xf32>
    %31 = vector.shape_cast %27 : vector<8x8xf32> to vector<1x8x8xf32>
    %32 = vector.shape_cast %28 : vector<8x8xf32> to vector<1x8x8xf32>
    %33 = vector.shape_cast %29 : vector<8x8xf32> to vector<1x8x8xf32>
    %34 = vector.shape_cast %30 : vector<8x8xf32> to vector<1x8x8xf32>
    %35 = tpu.concatenate %31, %32, %33, %34 in 0 : vector<1x8x8xf32>, vector<1x8x8xf32>, vector<1x8x8xf32>, vector<1x8x8xf32> -> vector<4x8x8xf32>
    %36 = vector.extract_strided_slice %17 {offsets = [0, 0], sizes = [8, 8], strides = [1, 1]} : vector<8x32xf32> to vector<8x8xf32>
    %37 = vector.extract_strided_slice %17 {offsets = [0, 8], sizes = [8, 8], strides = [1, 1]} : vector<8x32xf32> to vector<8x8xf32>
    %38 = vector.extract_strided_slice %17 {offsets = [0, 16], sizes = [8, 8], strides = [1, 1]} : vector<8x32xf32> to vector<8x8xf32>
    %39 = vector.extract_strided_slice %17 {offsets = [0, 24], sizes = [8, 8], strides = [1, 1]} : vector<8x32xf32> to vector<8x8xf32>
    %40 = vector.shape_cast %36 : vector<8x8xf32> to vector<1x8x8xf32>
    %41 = vector.shape_cast %37 : vector<8x8xf32> to vector<1x8x8xf32>
    %42 = vector.shape_cast %38 : vector<8x8xf32> to vector<1x8x8xf32>
    %43 = vector.shape_cast %39 : vector<8x8xf32> to vector<1x8x8xf32>
    %44 = tpu.concatenate %40, %41, %42, %43 in 0 : vector<1x8x8xf32>, vector<1x8x8xf32>, vector<1x8x8xf32>, vector<1x8x8xf32> -> vector<4x8x8xf32>
    "tpu.trace_start"() <{level = 10 : i32, message = "hnd,hmd->hnm"}> : () -> ()
    %cst_15 = arith.constant dense<0.000000e+00> : vector<4x8x8xf32>
    %45 = tpu.matmul %26, %35, %cst_15 {dimension_numbers = #tpu.dot_dimension_numbers<[2], [2], [1], [1], [0, 0, 0, 1, 1, 1], [0], [0]>} : vector<4x8x8xf32>, vector<4x8x8xf32>, vector<4x8x8xf32> -> vector<4x8x8xf32>
    "tpu.trace_stop"() : () -> ()
    %46 = tpu.iota {dimensions = array<i32: 2>} : vector<4x8x8xi32>
    %cst_16 = arith.constant 0.000000e+00 : f32
    %47 = vector.broadcast %cst_16 : f32 to vector<4x8x8xf32>
    %cst_17 = arith.constant dense<0xFF800000> : vector<4x8xf32>
    %48 = vector.multi_reduction <maximumf>, %45, %cst_17 [2] : vector<4x8x8xf32> to vector<4x8xf32>
    %49 = vector.shape_cast %48 : vector<4x8xf32> to vector<4x8x1xf32>
    %50 = vector.broadcast %49 : vector<4x8x1xf32> to vector<4x8x8xf32>
    %51 = arith.cmpf oeq, %45, %50 : vector<4x8x8xf32>
    %c8_i32 = arith.constant 8 : i32
    %52 = vector.broadcast %c8_i32 : i32 to vector<4x8x8xi32>
    %53 = arith.select %51, %46, %52 : vector<4x8x8xi1>, vector<4x8x8xi32>
    %cst_18 = arith.constant dense<2147483647> : vector<4x8xi32>
    %54 = vector.multi_reduction <minsi>, %53, %cst_18 [2] : vector<4x8x8xi32> to vector<4x8xi32>
    %55 = vector.shape_cast %54 : vector<4x8xi32> to vector<4x8x1xi32>
    %56 = vector.broadcast %55 : vector<4x8x1xi32> to vector<4x8x8xi32>
    %57 = arith.cmpi eq, %46, %56 : vector<4x8x8xi32>
    %cst_19 = arith.constant 1.000000e+00 : f32
    %58 = vector.broadcast %cst_19 : f32 to vector<4x8x8xf32>
    %59 = arith.select %57, %58, %47 : vector<4x8x8xi1>, vector<4x8x8xf32>
    %cst_20 = arith.constant 0xFF800000 : f32
    %60 = vector.broadcast %cst_20 : f32 to vector<4x8x8xf32>
    %61 = arith.select %57, %60, %45 : vector<4x8x8xi1>, vector<4x8x8xf32>
    %cst_21 = arith.constant dense<0xFF800000> : vector<4x8xf32>
    %62 = vector.multi_reduction <maximumf>, %61, %cst_21 [2] : vector<4x8x8xf32> to vector<4x8xf32>
    %63 = vector.shape_cast %62 : vector<4x8xf32> to vector<4x8x1xf32>
    %64 = vector.broadcast %63 : vector<4x8x1xf32> to vector<4x8x8xf32>
    %65 = arith.cmpf oeq, %61, %64 : vector<4x8x8xf32>
    %c8_i32_22 = arith.constant 8 : i32
    %66 = vector.broadcast %c8_i32_22 : i32 to vector<4x8x8xi32>
    %67 = arith.select %65, %46, %66 : vector<4x8x8xi1>, vector<4x8x8xi32>
    %cst_23 = arith.constant dense<2147483647> : vector<4x8xi32>
    %68 = vector.multi_reduction <minsi>, %67, %cst_23 [2] : vector<4x8x8xi32> to vector<4x8xi32>
    %69 = vector.shape_cast %68 : vector<4x8xi32> to vector<4x8x1xi32>
    %70 = vector.broadcast %69 : vector<4x8x1xi32> to vector<4x8x8xi32>
    %71 = arith.cmpi eq, %46, %70 : vector<4x8x8xi32>
    %cst_24 = arith.constant 1.000000e+00 : f32
    %72 = vector.broadcast %cst_24 : f32 to vector<4x8x8xf32>
    %73 = arith.select %71, %72, %59 : vector<4x8x8xi1>, vector<4x8x8xf32>
    %cst_25 = arith.constant 0xFF800000 : f32
    %74 = vector.broadcast %cst_25 : f32 to vector<4x8x8xf32>
    %75 = arith.select %71, %74, %61 : vector<4x8x8xi1>, vector<4x8x8xf32>
    %cst_26 = arith.constant dense<0xFF800000> : vector<4x8xf32>
    %76 = vector.multi_reduction <maximumf>, %75, %cst_26 [2] : vector<4x8x8xf32> to vector<4x8xf32>
    %77 = vector.shape_cast %76 : vector<4x8xf32> to vector<4x8x1xf32>
    %78 = vector.broadcast %77 : vector<4x8x1xf32> to vector<4x8x8xf32>
    %79 = arith.cmpf oeq, %75, %78 : vector<4x8x8xf32>
    %c8_i32_27 = arith.constant 8 : i32
    %80 = vector.broadcast %c8_i32_27 : i32 to vector<4x8x8xi32>
    %81 = arith.select %79, %46, %80 : vector<4x8x8xi1>, vector<4x8x8xi32>
    %cst_28 = arith.constant dense<2147483647> : vector<4x8xi32>
    %82 = vector.multi_reduction <minsi>, %81, %cst_28 [2] : vector<4x8x8xi32> to vector<4x8xi32>
    %83 = vector.shape_cast %82 : vector<4x8xi32> to vector<4x8x1xi32>
    %84 = vector.broadcast %83 : vector<4x8x1xi32> to vector<4x8x8xi32>
    %85 = arith.cmpi eq, %46, %84 : vector<4x8x8xi32>
    %cst_29 = arith.constant 1.000000e+00 : f32
    %86 = vector.broadcast %cst_29 : f32 to vector<4x8x8xf32>
    %87 = arith.select %85, %86, %73 : vector<4x8x8xi1>, vector<4x8x8xf32>
    %cst_30 = arith.constant 0.000000e+00 : f32
    %88 = vector.broadcast %cst_30 : f32 to vector<4x8x8xf32>
    %89 = arith.cmpf ogt, %87, %88 : vector<4x8x8xf32>
    %cst_31 = arith.constant 0xFF800000 : f32
    %90 = vector.broadcast %cst_31 : f32 to vector<4x8x8xf32>
    %91 = arith.select %89, %45, %90 : vector<4x8x8xi1>, vector<4x8x8xf32>
    %cst_32 = arith.constant dense<0xFF800000> : vector<4x8xf32>
    %92 = vector.multi_reduction <maximumf>, %91, %cst_32 [2] : vector<4x8x8xf32> to vector<4x8xf32>
    %93 = vector.shape_cast %92 : vector<4x8xf32> to vector<4x8x1xf32>
    %94 = vector.broadcast %93 : vector<4x8x1xf32> to vector<4x8x8xf32>
    %95 = arith.subf %91, %94 : vector<4x8x8xf32>
    %96 = math.exp %95 : vector<4x8x8xf32>
    %cst_33 = arith.constant dense<0.000000e+00> : vector<4x8xf32>
    %97 = vector.multi_reduction <add>, %96, %cst_33 [2] : vector<4x8x8xf32> to vector<4x8xf32>
    %98 = vector.shape_cast %97 : vector<4x8xf32> to vector<4x8x1xf32>
    %99 = tpu.reciprocal %98 {approx = true} : vector<4x8x1xf32> -> vector<4x8x1xf32>
    %100 = vector.broadcast %99 : vector<4x8x1xf32> to vector<4x8x8xf32>
    %101 = arith.mulf %96, %100 : vector<4x8x8xf32>
    "tpu.trace_start"() <{level = 10 : i32, message = "hnm,hmd->hnd"}> : () -> ()
    %cst_34 = arith.constant dense<0.000000e+00> : vector<4x8x8xf32>
    %102 = tpu.matmul %101, %44, %cst_34 {dimension_numbers = #tpu.dot_dimension_numbers<[2], [1], [1], [2], [0, 0, 0, 1, 1, 2], [0], [0]>} : vector<4x8x8xf32>, vector<4x8x8xf32>, vector<4x8x8xf32> -> vector<4x8x8xf32>
    "tpu.trace_stop"() : () -> ()
    %103 = vector.extract_strided_slice %102 {offsets = [0, 0, 0], sizes = [1, 8, 8], strides = [1, 1, 1]} : vector<4x8x8xf32> to vector<1x8x8xf32>
    %104 = vector.shape_cast %103 : vector<1x8x8xf32> to vector<8x8xf32>
    %105 = vector.extract_strided_slice %102 {offsets = [1, 0, 0], sizes = [1, 8, 8], strides = [1, 1, 1]} : vector<4x8x8xf32> to vector<1x8x8xf32>
    %106 = vector.shape_cast %105 : vector<1x8x8xf32> to vector<8x8xf32>
    %107 = vector.extract_strided_slice %102 {offsets = [2, 0, 0], sizes = [1, 8, 8], strides = [1, 1, 1]} : vector<4x8x8xf32> to vector<1x8x8xf32>
    %108 = vector.shape_cast %107 : vector<1x8x8xf32> to vector<8x8xf32>
    %109 = vector.extract_strided_slice %102 {offsets = [3, 0, 0], sizes = [1, 8, 8], strides = [1, 1, 1]} : vector<4x8x8xf32> to vector<1x8x8xf32>
    %110 = vector.shape_cast %109 : vector<1x8x8xf32> to vector<8x8xf32>
    %111 = tpu.concatenate %104, %106, %108, %110 in 1 : vector<8x8xf32>, vector<8x8xf32>, vector<8x8xf32>, vector<8x8xf32> -> vector<8x32xf32>
    %112 = arith.addf %3, %111 : vector<8x32xf32>
    %c0_35 = arith.constant 0 : index
    %c0_36 = arith.constant 0 : index
    %113 = vector.load %arg7[%c0_35, %c0_36] : memref<1x32xf32, #tpu.memory_space<vmem>>, vector<1x32xf32>
    %c0_37 = arith.constant 0 : index
    %c0_38 = arith.constant 0 : index
    %114 = vector.load %arg8[%c0_37, %c0_38] : memref<1x32xf32, #tpu.memory_space<vmem>>, vector<1x32xf32>
    %cst_39 = arith.constant dense<0.000000e+00> : vector<8xf32>
    %115 = vector.multi_reduction <add>, %112, %cst_39 [1] : vector<8x32xf32> to vector<8xf32>
    %116 = vector.shape_cast %115 : vector<8xf32> to vector<8x1xf32>
    %cst_40 = arith.constant 3.200000e+01 : f32
    %117 = vector.broadcast %cst_40 : f32 to vector<8x1xf32>
    %118 = arith.divf %116, %117 : vector<8x1xf32>
    %119 = vector.broadcast %118 : vector<8x1xf32> to vector<8x32xf32>
    %120 = arith.subf %112, %119 : vector<8x32xf32>
    %121 = arith.mulf %120, %120 : vector<8x32xf32>
    %cst_41 = arith.constant dense<0.000000e+00> : vector<8xf32>
    %122 = vector.multi_reduction <add>, %121, %cst_41 [1] : vector<8x32xf32> to vector<8xf32>
    %123 = vector.shape_cast %122 : vector<8xf32> to vector<8x1xf32>
    %cst_42 = arith.constant 3.200000e+01 : f32
    %124 = vector.broadcast %cst_42 : f32 to vector<8x1xf32>
    %125 = arith.divf %123, %124 : vector<8x1xf32>
    %126 = vector.broadcast %118 : vector<8x1xf32> to vector<8x32xf32>
    %127 = arith.subf %112, %126 : vector<8x32xf32>
    %cst_43 = arith.constant 9.99999974E-6 : f32
    %128 = vector.broadcast %cst_43 : f32 to vector<8x1xf32>
    %129 = arith.addf %125, %128 : vector<8x1xf32>
    %130 = math.rsqrt %129 : vector<8x1xf32>
    %131 = vector.broadcast %130 : vector<8x1xf32> to vector<8x32xf32>
    %132 = arith.mulf %127, %131 : vector<8x32xf32>
    %133 = vector.broadcast %113 : vector<1x32xf32> to vector<8x32xf32>
    %134 = arith.mulf %132, %133 : vector<8x32xf32>
    %135 = vector.broadcast %114 : vector<1x32xf32> to vector<8x32xf32>
    %136 = arith.addf %134, %135 : vector<8x32xf32>
    %c0_44 = arith.constant 0 : index
    %c0_45 = arith.constant 0 : index
    %137 = vector.load %arg9[%c0_44, %c0_45] : memref<32x32xf32, #tpu.memory_space<vmem>>, vector<32x32xf32>
    %cst_46 = arith.constant dense<0.000000e+00> : vector<8x32xf32>
    %138 = tpu.matmul %136, %137, %cst_46 {dimension_numbers = #tpu.dot_dimension_numbers<[1], [0], [0], [1], [0, 0, 1, 1], [], []>} : vector<8x32xf32>, vector<32x32xf32>, vector<8x32xf32> -> vector<8x32xf32>
    %c0_47 = arith.constant 0 : index
    %c0_48 = arith.constant 0 : index
    %139 = vector.load %arg10[%c0_47, %c0_48] : memref<1x32xf32, #tpu.memory_space<vmem>>, vector<1x32xf32>
    %140 = vector.broadcast %139 : vector<1x32xf32> to vector<8x32xf32>
    %141 = arith.addf %138, %140 : vector<8x32xf32>
    %cst_49 = arith.constant 0.000000e+00 : f32
    %142 = vector.broadcast %cst_49 : f32 to vector<8x32xf32>
    %143 = arith.maximumf %141, %142 : vector<8x32xf32>
    %c0_50 = arith.constant 0 : index
    %c0_51 = arith.constant 0 : index
    %144 = vector.load %arg11[%c0_50, %c0_51] : memref<32x32xf32, #tpu.memory_space<vmem>>, vector<32x32xf32>
    %cst_52 = arith.constant dense<0.000000e+00> : vector<8x32xf32>
    %145 = tpu.matmul %143, %144, %cst_52 {dimension_numbers = #tpu.dot_dimension_numbers<[1], [0], [0], [1], [0, 0, 1, 1], [], []>} : vector<8x32xf32>, vector<32x32xf32>, vector<8x32xf32> -> vector<8x32xf32>
    %c0_53 = arith.constant 0 : index
    %c0_54 = arith.constant 0 : index
    %146 = vector.load %arg12[%c0_53, %c0_54] : memref<1x32xf32, #tpu.memory_space<vmem>>, vector<1x32xf32>
    %147 = vector.broadcast %146 : vector<1x32xf32> to vector<8x32xf32>
    %148 = arith.addf %145, %147 : vector<8x32xf32>
    %149 = arith.addf %136, %148 : vector<8x32xf32>
    %c0_55 = arith.constant 0 : index
    %c0_56 = arith.constant 0 : index
    %150 = vector.load %arg13[%c0_55, %c0_56] : memref<1x32xf32, #tpu.memory_space<vmem>>, vector<1x32xf32>
    %c0_57 = arith.constant 0 : index
    %c0_58 = arith.constant 0 : index
    %151 = vector.load %arg14[%c0_57, %c0_58] : memref<1x32xf32, #tpu.memory_space<vmem>>, vector<1x32xf32>
    %cst_59 = arith.constant dense<0.000000e+00> : vector<8xf32>
    %152 = vector.multi_reduction <add>, %149, %cst_59 [1] : vector<8x32xf32> to vector<8xf32>
    %153 = vector.shape_cast %152 : vector<8xf32> to vector<8x1xf32>
    %cst_60 = arith.constant 3.200000e+01 : f32
    %154 = vector.broadcast %cst_60 : f32 to vector<8x1xf32>
    %155 = arith.divf %153, %154 : vector<8x1xf32>
    %156 = vector.broadcast %155 : vector<8x1xf32> to vector<8x32xf32>
    %157 = arith.subf %149, %156 : vector<8x32xf32>
    %158 = arith.mulf %157, %157 : vector<8x32xf32>
    %cst_61 = arith.constant dense<0.000000e+00> : vector<8xf32>
    %159 = vector.multi_reduction <add>, %158, %cst_61 [1] : vector<8x32xf32> to vector<8xf32>
    %160 = vector.shape_cast %159 : vector<8xf32> to vector<8x1xf32>
    %cst_62 = arith.constant 3.200000e+01 : f32
    %161 = vector.broadcast %cst_62 : f32 to vector<8x1xf32>
    %162 = arith.divf %160, %161 : vector<8x1xf32>
    %163 = vector.broadcast %155 : vector<8x1xf32> to vector<8x32xf32>
    %164 = arith.subf %149, %163 : vector<8x32xf32>
    %cst_63 = arith.constant 9.99999974E-6 : f32
    %165 = vector.broadcast %cst_63 : f32 to vector<8x1xf32>
    %166 = arith.addf %162, %165 : vector<8x1xf32>
    %167 = math.rsqrt %166 : vector<8x1xf32>
    %168 = vector.broadcast %167 : vector<8x1xf32> to vector<8x32xf32>
    %169 = arith.mulf %164, %168 : vector<8x32xf32>
    %170 = vector.broadcast %150 : vector<1x32xf32> to vector<8x32xf32>
    %171 = arith.mulf %169, %170 : vector<8x32xf32>
    %172 = vector.broadcast %151 : vector<1x32xf32> to vector<8x32xf32>
    %173 = arith.addf %171, %172 : vector<8x32xf32>
    %c0_64 = arith.constant 0 : index
    %c0_65 = arith.constant 0 : index
    %c0_66 = arith.constant 0 : index
    %174 = vector.load %arg15[%c0_64, %c0_65, %c0_66] : memref<1x8x32xf32, #tpu.memory_space<vmem>>, vector<1x8x32xf32>
    %175 = vector.shape_cast %174 : vector<1x8x32xf32> to vector<8x32xf32>
    %176 = vector.shape_cast %173 : vector<8x32xf32> to vector<1x8x32xf32>
    tpu.vector_store %arg15[%c0_64, %c0_65, %c0_66], %176 {strides = array<i32>} : memref<1x8x32xf32, #tpu.memory_space<vmem>>, vector<1x8x32xf32>,
    return
  }
  func.func @transform_0(%arg0: i32) -> (i32, i32, i32) {
    %c0_i32 = arith.constant 0 : i32
    %c0_i32_0 = arith.constant 0 : i32
    %c0_i32_1 = arith.constant 0 : i32
    return %arg0, %c0_i32, %c0_i32_0 : i32, i32, i32
  }
  func.func @transform_1(%arg0: i32) -> (i32, i32, i32) {
    %c0_i32 = arith.constant 0 : i32
    %c0_i32_0 = arith.constant 0 : i32
    %c0_i32_1 = arith.constant 0 : i32
    return %arg0, %c0_i32, %c0_i32_0 : i32, i32, i32
  }
  func.func @transform_2(%arg0: i32) -> (i32, i32) {
    %c0_i32 = arith.constant 0 : i32
    %c0_i32_0 = arith.constant 0 : i32
    %c0_i32_1 = arith.constant 0 : i32
    return %c0_i32, %c0_i32_0 : i32, i32
  }
  func.func @transform_3(%arg0: i32) -> (i32, i32) {
    %c0_i32 = arith.constant 0 : i32
    %c0_i32_0 = arith.constant 0 : i32
    %c0_i32_1 = arith.constant 0 : i32
    return %c0_i32, %c0_i32_0 : i32, i32
  }
  func.func @transform_4(%arg0: i32) -> (i32, i32) {
    %c0_i32 = arith.constant 0 : i32
    %c0_i32_0 = arith.constant 0 : i32
    %c0_i32_1 = arith.constant 0 : i32
    return %c0_i32, %c0_i32_0 : i32, i32
  }
  func.func @transform_5(%arg0: i32) -> (i32, i32) {
    %c0_i32 = arith.constant 0 : i32
    %c0_i32_0 = arith.constant 0 : i32
    %c0_i32_1 = arith.constant 0 : i32
    return %c0_i32, %c0_i32_0 : i32, i32
  }
  func.func @transform_6(%arg0: i32) -> (i32, i32) {
    %c0_i32 = arith.constant 0 : i32
    %c0_i32_0 = arith.constant 0 : i32
    %c0_i32_1 = arith.constant 0 : i32
    return %c0_i32, %c0_i32_0 : i32, i32
  }
  func.func @transform_7(%arg0: i32) -> (i32, i32) {
    %c0_i32 = arith.constant 0 : i32
    %c0_i32_0 = arith.constant 0 : i32
    %c0_i32_1 = arith.constant 0 : i32
    return %c0_i32, %c0_i32_0 : i32, i32
  }
  func.func @transform_8(%arg0: i32) -> (i32, i32) {
    %c0_i32 = arith.constant 0 : i32
    %c0_i32_0 = arith.constant 0 : i32
    %c0_i32_1 = arith.constant 0 : i32
    return %c0_i32, %c0_i32_0 : i32, i32
  }
  func.func @transform_9(%arg0: i32) -> (i32, i32) {
    %c0_i32 = arith.constant 0 : i32
    %c0_i32_0 = arith.constant 0 : i32
    %c0_i32_1 = arith.constant 0 : i32
    return %c0_i32, %c0_i32_0 : i32, i32
  }
  func.func @transform_10(%arg0: i32) -> (i32, i32) {
    %c0_i32 = arith.constant 0 : i32
    %c0_i32_0 = arith.constant 0 : i32
    %c0_i32_1 = arith.constant 0 : i32
    return %c0_i32, %c0_i32_0 : i32, i32
  }
  func.func @transform_11(%arg0: i32) -> (i32, i32) {
    %c0_i32 = arith.constant 0 : i32
    %c0_i32_0 = arith.constant 0 : i32
    %c0_i32_1 = arith.constant 0 : i32
    return %c0_i32, %c0_i32_0 : i32, i32
  }
  func.func @transform_12(%arg0: i32) -> (i32, i32) {
    %c0_i32 = arith.constant 0 : i32
    %c0_i32_0 = arith.constant 0 : i32
    %c0_i32_1 = arith.constant 0 : i32
    return %c0_i32, %c0_i32_0 : i32, i32
  }
  func.func @transform_13(%arg0: i32) -> (i32, i32) {
    %c0_i32 = arith.constant 0 : i32
    %c0_i32_0 = arith.constant 0 : i32
    %c0_i32_1 = arith.constant 0 : i32
    return %c0_i32, %c0_i32_0 : i32, i32
  }
  func.func @transform_14(%arg0: i32) -> (i32, i32, i32) {
    %c0_i32 = arith.constant 0 : i32
    %c0_i32_0 = arith.constant 0 : i32
    %c0_i32_1 = arith.constant 0 : i32
    return %arg0, %c0_i32, %c0_i32_0 : i32, i32, i32
  }
}

module attributes {stable_mosaic.version = 11 : i64} {
  func.func @_conv_layer_kernel(%arg0: i32, %arg1: memref<8x8xf32, #tpu.memory_space<vmem>>, %arg2: memref<1x8x32xf32, #tpu.memory_space<vmem>>, %arg3: memref<1x8x32xf32, #tpu.memory_space<vmem>>, %arg4: memref<1x32xf32, #tpu.memory_space<vmem>>, %arg5: memref<1x32xf32, #tpu.memory_space<vmem>>, %arg6: memref<32x32xf32, #tpu.memory_space<vmem>>, %arg7: memref<1x32xf32, #tpu.memory_space<vmem>>, %arg8: memref<32x32xf32, #tpu.memory_space<vmem>>, %arg9: memref<1x32xf32, #tpu.memory_space<vmem>>, %arg10: memref<1x32xf32, #tpu.memory_space<vmem>>, %arg11: memref<1x32xf32, #tpu.memory_space<vmem>>, %arg12: memref<1x8x32xf32, #tpu.memory_space<vmem>>) attributes {dimension_semantics = [#tpu.dimension_semantics<parallel>], iteration_bounds = array<i64: 2>, scalar_prefetch = 0 : i64, scratch_operands = 0 : i64, tpu.core_type = #tpu.core_type<tc>, window_params = [{pipeline_mode = #tpu.pipeline_mode<synchronous>, transform_indices = @transform_0, window_bounds = array<i64: 8, 8>}, {transform_indices = @transform_1, window_bounds = array<i64: 1, 8, 32>}, {transform_indices = @transform_2, window_bounds = array<i64: 1, 8, 32>}, {pipeline_mode = #tpu.pipeline_mode<synchronous>, transform_indices = @transform_3, window_bounds = array<i64: 1, 32>}, {pipeline_mode = #tpu.pipeline_mode<synchronous>, transform_indices = @transform_4, window_bounds = array<i64: 1, 32>}, {pipeline_mode = #tpu.pipeline_mode<synchronous>, transform_indices = @transform_5, window_bounds = array<i64: 32, 32>}, {pipeline_mode = #tpu.pipeline_mode<synchronous>, transform_indices = @transform_6, window_bounds = array<i64: 1, 32>}, {pipeline_mode = #tpu.pipeline_mode<synchronous>, transform_indices = @transform_7, window_bounds = array<i64: 32, 32>}, {pipeline_mode = #tpu.pipeline_mode<synchronous>, transform_indices = @transform_8, window_bounds = array<i64: 1, 32>}, {pipeline_mode = #tpu.pipeline_mode<synchronous>, transform_indices = @transform_9, window_bounds = array<i64: 1, 32>}, {pipeline_mode = #tpu.pipeline_mode<synchronous>, transform_indices = @transform_10, window_bounds = array<i64: 1, 32>}, {transform_indices = @transform_11, window_bounds = array<i64: 1, 8, 32>}]} {
    %c0 = arith.constant 0 : index
    %c0_0 = arith.constant 0 : index
    %c0_1 = arith.constant 0 : index
    %0 = vector.load %arg2[%c0, %c0_0, %c0_1] : memref<1x8x32xf32, #tpu.memory_space<vmem>>, vector<1x8x32xf32>
    %1 = vector.shape_cast %0 : vector<1x8x32xf32> to vector<8x32xf32>
    %c0_2 = arith.constant 0 : index
    %c0_3 = arith.constant 0 : index
    %c0_4 = arith.constant 0 : index
    %2 = vector.load %arg3[%c0_2, %c0_3, %c0_4] : memref<1x8x32xf32, #tpu.memory_space<vmem>>, vector<1x8x32xf32>
    %3 = vector.shape_cast %2 : vector<1x8x32xf32> to vector<8x32xf32>
    %c0_5 = arith.constant 0 : index
    %c0_6 = arith.constant 0 : index
    %4 = vector.load %arg1[%c0_5, %c0_6] : memref<8x8xf32, #tpu.memory_space<vmem>>, vector<8x8xf32>
    %cst = arith.constant dense<0.000000e+00> : vector<8x32xf32>
    %5 = tpu.matmul %4, %1, %cst {dimension_numbers = #tpu.dot_dimension_numbers<[1], [0], [0], [1], [0, 0, 1, 1], [], []>} : vector<8x8xf32>, vector<8x32xf32>, vector<8x32xf32> -> vector<8x32xf32>
    %6 = arith.addf %3, %5 : vector<8x32xf32>
    %c0_7 = arith.constant 0 : index
    %c0_8 = arith.constant 0 : index
    %7 = vector.load %arg4[%c0_7, %c0_8] : memref<1x32xf32, #tpu.memory_space<vmem>>, vector<1x32xf32>
    %c0_9 = arith.constant 0 : index
    %c0_10 = arith.constant 0 : index
    %8 = vector.load %arg5[%c0_9, %c0_10] : memref<1x32xf32, #tpu.memory_space<vmem>>, vector<1x32xf32>
    %cst_11 = arith.constant dense<0.000000e+00> : vector<8xf32>
    %9 = vector.multi_reduction <add>, %6, %cst_11 [1] : vector<8x32xf32> to vector<8xf32>
    %10 = vector.shape_cast %9 : vector<8xf32> to vector<8x1xf32>
    %cst_12 = arith.constant 3.200000e+01 : f32
    %11 = vector.broadcast %cst_12 : f32 to vector<8x1xf32>
    %12 = arith.divf %10, %11 : vector<8x1xf32>
    %13 = vector.broadcast %12 : vector<8x1xf32> to vector<8x32xf32>
    %14 = arith.subf %6, %13 : vector<8x32xf32>
    %15 = arith.mulf %14, %14 : vector<8x32xf32>
    %cst_13 = arith.constant dense<0.000000e+00> : vector<8xf32>
    %16 = vector.multi_reduction <add>, %15, %cst_13 [1] : vector<8x32xf32> to vector<8xf32>
    %17 = vector.shape_cast %16 : vector<8xf32> to vector<8x1xf32>
    %cst_14 = arith.constant 3.200000e+01 : f32
    %18 = vector.broadcast %cst_14 : f32 to vector<8x1xf32>
    %19 = arith.divf %17, %18 : vector<8x1xf32>
    %20 = vector.broadcast %12 : vector<8x1xf32> to vector<8x32xf32>
    %21 = arith.subf %6, %20 : vector<8x32xf32>
    %cst_15 = arith.constant 9.99999974E-6 : f32
    %22 = vector.broadcast %cst_15 : f32 to vector<8x1xf32>
    %23 = arith.addf %19, %22 : vector<8x1xf32>
    %24 = math.rsqrt %23 : vector<8x1xf32>
    %25 = vector.broadcast %24 : vector<8x1xf32> to vector<8x32xf32>
    %26 = arith.mulf %21, %25 : vector<8x32xf32>
    %27 = vector.broadcast %7 : vector<1x32xf32> to vector<8x32xf32>
    %28 = arith.mulf %26, %27 : vector<8x32xf32>
    %29 = vector.broadcast %8 : vector<1x32xf32> to vector<8x32xf32>
    %30 = arith.addf %28, %29 : vector<8x32xf32>
    %c0_16 = arith.constant 0 : index
    %c0_17 = arith.constant 0 : index
    %31 = vector.load %arg6[%c0_16, %c0_17] : memref<32x32xf32, #tpu.memory_space<vmem>>, vector<32x32xf32>
    %cst_18 = arith.constant dense<0.000000e+00> : vector<8x32xf32>
    %32 = tpu.matmul %30, %31, %cst_18 {dimension_numbers = #tpu.dot_dimension_numbers<[1], [0], [0], [1], [0, 0, 1, 1], [], []>} : vector<8x32xf32>, vector<32x32xf32>, vector<8x32xf32> -> vector<8x32xf32>
    %c0_19 = arith.constant 0 : index
    %c0_20 = arith.constant 0 : index
    %33 = vector.load %arg7[%c0_19, %c0_20] : memref<1x32xf32, #tpu.memory_space<vmem>>, vector<1x32xf32>
    %34 = vector.broadcast %33 : vector<1x32xf32> to vector<8x32xf32>
    %35 = arith.addf %32, %34 : vector<8x32xf32>
    %cst_21 = arith.constant 0.000000e+00 : f32
    %36 = vector.broadcast %cst_21 : f32 to vector<8x32xf32>
    %37 = arith.maximumf %35, %36 : vector<8x32xf32>
    %c0_22 = arith.constant 0 : index
    %c0_23 = arith.constant 0 : index
    %38 = vector.load %arg8[%c0_22, %c0_23] : memref<32x32xf32, #tpu.memory_space<vmem>>, vector<32x32xf32>
    %cst_24 = arith.constant dense<0.000000e+00> : vector<8x32xf32>
    %39 = tpu.matmul %37, %38, %cst_24 {dimension_numbers = #tpu.dot_dimension_numbers<[1], [0], [0], [1], [0, 0, 1, 1], [], []>} : vector<8x32xf32>, vector<32x32xf32>, vector<8x32xf32> -> vector<8x32xf32>
    %c0_25 = arith.constant 0 : index
    %c0_26 = arith.constant 0 : index
    %40 = vector.load %arg9[%c0_25, %c0_26] : memref<1x32xf32, #tpu.memory_space<vmem>>, vector<1x32xf32>
    %41 = vector.broadcast %40 : vector<1x32xf32> to vector<8x32xf32>
    %42 = arith.addf %39, %41 : vector<8x32xf32>
    %43 = arith.addf %30, %42 : vector<8x32xf32>
    %c0_27 = arith.constant 0 : index
    %c0_28 = arith.constant 0 : index
    %44 = vector.load %arg10[%c0_27, %c0_28] : memref<1x32xf32, #tpu.memory_space<vmem>>, vector<1x32xf32>
    %c0_29 = arith.constant 0 : index
    %c0_30 = arith.constant 0 : index
    %45 = vector.load %arg11[%c0_29, %c0_30] : memref<1x32xf32, #tpu.memory_space<vmem>>, vector<1x32xf32>
    %cst_31 = arith.constant dense<0.000000e+00> : vector<8xf32>
    %46 = vector.multi_reduction <add>, %43, %cst_31 [1] : vector<8x32xf32> to vector<8xf32>
    %47 = vector.shape_cast %46 : vector<8xf32> to vector<8x1xf32>
    %cst_32 = arith.constant 3.200000e+01 : f32
    %48 = vector.broadcast %cst_32 : f32 to vector<8x1xf32>
    %49 = arith.divf %47, %48 : vector<8x1xf32>
    %50 = vector.broadcast %49 : vector<8x1xf32> to vector<8x32xf32>
    %51 = arith.subf %43, %50 : vector<8x32xf32>
    %52 = arith.mulf %51, %51 : vector<8x32xf32>
    %cst_33 = arith.constant dense<0.000000e+00> : vector<8xf32>
    %53 = vector.multi_reduction <add>, %52, %cst_33 [1] : vector<8x32xf32> to vector<8xf32>
    %54 = vector.shape_cast %53 : vector<8xf32> to vector<8x1xf32>
    %cst_34 = arith.constant 3.200000e+01 : f32
    %55 = vector.broadcast %cst_34 : f32 to vector<8x1xf32>
    %56 = arith.divf %54, %55 : vector<8x1xf32>
    %57 = vector.broadcast %49 : vector<8x1xf32> to vector<8x32xf32>
    %58 = arith.subf %43, %57 : vector<8x32xf32>
    %cst_35 = arith.constant 9.99999974E-6 : f32
    %59 = vector.broadcast %cst_35 : f32 to vector<8x1xf32>
    %60 = arith.addf %56, %59 : vector<8x1xf32>
    %61 = math.rsqrt %60 : vector<8x1xf32>
    %62 = vector.broadcast %61 : vector<8x1xf32> to vector<8x32xf32>
    %63 = arith.mulf %58, %62 : vector<8x32xf32>
    %64 = vector.broadcast %44 : vector<1x32xf32> to vector<8x32xf32>
    %65 = arith.mulf %63, %64 : vector<8x32xf32>
    %66 = vector.broadcast %45 : vector<1x32xf32> to vector<8x32xf32>
    %67 = arith.addf %65, %66 : vector<8x32xf32>
    %c0_36 = arith.constant 0 : index
    %c0_37 = arith.constant 0 : index
    %c0_38 = arith.constant 0 : index
    %68 = vector.load %arg12[%c0_36, %c0_37, %c0_38] : memref<1x8x32xf32, #tpu.memory_space<vmem>>, vector<1x8x32xf32>
    %69 = vector.shape_cast %68 : vector<1x8x32xf32> to vector<8x32xf32>
    %70 = vector.shape_cast %67 : vector<8x32xf32> to vector<1x8x32xf32>
    tpu.vector_store %arg12[%c0_36, %c0_37, %c0_38], %70 {strides = array<i32>} : memref<1x8x32xf32, #tpu.memory_space<vmem>>, vector<1x8x32xf32>,
    return
  }
  func.func @transform_0(%arg0: i32) -> (i32, i32) {
    %c0_i32 = arith.constant 0 : i32
    %c0_i32_0 = arith.constant 0 : i32
    %c0_i32_1 = arith.constant 0 : i32
    return %c0_i32, %c0_i32_0 : i32, i32
  }
  func.func @transform_1(%arg0: i32) -> (i32, i32, i32) {
    %c0_i32 = arith.constant 0 : i32
    %c0_i32_0 = arith.constant 0 : i32
    %c0_i32_1 = arith.constant 0 : i32
    return %arg0, %c0_i32, %c0_i32_0 : i32, i32, i32
  }
  func.func @transform_2(%arg0: i32) -> (i32, i32, i32) {
    %c0_i32 = arith.constant 0 : i32
    %c0_i32_0 = arith.constant 0 : i32
    %c0_i32_1 = arith.constant 0 : i32
    return %arg0, %c0_i32, %c0_i32_0 : i32, i32, i32
  }
  func.func @transform_3(%arg0: i32) -> (i32, i32) {
    %c0_i32 = arith.constant 0 : i32
    %c0_i32_0 = arith.constant 0 : i32
    %c0_i32_1 = arith.constant 0 : i32
    return %c0_i32, %c0_i32_0 : i32, i32
  }
  func.func @transform_4(%arg0: i32) -> (i32, i32) {
    %c0_i32 = arith.constant 0 : i32
    %c0_i32_0 = arith.constant 0 : i32
    %c0_i32_1 = arith.constant 0 : i32
    return %c0_i32, %c0_i32_0 : i32, i32
  }
  func.func @transform_5(%arg0: i32) -> (i32, i32) {
    %c0_i32 = arith.constant 0 : i32
    %c0_i32_0 = arith.constant 0 : i32
    %c0_i32_1 = arith.constant 0 : i32
    return %c0_i32, %c0_i32_0 : i32, i32
  }
  func.func @transform_6(%arg0: i32) -> (i32, i32) {
    %c0_i32 = arith.constant 0 : i32
    %c0_i32_0 = arith.constant 0 : i32
    %c0_i32_1 = arith.constant 0 : i32
    return %c0_i32, %c0_i32_0 : i32, i32
  }
  func.func @transform_7(%arg0: i32) -> (i32, i32) {
    %c0_i32 = arith.constant 0 : i32
    %c0_i32_0 = arith.constant 0 : i32
    %c0_i32_1 = arith.constant 0 : i32
    return %c0_i32, %c0_i32_0 : i32, i32
  }
  func.func @transform_8(%arg0: i32) -> (i32, i32) {
    %c0_i32 = arith.constant 0 : i32
    %c0_i32_0 = arith.constant 0 : i32
    %c0_i32_1 = arith.constant 0 : i32
    return %c0_i32, %c0_i32_0 : i32, i32
  }
  func.func @transform_9(%arg0: i32) -> (i32, i32) {
    %c0_i32 = arith.constant 0 : i32
    %c0_i32_0 = arith.constant 0 : i32
    %c0_i32_1 = arith.constant 0 : i32
    return %c0_i32, %c0_i32_0 : i32, i32
  }
  func.func @transform_10(%arg0: i32) -> (i32, i32) {
    %c0_i32 = arith.constant 0 : i32
    %c0_i32_0 = arith.constant 0 : i32
    %c0_i32_1 = arith.constant 0 : i32
    return %c0_i32, %c0_i32_0 : i32, i32
  }
  func.func @transform_11(%arg0: i32) -> (i32, i32, i32) {
    %c0_i32 = arith.constant 0 : i32
    %c0_i32_0 = arith.constant 0 : i32
    %c0_i32_1 = arith.constant 0 : i32
    return %arg0, %c0_i32, %c0_i32_0 : i32, i32, i32
  }
}

module attributes {stable_mosaic.version = 11 : i64} {
  func.func @_conv_layer_kernel(%arg0: i32, %arg1: memref<8x8xf32, #tpu.memory_space<vmem>>, %arg2: memref<1x8x32xf32, #tpu.memory_space<vmem>>, %arg3: memref<1x8x32xf32, #tpu.memory_space<vmem>>, %arg4: memref<1x32xf32, #tpu.memory_space<vmem>>, %arg5: memref<1x32xf32, #tpu.memory_space<vmem>>, %arg6: memref<32x32xf32, #tpu.memory_space<vmem>>, %arg7: memref<1x32xf32, #tpu.memory_space<vmem>>, %arg8: memref<32x32xf32, #tpu.memory_space<vmem>>, %arg9: memref<1x32xf32, #tpu.memory_space<vmem>>, %arg10: memref<1x32xf32, #tpu.memory_space<vmem>>, %arg11: memref<1x32xf32, #tpu.memory_space<vmem>>, %arg12: memref<1x8x32xf32, #tpu.memory_space<vmem>>) attributes {dimension_semantics = [#tpu.dimension_semantics<parallel>], iteration_bounds = array<i64: 2>, scalar_prefetch = 0 : i64, scratch_operands = 0 : i64, tpu.core_type = #tpu.core_type<tc>, window_params = [{pipeline_mode = #tpu.pipeline_mode<synchronous>, transform_indices = @transform_0, window_bounds = array<i64: 8, 8>}, {transform_indices = @transform_1, window_bounds = array<i64: 1, 8, 32>}, {transform_indices = @transform_2, window_bounds = array<i64: 1, 8, 32>}, {pipeline_mode = #tpu.pipeline_mode<synchronous>, transform_indices = @transform_3, window_bounds = array<i64: 1, 32>}, {pipeline_mode = #tpu.pipeline_mode<synchronous>, transform_indices = @transform_4, window_bounds = array<i64: 1, 32>}, {pipeline_mode = #tpu.pipeline_mode<synchronous>, transform_indices = @transform_5, window_bounds = array<i64: 32, 32>}, {pipeline_mode = #tpu.pipeline_mode<synchronous>, transform_indices = @transform_6, window_bounds = array<i64: 1, 32>}, {pipeline_mode = #tpu.pipeline_mode<synchronous>, transform_indices = @transform_7, window_bounds = array<i64: 32, 32>}, {pipeline_mode = #tpu.pipeline_mode<synchronous>, transform_indices = @transform_8, window_bounds = array<i64: 1, 32>}, {pipeline_mode = #tpu.pipeline_mode<synchronous>, transform_indices = @transform_9, window_bounds = array<i64: 1, 32>}, {pipeline_mode = #tpu.pipeline_mode<synchronous>, transform_indices = @transform_10, window_bounds = array<i64: 1, 32>}, {transform_indices = @transform_11, window_bounds = array<i64: 1, 8, 32>}]} {
    %c0 = arith.constant 0 : index
    %c0_0 = arith.constant 0 : index
    %c0_1 = arith.constant 0 : index
    %0 = vector.load %arg2[%c0, %c0_0, %c0_1] : memref<1x8x32xf32, #tpu.memory_space<vmem>>, vector<1x8x32xf32>
    %1 = vector.shape_cast %0 : vector<1x8x32xf32> to vector<8x32xf32>
    %c0_2 = arith.constant 0 : index
    %c0_3 = arith.constant 0 : index
    %c0_4 = arith.constant 0 : index
    %2 = vector.load %arg3[%c0_2, %c0_3, %c0_4] : memref<1x8x32xf32, #tpu.memory_space<vmem>>, vector<1x8x32xf32>
    %3 = vector.shape_cast %2 : vector<1x8x32xf32> to vector<8x32xf32>
    %c0_5 = arith.constant 0 : index
    %c0_6 = arith.constant 0 : index
    %4 = vector.load %arg1[%c0_5, %c0_6] : memref<8x8xf32, #tpu.memory_space<vmem>>, vector<8x8xf32>
    %cst = arith.constant dense<0.000000e+00> : vector<8x32xf32>
    %5 = tpu.matmul %4, %1, %cst {dimension_numbers = #tpu.dot_dimension_numbers<[1], [0], [0], [1], [0, 0, 1, 1], [], []>} : vector<8x8xf32>, vector<8x32xf32>, vector<8x32xf32> -> vector<8x32xf32>
    %6 = arith.addf %3, %5 : vector<8x32xf32>
    %c0_7 = arith.constant 0 : index
    %c0_8 = arith.constant 0 : index
    %7 = vector.load %arg4[%c0_7, %c0_8] : memref<1x32xf32, #tpu.memory_space<vmem>>, vector<1x32xf32>
    %c0_9 = arith.constant 0 : index
    %c0_10 = arith.constant 0 : index
    %8 = vector.load %arg5[%c0_9, %c0_10] : memref<1x32xf32, #tpu.memory_space<vmem>>, vector<1x32xf32>
    %cst_11 = arith.constant dense<0.000000e+00> : vector<8xf32>
    %9 = vector.multi_reduction <add>, %6, %cst_11 [1] : vector<8x32xf32> to vector<8xf32>
    %10 = vector.shape_cast %9 : vector<8xf32> to vector<8x1xf32>
    %cst_12 = arith.constant 3.200000e+01 : f32
    %11 = vector.broadcast %cst_12 : f32 to vector<8x1xf32>
    %12 = arith.divf %10, %11 : vector<8x1xf32>
    %13 = vector.broadcast %12 : vector<8x1xf32> to vector<8x32xf32>
    %14 = arith.subf %6, %13 : vector<8x32xf32>
    %15 = arith.mulf %14, %14 : vector<8x32xf32>
    %cst_13 = arith.constant dense<0.000000e+00> : vector<8xf32>
    %16 = vector.multi_reduction <add>, %15, %cst_13 [1] : vector<8x32xf32> to vector<8xf32>
    %17 = vector.shape_cast %16 : vector<8xf32> to vector<8x1xf32>
    %cst_14 = arith.constant 3.200000e+01 : f32
    %18 = vector.broadcast %cst_14 : f32 to vector<8x1xf32>
    %19 = arith.divf %17, %18 : vector<8x1xf32>
    %20 = vector.broadcast %12 : vector<8x1xf32> to vector<8x32xf32>
    %21 = arith.subf %6, %20 : vector<8x32xf32>
    %cst_15 = arith.constant 9.99999974E-6 : f32
    %22 = vector.broadcast %cst_15 : f32 to vector<8x1xf32>
    %23 = arith.addf %19, %22 : vector<8x1xf32>
    %24 = math.rsqrt %23 : vector<8x1xf32>
    %25 = vector.broadcast %24 : vector<8x1xf32> to vector<8x32xf32>
    %26 = arith.mulf %21, %25 : vector<8x32xf32>
    %27 = vector.broadcast %7 : vector<1x32xf32> to vector<8x32xf32>
    %28 = arith.mulf %26, %27 : vector<8x32xf32>
    %29 = vector.broadcast %8 : vector<1x32xf32> to vector<8x32xf32>
    %30 = arith.addf %28, %29 : vector<8x32xf32>
    %c0_16 = arith.constant 0 : index
    %c0_17 = arith.constant 0 : index
    %31 = vector.load %arg6[%c0_16, %c0_17] : memref<32x32xf32, #tpu.memory_space<vmem>>, vector<32x32xf32>
    %cst_18 = arith.constant dense<0.000000e+00> : vector<8x32xf32>
    %32 = tpu.matmul %30, %31, %cst_18 {dimension_numbers = #tpu.dot_dimension_numbers<[1], [0], [0], [1], [0, 0, 1, 1], [], []>} : vector<8x32xf32>, vector<32x32xf32>, vector<8x32xf32> -> vector<8x32xf32>
    %c0_19 = arith.constant 0 : index
    %c0_20 = arith.constant 0 : index
    %33 = vector.load %arg7[%c0_19, %c0_20] : memref<1x32xf32, #tpu.memory_space<vmem>>, vector<1x32xf32>
    %34 = vector.broadcast %33 : vector<1x32xf32> to vector<8x32xf32>
    %35 = arith.addf %32, %34 : vector<8x32xf32>
    %cst_21 = arith.constant 0.000000e+00 : f32
    %36 = vector.broadcast %cst_21 : f32 to vector<8x32xf32>
    %37 = arith.maximumf %35, %36 : vector<8x32xf32>
    %c0_22 = arith.constant 0 : index
    %c0_23 = arith.constant 0 : index
    %38 = vector.load %arg8[%c0_22, %c0_23] : memref<32x32xf32, #tpu.memory_space<vmem>>, vector<32x32xf32>
    %cst_24 = arith.constant dense<0.000000e+00> : vector<8x32xf32>
    %39 = tpu.matmul %37, %38, %cst_24 {dimension_numbers = #tpu.dot_dimension_numbers<[1], [0], [0], [1], [0, 0, 1, 1], [], []>} : vector<8x32xf32>, vector<32x32xf32>, vector<8x32xf32> -> vector<8x32xf32>
    %c0_25 = arith.constant 0 : index
    %c0_26 = arith.constant 0 : index
    %40 = vector.load %arg9[%c0_25, %c0_26] : memref<1x32xf32, #tpu.memory_space<vmem>>, vector<1x32xf32>
    %41 = vector.broadcast %40 : vector<1x32xf32> to vector<8x32xf32>
    %42 = arith.addf %39, %41 : vector<8x32xf32>
    %43 = arith.addf %30, %42 : vector<8x32xf32>
    %c0_27 = arith.constant 0 : index
    %c0_28 = arith.constant 0 : index
    %44 = vector.load %arg10[%c0_27, %c0_28] : memref<1x32xf32, #tpu.memory_space<vmem>>, vector<1x32xf32>
    %c0_29 = arith.constant 0 : index
    %c0_30 = arith.constant 0 : index
    %45 = vector.load %arg11[%c0_29, %c0_30] : memref<1x32xf32, #tpu.memory_space<vmem>>, vector<1x32xf32>
    %cst_31 = arith.constant dense<0.000000e+00> : vector<8xf32>
    %46 = vector.multi_reduction <add>, %43, %cst_31 [1] : vector<8x32xf32> to vector<8xf32>
    %47 = vector.shape_cast %46 : vector<8xf32> to vector<8x1xf32>
    %cst_32 = arith.constant 3.200000e+01 : f32
    %48 = vector.broadcast %cst_32 : f32 to vector<8x1xf32>
    %49 = arith.divf %47, %48 : vector<8x1xf32>
    %50 = vector.broadcast %49 : vector<8x1xf32> to vector<8x32xf32>
    %51 = arith.subf %43, %50 : vector<8x32xf32>
    %52 = arith.mulf %51, %51 : vector<8x32xf32>
    %cst_33 = arith.constant dense<0.000000e+00> : vector<8xf32>
    %53 = vector.multi_reduction <add>, %52, %cst_33 [1] : vector<8x32xf32> to vector<8xf32>
    %54 = vector.shape_cast %53 : vector<8xf32> to vector<8x1xf32>
    %cst_34 = arith.constant 3.200000e+01 : f32
    %55 = vector.broadcast %cst_34 : f32 to vector<8x1xf32>
    %56 = arith.divf %54, %55 : vector<8x1xf32>
    %57 = vector.broadcast %49 : vector<8x1xf32> to vector<8x32xf32>
    %58 = arith.subf %43, %57 : vector<8x32xf32>
    %cst_35 = arith.constant 9.99999974E-6 : f32
    %59 = vector.broadcast %cst_35 : f32 to vector<8x1xf32>
    %60 = arith.addf %56, %59 : vector<8x1xf32>
    %61 = math.rsqrt %60 : vector<8x1xf32>
    %62 = vector.broadcast %61 : vector<8x1xf32> to vector<8x32xf32>
    %63 = arith.mulf %58, %62 : vector<8x32xf32>
    %64 = vector.broadcast %44 : vector<1x32xf32> to vector<8x32xf32>
    %65 = arith.mulf %63, %64 : vector<8x32xf32>
    %66 = vector.broadcast %45 : vector<1x32xf32> to vector<8x32xf32>
    %67 = arith.addf %65, %66 : vector<8x32xf32>
    %c0_36 = arith.constant 0 : index
    %c0_37 = arith.constant 0 : index
    %c0_38 = arith.constant 0 : index
    %68 = vector.load %arg12[%c0_36, %c0_37, %c0_38] : memref<1x8x32xf32, #tpu.memory_space<vmem>>, vector<1x8x32xf32>
    %69 = vector.shape_cast %68 : vector<1x8x32xf32> to vector<8x32xf32>
    %70 = vector.shape_cast %67 : vector<8x32xf32> to vector<1x8x32xf32>
    tpu.vector_store %arg12[%c0_36, %c0_37, %c0_38], %70 {strides = array<i32>} : memref<1x8x32xf32, #tpu.memory_space<vmem>>, vector<1x8x32xf32>,
    return
  }
  func.func @transform_0(%arg0: i32) -> (i32, i32) {
    %c0_i32 = arith.constant 0 : i32
    %c0_i32_0 = arith.constant 0 : i32
    %c0_i32_1 = arith.constant 0 : i32
    return %c0_i32, %c0_i32_0 : i32, i32
  }
  func.func @transform_1(%arg0: i32) -> (i32, i32, i32) {
    %c0_i32 = arith.constant 0 : i32
    %c0_i32_0 = arith.constant 0 : i32
    %c0_i32_1 = arith.constant 0 : i32
    return %arg0, %c0_i32, %c0_i32_0 : i32, i32, i32
  }
  func.func @transform_2(%arg0: i32) -> (i32, i32, i32) {
    %c0_i32 = arith.constant 0 : i32
    %c0_i32_0 = arith.constant 0 : i32
    %c0_i32_1 = arith.constant 0 : i32
    return %arg0, %c0_i32, %c0_i32_0 : i32, i32, i32
  }
  func.func @transform_3(%arg0: i32) -> (i32, i32) {
    %c0_i32 = arith.constant 0 : i32
    %c0_i32_0 = arith.constant 0 : i32
    %c0_i32_1 = arith.constant 0 : i32
    return %c0_i32, %c0_i32_0 : i32, i32
  }
  func.func @transform_4(%arg0: i32) -> (i32, i32) {
    %c0_i32 = arith.constant 0 : i32
    %c0_i32_0 = arith.constant 0 : i32
    %c0_i32_1 = arith.constant 0 : i32
    return %c0_i32, %c0_i32_0 : i32, i32
  }
  func.func @transform_5(%arg0: i32) -> (i32, i32) {
    %c0_i32 = arith.constant 0 : i32
    %c0_i32_0 = arith.constant 0 : i32
    %c0_i32_1 = arith.constant 0 : i32
    return %c0_i32, %c0_i32_0 : i32, i32
  }
  func.func @transform_6(%arg0: i32) -> (i32, i32) {
    %c0_i32 = arith.constant 0 : i32
    %c0_i32_0 = arith.constant 0 : i32
    %c0_i32_1 = arith.constant 0 : i32
    return %c0_i32, %c0_i32_0 : i32, i32
  }
  func.func @transform_7(%arg0: i32) -> (i32, i32) {
    %c0_i32 = arith.constant 0 : i32
    %c0_i32_0 = arith.constant 0 : i32
    %c0_i32_1 = arith.constant 0 : i32
    return %c0_i32, %c0_i32_0 : i32, i32
  }
  func.func @transform_8(%arg0: i32) -> (i32, i32) {
    %c0_i32 = arith.constant 0 : i32
    %c0_i32_0 = arith.constant 0 : i32
    %c0_i32_1 = arith.constant 0 : i32
    return %c0_i32, %c0_i32_0 : i32, i32
  }
  func.func @transform_9(%arg0: i32) -> (i32, i32) {
    %c0_i32 = arith.constant 0 : i32
    %c0_i32_0 = arith.constant 0 : i32
    %c0_i32_1 = arith.constant 0 : i32
    return %c0_i32, %c0_i32_0 : i32, i32
  }
  func.func @transform_10(%arg0: i32) -> (i32, i32) {
    %c0_i32 = arith.constant 0 : i32
    %c0_i32_0 = arith.constant 0 : i32
    %c0_i32_1 = arith.constant 0 : i32
    return %c0_i32, %c0_i32_0 : i32, i32
  }
  func.func @transform_11(%arg0: i32) -> (i32, i32, i32) {
    %c0_i32 = arith.constant 0 : i32
    %c0_i32_0 = arith.constant 0 : i32
    %c0_i32_1 = arith.constant 0 : i32
    return %arg0, %c0_i32, %c0_i32_0 : i32, i32, i32
  }
}

module attributes {stable_mosaic.version = 11 : i64} {
  func.func @_attn_layer_kernel(%arg0: i32, %arg1: memref<1x8x32xf32, #tpu.memory_space<vmem>>, %arg2: memref<1x8x32xf32, #tpu.memory_space<vmem>>, %arg3: memref<32x32xf32, #tpu.memory_space<vmem>>, %arg4: memref<1x32xf32, #tpu.memory_space<vmem>>, %arg5: memref<32x64xf32, #tpu.memory_space<vmem>>, %arg6: memref<1x64xf32, #tpu.memory_space<vmem>>, %arg7: memref<1x32xf32, #tpu.memory_space<vmem>>, %arg8: memref<1x32xf32, #tpu.memory_space<vmem>>, %arg9: memref<32x32xf32, #tpu.memory_space<vmem>>, %arg10: memref<1x32xf32, #tpu.memory_space<vmem>>, %arg11: memref<32x32xf32, #tpu.memory_space<vmem>>, %arg12: memref<1x32xf32, #tpu.memory_space<vmem>>, %arg13: memref<1x32xf32, #tpu.memory_space<vmem>>, %arg14: memref<1x32xf32, #tpu.memory_space<vmem>>, %arg15: memref<1x8x32xf32, #tpu.memory_space<vmem>>) attributes {dimension_semantics = [#tpu.dimension_semantics<parallel>], iteration_bounds = array<i64: 2>, scalar_prefetch = 0 : i64, scratch_operands = 0 : i64, tpu.core_type = #tpu.core_type<tc>, window_params = [{transform_indices = @transform_0, window_bounds = array<i64: 1, 8, 32>}, {transform_indices = @transform_1, window_bounds = array<i64: 1, 8, 32>}, {pipeline_mode = #tpu.pipeline_mode<synchronous>, transform_indices = @transform_2, window_bounds = array<i64: 32, 32>}, {pipeline_mode = #tpu.pipeline_mode<synchronous>, transform_indices = @transform_3, window_bounds = array<i64: 1, 32>}, {pipeline_mode = #tpu.pipeline_mode<synchronous>, transform_indices = @transform_4, window_bounds = array<i64: 32, 64>}, {pipeline_mode = #tpu.pipeline_mode<synchronous>, transform_indices = @transform_5, window_bounds = array<i64: 1, 64>}, {pipeline_mode = #tpu.pipeline_mode<synchronous>, transform_indices = @transform_6, window_bounds = array<i64: 1, 32>}, {pipeline_mode = #tpu.pipeline_mode<synchronous>, transform_indices = @transform_7, window_bounds = array<i64: 1, 32>}, {pipeline_mode = #tpu.pipeline_mode<synchronous>, transform_indices = @transform_8, window_bounds = array<i64: 32, 32>}, {pipeline_mode = #tpu.pipeline_mode<synchronous>, transform_indices = @transform_9, window_bounds = array<i64: 1, 32>}, {pipeline_mode = #tpu.pipeline_mode<synchronous>, transform_indices = @transform_10, window_bounds = array<i64: 32, 32>}, {pipeline_mode = #tpu.pipeline_mode<synchronous>, transform_indices = @transform_11, window_bounds = array<i64: 1, 32>}, {pipeline_mode = #tpu.pipeline_mode<synchronous>, transform_indices = @transform_12, window_bounds = array<i64: 1, 32>}, {pipeline_mode = #tpu.pipeline_mode<synchronous>, transform_indices = @transform_13, window_bounds = array<i64: 1, 32>}, {transform_indices = @transform_14, window_bounds = array<i64: 1, 8, 32>}]} {
    %c0 = arith.constant 0 : index
    %c0_0 = arith.constant 0 : index
    %c0_1 = arith.constant 0 : index
    %0 = vector.load %arg1[%c0, %c0_0, %c0_1] : memref<1x8x32xf32, #tpu.memory_space<vmem>>, vector<1x8x32xf32>
    %1 = vector.shape_cast %0 : vector<1x8x32xf32> to vector<8x32xf32>
    %c0_2 = arith.constant 0 : index
    %c0_3 = arith.constant 0 : index
    %c0_4 = arith.constant 0 : index
    %2 = vector.load %arg2[%c0_2, %c0_3, %c0_4] : memref<1x8x32xf32, #tpu.memory_space<vmem>>, vector<1x8x32xf32>
    %3 = vector.shape_cast %2 : vector<1x8x32xf32> to vector<8x32xf32>
    %c0_5 = arith.constant 0 : index
    %c0_6 = arith.constant 0 : index
    %4 = vector.load %arg3[%c0_5, %c0_6] : memref<32x32xf32, #tpu.memory_space<vmem>>, vector<32x32xf32>
    %cst = arith.constant dense<0.000000e+00> : vector<8x32xf32>
    %5 = tpu.matmul %3, %4, %cst {dimension_numbers = #tpu.dot_dimension_numbers<[1], [0], [0], [1], [0, 0, 1, 1], [], []>} : vector<8x32xf32>, vector<32x32xf32>, vector<8x32xf32> -> vector<8x32xf32>
    %c0_7 = arith.constant 0 : index
    %c0_8 = arith.constant 0 : index
    %6 = vector.load %arg4[%c0_7, %c0_8] : memref<1x32xf32, #tpu.memory_space<vmem>>, vector<1x32xf32>
    %7 = vector.broadcast %6 : vector<1x32xf32> to vector<8x32xf32>
    %8 = arith.addf %5, %7 : vector<8x32xf32>
    %cst_9 = arith.constant 0.176776692 : f32
    %9 = vector.broadcast %cst_9 : f32 to vector<8x32xf32>
    %10 = arith.mulf %8, %9 : vector<8x32xf32>
    %c0_10 = arith.constant 0 : index
    %c0_11 = arith.constant 0 : index
    %11 = vector.load %arg5[%c0_10, %c0_11] : memref<32x64xf32, #tpu.memory_space<vmem>>, vector<32x64xf32>
    %cst_12 = arith.constant dense<0.000000e+00> : vector<8x64xf32>
    %12 = tpu.matmul %1, %11, %cst_12 {dimension_numbers = #tpu.dot_dimension_numbers<[1], [0], [0], [1], [0, 0, 1, 1], [], []>} : vector<8x32xf32>, vector<32x64xf32>, vector<8x64xf32> -> vector<8x64xf32>
    %c0_13 = arith.constant 0 : index
    %c0_14 = arith.constant 0 : index
    %13 = vector.load %arg6[%c0_13, %c0_14] : memref<1x64xf32, #tpu.memory_space<vmem>>, vector<1x64xf32>
    %14 = vector.broadcast %13 : vector<1x64xf32> to vector<8x64xf32>
    %15 = arith.addf %12, %14 : vector<8x64xf32>
    %16 = vector.extract_strided_slice %15 {offsets = [0, 0], sizes = [8, 32], strides = [1, 1]} : vector<8x64xf32> to vector<8x32xf32>
    %17 = vector.extract_strided_slice %15 {offsets = [0, 32], sizes = [8, 32], strides = [1, 1]} : vector<8x64xf32> to vector<8x32xf32>
    %18 = vector.extract_strided_slice %10 {offsets = [0, 0], sizes = [8, 8], strides = [1, 1]} : vector<8x32xf32> to vector<8x8xf32>
    %19 = vector.extract_strided_slice %10 {offsets = [0, 8], sizes = [8, 8], strides = [1, 1]} : vector<8x32xf32> to vector<8x8xf32>
    %20 = vector.extract_strided_slice %10 {offsets = [0, 16], sizes = [8, 8], strides = [1, 1]} : vector<8x32xf32> to vector<8x8xf32>
    %21 = vector.extract_strided_slice %10 {offsets = [0, 24], sizes = [8, 8], strides = [1, 1]} : vector<8x32xf32> to vector<8x8xf32>
    %22 = vector.shape_cast %18 : vector<8x8xf32> to vector<1x8x8xf32>
    %23 = vector.shape_cast %19 : vector<8x8xf32> to vector<1x8x8xf32>
    %24 = vector.shape_cast %20 : vector<8x8xf32> to vector<1x8x8xf32>
    %25 = vector.shape_cast %21 : vector<8x8xf32> to vector<1x8x8xf32>
    %26 = tpu.concatenate %22, %23, %24, %25 in 0 : vector<1x8x8xf32>, vector<1x8x8xf32>, vector<1x8x8xf32>, vector<1x8x8xf32> -> vector<4x8x8xf32>
    %27 = vector.extract_strided_slice %16 {offsets = [0, 0], sizes = [8, 8], strides = [1, 1]} : vector<8x32xf32> to vector<8x8xf32>
    %28 = vector.extract_strided_slice %16 {offsets = [0, 8], sizes = [8, 8], strides = [1, 1]} : vector<8x32xf32> to vector<8x8xf32>
    %29 = vector.extract_strided_slice %16 {offsets = [0, 16], sizes = [8, 8], strides = [1, 1]} : vector<8x32xf32> to vector<8x8xf32>
    %30 = vector.extract_strided_slice %16 {offsets = [0, 24], sizes = [8, 8], strides = [1, 1]} : vector<8x32xf32> to vector<8x8xf32>
    %31 = vector.shape_cast %27 : vector<8x8xf32> to vector<1x8x8xf32>
    %32 = vector.shape_cast %28 : vector<8x8xf32> to vector<1x8x8xf32>
    %33 = vector.shape_cast %29 : vector<8x8xf32> to vector<1x8x8xf32>
    %34 = vector.shape_cast %30 : vector<8x8xf32> to vector<1x8x8xf32>
    %35 = tpu.concatenate %31, %32, %33, %34 in 0 : vector<1x8x8xf32>, vector<1x8x8xf32>, vector<1x8x8xf32>, vector<1x8x8xf32> -> vector<4x8x8xf32>
    %36 = vector.extract_strided_slice %17 {offsets = [0, 0], sizes = [8, 8], strides = [1, 1]} : vector<8x32xf32> to vector<8x8xf32>
    %37 = vector.extract_strided_slice %17 {offsets = [0, 8], sizes = [8, 8], strides = [1, 1]} : vector<8x32xf32> to vector<8x8xf32>
    %38 = vector.extract_strided_slice %17 {offsets = [0, 16], sizes = [8, 8], strides = [1, 1]} : vector<8x32xf32> to vector<8x8xf32>
    %39 = vector.extract_strided_slice %17 {offsets = [0, 24], sizes = [8, 8], strides = [1, 1]} : vector<8x32xf32> to vector<8x8xf32>
    %40 = vector.shape_cast %36 : vector<8x8xf32> to vector<1x8x8xf32>
    %41 = vector.shape_cast %37 : vector<8x8xf32> to vector<1x8x8xf32>
    %42 = vector.shape_cast %38 : vector<8x8xf32> to vector<1x8x8xf32>
    %43 = vector.shape_cast %39 : vector<8x8xf32> to vector<1x8x8xf32>
    %44 = tpu.concatenate %40, %41, %42, %43 in 0 : vector<1x8x8xf32>, vector<1x8x8xf32>, vector<1x8x8xf32>, vector<1x8x8xf32> -> vector<4x8x8xf32>
    "tpu.trace_start"() <{level = 10 : i32, message = "hnd,hmd->hnm"}> : () -> ()
    %cst_15 = arith.constant dense<0.000000e+00> : vector<4x8x8xf32>
    %45 = tpu.matmul %26, %35, %cst_15 {dimension_numbers = #tpu.dot_dimension_numbers<[2], [2], [1], [1], [0, 0, 0, 1, 1, 1], [0], [0]>} : vector<4x8x8xf32>, vector<4x8x8xf32>, vector<4x8x8xf32> -> vector<4x8x8xf32>
    "tpu.trace_stop"() : () -> ()
    %46 = tpu.iota {dimensions = array<i32: 2>} : vector<4x8x8xi32>
    %cst_16 = arith.constant 0.000000e+00 : f32
    %47 = vector.broadcast %cst_16 : f32 to vector<4x8x8xf32>
    %cst_17 = arith.constant dense<0xFF800000> : vector<4x8xf32>
    %48 = vector.multi_reduction <maximumf>, %45, %cst_17 [2] : vector<4x8x8xf32> to vector<4x8xf32>
    %49 = vector.shape_cast %48 : vector<4x8xf32> to vector<4x8x1xf32>
    %50 = vector.broadcast %49 : vector<4x8x1xf32> to vector<4x8x8xf32>
    %51 = arith.cmpf oeq, %45, %50 : vector<4x8x8xf32>
    %c8_i32 = arith.constant 8 : i32
    %52 = vector.broadcast %c8_i32 : i32 to vector<4x8x8xi32>
    %53 = arith.select %51, %46, %52 : vector<4x8x8xi1>, vector<4x8x8xi32>
    %cst_18 = arith.constant dense<2147483647> : vector<4x8xi32>
    %54 = vector.multi_reduction <minsi>, %53, %cst_18 [2] : vector<4x8x8xi32> to vector<4x8xi32>
    %55 = vector.shape_cast %54 : vector<4x8xi32> to vector<4x8x1xi32>
    %56 = vector.broadcast %55 : vector<4x8x1xi32> to vector<4x8x8xi32>
    %57 = arith.cmpi eq, %46, %56 : vector<4x8x8xi32>
    %cst_19 = arith.constant 1.000000e+00 : f32
    %58 = vector.broadcast %cst_19 : f32 to vector<4x8x8xf32>
    %59 = arith.select %57, %58, %47 : vector<4x8x8xi1>, vector<4x8x8xf32>
    %cst_20 = arith.constant 0xFF800000 : f32
    %60 = vector.broadcast %cst_20 : f32 to vector<4x8x8xf32>
    %61 = arith.select %57, %60, %45 : vector<4x8x8xi1>, vector<4x8x8xf32>
    %cst_21 = arith.constant dense<0xFF800000> : vector<4x8xf32>
    %62 = vector.multi_reduction <maximumf>, %61, %cst_21 [2] : vector<4x8x8xf32> to vector<4x8xf32>
    %63 = vector.shape_cast %62 : vector<4x8xf32> to vector<4x8x1xf32>
    %64 = vector.broadcast %63 : vector<4x8x1xf32> to vector<4x8x8xf32>
    %65 = arith.cmpf oeq, %61, %64 : vector<4x8x8xf32>
    %c8_i32_22 = arith.constant 8 : i32
    %66 = vector.broadcast %c8_i32_22 : i32 to vector<4x8x8xi32>
    %67 = arith.select %65, %46, %66 : vector<4x8x8xi1>, vector<4x8x8xi32>
    %cst_23 = arith.constant dense<2147483647> : vector<4x8xi32>
    %68 = vector.multi_reduction <minsi>, %67, %cst_23 [2] : vector<4x8x8xi32> to vector<4x8xi32>
    %69 = vector.shape_cast %68 : vector<4x8xi32> to vector<4x8x1xi32>
    %70 = vector.broadcast %69 : vector<4x8x1xi32> to vector<4x8x8xi32>
    %71 = arith.cmpi eq, %46, %70 : vector<4x8x8xi32>
    %cst_24 = arith.constant 1.000000e+00 : f32
    %72 = vector.broadcast %cst_24 : f32 to vector<4x8x8xf32>
    %73 = arith.select %71, %72, %59 : vector<4x8x8xi1>, vector<4x8x8xf32>
    %cst_25 = arith.constant 0xFF800000 : f32
    %74 = vector.broadcast %cst_25 : f32 to vector<4x8x8xf32>
    %75 = arith.select %71, %74, %61 : vector<4x8x8xi1>, vector<4x8x8xf32>
    %cst_26 = arith.constant dense<0xFF800000> : vector<4x8xf32>
    %76 = vector.multi_reduction <maximumf>, %75, %cst_26 [2] : vector<4x8x8xf32> to vector<4x8xf32>
    %77 = vector.shape_cast %76 : vector<4x8xf32> to vector<4x8x1xf32>
    %78 = vector.broadcast %77 : vector<4x8x1xf32> to vector<4x8x8xf32>
    %79 = arith.cmpf oeq, %75, %78 : vector<4x8x8xf32>
    %c8_i32_27 = arith.constant 8 : i32
    %80 = vector.broadcast %c8_i32_27 : i32 to vector<4x8x8xi32>
    %81 = arith.select %79, %46, %80 : vector<4x8x8xi1>, vector<4x8x8xi32>
    %cst_28 = arith.constant dense<2147483647> : vector<4x8xi32>
    %82 = vector.multi_reduction <minsi>, %81, %cst_28 [2] : vector<4x8x8xi32> to vector<4x8xi32>
    %83 = vector.shape_cast %82 : vector<4x8xi32> to vector<4x8x1xi32>
    %84 = vector.broadcast %83 : vector<4x8x1xi32> to vector<4x8x8xi32>
    %85 = arith.cmpi eq, %46, %84 : vector<4x8x8xi32>
    %cst_29 = arith.constant 1.000000e+00 : f32
    %86 = vector.broadcast %cst_29 : f32 to vector<4x8x8xf32>
    %87 = arith.select %85, %86, %73 : vector<4x8x8xi1>, vector<4x8x8xf32>
    %cst_30 = arith.constant 0.000000e+00 : f32
    %88 = vector.broadcast %cst_30 : f32 to vector<4x8x8xf32>
    %89 = arith.cmpf ogt, %87, %88 : vector<4x8x8xf32>
    %cst_31 = arith.constant 0xFF800000 : f32
    %90 = vector.broadcast %cst_31 : f32 to vector<4x8x8xf32>
    %91 = arith.select %89, %45, %90 : vector<4x8x8xi1>, vector<4x8x8xf32>
    %cst_32 = arith.constant dense<0xFF800000> : vector<4x8xf32>
    %92 = vector.multi_reduction <maximumf>, %91, %cst_32 [2] : vector<4x8x8xf32> to vector<4x8xf32>
    %93 = vector.shape_cast %92 : vector<4x8xf32> to vector<4x8x1xf32>
    %94 = vector.broadcast %93 : vector<4x8x1xf32> to vector<4x8x8xf32>
    %95 = arith.subf %91, %94 : vector<4x8x8xf32>
    %96 = math.exp %95 : vector<4x8x8xf32>
    %cst_33 = arith.constant dense<0.000000e+00> : vector<4x8xf32>
    %97 = vector.multi_reduction <add>, %96, %cst_33 [2] : vector<4x8x8xf32> to vector<4x8xf32>
    %98 = vector.shape_cast %97 : vector<4x8xf32> to vector<4x8x1xf32>
    %99 = tpu.reciprocal %98 {approx = true} : vector<4x8x1xf32> -> vector<4x8x1xf32>
    %100 = vector.broadcast %99 : vector<4x8x1xf32> to vector<4x8x8xf32>
    %101 = arith.mulf %96, %100 : vector<4x8x8xf32>
    "tpu.trace_start"() <{level = 10 : i32, message = "hnm,hmd->hnd"}> : () -> ()
    %cst_34 = arith.constant dense<0.000000e+00> : vector<4x8x8xf32>
    %102 = tpu.matmul %101, %44, %cst_34 {dimension_numbers = #tpu.dot_dimension_numbers<[2], [1], [1], [2], [0, 0, 0, 1, 1, 2], [0], [0]>} : vector<4x8x8xf32>, vector<4x8x8xf32>, vector<4x8x8xf32> -> vector<4x8x8xf32>
    "tpu.trace_stop"() : () -> ()
    %103 = vector.extract_strided_slice %102 {offsets = [0, 0, 0], sizes = [1, 8, 8], strides = [1, 1, 1]} : vector<4x8x8xf32> to vector<1x8x8xf32>
    %104 = vector.shape_cast %103 : vector<1x8x8xf32> to vector<8x8xf32>
    %105 = vector.extract_strided_slice %102 {offsets = [1, 0, 0], sizes = [1, 8, 8], strides = [1, 1, 1]} : vector<4x8x8xf32> to vector<1x8x8xf32>
    %106 = vector.shape_cast %105 : vector<1x8x8xf32> to vector<8x8xf32>
    %107 = vector.extract_strided_slice %102 {offsets = [2, 0, 0], sizes = [1, 8, 8], strides = [1, 1, 1]} : vector<4x8x8xf32> to vector<1x8x8xf32>
    %108 = vector.shape_cast %107 : vector<1x8x8xf32> to vector<8x8xf32>
    %109 = vector.extract_strided_slice %102 {offsets = [3, 0, 0], sizes = [1, 8, 8], strides = [1, 1, 1]} : vector<4x8x8xf32> to vector<1x8x8xf32>
    %110 = vector.shape_cast %109 : vector<1x8x8xf32> to vector<8x8xf32>
    %111 = tpu.concatenate %104, %106, %108, %110 in 1 : vector<8x8xf32>, vector<8x8xf32>, vector<8x8xf32>, vector<8x8xf32> -> vector<8x32xf32>
    %112 = arith.addf %3, %111 : vector<8x32xf32>
    %c0_35 = arith.constant 0 : index
    %c0_36 = arith.constant 0 : index
    %113 = vector.load %arg7[%c0_35, %c0_36] : memref<1x32xf32, #tpu.memory_space<vmem>>, vector<1x32xf32>
    %c0_37 = arith.constant 0 : index
    %c0_38 = arith.constant 0 : index
    %114 = vector.load %arg8[%c0_37, %c0_38] : memref<1x32xf32, #tpu.memory_space<vmem>>, vector<1x32xf32>
    %cst_39 = arith.constant dense<0.000000e+00> : vector<8xf32>
    %115 = vector.multi_reduction <add>, %112, %cst_39 [1] : vector<8x32xf32> to vector<8xf32>
    %116 = vector.shape_cast %115 : vector<8xf32> to vector<8x1xf32>
    %cst_40 = arith.constant 3.200000e+01 : f32
    %117 = vector.broadcast %cst_40 : f32 to vector<8x1xf32>
    %118 = arith.divf %116, %117 : vector<8x1xf32>
    %119 = vector.broadcast %118 : vector<8x1xf32> to vector<8x32xf32>
    %120 = arith.subf %112, %119 : vector<8x32xf32>
    %121 = arith.mulf %120, %120 : vector<8x32xf32>
    %cst_41 = arith.constant dense<0.000000e+00> : vector<8xf32>
    %122 = vector.multi_reduction <add>, %121, %cst_41 [1] : vector<8x32xf32> to vector<8xf32>
    %123 = vector.shape_cast %122 : vector<8xf32> to vector<8x1xf32>
    %cst_42 = arith.constant 3.200000e+01 : f32
    %124 = vector.broadcast %cst_42 : f32 to vector<8x1xf32>
    %125 = arith.divf %123, %124 : vector<8x1xf32>
    %126 = vector.broadcast %118 : vector<8x1xf32> to vector<8x32xf32>
    %127 = arith.subf %112, %126 : vector<8x32xf32>
    %cst_43 = arith.constant 9.99999974E-6 : f32
    %128 = vector.broadcast %cst_43 : f32 to vector<8x1xf32>
    %129 = arith.addf %125, %128 : vector<8x1xf32>
    %130 = math.rsqrt %129 : vector<8x1xf32>
    %131 = vector.broadcast %130 : vector<8x1xf32> to vector<8x32xf32>
    %132 = arith.mulf %127, %131 : vector<8x32xf32>
    %133 = vector.broadcast %113 : vector<1x32xf32> to vector<8x32xf32>
    %134 = arith.mulf %132, %133 : vector<8x32xf32>
    %135 = vector.broadcast %114 : vector<1x32xf32> to vector<8x32xf32>
    %136 = arith.addf %134, %135 : vector<8x32xf32>
    %c0_44 = arith.constant 0 : index
    %c0_45 = arith.constant 0 : index
    %137 = vector.load %arg9[%c0_44, %c0_45] : memref<32x32xf32, #tpu.memory_space<vmem>>, vector<32x32xf32>
    %cst_46 = arith.constant dense<0.000000e+00> : vector<8x32xf32>
    %138 = tpu.matmul %136, %137, %cst_46 {dimension_numbers = #tpu.dot_dimension_numbers<[1], [0], [0], [1], [0, 0, 1, 1], [], []>} : vector<8x32xf32>, vector<32x32xf32>, vector<8x32xf32> -> vector<8x32xf32>
    %c0_47 = arith.constant 0 : index
    %c0_48 = arith.constant 0 : index
    %139 = vector.load %arg10[%c0_47, %c0_48] : memref<1x32xf32, #tpu.memory_space<vmem>>, vector<1x32xf32>
    %140 = vector.broadcast %139 : vector<1x32xf32> to vector<8x32xf32>
    %141 = arith.addf %138, %140 : vector<8x32xf32>
    %cst_49 = arith.constant 0.000000e+00 : f32
    %142 = vector.broadcast %cst_49 : f32 to vector<8x32xf32>
    %143 = arith.maximumf %141, %142 : vector<8x32xf32>
    %c0_50 = arith.constant 0 : index
    %c0_51 = arith.constant 0 : index
    %144 = vector.load %arg11[%c0_50, %c0_51] : memref<32x32xf32, #tpu.memory_space<vmem>>, vector<32x32xf32>
    %cst_52 = arith.constant dense<0.000000e+00> : vector<8x32xf32>
    %145 = tpu.matmul %143, %144, %cst_52 {dimension_numbers = #tpu.dot_dimension_numbers<[1], [0], [0], [1], [0, 0, 1, 1], [], []>} : vector<8x32xf32>, vector<32x32xf32>, vector<8x32xf32> -> vector<8x32xf32>
    %c0_53 = arith.constant 0 : index
    %c0_54 = arith.constant 0 : index
    %146 = vector.load %arg12[%c0_53, %c0_54] : memref<1x32xf32, #tpu.memory_space<vmem>>, vector<1x32xf32>
    %147 = vector.broadcast %146 : vector<1x32xf32> to vector<8x32xf32>
    %148 = arith.addf %145, %147 : vector<8x32xf32>
    %149 = arith.addf %136, %148 : vector<8x32xf32>
    %c0_55 = arith.constant 0 : index
    %c0_56 = arith.constant 0 : index
    %150 = vector.load %arg13[%c0_55, %c0_56] : memref<1x32xf32, #tpu.memory_space<vmem>>, vector<1x32xf32>
    %c0_57 = arith.constant 0 : index
    %c0_58 = arith.constant 0 : index
    %151 = vector.load %arg14[%c0_57, %c0_58] : memref<1x32xf32, #tpu.memory_space<vmem>>, vector<1x32xf32>
    %cst_59 = arith.constant dense<0.000000e+00> : vector<8xf32>
    %152 = vector.multi_reduction <add>, %149, %cst_59 [1] : vector<8x32xf32> to vector<8xf32>
    %153 = vector.shape_cast %152 : vector<8xf32> to vector<8x1xf32>
    %cst_60 = arith.constant 3.200000e+01 : f32
    %154 = vector.broadcast %cst_60 : f32 to vector<8x1xf32>
    %155 = arith.divf %153, %154 : vector<8x1xf32>
    %156 = vector.broadcast %155 : vector<8x1xf32> to vector<8x32xf32>
    %157 = arith.subf %149, %156 : vector<8x32xf32>
    %158 = arith.mulf %157, %157 : vector<8x32xf32>
    %cst_61 = arith.constant dense<0.000000e+00> : vector<8xf32>
    %159 = vector.multi_reduction <add>, %158, %cst_61 [1] : vector<8x32xf32> to vector<8xf32>
    %160 = vector.shape_cast %159 : vector<8xf32> to vector<8x1xf32>
    %cst_62 = arith.constant 3.200000e+01 : f32
    %161 = vector.broadcast %cst_62 : f32 to vector<8x1xf32>
    %162 = arith.divf %160, %161 : vector<8x1xf32>
    %163 = vector.broadcast %155 : vector<8x1xf32> to vector<8x32xf32>
    %164 = arith.subf %149, %163 : vector<8x32xf32>
    %cst_63 = arith.constant 9.99999974E-6 : f32
    %165 = vector.broadcast %cst_63 : f32 to vector<8x1xf32>
    %166 = arith.addf %162, %165 : vector<8x1xf32>
    %167 = math.rsqrt %166 : vector<8x1xf32>
    %168 = vector.broadcast %167 : vector<8x1xf32> to vector<8x32xf32>
    %169 = arith.mulf %164, %168 : vector<8x32xf32>
    %170 = vector.broadcast %150 : vector<1x32xf32> to vector<8x32xf32>
    %171 = arith.mulf %169, %170 : vector<8x32xf32>
    %172 = vector.broadcast %151 : vector<1x32xf32> to vector<8x32xf32>
    %173 = arith.addf %171, %172 : vector<8x32xf32>
    %c0_64 = arith.constant 0 : index
    %c0_65 = arith.constant 0 : index
    %c0_66 = arith.constant 0 : index
    %174 = vector.load %arg15[%c0_64, %c0_65, %c0_66] : memref<1x8x32xf32, #tpu.memory_space<vmem>>, vector<1x8x32xf32>
    %175 = vector.shape_cast %174 : vector<1x8x32xf32> to vector<8x32xf32>
    %176 = vector.shape_cast %173 : vector<8x32xf32> to vector<1x8x32xf32>
    tpu.vector_store %arg15[%c0_64, %c0_65, %c0_66], %176 {strides = array<i32>} : memref<1x8x32xf32, #tpu.memory_space<vmem>>, vector<1x8x32xf32>,
    return
  }
  func.func @transform_0(%arg0: i32) -> (i32, i32, i32) {
    %c0_i32 = arith.constant 0 : i32
    %c0_i32_0 = arith.constant 0 : i32
    %c0_i32_1 = arith.constant 0 : i32
    return %arg0, %c0_i32, %c0_i32_0 : i32, i32, i32
  }
  func.func @transform_1(%arg0: i32) -> (i32, i32, i32) {
    %c0_i32 = arith.constant 0 : i32
    %c0_i32_0 = arith.constant 0 : i32
    %c0_i32_1 = arith.constant 0 : i32
    return %arg0, %c0_i32, %c0_i32_0 : i32, i32, i32
  }
  func.func @transform_2(%arg0: i32) -> (i32, i32) {
    %c0_i32 = arith.constant 0 : i32
    %c0_i32_0 = arith.constant 0 : i32
    %c0_i32_1 = arith.constant 0 : i32
    return %c0_i32, %c0_i32_0 : i32, i32
  }
  func.func @transform_3(%arg0: i32) -> (i32, i32) {
    %c0_i32 = arith.constant 0 : i32
    %c0_i32_0 = arith.constant 0 : i32
    %c0_i32_1 = arith.constant 0 : i32
    return %c0_i32, %c0_i32_0 : i32, i32
  }
  func.func @transform_4(%arg0: i32) -> (i32, i32) {
    %c0_i32 = arith.constant 0 : i32
    %c0_i32_0 = arith.constant 0 : i32
    %c0_i32_1 = arith.constant 0 : i32
    return %c0_i32, %c0_i32_0 : i32, i32
  }
  func.func @transform_5(%arg0: i32) -> (i32, i32) {
    %c0_i32 = arith.constant 0 : i32
    %c0_i32_0 = arith.constant 0 : i32
    %c0_i32_1 = arith.constant 0 : i32
    return %c0_i32, %c0_i32_0 : i32, i32
  }
  func.func @transform_6(%arg0: i32) -> (i32, i32) {
    %c0_i32 = arith.constant 0 : i32
    %c0_i32_0 = arith.constant 0 : i32
    %c0_i32_1 = arith.constant 0 : i32
    return %c0_i32, %c0_i32_0 : i32, i32
  }
  func.func @transform_7(%arg0: i32) -> (i32, i32) {
    %c0_i32 = arith.constant 0 : i32
    %c0_i32_0 = arith.constant 0 : i32
    %c0_i32_1 = arith.constant 0 : i32
    return %c0_i32, %c0_i32_0 : i32, i32
  }
  func.func @transform_8(%arg0: i32) -> (i32, i32) {
    %c0_i32 = arith.constant 0 : i32
    %c0_i32_0 = arith.constant 0 : i32
    %c0_i32_1 = arith.constant 0 : i32
    return %c0_i32, %c0_i32_0 : i32, i32
  }
  func.func @transform_9(%arg0: i32) -> (i32, i32) {
    %c0_i32 = arith.constant 0 : i32
    %c0_i32_0 = arith.constant 0 : i32
    %c0_i32_1 = arith.constant 0 : i32
    return %c0_i32, %c0_i32_0 : i32, i32
  }
  func.func @transform_10(%arg0: i32) -> (i32, i32) {
    %c0_i32 = arith.constant 0 : i32
    %c0_i32_0 = arith.constant 0 : i32
    %c0_i32_1 = arith.constant 0 : i32
    return %c0_i32, %c0_i32_0 : i32, i32
  }
  func.func @transform_11(%arg0: i32) -> (i32, i32) {
    %c0_i32 = arith.constant 0 : i32
    %c0_i32_0 = arith.constant 0 : i32
    %c0_i32_1 = arith.constant 0 : i32
    return %c0_i32, %c0_i32_0 : i32, i32
  }
  func.func @transform_12(%arg0: i32) -> (i32, i32) {
    %c0_i32 = arith.constant 0 : i32
    %c0_i32_0 = arith.constant 0 : i32
    %c0_i32_1 = arith.constant 0 : i32
    return %c0_i32, %c0_i32_0 : i32, i32
  }
  func.func @transform_13(%arg0: i32) -> (i32, i32) {
    %c0_i32 = arith.constant 0 : i32
    %c0_i32_0 = arith.constant 0 : i32
    %c0_i32_1 = arith.constant 0 : i32
    return %c0_i32, %c0_i32_0 : i32, i32
  }
  func.func @transform_14(%arg0: i32) -> (i32, i32, i32) {
    %c0_i32 = arith.constant 0 : i32
    %c0_i32_0 = arith.constant 0 : i32
    %c0_i32_1 = arith.constant 0 : i32
    return %arg0, %c0_i32, %c0_i32_0 : i32, i32, i32
  }
}

module attributes {stable_mosaic.version = 11 : i64} {
  func.func @_ffn_kernel(%arg0: i32, %arg1: memref<16x32xf32, #tpu.memory_space<vmem>>, %arg2: memref<32x32xf32, #tpu.memory_space<vmem>>, %arg3: memref<1x32xf32, #tpu.memory_space<vmem>>, %arg4: memref<32x16xf32, #tpu.memory_space<vmem>>, %arg5: memref<1x16xf32, #tpu.memory_space<vmem>>, %arg6: memref<16x16xf32, #tpu.memory_space<vmem>>) attributes {dimension_semantics = [#tpu.dimension_semantics<parallel>], iteration_bounds = array<i64: 1>, scalar_prefetch = 0 : i64, scratch_operands = 0 : i64, tpu.core_type = #tpu.core_type<tc>, window_params = [{transform_indices = @transform_0, window_bounds = array<i64: 16, 32>}, {pipeline_mode = #tpu.pipeline_mode<synchronous>, transform_indices = @transform_1, window_bounds = array<i64: 32, 32>}, {pipeline_mode = #tpu.pipeline_mode<synchronous>, transform_indices = @transform_2, window_bounds = array<i64: 1, 32>}, {pipeline_mode = #tpu.pipeline_mode<synchronous>, transform_indices = @transform_3, window_bounds = array<i64: 32, 16>}, {pipeline_mode = #tpu.pipeline_mode<synchronous>, transform_indices = @transform_4, window_bounds = array<i64: 1, 16>}, {transform_indices = @transform_5, window_bounds = array<i64: 16, 16>}]} {
    %c0 = arith.constant 0 : index
    %c0_0 = arith.constant 0 : index
    %0 = vector.load %arg1[%c0, %c0_0] : memref<16x32xf32, #tpu.memory_space<vmem>>, vector<16x32xf32>
    %c0_1 = arith.constant 0 : index
    %c0_2 = arith.constant 0 : index
    %1 = vector.load %arg2[%c0_1, %c0_2] : memref<32x32xf32, #tpu.memory_space<vmem>>, vector<32x32xf32>
    %cst = arith.constant dense<0.000000e+00> : vector<16x32xf32>
    %2 = tpu.matmul %0, %1, %cst {dimension_numbers = #tpu.dot_dimension_numbers<[1], [0], [0], [1], [0, 0, 1, 1], [], []>} : vector<16x32xf32>, vector<32x32xf32>, vector<16x32xf32> -> vector<16x32xf32>
    %c0_3 = arith.constant 0 : index
    %c0_4 = arith.constant 0 : index
    %3 = vector.load %arg3[%c0_3, %c0_4] : memref<1x32xf32, #tpu.memory_space<vmem>>, vector<1x32xf32>
    %4 = vector.broadcast %3 : vector<1x32xf32> to vector<16x32xf32>
    %5 = arith.addf %2, %4 : vector<16x32xf32>
    %cst_5 = arith.constant 0.000000e+00 : f32
    %6 = vector.broadcast %cst_5 : f32 to vector<16x32xf32>
    %7 = arith.maximumf %5, %6 : vector<16x32xf32>
    %c0_6 = arith.constant 0 : index
    %c0_7 = arith.constant 0 : index
    %8 = vector.load %arg4[%c0_6, %c0_7] : memref<32x16xf32, #tpu.memory_space<vmem>>, vector<32x16xf32>
    %cst_8 = arith.constant dense<0.000000e+00> : vector<16x16xf32>
    %9 = tpu.matmul %7, %8, %cst_8 {dimension_numbers = #tpu.dot_dimension_numbers<[1], [0], [0], [1], [0, 0, 1, 1], [], []>} : vector<16x32xf32>, vector<32x16xf32>, vector<16x16xf32> -> vector<16x16xf32>
    %c0_9 = arith.constant 0 : index
    %c0_10 = arith.constant 0 : index
    %10 = vector.load %arg5[%c0_9, %c0_10] : memref<1x16xf32, #tpu.memory_space<vmem>>, vector<1x16xf32>
    %11 = vector.broadcast %10 : vector<1x16xf32> to vector<16x16xf32>
    %12 = arith.addf %9, %11 : vector<16x16xf32>
    %c0_11 = arith.constant 0 : index
    %c0_12 = arith.constant 0 : index
    %13 = vector.load %arg6[%c0_11, %c0_12] : memref<16x16xf32, #tpu.memory_space<vmem>>, vector<16x16xf32>
    tpu.vector_store %arg6[%c0_11, %c0_12], %12 {strides = array<i32>} : memref<16x16xf32, #tpu.memory_space<vmem>>, vector<16x16xf32>,
    return
  }
  func.func @transform_0(%arg0: i32) -> (i32, i32) {
    %c0_i32 = arith.constant 0 : i32
    %c0_i32_0 = arith.constant 0 : i32
    return %arg0, %c0_i32 : i32, i32
  }
  func.func @transform_1(%arg0: i32) -> (i32, i32) {
    %c0_i32 = arith.constant 0 : i32
    %c0_i32_0 = arith.constant 0 : i32
    %c0_i32_1 = arith.constant 0 : i32
    return %c0_i32, %c0_i32_0 : i32, i32
  }
  func.func @transform_2(%arg0: i32) -> (i32, i32) {
    %c0_i32 = arith.constant 0 : i32
    %c0_i32_0 = arith.constant 0 : i32
    %c0_i32_1 = arith.constant 0 : i32
    return %c0_i32, %c0_i32_0 : i32, i32
  }
  func.func @transform_3(%arg0: i32) -> (i32, i32) {
    %c0_i32 = arith.constant 0 : i32
    %c0_i32_0 = arith.constant 0 : i32
    %c0_i32_1 = arith.constant 0 : i32
    return %c0_i32, %c0_i32_0 : i32, i32
  }
  func.func @transform_4(%arg0: i32) -> (i32, i32) {
    %c0_i32 = arith.constant 0 : i32
    %c0_i32_0 = arith.constant 0 : i32
    %c0_i32_1 = arith.constant 0 : i32
    return %c0_i32, %c0_i32_0 : i32, i32
  }
  func.func @transform_5(%arg0: i32) -> (i32, i32) {
    %c0_i32 = arith.constant 0 : i32
    %c0_i32_0 = arith.constant 0 : i32
    return %arg0, %c0_i32 : i32, i32
  }
}

module attributes {stable_mosaic.version = 11 : i64} {
  func.func @_attn_layer_kernel(%arg0: i32, %arg1: memref<1x8x32xf32, #tpu.memory_space<vmem>>, %arg2: memref<1x8x32xf32, #tpu.memory_space<vmem>>, %arg3: memref<32x32xf32, #tpu.memory_space<vmem>>, %arg4: memref<1x32xf32, #tpu.memory_space<vmem>>, %arg5: memref<32x64xf32, #tpu.memory_space<vmem>>, %arg6: memref<1x64xf32, #tpu.memory_space<vmem>>, %arg7: memref<1x32xf32, #tpu.memory_space<vmem>>, %arg8: memref<1x32xf32, #tpu.memory_space<vmem>>, %arg9: memref<32x32xf32, #tpu.memory_space<vmem>>, %arg10: memref<1x32xf32, #tpu.memory_space<vmem>>, %arg11: memref<32x32xf32, #tpu.memory_space<vmem>>, %arg12: memref<1x32xf32, #tpu.memory_space<vmem>>, %arg13: memref<1x32xf32, #tpu.memory_space<vmem>>, %arg14: memref<1x32xf32, #tpu.memory_space<vmem>>, %arg15: memref<1x8x32xf32, #tpu.memory_space<vmem>>) attributes {dimension_semantics = [#tpu.dimension_semantics<parallel>], iteration_bounds = array<i64: 2>, scalar_prefetch = 0 : i64, scratch_operands = 0 : i64, tpu.core_type = #tpu.core_type<tc>, window_params = [{transform_indices = @transform_0, window_bounds = array<i64: 1, 8, 32>}, {transform_indices = @transform_1, window_bounds = array<i64: 1, 8, 32>}, {pipeline_mode = #tpu.pipeline_mode<synchronous>, transform_indices = @transform_2, window_bounds = array<i64: 32, 32>}, {pipeline_mode = #tpu.pipeline_mode<synchronous>, transform_indices = @transform_3, window_bounds = array<i64: 1, 32>}, {pipeline_mode = #tpu.pipeline_mode<synchronous>, transform_indices = @transform_4, window_bounds = array<i64: 32, 64>}, {pipeline_mode = #tpu.pipeline_mode<synchronous>, transform_indices = @transform_5, window_bounds = array<i64: 1, 64>}, {pipeline_mode = #tpu.pipeline_mode<synchronous>, transform_indices = @transform_6, window_bounds = array<i64: 1, 32>}, {pipeline_mode = #tpu.pipeline_mode<synchronous>, transform_indices = @transform_7, window_bounds = array<i64: 1, 32>}, {pipeline_mode = #tpu.pipeline_mode<synchronous>, transform_indices = @transform_8, window_bounds = array<i64: 32, 32>}, {pipeline_mode = #tpu.pipeline_mode<synchronous>, transform_indices = @transform_9, window_bounds = array<i64: 1, 32>}, {pipeline_mode = #tpu.pipeline_mode<synchronous>, transform_indices = @transform_10, window_bounds = array<i64: 32, 32>}, {pipeline_mode = #tpu.pipeline_mode<synchronous>, transform_indices = @transform_11, window_bounds = array<i64: 1, 32>}, {pipeline_mode = #tpu.pipeline_mode<synchronous>, transform_indices = @transform_12, window_bounds = array<i64: 1, 32>}, {pipeline_mode = #tpu.pipeline_mode<synchronous>, transform_indices = @transform_13, window_bounds = array<i64: 1, 32>}, {transform_indices = @transform_14, window_bounds = array<i64: 1, 8, 32>}]} {
    %c0 = arith.constant 0 : index
    %c0_0 = arith.constant 0 : index
    %c0_1 = arith.constant 0 : index
    %0 = vector.load %arg1[%c0, %c0_0, %c0_1] : memref<1x8x32xf32, #tpu.memory_space<vmem>>, vector<1x8x32xf32>
    %1 = vector.shape_cast %0 : vector<1x8x32xf32> to vector<8x32xf32>
    %c0_2 = arith.constant 0 : index
    %c0_3 = arith.constant 0 : index
    %c0_4 = arith.constant 0 : index
    %2 = vector.load %arg2[%c0_2, %c0_3, %c0_4] : memref<1x8x32xf32, #tpu.memory_space<vmem>>, vector<1x8x32xf32>
    %3 = vector.shape_cast %2 : vector<1x8x32xf32> to vector<8x32xf32>
    %c0_5 = arith.constant 0 : index
    %c0_6 = arith.constant 0 : index
    %4 = vector.load %arg3[%c0_5, %c0_6] : memref<32x32xf32, #tpu.memory_space<vmem>>, vector<32x32xf32>
    %cst = arith.constant dense<0.000000e+00> : vector<8x32xf32>
    %5 = tpu.matmul %3, %4, %cst {dimension_numbers = #tpu.dot_dimension_numbers<[1], [0], [0], [1], [0, 0, 1, 1], [], []>} : vector<8x32xf32>, vector<32x32xf32>, vector<8x32xf32> -> vector<8x32xf32>
    %c0_7 = arith.constant 0 : index
    %c0_8 = arith.constant 0 : index
    %6 = vector.load %arg4[%c0_7, %c0_8] : memref<1x32xf32, #tpu.memory_space<vmem>>, vector<1x32xf32>
    %7 = vector.broadcast %6 : vector<1x32xf32> to vector<8x32xf32>
    %8 = arith.addf %5, %7 : vector<8x32xf32>
    %cst_9 = arith.constant 0.176776692 : f32
    %9 = vector.broadcast %cst_9 : f32 to vector<8x32xf32>
    %10 = arith.mulf %8, %9 : vector<8x32xf32>
    %c0_10 = arith.constant 0 : index
    %c0_11 = arith.constant 0 : index
    %11 = vector.load %arg5[%c0_10, %c0_11] : memref<32x64xf32, #tpu.memory_space<vmem>>, vector<32x64xf32>
    %cst_12 = arith.constant dense<0.000000e+00> : vector<8x64xf32>
    %12 = tpu.matmul %1, %11, %cst_12 {dimension_numbers = #tpu.dot_dimension_numbers<[1], [0], [0], [1], [0, 0, 1, 1], [], []>} : vector<8x32xf32>, vector<32x64xf32>, vector<8x64xf32> -> vector<8x64xf32>
    %c0_13 = arith.constant 0 : index
    %c0_14 = arith.constant 0 : index
    %13 = vector.load %arg6[%c0_13, %c0_14] : memref<1x64xf32, #tpu.memory_space<vmem>>, vector<1x64xf32>
    %14 = vector.broadcast %13 : vector<1x64xf32> to vector<8x64xf32>
    %15 = arith.addf %12, %14 : vector<8x64xf32>
    %16 = vector.extract_strided_slice %15 {offsets = [0, 0], sizes = [8, 32], strides = [1, 1]} : vector<8x64xf32> to vector<8x32xf32>
    %17 = vector.extract_strided_slice %15 {offsets = [0, 32], sizes = [8, 32], strides = [1, 1]} : vector<8x64xf32> to vector<8x32xf32>
    %18 = vector.extract_strided_slice %10 {offsets = [0, 0], sizes = [8, 8], strides = [1, 1]} : vector<8x32xf32> to vector<8x8xf32>
    %19 = vector.extract_strided_slice %10 {offsets = [0, 8], sizes = [8, 8], strides = [1, 1]} : vector<8x32xf32> to vector<8x8xf32>
    %20 = vector.extract_strided_slice %10 {offsets = [0, 16], sizes = [8, 8], strides = [1, 1]} : vector<8x32xf32> to vector<8x8xf32>
    %21 = vector.extract_strided_slice %10 {offsets = [0, 24], sizes = [8, 8], strides = [1, 1]} : vector<8x32xf32> to vector<8x8xf32>
    %22 = vector.shape_cast %18 : vector<8x8xf32> to vector<1x8x8xf32>
    %23 = vector.shape_cast %19 : vector<8x8xf32> to vector<1x8x8xf32>
    %24 = vector.shape_cast %20 : vector<8x8xf32> to vector<1x8x8xf32>
    %25 = vector.shape_cast %21 : vector<8x8xf32> to vector<1x8x8xf32>
    %26 = tpu.concatenate %22, %23, %24, %25 in 0 : vector<1x8x8xf32>, vector<1x8x8xf32>, vector<1x8x8xf32>, vector<1x8x8xf32> -> vector<4x8x8xf32>
    %27 = vector.extract_strided_slice %16 {offsets = [0, 0], sizes = [8, 8], strides = [1, 1]} : vector<8x32xf32> to vector<8x8xf32>
    %28 = vector.extract_strided_slice %16 {offsets = [0, 8], sizes = [8, 8], strides = [1, 1]} : vector<8x32xf32> to vector<8x8xf32>
    %29 = vector.extract_strided_slice %16 {offsets = [0, 16], sizes = [8, 8], strides = [1, 1]} : vector<8x32xf32> to vector<8x8xf32>
    %30 = vector.extract_strided_slice %16 {offsets = [0, 24], sizes = [8, 8], strides = [1, 1]} : vector<8x32xf32> to vector<8x8xf32>
    %31 = vector.shape_cast %27 : vector<8x8xf32> to vector<1x8x8xf32>
    %32 = vector.shape_cast %28 : vector<8x8xf32> to vector<1x8x8xf32>
    %33 = vector.shape_cast %29 : vector<8x8xf32> to vector<1x8x8xf32>
    %34 = vector.shape_cast %30 : vector<8x8xf32> to vector<1x8x8xf32>
    %35 = tpu.concatenate %31, %32, %33, %34 in 0 : vector<1x8x8xf32>, vector<1x8x8xf32>, vector<1x8x8xf32>, vector<1x8x8xf32> -> vector<4x8x8xf32>
    %36 = vector.extract_strided_slice %17 {offsets = [0, 0], sizes = [8, 8], strides = [1, 1]} : vector<8x32xf32> to vector<8x8xf32>
    %37 = vector.extract_strided_slice %17 {offsets = [0, 8], sizes = [8, 8], strides = [1, 1]} : vector<8x32xf32> to vector<8x8xf32>
    %38 = vector.extract_strided_slice %17 {offsets = [0, 16], sizes = [8, 8], strides = [1, 1]} : vector<8x32xf32> to vector<8x8xf32>
    %39 = vector.extract_strided_slice %17 {offsets = [0, 24], sizes = [8, 8], strides = [1, 1]} : vector<8x32xf32> to vector<8x8xf32>
    %40 = vector.shape_cast %36 : vector<8x8xf32> to vector<1x8x8xf32>
    %41 = vector.shape_cast %37 : vector<8x8xf32> to vector<1x8x8xf32>
    %42 = vector.shape_cast %38 : vector<8x8xf32> to vector<1x8x8xf32>
    %43 = vector.shape_cast %39 : vector<8x8xf32> to vector<1x8x8xf32>
    %44 = tpu.concatenate %40, %41, %42, %43 in 0 : vector<1x8x8xf32>, vector<1x8x8xf32>, vector<1x8x8xf32>, vector<1x8x8xf32> -> vector<4x8x8xf32>
    "tpu.trace_start"() <{level = 10 : i32, message = "hnd,hmd->hnm"}> : () -> ()
    %cst_15 = arith.constant dense<0.000000e+00> : vector<4x8x8xf32>
    %45 = tpu.matmul %26, %35, %cst_15 {dimension_numbers = #tpu.dot_dimension_numbers<[2], [2], [1], [1], [0, 0, 0, 1, 1, 1], [0], [0]>} : vector<4x8x8xf32>, vector<4x8x8xf32>, vector<4x8x8xf32> -> vector<4x8x8xf32>
    "tpu.trace_stop"() : () -> ()
    %46 = tpu.iota {dimensions = array<i32: 2>} : vector<4x8x8xi32>
    %cst_16 = arith.constant 0.000000e+00 : f32
    %47 = vector.broadcast %cst_16 : f32 to vector<4x8x8xf32>
    %cst_17 = arith.constant dense<0xFF800000> : vector<4x8xf32>
    %48 = vector.multi_reduction <maximumf>, %45, %cst_17 [2] : vector<4x8x8xf32> to vector<4x8xf32>
    %49 = vector.shape_cast %48 : vector<4x8xf32> to vector<4x8x1xf32>
    %50 = vector.broadcast %49 : vector<4x8x1xf32> to vector<4x8x8xf32>
    %51 = arith.cmpf oeq, %45, %50 : vector<4x8x8xf32>
    %c8_i32 = arith.constant 8 : i32
    %52 = vector.broadcast %c8_i32 : i32 to vector<4x8x8xi32>
    %53 = arith.select %51, %46, %52 : vector<4x8x8xi1>, vector<4x8x8xi32>
    %cst_18 = arith.constant dense<2147483647> : vector<4x8xi32>
    %54 = vector.multi_reduction <minsi>, %53, %cst_18 [2] : vector<4x8x8xi32> to vector<4x8xi32>
    %55 = vector.shape_cast %54 : vector<4x8xi32> to vector<4x8x1xi32>
    %56 = vector.broadcast %55 : vector<4x8x1xi32> to vector<4x8x8xi32>
    %57 = arith.cmpi eq, %46, %56 : vector<4x8x8xi32>
    %cst_19 = arith.constant 1.000000e+00 : f32
    %58 = vector.broadcast %cst_19 : f32 to vector<4x8x8xf32>
    %59 = arith.select %57, %58, %47 : vector<4x8x8xi1>, vector<4x8x8xf32>
    %cst_20 = arith.constant 0xFF800000 : f32
    %60 = vector.broadcast %cst_20 : f32 to vector<4x8x8xf32>
    %61 = arith.select %57, %60, %45 : vector<4x8x8xi1>, vector<4x8x8xf32>
    %cst_21 = arith.constant dense<0xFF800000> : vector<4x8xf32>
    %62 = vector.multi_reduction <maximumf>, %61, %cst_21 [2] : vector<4x8x8xf32> to vector<4x8xf32>
    %63 = vector.shape_cast %62 : vector<4x8xf32> to vector<4x8x1xf32>
    %64 = vector.broadcast %63 : vector<4x8x1xf32> to vector<4x8x8xf32>
    %65 = arith.cmpf oeq, %61, %64 : vector<4x8x8xf32>
    %c8_i32_22 = arith.constant 8 : i32
    %66 = vector.broadcast %c8_i32_22 : i32 to vector<4x8x8xi32>
    %67 = arith.select %65, %46, %66 : vector<4x8x8xi1>, vector<4x8x8xi32>
    %cst_23 = arith.constant dense<2147483647> : vector<4x8xi32>
    %68 = vector.multi_reduction <minsi>, %67, %cst_23 [2] : vector<4x8x8xi32> to vector<4x8xi32>
    %69 = vector.shape_cast %68 : vector<4x8xi32> to vector<4x8x1xi32>
    %70 = vector.broadcast %69 : vector<4x8x1xi32> to vector<4x8x8xi32>
    %71 = arith.cmpi eq, %46, %70 : vector<4x8x8xi32>
    %cst_24 = arith.constant 1.000000e+00 : f32
    %72 = vector.broadcast %cst_24 : f32 to vector<4x8x8xf32>
    %73 = arith.select %71, %72, %59 : vector<4x8x8xi1>, vector<4x8x8xf32>
    %cst_25 = arith.constant 0xFF800000 : f32
    %74 = vector.broadcast %cst_25 : f32 to vector<4x8x8xf32>
    %75 = arith.select %71, %74, %61 : vector<4x8x8xi1>, vector<4x8x8xf32>
    %cst_26 = arith.constant dense<0xFF800000> : vector<4x8xf32>
    %76 = vector.multi_reduction <maximumf>, %75, %cst_26 [2] : vector<4x8x8xf32> to vector<4x8xf32>
    %77 = vector.shape_cast %76 : vector<4x8xf32> to vector<4x8x1xf32>
    %78 = vector.broadcast %77 : vector<4x8x1xf32> to vector<4x8x8xf32>
    %79 = arith.cmpf oeq, %75, %78 : vector<4x8x8xf32>
    %c8_i32_27 = arith.constant 8 : i32
    %80 = vector.broadcast %c8_i32_27 : i32 to vector<4x8x8xi32>
    %81 = arith.select %79, %46, %80 : vector<4x8x8xi1>, vector<4x8x8xi32>
    %cst_28 = arith.constant dense<2147483647> : vector<4x8xi32>
    %82 = vector.multi_reduction <minsi>, %81, %cst_28 [2] : vector<4x8x8xi32> to vector<4x8xi32>
    %83 = vector.shape_cast %82 : vector<4x8xi32> to vector<4x8x1xi32>
    %84 = vector.broadcast %83 : vector<4x8x1xi32> to vector<4x8x8xi32>
    %85 = arith.cmpi eq, %46, %84 : vector<4x8x8xi32>
    %cst_29 = arith.constant 1.000000e+00 : f32
    %86 = vector.broadcast %cst_29 : f32 to vector<4x8x8xf32>
    %87 = arith.select %85, %86, %73 : vector<4x8x8xi1>, vector<4x8x8xf32>
    %cst_30 = arith.constant 0.000000e+00 : f32
    %88 = vector.broadcast %cst_30 : f32 to vector<4x8x8xf32>
    %89 = arith.cmpf ogt, %87, %88 : vector<4x8x8xf32>
    %cst_31 = arith.constant 0xFF800000 : f32
    %90 = vector.broadcast %cst_31 : f32 to vector<4x8x8xf32>
    %91 = arith.select %89, %45, %90 : vector<4x8x8xi1>, vector<4x8x8xf32>
    %cst_32 = arith.constant dense<0xFF800000> : vector<4x8xf32>
    %92 = vector.multi_reduction <maximumf>, %91, %cst_32 [2] : vector<4x8x8xf32> to vector<4x8xf32>
    %93 = vector.shape_cast %92 : vector<4x8xf32> to vector<4x8x1xf32>
    %94 = vector.broadcast %93 : vector<4x8x1xf32> to vector<4x8x8xf32>
    %95 = arith.subf %91, %94 : vector<4x8x8xf32>
    %96 = math.exp %95 : vector<4x8x8xf32>
    %cst_33 = arith.constant dense<0.000000e+00> : vector<4x8xf32>
    %97 = vector.multi_reduction <add>, %96, %cst_33 [2] : vector<4x8x8xf32> to vector<4x8xf32>
    %98 = vector.shape_cast %97 : vector<4x8xf32> to vector<4x8x1xf32>
    %99 = tpu.reciprocal %98 {approx = true} : vector<4x8x1xf32> -> vector<4x8x1xf32>
    %100 = vector.broadcast %99 : vector<4x8x1xf32> to vector<4x8x8xf32>
    %101 = arith.mulf %96, %100 : vector<4x8x8xf32>
    "tpu.trace_start"() <{level = 10 : i32, message = "hnm,hmd->hnd"}> : () -> ()
    %cst_34 = arith.constant dense<0.000000e+00> : vector<4x8x8xf32>
    %102 = tpu.matmul %101, %44, %cst_34 {dimension_numbers = #tpu.dot_dimension_numbers<[2], [1], [1], [2], [0, 0, 0, 1, 1, 2], [0], [0]>} : vector<4x8x8xf32>, vector<4x8x8xf32>, vector<4x8x8xf32> -> vector<4x8x8xf32>
    "tpu.trace_stop"() : () -> ()
    %103 = vector.extract_strided_slice %102 {offsets = [0, 0, 0], sizes = [1, 8, 8], strides = [1, 1, 1]} : vector<4x8x8xf32> to vector<1x8x8xf32>
    %104 = vector.shape_cast %103 : vector<1x8x8xf32> to vector<8x8xf32>
    %105 = vector.extract_strided_slice %102 {offsets = [1, 0, 0], sizes = [1, 8, 8], strides = [1, 1, 1]} : vector<4x8x8xf32> to vector<1x8x8xf32>
    %106 = vector.shape_cast %105 : vector<1x8x8xf32> to vector<8x8xf32>
    %107 = vector.extract_strided_slice %102 {offsets = [2, 0, 0], sizes = [1, 8, 8], strides = [1, 1, 1]} : vector<4x8x8xf32> to vector<1x8x8xf32>
    %108 = vector.shape_cast %107 : vector<1x8x8xf32> to vector<8x8xf32>
    %109 = vector.extract_strided_slice %102 {offsets = [3, 0, 0], sizes = [1, 8, 8], strides = [1, 1, 1]} : vector<4x8x8xf32> to vector<1x8x8xf32>
    %110 = vector.shape_cast %109 : vector<1x8x8xf32> to vector<8x8xf32>
    %111 = tpu.concatenate %104, %106, %108, %110 in 1 : vector<8x8xf32>, vector<8x8xf32>, vector<8x8xf32>, vector<8x8xf32> -> vector<8x32xf32>
    %112 = arith.addf %3, %111 : vector<8x32xf32>
    %c0_35 = arith.constant 0 : index
    %c0_36 = arith.constant 0 : index
    %113 = vector.load %arg7[%c0_35, %c0_36] : memref<1x32xf32, #tpu.memory_space<vmem>>, vector<1x32xf32>
    %c0_37 = arith.constant 0 : index
    %c0_38 = arith.constant 0 : index
    %114 = vector.load %arg8[%c0_37, %c0_38] : memref<1x32xf32, #tpu.memory_space<vmem>>, vector<1x32xf32>
    %cst_39 = arith.constant dense<0.000000e+00> : vector<8xf32>
    %115 = vector.multi_reduction <add>, %112, %cst_39 [1] : vector<8x32xf32> to vector<8xf32>
    %116 = vector.shape_cast %115 : vector<8xf32> to vector<8x1xf32>
    %cst_40 = arith.constant 3.200000e+01 : f32
    %117 = vector.broadcast %cst_40 : f32 to vector<8x1xf32>
    %118 = arith.divf %116, %117 : vector<8x1xf32>
    %119 = vector.broadcast %118 : vector<8x1xf32> to vector<8x32xf32>
    %120 = arith.subf %112, %119 : vector<8x32xf32>
    %121 = arith.mulf %120, %120 : vector<8x32xf32>
    %cst_41 = arith.constant dense<0.000000e+00> : vector<8xf32>
    %122 = vector.multi_reduction <add>, %121, %cst_41 [1] : vector<8x32xf32> to vector<8xf32>
    %123 = vector.shape_cast %122 : vector<8xf32> to vector<8x1xf32>
    %cst_42 = arith.constant 3.200000e+01 : f32
    %124 = vector.broadcast %cst_42 : f32 to vector<8x1xf32>
    %125 = arith.divf %123, %124 : vector<8x1xf32>
    %126 = vector.broadcast %118 : vector<8x1xf32> to vector<8x32xf32>
    %127 = arith.subf %112, %126 : vector<8x32xf32>
    %cst_43 = arith.constant 9.99999974E-6 : f32
    %128 = vector.broadcast %cst_43 : f32 to vector<8x1xf32>
    %129 = arith.addf %125, %128 : vector<8x1xf32>
    %130 = math.rsqrt %129 : vector<8x1xf32>
    %131 = vector.broadcast %130 : vector<8x1xf32> to vector<8x32xf32>
    %132 = arith.mulf %127, %131 : vector<8x32xf32>
    %133 = vector.broadcast %113 : vector<1x32xf32> to vector<8x32xf32>
    %134 = arith.mulf %132, %133 : vector<8x32xf32>
    %135 = vector.broadcast %114 : vector<1x32xf32> to vector<8x32xf32>
    %136 = arith.addf %134, %135 : vector<8x32xf32>
    %c0_44 = arith.constant 0 : index
    %c0_45 = arith.constant 0 : index
    %137 = vector.load %arg9[%c0_44, %c0_45] : memref<32x32xf32, #tpu.memory_space<vmem>>, vector<32x32xf32>
    %cst_46 = arith.constant dense<0.000000e+00> : vector<8x32xf32>
    %138 = tpu.matmul %136, %137, %cst_46 {dimension_numbers = #tpu.dot_dimension_numbers<[1], [0], [0], [1], [0, 0, 1, 1], [], []>} : vector<8x32xf32>, vector<32x32xf32>, vector<8x32xf32> -> vector<8x32xf32>
    %c0_47 = arith.constant 0 : index
    %c0_48 = arith.constant 0 : index
    %139 = vector.load %arg10[%c0_47, %c0_48] : memref<1x32xf32, #tpu.memory_space<vmem>>, vector<1x32xf32>
    %140 = vector.broadcast %139 : vector<1x32xf32> to vector<8x32xf32>
    %141 = arith.addf %138, %140 : vector<8x32xf32>
    %cst_49 = arith.constant 0.000000e+00 : f32
    %142 = vector.broadcast %cst_49 : f32 to vector<8x32xf32>
    %143 = arith.maximumf %141, %142 : vector<8x32xf32>
    %c0_50 = arith.constant 0 : index
    %c0_51 = arith.constant 0 : index
    %144 = vector.load %arg11[%c0_50, %c0_51] : memref<32x32xf32, #tpu.memory_space<vmem>>, vector<32x32xf32>
    %cst_52 = arith.constant dense<0.000000e+00> : vector<8x32xf32>
    %145 = tpu.matmul %143, %144, %cst_52 {dimension_numbers = #tpu.dot_dimension_numbers<[1], [0], [0], [1], [0, 0, 1, 1], [], []>} : vector<8x32xf32>, vector<32x32xf32>, vector<8x32xf32> -> vector<8x32xf32>
    %c0_53 = arith.constant 0 : index
    %c0_54 = arith.constant 0 : index
    %146 = vector.load %arg12[%c0_53, %c0_54] : memref<1x32xf32, #tpu.memory_space<vmem>>, vector<1x32xf32>
    %147 = vector.broadcast %146 : vector<1x32xf32> to vector<8x32xf32>
    %148 = arith.addf %145, %147 : vector<8x32xf32>
    %149 = arith.addf %136, %148 : vector<8x32xf32>
    %c0_55 = arith.constant 0 : index
    %c0_56 = arith.constant 0 : index
    %150 = vector.load %arg13[%c0_55, %c0_56] : memref<1x32xf32, #tpu.memory_space<vmem>>, vector<1x32xf32>
    %c0_57 = arith.constant 0 : index
    %c0_58 = arith.constant 0 : index
    %151 = vector.load %arg14[%c0_57, %c0_58] : memref<1x32xf32, #tpu.memory_space<vmem>>, vector<1x32xf32>
    %cst_59 = arith.constant dense<0.000000e+00> : vector<8xf32>
    %152 = vector.multi_reduction <add>, %149, %cst_59 [1] : vector<8x32xf32> to vector<8xf32>
    %153 = vector.shape_cast %152 : vector<8xf32> to vector<8x1xf32>
    %cst_60 = arith.constant 3.200000e+01 : f32
    %154 = vector.broadcast %cst_60 : f32 to vector<8x1xf32>
    %155 = arith.divf %153, %154 : vector<8x1xf32>
    %156 = vector.broadcast %155 : vector<8x1xf32> to vector<8x32xf32>
    %157 = arith.subf %149, %156 : vector<8x32xf32>
    %158 = arith.mulf %157, %157 : vector<8x32xf32>
    %cst_61 = arith.constant dense<0.000000e+00> : vector<8xf32>
    %159 = vector.multi_reduction <add>, %158, %cst_61 [1] : vector<8x32xf32> to vector<8xf32>
    %160 = vector.shape_cast %159 : vector<8xf32> to vector<8x1xf32>
    %cst_62 = arith.constant 3.200000e+01 : f32
    %161 = vector.broadcast %cst_62 : f32 to vector<8x1xf32>
    %162 = arith.divf %160, %161 : vector<8x1xf32>
    %163 = vector.broadcast %155 : vector<8x1xf32> to vector<8x32xf32>
    %164 = arith.subf %149, %163 : vector<8x32xf32>
    %cst_63 = arith.constant 9.99999974E-6 : f32
    %165 = vector.broadcast %cst_63 : f32 to vector<8x1xf32>
    %166 = arith.addf %162, %165 : vector<8x1xf32>
    %167 = math.rsqrt %166 : vector<8x1xf32>
    %168 = vector.broadcast %167 : vector<8x1xf32> to vector<8x32xf32>
    %169 = arith.mulf %164, %168 : vector<8x32xf32>
    %170 = vector.broadcast %150 : vector<1x32xf32> to vector<8x32xf32>
    %171 = arith.mulf %169, %170 : vector<8x32xf32>
    %172 = vector.broadcast %151 : vector<1x32xf32> to vector<8x32xf32>
    %173 = arith.addf %171, %172 : vector<8x32xf32>
    %c0_64 = arith.constant 0 : index
    %c0_65 = arith.constant 0 : index
    %c0_66 = arith.constant 0 : index
    %174 = vector.load %arg15[%c0_64, %c0_65, %c0_66] : memref<1x8x32xf32, #tpu.memory_space<vmem>>, vector<1x8x32xf32>
    %175 = vector.shape_cast %174 : vector<1x8x32xf32> to vector<8x32xf32>
    %176 = vector.shape_cast %173 : vector<8x32xf32> to vector<1x8x32xf32>
    tpu.vector_store %arg15[%c0_64, %c0_65, %c0_66], %176 {strides = array<i32>} : memref<1x8x32xf32, #tpu.memory_space<vmem>>, vector<1x8x32xf32>,
    return
  }
  func.func @transform_0(%arg0: i32) -> (i32, i32, i32) {
    %c0_i32 = arith.constant 0 : i32
    %c0_i32_0 = arith.constant 0 : i32
    %c0_i32_1 = arith.constant 0 : i32
    return %arg0, %c0_i32, %c0_i32_0 : i32, i32, i32
  }
  func.func @transform_1(%arg0: i32) -> (i32, i32, i32) {
    %c0_i32 = arith.constant 0 : i32
    %c0_i32_0 = arith.constant 0 : i32
    %c0_i32_1 = arith.constant 0 : i32
    return %arg0, %c0_i32, %c0_i32_0 : i32, i32, i32
  }
  func.func @transform_2(%arg0: i32) -> (i32, i32) {
    %c0_i32 = arith.constant 0 : i32
    %c0_i32_0 = arith.constant 0 : i32
    %c0_i32_1 = arith.constant 0 : i32
    return %c0_i32, %c0_i32_0 : i32, i32
  }
  func.func @transform_3(%arg0: i32) -> (i32, i32) {
    %c0_i32 = arith.constant 0 : i32
    %c0_i32_0 = arith.constant 0 : i32
    %c0_i32_1 = arith.constant 0 : i32
    return %c0_i32, %c0_i32_0 : i32, i32
  }
  func.func @transform_4(%arg0: i32) -> (i32, i32) {
    %c0_i32 = arith.constant 0 : i32
    %c0_i32_0 = arith.constant 0 : i32
    %c0_i32_1 = arith.constant 0 : i32
    return %c0_i32, %c0_i32_0 : i32, i32
  }
  func.func @transform_5(%arg0: i32) -> (i32, i32) {
    %c0_i32 = arith.constant 0 : i32
    %c0_i32_0 = arith.constant 0 : i32
    %c0_i32_1 = arith.constant 0 : i32
    return %c0_i32, %c0_i32_0 : i32, i32
  }
  func.func @transform_6(%arg0: i32) -> (i32, i32) {
    %c0_i32 = arith.constant 0 : i32
    %c0_i32_0 = arith.constant 0 : i32
    %c0_i32_1 = arith.constant 0 : i32
    return %c0_i32, %c0_i32_0 : i32, i32
  }
  func.func @transform_7(%arg0: i32) -> (i32, i32) {
    %c0_i32 = arith.constant 0 : i32
    %c0_i32_0 = arith.constant 0 : i32
    %c0_i32_1 = arith.constant 0 : i32
    return %c0_i32, %c0_i32_0 : i32, i32
  }
  func.func @transform_8(%arg0: i32) -> (i32, i32) {
    %c0_i32 = arith.constant 0 : i32
    %c0_i32_0 = arith.constant 0 : i32
    %c0_i32_1 = arith.constant 0 : i32
    return %c0_i32, %c0_i32_0 : i32, i32
  }
  func.func @transform_9(%arg0: i32) -> (i32, i32) {
    %c0_i32 = arith.constant 0 : i32
    %c0_i32_0 = arith.constant 0 : i32
    %c0_i32_1 = arith.constant 0 : i32
    return %c0_i32, %c0_i32_0 : i32, i32
  }
  func.func @transform_10(%arg0: i32) -> (i32, i32) {
    %c0_i32 = arith.constant 0 : i32
    %c0_i32_0 = arith.constant 0 : i32
    %c0_i32_1 = arith.constant 0 : i32
    return %c0_i32, %c0_i32_0 : i32, i32
  }
  func.func @transform_11(%arg0: i32) -> (i32, i32) {
    %c0_i32 = arith.constant 0 : i32
    %c0_i32_0 = arith.constant 0 : i32
    %c0_i32_1 = arith.constant 0 : i32
    return %c0_i32, %c0_i32_0 : i32, i32
  }
  func.func @transform_12(%arg0: i32) -> (i32, i32) {
    %c0_i32 = arith.constant 0 : i32
    %c0_i32_0 = arith.constant 0 : i32
    %c0_i32_1 = arith.constant 0 : i32
    return %c0_i32, %c0_i32_0 : i32, i32
  }
  func.func @transform_13(%arg0: i32) -> (i32, i32) {
    %c0_i32 = arith.constant 0 : i32
    %c0_i32_0 = arith.constant 0 : i32
    %c0_i32_1 = arith.constant 0 : i32
    return %c0_i32, %c0_i32_0 : i32, i32
  }
  func.func @transform_14(%arg0: i32) -> (i32, i32, i32) {
    %c0_i32 = arith.constant 0 : i32
    %c0_i32_0 = arith.constant 0 : i32
    %c0_i32_1 = arith.constant 0 : i32
    return %arg0, %c0_i32, %c0_i32_0 : i32, i32, i32
  }
}

module attributes {stable_mosaic.version = 11 : i64} {
  func.func @_conv_layer_kernel(%arg0: i32, %arg1: memref<8x8xf32, #tpu.memory_space<vmem>>, %arg2: memref<1x8x32xf32, #tpu.memory_space<vmem>>, %arg3: memref<1x8x32xf32, #tpu.memory_space<vmem>>, %arg4: memref<1x32xf32, #tpu.memory_space<vmem>>, %arg5: memref<1x32xf32, #tpu.memory_space<vmem>>, %arg6: memref<32x32xf32, #tpu.memory_space<vmem>>, %arg7: memref<1x32xf32, #tpu.memory_space<vmem>>, %arg8: memref<32x32xf32, #tpu.memory_space<vmem>>, %arg9: memref<1x32xf32, #tpu.memory_space<vmem>>, %arg10: memref<1x32xf32, #tpu.memory_space<vmem>>, %arg11: memref<1x32xf32, #tpu.memory_space<vmem>>, %arg12: memref<1x8x32xf32, #tpu.memory_space<vmem>>) attributes {dimension_semantics = [#tpu.dimension_semantics<parallel>], iteration_bounds = array<i64: 2>, scalar_prefetch = 0 : i64, scratch_operands = 0 : i64, tpu.core_type = #tpu.core_type<tc>, window_params = [{pipeline_mode = #tpu.pipeline_mode<synchronous>, transform_indices = @transform_0, window_bounds = array<i64: 8, 8>}, {transform_indices = @transform_1, window_bounds = array<i64: 1, 8, 32>}, {transform_indices = @transform_2, window_bounds = array<i64: 1, 8, 32>}, {pipeline_mode = #tpu.pipeline_mode<synchronous>, transform_indices = @transform_3, window_bounds = array<i64: 1, 32>}, {pipeline_mode = #tpu.pipeline_mode<synchronous>, transform_indices = @transform_4, window_bounds = array<i64: 1, 32>}, {pipeline_mode = #tpu.pipeline_mode<synchronous>, transform_indices = @transform_5, window_bounds = array<i64: 32, 32>}, {pipeline_mode = #tpu.pipeline_mode<synchronous>, transform_indices = @transform_6, window_bounds = array<i64: 1, 32>}, {pipeline_mode = #tpu.pipeline_mode<synchronous>, transform_indices = @transform_7, window_bounds = array<i64: 32, 32>}, {pipeline_mode = #tpu.pipeline_mode<synchronous>, transform_indices = @transform_8, window_bounds = array<i64: 1, 32>}, {pipeline_mode = #tpu.pipeline_mode<synchronous>, transform_indices = @transform_9, window_bounds = array<i64: 1, 32>}, {pipeline_mode = #tpu.pipeline_mode<synchronous>, transform_indices = @transform_10, window_bounds = array<i64: 1, 32>}, {transform_indices = @transform_11, window_bounds = array<i64: 1, 8, 32>}]} {
    %c0 = arith.constant 0 : index
    %c0_0 = arith.constant 0 : index
    %c0_1 = arith.constant 0 : index
    %0 = vector.load %arg2[%c0, %c0_0, %c0_1] : memref<1x8x32xf32, #tpu.memory_space<vmem>>, vector<1x8x32xf32>
    %1 = vector.shape_cast %0 : vector<1x8x32xf32> to vector<8x32xf32>
    %c0_2 = arith.constant 0 : index
    %c0_3 = arith.constant 0 : index
    %c0_4 = arith.constant 0 : index
    %2 = vector.load %arg3[%c0_2, %c0_3, %c0_4] : memref<1x8x32xf32, #tpu.memory_space<vmem>>, vector<1x8x32xf32>
    %3 = vector.shape_cast %2 : vector<1x8x32xf32> to vector<8x32xf32>
    %c0_5 = arith.constant 0 : index
    %c0_6 = arith.constant 0 : index
    %4 = vector.load %arg1[%c0_5, %c0_6] : memref<8x8xf32, #tpu.memory_space<vmem>>, vector<8x8xf32>
    %cst = arith.constant dense<0.000000e+00> : vector<8x32xf32>
    %5 = tpu.matmul %4, %1, %cst {dimension_numbers = #tpu.dot_dimension_numbers<[1], [0], [0], [1], [0, 0, 1, 1], [], []>} : vector<8x8xf32>, vector<8x32xf32>, vector<8x32xf32> -> vector<8x32xf32>
    %6 = arith.addf %3, %5 : vector<8x32xf32>
    %c0_7 = arith.constant 0 : index
    %c0_8 = arith.constant 0 : index
    %7 = vector.load %arg4[%c0_7, %c0_8] : memref<1x32xf32, #tpu.memory_space<vmem>>, vector<1x32xf32>
    %c0_9 = arith.constant 0 : index
    %c0_10 = arith.constant 0 : index
    %8 = vector.load %arg5[%c0_9, %c0_10] : memref<1x32xf32, #tpu.memory_space<vmem>>, vector<1x32xf32>
    %cst_11 = arith.constant dense<0.000000e+00> : vector<8xf32>
    %9 = vector.multi_reduction <add>, %6, %cst_11 [1] : vector<8x32xf32> to vector<8xf32>
    %10 = vector.shape_cast %9 : vector<8xf32> to vector<8x1xf32>
    %cst_12 = arith.constant 3.200000e+01 : f32
    %11 = vector.broadcast %cst_12 : f32 to vector<8x1xf32>
    %12 = arith.divf %10, %11 : vector<8x1xf32>
    %13 = vector.broadcast %12 : vector<8x1xf32> to vector<8x32xf32>
    %14 = arith.subf %6, %13 : vector<8x32xf32>
    %15 = arith.mulf %14, %14 : vector<8x32xf32>
    %cst_13 = arith.constant dense<0.000000e+00> : vector<8xf32>
    %16 = vector.multi_reduction <add>, %15, %cst_13 [1] : vector<8x32xf32> to vector<8xf32>
    %17 = vector.shape_cast %16 : vector<8xf32> to vector<8x1xf32>
    %cst_14 = arith.constant 3.200000e+01 : f32
    %18 = vector.broadcast %cst_14 : f32 to vector<8x1xf32>
    %19 = arith.divf %17, %18 : vector<8x1xf32>
    %20 = vector.broadcast %12 : vector<8x1xf32> to vector<8x32xf32>
    %21 = arith.subf %6, %20 : vector<8x32xf32>
    %cst_15 = arith.constant 9.99999974E-6 : f32
    %22 = vector.broadcast %cst_15 : f32 to vector<8x1xf32>
    %23 = arith.addf %19, %22 : vector<8x1xf32>
    %24 = math.rsqrt %23 : vector<8x1xf32>
    %25 = vector.broadcast %24 : vector<8x1xf32> to vector<8x32xf32>
    %26 = arith.mulf %21, %25 : vector<8x32xf32>
    %27 = vector.broadcast %7 : vector<1x32xf32> to vector<8x32xf32>
    %28 = arith.mulf %26, %27 : vector<8x32xf32>
    %29 = vector.broadcast %8 : vector<1x32xf32> to vector<8x32xf32>
    %30 = arith.addf %28, %29 : vector<8x32xf32>
    %c0_16 = arith.constant 0 : index
    %c0_17 = arith.constant 0 : index
    %31 = vector.load %arg6[%c0_16, %c0_17] : memref<32x32xf32, #tpu.memory_space<vmem>>, vector<32x32xf32>
    %cst_18 = arith.constant dense<0.000000e+00> : vector<8x32xf32>
    %32 = tpu.matmul %30, %31, %cst_18 {dimension_numbers = #tpu.dot_dimension_numbers<[1], [0], [0], [1], [0, 0, 1, 1], [], []>} : vector<8x32xf32>, vector<32x32xf32>, vector<8x32xf32> -> vector<8x32xf32>
    %c0_19 = arith.constant 0 : index
    %c0_20 = arith.constant 0 : index
    %33 = vector.load %arg7[%c0_19, %c0_20] : memref<1x32xf32, #tpu.memory_space<vmem>>, vector<1x32xf32>
    %34 = vector.broadcast %33 : vector<1x32xf32> to vector<8x32xf32>
    %35 = arith.addf %32, %34 : vector<8x32xf32>
    %cst_21 = arith.constant 0.000000e+00 : f32
    %36 = vector.broadcast %cst_21 : f32 to vector<8x32xf32>
    %37 = arith.maximumf %35, %36 : vector<8x32xf32>
    %c0_22 = arith.constant 0 : index
    %c0_23 = arith.constant 0 : index
    %38 = vector.load %arg8[%c0_22, %c0_23] : memref<32x32xf32, #tpu.memory_space<vmem>>, vector<32x32xf32>
    %cst_24 = arith.constant dense<0.000000e+00> : vector<8x32xf32>
    %39 = tpu.matmul %37, %38, %cst_24 {dimension_numbers = #tpu.dot_dimension_numbers<[1], [0], [0], [1], [0, 0, 1, 1], [], []>} : vector<8x32xf32>, vector<32x32xf32>, vector<8x32xf32> -> vector<8x32xf32>
    %c0_25 = arith.constant 0 : index
    %c0_26 = arith.constant 0 : index
    %40 = vector.load %arg9[%c0_25, %c0_26] : memref<1x32xf32, #tpu.memory_space<vmem>>, vector<1x32xf32>
    %41 = vector.broadcast %40 : vector<1x32xf32> to vector<8x32xf32>
    %42 = arith.addf %39, %41 : vector<8x32xf32>
    %43 = arith.addf %30, %42 : vector<8x32xf32>
    %c0_27 = arith.constant 0 : index
    %c0_28 = arith.constant 0 : index
    %44 = vector.load %arg10[%c0_27, %c0_28] : memref<1x32xf32, #tpu.memory_space<vmem>>, vector<1x32xf32>
    %c0_29 = arith.constant 0 : index
    %c0_30 = arith.constant 0 : index
    %45 = vector.load %arg11[%c0_29, %c0_30] : memref<1x32xf32, #tpu.memory_space<vmem>>, vector<1x32xf32>
    %cst_31 = arith.constant dense<0.000000e+00> : vector<8xf32>
    %46 = vector.multi_reduction <add>, %43, %cst_31 [1] : vector<8x32xf32> to vector<8xf32>
    %47 = vector.shape_cast %46 : vector<8xf32> to vector<8x1xf32>
    %cst_32 = arith.constant 3.200000e+01 : f32
    %48 = vector.broadcast %cst_32 : f32 to vector<8x1xf32>
    %49 = arith.divf %47, %48 : vector<8x1xf32>
    %50 = vector.broadcast %49 : vector<8x1xf32> to vector<8x32xf32>
    %51 = arith.subf %43, %50 : vector<8x32xf32>
    %52 = arith.mulf %51, %51 : vector<8x32xf32>
    %cst_33 = arith.constant dense<0.000000e+00> : vector<8xf32>
    %53 = vector.multi_reduction <add>, %52, %cst_33 [1] : vector<8x32xf32> to vector<8xf32>
    %54 = vector.shape_cast %53 : vector<8xf32> to vector<8x1xf32>
    %cst_34 = arith.constant 3.200000e+01 : f32
    %55 = vector.broadcast %cst_34 : f32 to vector<8x1xf32>
    %56 = arith.divf %54, %55 : vector<8x1xf32>
    %57 = vector.broadcast %49 : vector<8x1xf32> to vector<8x32xf32>
    %58 = arith.subf %43, %57 : vector<8x32xf32>
    %cst_35 = arith.constant 9.99999974E-6 : f32
    %59 = vector.broadcast %cst_35 : f32 to vector<8x1xf32>
    %60 = arith.addf %56, %59 : vector<8x1xf32>
    %61 = math.rsqrt %60 : vector<8x1xf32>
    %62 = vector.broadcast %61 : vector<8x1xf32> to vector<8x32xf32>
    %63 = arith.mulf %58, %62 : vector<8x32xf32>
    %64 = vector.broadcast %44 : vector<1x32xf32> to vector<8x32xf32>
    %65 = arith.mulf %63, %64 : vector<8x32xf32>
    %66 = vector.broadcast %45 : vector<1x32xf32> to vector<8x32xf32>
    %67 = arith.addf %65, %66 : vector<8x32xf32>
    %c0_36 = arith.constant 0 : index
    %c0_37 = arith.constant 0 : index
    %c0_38 = arith.constant 0 : index
    %68 = vector.load %arg12[%c0_36, %c0_37, %c0_38] : memref<1x8x32xf32, #tpu.memory_space<vmem>>, vector<1x8x32xf32>
    %69 = vector.shape_cast %68 : vector<1x8x32xf32> to vector<8x32xf32>
    %70 = vector.shape_cast %67 : vector<8x32xf32> to vector<1x8x32xf32>
    tpu.vector_store %arg12[%c0_36, %c0_37, %c0_38], %70 {strides = array<i32>} : memref<1x8x32xf32, #tpu.memory_space<vmem>>, vector<1x8x32xf32>,
    return
  }
  func.func @transform_0(%arg0: i32) -> (i32, i32) {
    %c0_i32 = arith.constant 0 : i32
    %c0_i32_0 = arith.constant 0 : i32
    %c0_i32_1 = arith.constant 0 : i32
    return %c0_i32, %c0_i32_0 : i32, i32
  }
  func.func @transform_1(%arg0: i32) -> (i32, i32, i32) {
    %c0_i32 = arith.constant 0 : i32
    %c0_i32_0 = arith.constant 0 : i32
    %c0_i32_1 = arith.constant 0 : i32
    return %arg0, %c0_i32, %c0_i32_0 : i32, i32, i32
  }
  func.func @transform_2(%arg0: i32) -> (i32, i32, i32) {
    %c0_i32 = arith.constant 0 : i32
    %c0_i32_0 = arith.constant 0 : i32
    %c0_i32_1 = arith.constant 0 : i32
    return %arg0, %c0_i32, %c0_i32_0 : i32, i32, i32
  }
  func.func @transform_3(%arg0: i32) -> (i32, i32) {
    %c0_i32 = arith.constant 0 : i32
    %c0_i32_0 = arith.constant 0 : i32
    %c0_i32_1 = arith.constant 0 : i32
    return %c0_i32, %c0_i32_0 : i32, i32
  }
  func.func @transform_4(%arg0: i32) -> (i32, i32) {
    %c0_i32 = arith.constant 0 : i32
    %c0_i32_0 = arith.constant 0 : i32
    %c0_i32_1 = arith.constant 0 : i32
    return %c0_i32, %c0_i32_0 : i32, i32
  }
  func.func @transform_5(%arg0: i32) -> (i32, i32) {
    %c0_i32 = arith.constant 0 : i32
    %c0_i32_0 = arith.constant 0 : i32
    %c0_i32_1 = arith.constant 0 : i32
    return %c0_i32, %c0_i32_0 : i32, i32
  }
  func.func @transform_6(%arg0: i32) -> (i32, i32) {
    %c0_i32 = arith.constant 0 : i32
    %c0_i32_0 = arith.constant 0 : i32
    %c0_i32_1 = arith.constant 0 : i32
    return %c0_i32, %c0_i32_0 : i32, i32
  }
  func.func @transform_7(%arg0: i32) -> (i32, i32) {
    %c0_i32 = arith.constant 0 : i32
    %c0_i32_0 = arith.constant 0 : i32
    %c0_i32_1 = arith.constant 0 : i32
    return %c0_i32, %c0_i32_0 : i32, i32
  }
  func.func @transform_8(%arg0: i32) -> (i32, i32) {
    %c0_i32 = arith.constant 0 : i32
    %c0_i32_0 = arith.constant 0 : i32
    %c0_i32_1 = arith.constant 0 : i32
    return %c0_i32, %c0_i32_0 : i32, i32
  }
  func.func @transform_9(%arg0: i32) -> (i32, i32) {
    %c0_i32 = arith.constant 0 : i32
    %c0_i32_0 = arith.constant 0 : i32
    %c0_i32_1 = arith.constant 0 : i32
    return %c0_i32, %c0_i32_0 : i32, i32
  }
  func.func @transform_10(%arg0: i32) -> (i32, i32) {
    %c0_i32 = arith.constant 0 : i32
    %c0_i32_0 = arith.constant 0 : i32
    %c0_i32_1 = arith.constant 0 : i32
    return %c0_i32, %c0_i32_0 : i32, i32
  }
  func.func @transform_11(%arg0: i32) -> (i32, i32, i32) {
    %c0_i32 = arith.constant 0 : i32
    %c0_i32_0 = arith.constant 0 : i32
    %c0_i32_1 = arith.constant 0 : i32
    return %arg0, %c0_i32, %c0_i32_0 : i32, i32, i32
  }
}

</mosaic_0001>

<bundles_post_ra>
// kernel: tag_encoder_fwd.18
= control target key start
LH: loop header
LB: loop body
LE: loop exit
PB: predicated region body
PF: predicated region fallthrough
CT: control target
= control target key end

     0   :  { %vm28_vm0 = vcmask 1043456   ;;  %vm21_vm1 = vcmask 31744   ;;  %vm55_vm2 = vcmask 261120   ;;  %s105_s1 = inlined_call_operand.vmem [shape: f32[4,32], index: 1, kind: input, shape index: {}]   ;;  %s106_s0 = inlined_call_operand.vmem [shape: f32[16,4], index: 0, kind: input, shape index: {}]   ;;  %s107_s2 = inlined_call_operand.vmem [shape: f32[1,32], index: 2, kind: input, shape index: {}]   ;;  %s108_s3 = inlined_call_operand.vmem [shape: f32[16,32], index: 3, kind: output, shape index: {}]  }
   0x1   :  { %v16_v0 = vld [vmem:[%s105_s1] sm:$0xf]  ;;  %v15_v2 = vld [vmem:[%s106_s0 + $0x8] sm:$0xff] }
   0x2   :  { %v14_v1 = vld [vmem:[%s106_s0] sm:$0xff]  ;;  %62 = vmatpush.msk.msra.mxu0 %vm28_vm0, %v16_v0  ;;  %65 = vmatpush.msk.msra.mxu1 %vm28_vm0, %v16_v0 }
   0x3   :  { %63 = vmatmul.msk.f32.vlgmr.msra.gmra.mxu0 %vm21_vm1, %v14_v1  ;;  %64 = vmatmul.msk.f32.vlgmr.msra.gmra.mxu1 %vm21_vm1, %v15_v2  ;;  %v66_v3 = vld [vmem:[%s107_s2] ss:$0 sm:$0xff] }
  0x80   :  { %v49_v4 = vpop.f32.mrf.mxu0  ;;  %v52_v5 = vpop.f32.mrf.mxu1 }
  0x81   :  { %v50_v6 = vadd.f32 %v66_v3, %v49_v4  ;;  %v53_v7 = vadd.f32 %v66_v3, %v52_v5 }
  0x83   :  { %56 = vst.msk [vmem:[%s108_s3] sm:$0xff] %vm55_vm2, %v50_v6 }
  0x84   :  { %57 = vst.msk [vmem:[%s108_s3 + $0x8] sm:$0xff] %vm55_vm2, %v53_v7 }

// kernel: tag_encoder_fwd.20
= control target key start
LH: loop header
LB: loop body
LE: loop exit
PB: predicated region body
PF: predicated region fallthrough
CT: control target
= control target key end

     0   :  { %vm13_vm0 = vcmask 261120   ;;  %vm42_vm1 = vcmask 64512   ;;  %v40_v4 = vlaneseq  ;;  %v136_v36 = vmov 0.0   ;;  %s188_s1 = inlined_call_operand.vmem [shape: f32[8,32], index: 1, kind: input, shape index: {}]   ;;  %s189_s0 = inlined_call_operand.vmem [shape: f32[8,32], index: 0, kind: input, shape index: {}]   ;;  %s190_s2 = inlined_call_operand.vmem [shape: f32[8,8], index: 2, kind: output, shape index: {}]  }
   0x1   :  { %v12_v0 = vld [vmem:[%s188_s1] sm:$0xff] }
   0x2   :  { %129 = vmatpush.xpose.msk.msra.mxu0 %vm13_vm0, %v12_v0  ;;  %v11_v1 = vld [vmem:[%s189_s0] sm:$0xff]  ;;  %v162_v5 = vand.u32 127, %v40_v4 }
   0x5   :  { %130 = vmatmul.msk.f32.vlgmr.msra.gmra.mxu0 %vm13_vm0, %v11_v1 }
  0x82   :  { %v158_v2 = vpop.f32.mrf.mxu0 }
  0x83   :  { %v43_v3 = vsel %vm42_vm1, %v158_v2, -inf }
  0x84   :  { %44 = vmax.xlane.f32.xlu0 %v43_v3 }
  0xf7   :  { %v45_v6 = vpop.xlane.xlu0 %44 }
  0xf8   :  { %vm46_vm2 = vcmp.eq.f32.partialorder %v158_v2, %v45_v6 }
  0xf9   :  { %v47_v7 = vsel %vm46_vm2, %v162_v5, 8 }
  0xfa   :  { %v48_v8 = vsel %vm42_vm1, %v47_v7, 2147483647 }
  0xfb   :  { %v50_v9 = vshra.s32 %v48_v8, 16  ;;  %v49_v11 = vand.u32 65535, %v48_v8 }
  0xfd   :  { %v52_v10 = vcvt.s32.f32 %v50_v9  ;;  %v51_v13 = vcvt.s32.f32 %v49_v11 }
  0xff   :  { %53 = vmin.xlane.f32.xlu0 %v52_v10 }
 0x172   :  { %v54_v12 = vpop.xlane.xlu0 %53 }
 0x173   :  { %vm55_vm3 = vcmp.eq.f32.partialorder %v52_v10, %v54_v12  ;;  %v60_v15 = vcvt.f32.s32 %v54_v12 }
 0x174   :  { %v56_v14 = vsel %vm55_vm3, %v51_v13, inf }
 0x175   :  { %57 = vmin.xlane.f32.xlu1 %v56_v14  ;;  %v61_v17 = vshll.u32 %v60_v15, 16 }
 0x1e8   :  { %v58_v16 = vpop.xlane.xlu1 %57 }
 0x1e9   :  { %v59_v18 = vcvt.f32.s32 %v58_v16 }
 0x1eb   :  { %v62_v19 = vadd.s32 %v61_v17, %v59_v18 }
 0x1ed   :  { %vm63_vm4 = vcmp.eq.s32.totalorder %v162_v5, %v62_v19 }
 0x1ee   :  { %v65_v20 = vsel %vm63_vm4, -inf, %v158_v2  ;;  %v64_v37 = vsel %vm63_vm4, 1.0, %v136_v36 }
 0x1ef   :  { %v66_v21 = vsel %vm42_vm1, %v65_v20, -inf }
 0x1f0   :  { %67 = vmax.xlane.f32.xlu1 %v66_v21 }
 0x263   :  { %v68_v22 = vpop.xlane.xlu1 %67 }
 0x264   :  { %vm69_vm5 = vcmp.eq.f32.partialorder %v65_v20, %v68_v22 }
 0x265   :  { %v70_v23 = vsel %vm69_vm5, %v162_v5, 8 }
 0x266   :  { %v71_v24 = vsel %vm42_vm1, %v70_v23, 2147483647 }
 0x267   :  { %v73_v25 = vshra.s32 %v71_v24, 16  ;;  %v72_v27 = vand.u32 65535, %v71_v24 }
 0x269   :  { %v75_v26 = vcvt.s32.f32 %v73_v25  ;;  %v74_v29 = vcvt.s32.f32 %v72_v27 }
 0x26b   :  { %76 = vmin.xlane.f32.xlu2 %v75_v26 }
 0x2de   :  { %v77_v28 = vpop.xlane.xlu2 %76 }
 0x2df   :  { %vm78_vm6 = vcmp.eq.f32.partialorder %v75_v26, %v77_v28  ;;  %v83_v31 = vcvt.f32.s32 %v77_v28 }
 0x2e0   :  { %v79_v30 = vsel %vm78_vm6, %v74_v29, inf }
 0x2e1   :  { %80 = vmin.xlane.f32.xlu2 %v79_v30  ;;  %v84_v33 = vshll.u32 %v83_v31, 16 }
 0x354   :  { %v81_v32 = vpop.xlane.xlu2 %80 }
 0x355   :  { %v82_v34 = vcvt.f32.s32 %v81_v32 }
 0x357   :  { %v85_v35 = vadd.s32 %v84_v33, %v82_v34 }
 0x359   :  { %vm86_vm7 = vcmp.eq.s32.totalorder %v162_v5, %v85_v35 }
 0x35a   :  { %v88_v38 = vsel %vm86_vm7, -inf, %v65_v20  ;;  %v87_v39 = vsel %vm86_vm7, 1.0, %v64_v37 }
 0x35b   :  { %v89_v40 = vsel %vm42_vm1, %v88_v38, -inf }
 0x35c   :  { %90 = vmax.xlane.f32.xlu0 %v89_v40 }
 0x3cf   :  { %v91_v41 = vpop.xlane.xlu0 %90 }
 0x3d0   :  { %vm92_vm8 = vcmp.eq.f32.partialorder %v88_v38, %v91_v41 }
 0x3d1   :  { %v93_v42 = vsel %vm92_vm8, %v162_v5, 8 }
 0x3d2   :  { %v94_v43 = vsel %vm42_vm1, %v93_v42, 2147483647 }
 0x3d3   :  { %v96_v44 = vshra.s32 %v94_v43, 16  ;;  %v95_v46 = vand.u32 65535, %v94_v43 }
 0x3d5   :  { %v98_v45 = vcvt.s32.f32 %v96_v44  ;;  %v97_v48 = vcvt.s32.f32 %v95_v46 }
 0x3d7   :  { %99 = vmin.xlane.f32.xlu1 %v98_v45 }
 0x44a   :  { %v100_v47 = vpop.xlane.xlu1 %99 }
 0x44b   :  { %vm101_vm9 = vcmp.eq.f32.partialorder %v98_v45, %v100_v47  ;;  %v106_v50 = vcvt.f32.s32 %v100_v47 }
 0x44c   :  { %v102_v49 = vsel %vm101_vm9, %v97_v48, inf }
 0x44d   :  { %103 = vmin.xlane.f32.xlu2 %v102_v49  ;;  %v107_v52 = vshll.u32 %v106_v50, 16 }
 0x4c0   :  { %v104_v51 = vpop.xlane.xlu2 %103 }
 0x4c1   :  { %v105_v53 = vcvt.f32.s32 %v104_v51 }
 0x4c3   :  { %v108_v54 = vadd.s32 %v107_v52, %v105_v53 }
 0x4c5   :  { %vm109_vm10 = vcmp.eq.s32.totalorder %v162_v5, %v108_v54 }
 0x4c6   :  { %v110_v55 = vsel %vm109_vm10, 1.0, %v87_v39 }
 0x4c7   :  { %vm111_vm11 = vcmp.gt.f32.partialorder %v110_v55, 0.0 }
 0x4c8   :  { %v112_v56 = vsel %vm111_vm11, %v158_v2, -inf }
 0x4c9   :  { %v113_v57 = vsel %vm42_vm1, %v112_v56, -inf }
 0x4ca   :  { %114 = vmax.xlane.f32.xlu0 %v113_v57 }
 0x53d   :  { %v115_v58 = vpop.xlane.xlu0 %114 }
 0x53e   :  { %v116_v59 = vsub.f32 %v112_v56, %v115_v58 }
 0x540   :  { %v117_v60 = vmul.f32 1.442695, %v116_v59 }
 0x542   :  { %132 = vpow2.f32 %v117_v60 }
 0x548   :  { %v133_v61 = vpop.eup %132 }
 0x549   :  { %v119_v62 = vsel %vm42_vm1, %v133_v61, 0.0 }
 0x54a   :  { %120 = vadd.xlane.f32.xlu1 %v119_v62 }
 0x5bd   :  { %v121_v63 = vpop.xlane.xlu1 %120 }
 0x5be   :  { %134 = vrcp.f32 %v121_v63 }
 0x5c4   :  { %v135_v0 = vpop.eup %134 }
 0x5c5   :  { %v123_v1 = vmul.f32 %v135_v0, %v133_v61 }
 0x5c7   :  { %124 = vst.msk [vmem:[%s190_s2] sm:$0xff] %vm42_vm1, %v123_v1 }

// kernel: tag_encoder_fwd.23
= control target key start
LH: loop header
LB: loop body
LE: loop exit
PB: predicated region body
PF: predicated region fallthrough
CT: control target
= control target key end

     0   :  { %s732_s17 = smov 0   ;;  %s809_s0 = inlined_call_operand.vmem [shape: f32[8,8], index: 0, kind: input, shape index: {}]   ;;  %s810_s1 = inlined_call_operand.vmem [shape: f32[2,8,32], index: 1, kind: input, shape index: {}, may-alias: {1,2}]   ;;  %s811_s2 = inlined_call_operand.vmem [shape: f32[2,8,32], index: 2, kind: input, shape index: {}, may-alias: {1,2}]   ;;  %s812_s3 = inlined_call_operand.vmem [shape: f32[1,32], index: 3, kind: input, shape index: {}]   ;;  %s813_s4 = inlined_call_operand.vmem [shape: f32[1,32], index: 4, kind: input, shape index: {}]   ;;  %s814_s5 = inlined_call_operand.vmem [shape: f32[32,32], index: 5, kind: input, shape index: {}]   ;;  %s815_s6 = inlined_call_operand.vmem [shape: f32[1,32], index: 6, kind: input, shape index: {}]   ;;  %s816_s7 = inlined_call_operand.vmem [shape: f32[32,32], index: 7, kind: input, shape index: {}]   ;;  %s817_s8 = inlined_call_operand.vmem [shape: f32[1,32], index: 8, kind: input, shape index: {}]   ;;  %s818_s9 = inlined_call_operand.vmem [shape: f32[1,32], index: 9, kind: input, shape index: {}]   ;;  %s819_s10 = inlined_call_operand.vmem [shape: f32[1,32], index: 10, kind: input, shape index: {}]   ;;  %s820_s11 = inlined_call_operand.vmem [shape: f32[2,8,32], index: 11, kind: output, shape index: {}]  }
   0x1 LB: > { %s629_s18 = sadd.s32 4294967295, %s669_s17   ;;  %p633_p0 = scmp.ge.s32.totalorder %s669_s17, 1  ;;  %s669_s17 = sphi %s732_s17, %s21_s17  }
   0x2   : > { %p345_p1 = scmp.lt.s32.totalorder %s669_s17, 3 }
   0x4   : > { %p346_p2 = pnand %p633_p0, %p345_p1 }
   0x5   : > { %p387_p3 = scmp.lt.s32.totalorder (!%p346_p2), %s629_s18, 1 }
   0x6   : > { %349 = sbr.rel (%p346_p2) target bundleno = 947 (0x3b3), region = 64 }
   0xb   : > { %s822_s18 = smov (!%p387_p3, %s629_s18), 1  ;;  %v401_v0 = vld [vmem:[%s809_s0] sm:$0xff]  ;;  %vm402_vm0 = vcmask 64512   ;;  %vm429_vm1 = vcmask 261120   ;;  %v671_v6 = vmov 32.0   ;;  %v470_v18 = vld [vmem:[%s814_s5 + $0x18] sm:$0xff] }
   0xc   : > { %s740_s19 = sshll.u32 %s822_s18, 3  ;;  %657 = vrcp.f32 %v671_v6  ;;  %490 = vmatpush.msra.mxu1 %v470_v18  ;;  %v469_v19 = vld [vmem:[%s814_s5 + $0x10] sm:$0xff]  ;;  %v468_v20 = vld [vmem:[%s814_s5 + $0x8] sm:$0xff]  ;;  %v467_v21 = vld [vmem:[%s814_s5] sm:$0xff] }
   0xd   : > { %s390_s22 = scalar_lea.vmem %s810_s1, %s740_s19  ;;  %s394_s27 = scalar_lea.vmem %s811_s2, %s740_s19  ;;  %v502_v22 = vld [vmem:[%s816_s7 + $0x18] sm:$0xff]  ;;  %v651_v32 = vld [vmem:[%s812_s3] ss:$0 sm:$0xff]  ;;  %v501_v38 = vld [vmem:[%s816_s7 + $0x10] sm:$0xff] }
   0xe   : > { %v399_v1 = vld [vmem:[%s390_s22] sm:$0xff]  ;;  %491 = vmatpush.msra.mxu1 %v469_v19  ;;  %522 = vmatpush.msra.mxu2 %v502_v22  ;;  %v500_v39 = vld [vmem:[%s816_s7 + $0x8] sm:$0xff]  ;;  %s398_s24 = scalar_lea.vmem %s820_s11, %s740_s19 }
   0xf   : > { %421 = vmatpush.msra.mxu0 %v399_v1  ;;  %v400_v2 = vld [vmem:[%s394_s27] sm:$0xff] }
  0x10   : > { %637 = vmatmul.msk.f32.vlgmr.msra.gmra.mxu0 %vm402_vm0, %v401_v0  ;;  %492 = vmatpush.msra.mxu1 %v468_v20  ;;  %v652_v35 = vld [vmem:[%s813_s4] ss:$0 sm:$0xff] }
  0x11   : > { %523 = vmatpush.msra.mxu2 %v501_v38  ;;  %v499_v40 = vld [vmem:[%s816_s7] sm:$0xff] }
  0x12   : > { %v658_v7 = vpop.eup %657  ;;  %493 = vmatpush.msra.mxu1 %v467_v21  ;;  %v653_v41 = vld [vmem:[%s815_s6] ss:$0 sm:$0xff] }
  0x13   : > { %v434_v8 = vmul.f32 32.0, %v658_v7  ;;  %vm438_vm2 = vweird.f32 %v658_v7  ;;  %524 = vmatpush.msra.mxu2 %v500_v39  ;;  %v654_v45 = vld [vmem:[%s817_s8] ss:$0 sm:$0xff] }
  0x14   : > { %v655_v0 = vld [vmem:[%s818_s9] ss:$0 sm:$0xff] }
  0x15   : > { %v435_v9 = vsub.f32 1.0, %v434_v8  ;;  %525 = vmatpush.msra.mxu2 %v499_v40 }
  0x17   : > { %v436_v10 = vmul.f32 %v658_v7, %v435_v9 }
  0x19   : > { %v437_v11 = vadd.f32 %v658_v7, %v436_v10 }
  0x1b   : > { %v439_v12 = vsel %vm438_vm2, %v658_v7, %v437_v11 }
  0x8d   : > { %v423_v3 = vpop.f32.mrf.mxu0 }
  0x8e   : > { %v426_v4 = vadd.f32 %v423_v3, %v400_v2  ;;  %v656_v2 = vld [vmem:[%s819_s10] ss:$0 sm:$0xff] }
  0x90   : > { %v430_v5 = vsel %vm429_vm1, %v426_v4, 0.0 }
  0x91   : > { %431 = vadd.xlane.f32.xlu0 %v430_v5 }
 0x104   : > { %v432_v13 = vpop.xlane.xlu0 %431 }
 0x105   : > { %v440_v14 = vmul.f32 %v439_v12, %v432_v13 }
 0x107   : > { %v441_v15 = vsub.f32 %v426_v4, %v440_v14 }
 0x109   : > { %v442_v16 = vmul.f32 %v441_v15, %v441_v15 }
 0x10b   : > { %v443_v17 = vsel %vm429_vm1, %v442_v16, 0.0 }
 0x10c   : > { %444 = vadd.xlane.f32.xlu0 %v443_v17 }
 0x17f   : > { %v445_v23 = vpop.xlane.xlu0 %444 }
 0x180   : > { %v446_v24 = vmul.f32 %v445_v23, %v439_v12 }
 0x182   : > { %v447_v25 = vadd.f32 1e-05, %v446_v24 }
 0x184   : > { %659 = vrsqrt.f32 %v447_v25  ;;  %vm454_vm4 = vweird.f32 %v447_v25 }
 0x18a   : > { %v660_v26 = vpop.eup %659 }
 0x18b   : > { %v449_v27 = vmul.f32 %v660_v26, %v447_v25  ;;  %vm455_vm3 = vweird.f32 %v660_v26 }
 0x18c   : > { %vm456_vm5 = vmor %vm454_vm4, %vm455_vm3 }
 0x18d   : > { %v450_v28 = vmul.f32 %v660_v26, %v449_v27 }
 0x18f   : > { %v451_v29 = vmul.f32 0.5, %v450_v28 }
 0x191   : > { %v452_v30 = vsub.f32 1.5, %v451_v29 }
 0x193   : > { %v453_v31 = vmul.f32 %v660_v26, %v452_v30 }
 0x195   : > { %v457_v33 = vsel %vm456_vm5, %v660_v26, %v453_v31 }
 0x196   : > { %v458_v34 = vmul.f32 %v457_v33, %v441_v15 }
 0x198   : > { %v462_v36 = vmul.f32 %v651_v32, %v458_v34 }
 0x19a   : > { %v466_v37 = vadd.f32 %v652_v35, %v462_v36 }
 0x19c   : > { %638 = vmatmul.msk.f32.vlgmr.msra.gmra.mxu1 %vm429_vm1, %v466_v37 }
 0x219   : > { %v495_v42 = vpop.f32.mrf.mxu1 }
 0x21a   : > { %v496_v43 = vadd.f32 %v653_v41, %v495_v42 }
 0x21c   : > { %v498_v44 = vmax.f32 %v496_v43, 0.0 }
 0x21e   : > { %639 = vmatmul.msk.f32.vlgmr.msra.gmra.mxu2 %vm429_vm1, %v498_v44 }
 0x2a1   : > { %v527_v46 = vpop.f32.mrf.mxu2 }
 0x2a2   : > { %v528_v47 = vadd.f32 %v654_v45, %v527_v46 }
 0x2a4   : > { %v530_v48 = vadd.f32 %v528_v47, %v466_v37 }
 0x2a6   : > { %v533_v49 = vsel %vm429_vm1, %v530_v48, 0.0 }
 0x2a7   : > { %534 = vadd.xlane.f32.xlu1 %v533_v49 }
 0x31a   : > { %v535_v50 = vpop.xlane.xlu1 %534 }
 0x31b   : > { %v536_v51 = vmul.f32 %v535_v50, %v439_v12 }
 0x31d   : > { %v537_v52 = vsub.f32 %v530_v48, %v536_v51 }
 0x31f   : > { %v538_v53 = vmul.f32 %v537_v52, %v537_v52 }
 0x321   : > { %v539_v54 = vsel %vm429_vm1, %v538_v53, 0.0 }
 0x322   : > { %540 = vadd.xlane.f32.xlu1 %v539_v54 }
 0x395   : > { %v541_v55 = vpop.xlane.xlu1 %540 }
 0x396   : > { %v542_v56 = vmul.f32 %v541_v55, %v439_v12 }
 0x398   : > { %v543_v57 = vadd.f32 1e-05, %v542_v56 }
 0x39a   : > { %661 = vrsqrt.f32 %v543_v57  ;;  %vm550_vm7 = vweird.f32 %v543_v57 }
 0x3a0   : > { %v662_v58 = vpop.eup %661 }
 0x3a1   : > { %v545_v59 = vmul.f32 %v662_v58, %v543_v57  ;;  %vm551_vm6 = vweird.f32 %v662_v58 }
 0x3a2   : > { %vm552_vm8 = vmor %vm550_vm7, %vm551_vm6 }
 0x3a3   : > { %v546_v60 = vmul.f32 %v662_v58, %v545_v59 }
 0x3a5   : > { %v547_v61 = vmul.f32 0.5, %v546_v60 }
 0x3a7   : > { %v548_v62 = vsub.f32 1.5, %v547_v61 }
 0x3a9   : > { %v549_v63 = vmul.f32 %v662_v58, %v548_v62 }
 0x3ab   : > { %v553_v1 = vsel %vm552_vm8, %v662_v58, %v549_v63 }
 0x3ac   : > { %v554_v3 = vmul.f32 %v553_v1, %v537_v52 }
 0x3ae   : > { %v558_v4 = vmul.f32 %v655_v0, %v554_v3 }
 0x3b0   : > { %v562_v5 = vadd.f32 %v656_v2, %v558_v4 }
 0x3b2   : > { %563 = vst.msk [vmem:[%s398_s24] sm:$0xff] %vm429_vm1, %v562_v5 }
 0x3b3 PF: > { %s21_s17 = sadd.s32 1, %s669_s17  }
 0x3b4   : > { %p18_p4 = scmp.ge.s32.totalorder %s21_s17, 4  }
 0x3b6   :  { %20 = sbr.rel (!%p18_p4) target bundleno = 1 (0x1), region = 97 }

// kernel: tag_encoder_fwd.24
= control target key start
LH: loop header
LB: loop body
LE: loop exit
PB: predicated region body
PF: predicated region fallthrough
CT: control target
= control target key end

     0   :  { %s2581_s0 = inlined_call_operand.vmem [shape: f32[2,8,32], index: 0, kind: input, shape index: {}]   ;;  %s2582_s1 = inlined_call_operand.vmem [shape: f32[2,8,32], index: 1, kind: input, shape index: {}]   ;;  %s2583_s2 = inlined_call_operand.hbm [shape: f32[32,32], index: 2, kind: input, shape index: {}]   ;;  %s2584_s3 = inlined_call_operand.hbm [shape: f32[1,32], index: 3, kind: input, shape index: {}]   ;;  %s2585_s4 = inlined_call_operand.vmem [shape: f32[32,64], index: 4, kind: input, shape index: {}]   ;;  %s2586_s5 = inlined_call_operand.hbm [shape: f32[1,64], index: 5, kind: input, shape index: {}]   ;;  %s2587_s6 = inlined_call_operand.hbm [shape: f32[1,32], index: 6, kind: input, shape index: {}]   ;;  %s2588_s7 = inlined_call_operand.hbm [shape: f32[1,32], index: 7, kind: input, shape index: {}]   ;;  %s2589_s8 = inlined_call_operand.hbm [shape: f32[32,32], index: 8, kind: input, shape index: {}]   ;;  %s2590_s9 = inlined_call_operand.hbm [shape: f32[1,32], index: 9, kind: input, shape index: {}]   ;;  %s2591_s10 = inlined_call_operand.hbm [shape: f32[32,32], index: 10, kind: input, shape index: {}]   ;;  %s2592_s11 = inlined_call_operand.hbm [shape: f32[1,32], index: 11, kind: input, shape index: {}]   ;;  %s2593_s12 = inlined_call_operand.hbm [shape: f32[1,32], index: 12, kind: input, shape index: {}]   ;;  %s2594_s13 = inlined_call_operand.hbm [shape: f32[1,32], index: 13, kind: input, shape index: {}]   ;;  %s2595_s14 = inlined_call_operand.vmem [shape: f32[2,8,32], index: 14, kind: output, shape index: {}]  }
   0x1   :  { %2596 = sst [smem:[#allocation25_spill]] %s2584_s3 }
   0x2   :  { %2597 = sst [smem:[#allocation26_spill]] %s2587_s6 }
   0x3   :  { %2598 = sst [smem:[#allocation27_spill]] %s2589_s8 }
   0x4   :  { %19 = vsyncpa [#allocation3], 0 }
   0x5   :  { %20 = vsyncpa [#allocation5], 0 }
   0x6   :  { %21 = vsyncpa [#allocation8], 0 }
   0x7   :  { %22 = vsyncpa [#allocation11], 0 }
   0x8   :  { %23 = vsyncpa [#allocation14], 0 }
   0x9   :  { %24 = vsyncpa [#allocation17], 0  ;;  %s2251_s29 = smov 0  }
   0xa LB: > { %s2599_s3 = sld [smem:[#allocation25_spill]]  ;;  %s2260_s17 = sadd.s32 4294967295, %s2152_s29   ;;  %s2152_s29 = sphi %s2251_s29, %s30_s29  }
   0xb   : > { %p1581_p0 = scmp.ge.s32.totalorder %s2152_s29, 1  ;;  %p365_p1 = scmp.lt.s32.totalorder %s2152_s29, 3 }
   0xc   : > { %p1705_p2 = scmp.eq.s32.totalorder %s2260_s17, 0  ;;  %s2154_s19 = smov [#allocation4]  }
   0xd   : > { %p2265_p3 = pnand %p1581_p0, %p365_p1  ;;  %s393_s20 = sshll.u32 %s2154_s19, 4  ;;  %s394_s20 = int_to_ptr.vmem [resolvable:$true] %s393_s20 }
   0xe   : > { %s2601_s6 = sld [smem:[#allocation26_spill]]  ;;  %s2155_s25 = smov [#allocation7]  }
   0xf   : > { %p1671_p4 = pneg %p2265_p3  ;;  %s420_s26 = sshll.u32 %s2155_s25, 4  ;;  %s421_s26 = int_to_ptr.vmem [resolvable:$true] %s420_s26 }
  0x10   : > { %s391_s16 = sshll.u32 %s2599_s3, 4  ;;  %s2603_s8 = sld [smem:[#allocation27_spill]]  ;;  %s392_s16 = int_to_ptr.hbm [resolvable:$true] %s391_s16 }
  0x11   : > { %p2276_p5 = pnand %p1705_p2, %p1671_p4  ;;  %s2156_s15 = smov [#allocation10]  }
  0x12   : > { %s443_s19 = sshll.u32 %s2156_s15, 4  ;;  %s467_s3 = sshll.u32 %s2591_s10, 4  ;;  %s444_s19 = int_to_ptr.vmem [resolvable:$true] %s443_s19  ;;  %s468_s3 = int_to_ptr.hbm [resolvable:$true] %s467_s3 }
  0x13   : > { %1677 = dma.hbm_to_vmem [thread:$0]  (!%p2276_p5), %s392_s16, 16, %s394_s20, [#allocation5]  }
  0x14   : > { %s418_s23 = sshll.u32 %s2601_s6, 4  ;;  %s2157_s25 = smov 128   ;;  %s419_s23 = int_to_ptr.hbm [resolvable:$true] %s418_s23 }
  0x15   : > { %1683 = dma.hbm_to_vmem [thread:$0]  (!%p2276_p5), %s419_s23, 16, %s421_s26, [#allocation8]  }
  0x16   : > { %s441_s30 = sshll.u32 %s2603_s8, 4  ;;  %s2158_s6 = smov 8   ;;  %s442_s30 = int_to_ptr.hbm [resolvable:$true] %s441_s30 }
  0x17   : > { %1689 = dma.hbm_to_vmem [thread:$0]  (!%p2276_p5), %s442_s30, 512, %s444_s19, [#allocation11], %s2157_s25, %s2157_s25, %s2158_s6  }
  0x18   : > { %s494_s16 = sshll.u32 %s2593_s12, 4  ;;  %s2159_s20 = smov [#allocation13]   ;;  %s495_s16 = int_to_ptr.hbm [resolvable:$true] %s494_s16 }
  0x19   : > { %s469_s23 = sshll.u32 %s2159_s20, 4  ;;  %s2160_s26 = smov [#allocation16]   ;;  %s470_s23 = int_to_ptr.vmem [resolvable:$true] %s469_s23 }
  0x1a   : > { %1695 = dma.hbm_to_vmem [thread:$0]  (!%p2276_p5), %s468_s3, 512, %s470_s23, [#allocation14], %s2157_s25, %s2157_s25, %s2158_s6  }
  0x1b   : > { %s496_s15 = sshll.u32 %s2160_s26, 4  ;;  %s376_s8 = sshll.u32 %s2583_s2, 4  ;;  %s497_s15 = int_to_ptr.vmem [resolvable:$true] %s496_s15  ;;  %s377_s8 = int_to_ptr.hbm [resolvable:$true] %s376_s8 }
  0x1c   : > { %1701 = dma.hbm_to_vmem [thread:$0]  (!%p2276_p5), %s495_s16, 16, %s497_s15, [#allocation17]  }
  0x1d   : > { %s406_s27 = sshll.u32 %s2586_s5, 4  ;;  %s2161_s28 = smov [#allocation2]   ;;  %s407_s27 = int_to_ptr.hbm [resolvable:$true] %s406_s27 }
  0x1e   : > { %s378_s20 = sshll.u32 %s2161_s28, 4  ;;  %s2162_s3 = smov [#allocation6]   ;;  %s379_s20 = int_to_ptr.vmem [resolvable:$true] %s378_s20 }
  0x1f   : > { %1674 = dma.hbm_to_vmem [thread:$0]  (!%p2276_p5), %s377_s8, 512, %s379_s20, [#allocation3], %s2157_s25, %s2157_s25, %s2158_s6  }
  0x20   : > { %s408_s23 = sshll.u32 %s2162_s3, 4  ;;  %s430_s22 = sshll.u32 %s2588_s7, 4  ;;  %s409_s23 = int_to_ptr.vmem [resolvable:$true] %s408_s23  ;;  %s431_s22 = int_to_ptr.hbm [resolvable:$true] %s430_s22 }
  0x21   : > { %1680 = dma.hbm_to_vmem [thread:$0]  (!%p2276_p5), %s407_s27, 16, %s409_s23, [#allocation5]  }
  0x22   : > { %s456_s30 = sshll.u32 %s2590_s9, 4  ;;  %s2163_s19 = smov [#allocation9]   ;;  %s457_s30 = int_to_ptr.hbm [resolvable:$true] %s456_s30 }
  0x23   : > { %s432_s28 = sshll.u32 %s2163_s19, 4  ;;  %s2164_s6 = smov [#allocation12]   ;;  %s433_s28 = int_to_ptr.vmem [resolvable:$true] %s432_s28 }
  0x24   : > { %1686 = dma.hbm_to_vmem [thread:$0]  (!%p2276_p5), %s431_s22, 16, %s433_s28, [#allocation8]  }
  0x25   : > { %s458_s8 = sshll.u32 %s2164_s6, 4  ;;  %s482_s3 = sshll.u32 %s2592_s11, 4  ;;  %s459_s8 = int_to_ptr.vmem [resolvable:$true] %s458_s8  ;;  %s483_s3 = int_to_ptr.hbm [resolvable:$true] %s482_s3 }
  0x26   : > { %1692 = dma.hbm_to_vmem [thread:$0]  (!%p2276_p5), %s457_s30, 16, %s459_s8, [#allocation11]  }
  0x27   : > { %s506_s26 = sshll.u32 %s2594_s13, 4  ;;  %s2165_s21 = smov [#allocation15]   ;;  %s507_s26 = int_to_ptr.hbm [resolvable:$true] %s506_s26 }
  0x28   : > { %s484_s16 = sshll.u32 %s2165_s21, 4  ;;  %s2166_s22 = smov [#allocation18]   ;;  %s485_s16 = int_to_ptr.vmem [resolvable:$true] %s484_s16 }
  0x29   : > { %1698 = dma.hbm_to_vmem [thread:$0]  (!%p2276_p5), %s483_s3, 16, %s485_s16, [#allocation14]  }
  0x2a   : > { %s508_s15 = sshll.u32 %s2166_s22, 4  ;;  %535 = sbr.rel (%p2265_p3) target bundleno = 2871 (0xb37), region = 76  ;;  %s509_s15 = int_to_ptr.vmem [resolvable:$true] %s508_s15 }
  0x2b   : > { %1704 = dma.hbm_to_vmem [thread:$0]  (!%p2276_p5), %s507_s26, 16, %s509_s15, [#allocation17]  }
  0x2f   : > { %2127 = dma.done.wait (%p1705_p2), [#allocation3], 512  }
  0x30   : > { %2129 = vsyncadd (%p1705_p2), [#allocation3], 4294966784 }
  0x31   : > { %2131 = dma.done.wait (%p1705_p2), [#allocation5], 32  }
  0x32   : > { %2133 = vsyncadd (%p1705_p2), [#allocation5], 4294967264 }
  0x33   : > { %2135 = dma.done.wait (%p1705_p2), [#allocation8], 32  }
  0x34   : > { %2137 = vsyncadd (%p1705_p2), [#allocation8], 4294967264 }
  0x35   : > { %2139 = dma.done.wait (%p1705_p2), [#allocation11], 528  }
  0x36   : > { %2141 = vsyncadd (%p1705_p2), [#allocation11], 4294966768 }
  0x37   : > { %2143 = dma.done.wait (%p1705_p2), [#allocation14], 528  }
  0x38   : > { %2145 = vsyncadd (%p1705_p2), [#allocation14], 4294966768 }
  0x39   : > { %2147 = dma.done.wait (%p1705_p2), [#allocation17], 32  }
  0x3a   : > { %2149 = vsyncadd (%p1705_p2), [#allocation17], 4294967264  ;;  %p634_p6 = scmp.lt.s32.totalorder %s2260_s17, 1  ;;  %v651_v0 = vld [vmem:[#allocation2 + $0x18] sm:$0xff]  ;;  %v650_v2 = vld [vmem:[#allocation2 + $0x10] sm:$0xff]  ;;  %vm656_vm0 = vcmask 261120   ;;  %v823_v31 = vlaneseq }
  0x3b   : > { %v684_v1 = vld [vmem:[%s2585_s4 + $0x18] sm:$0xff]  ;;  %672 = vmatpush.msra.mxu0 %v651_v0  ;;  %v683_v3 = vld [vmem:[%s2585_s4 + $0x10] sm:$0xff]  ;;  %v649_v4 = vld [vmem:[#allocation2 + $0x8] sm:$0xff]  ;;  %vm726_vm1 = vcmask 64512   ;;  %s2167_s16 = smov 112   ;;  %s2168_s22 = smov 120  }
  0x3c   : > { %s2605_s17 = smov (!%p634_p6, %s2260_s17), 1  ;;  %704 = vmatpush.msra.mxu1 %v684_v1  ;;  %v682_v5 = vld [vmem:[%s2585_s4 + $0x8] sm:$0xff]  ;;  %v648_v6 = vld [vmem:[#allocation2] sm:$0xff]  ;;  %s2169_s15 = smov 104   ;;  %v2423_v32 = vand.u32 127, %v823_v31 }
  0x3d   : > { %s2357_s18 = sshll.u32 %s2605_s17, 3  ;;  %v681_v7 = vld [vmem:[%s2585_s4] sm:$0xff]  ;;  %673 = vmatpush.msra.mxu0 %v650_v2  ;;  %s2171_s24 = smov 96  }
  0x3e   : > { %s641_s6 = scalar_lea.vmem %s2582_s1, %s2357_s18  ;;  %s637_s20 = scalar_lea.vmem %s2581_s0, %s2357_s18  ;;  %705 = vmatpush.msra.mxu1 %v683_v3  ;;  %v1762_v10 = vld [vmem:[#allocation4] ss:$0 sm:$0xff]  ;;  %v1763_v11 = vld [vmem:[#allocation6] ss:$0 sm:$0xff] }
  0x3f   : > { %v2379_v8 = vld [vmem:[%s641_s6] sm:$0xff]  ;;  %674 = vmatpush.msra.mxu0 %v649_v4  ;;  %s2172_s30 = smov 16   ;;  %s2173_s19 = smov 8  }
  0x40   : > { %v646_v9 = vld [vmem:[%s637_s20] sm:$0xff]  ;;  %706 = vmatpush.msra.mxu1 %v682_v5  ;;  %s2174_s28 = smov 24   ;;  %s645_s25 = scalar_lea.vmem %s2595_s14, %s2357_s18 }
  0x41   : > { %675 = vmatpush.msra.mxu0 %v648_v6 }
  0x42   : > { %707 = vmatpush.msra.mxu1 %v681_v7  ;;  %1609 = vmatmul.msk.f32.vlgmr.msra.gmra.mxu0 %vm656_vm0, %v2379_v8 }
  0x43   : > { %1610 = vmatmul.msk.f32.vlgmr.msra.gmra.mxu1 %vm656_vm0, %v646_v9 }
  0xbf   : > { %v677_v12 = vpop.f32.mrf.mxu0 }
  0xc0   : > { %v709_v13 = vpop.f32.mrf.mxu1  ;;  %v678_v14 = vadd.f32 %v1762_v10, %v677_v12 }
  0xc1   : > { %v2384_v15 = vadd.f32 %v1763_v11, %v709_v13 }
  0xc2   : > { %v680_v16 = vmul.f32 0.17677669, %v678_v14 }
  0xc3   : > { %722 = vrot.lane.b32.xlu1 %v2384_v15, %s2167_s16  ;;  %720 = vrot.lane.b32.xlu0 %v2384_v15, %s2168_s22 }
  0xc4   : > { %1611 = vmatpush.xpose.msk.msra.mxu2 %vm726_vm1, %v2384_v15  ;;  %715 = vrot.lane.b32.xlu2 %v680_v16, %s2167_s16 }
  0xc7   : > { %1612 = vmatmul.msk.f32.vlgmr.msra.gmra.mxu2 %vm726_vm1, %v680_v16 }
  0xcb   : > { %724 = vrot.lane.b32.xlu1 %v2384_v15, %s2169_s15  ;;  %713 = vrot.lane.b32.xlu0 %v680_v16, %s2168_s22 }
  0xcc   : > { %717 = vrot.lane.b32.xlu2 %v680_v16, %s2169_s15 }
 0x11e   : > { %v716_v19 = vpop.permute.xlu2 %715 }
 0x126   : > { %v718_v22 = vpop.permute.xlu2 %717 }
 0x135   : > { %v2392_v17 = vpop.permute.xlu1 %722  ;;  %v2394_v18 = vpop.permute.xlu0 %720 }
 0x136   : > { %1613 = vmatpush.xpose.msk.msra.mxu3 %vm726_vm1, %v2394_v18  ;;  %1615 = vmatpush.xpose.msk.msrb.mxu2 %vm726_vm1, %v2392_v17 }
 0x139   : > { %1616 = vmatmul.msk.f32.vlgmr.msrb.gmra.mxu2 %vm726_vm1, %v716_v19 }
 0x13d   : > { %v2401_v20 = vpop.permute.xlu1 %724  ;;  %v714_v21 = vpop.permute.xlu0 %713 }
 0x13e   : > { %1614 = vmatmul.msk.f32.vlgmr.msra.gmra.mxu3 %vm726_vm1, %v714_v21 }
 0x13f   : > { %1617 = vmatpush.xpose.msk.msrb.mxu3 %vm726_vm1, %v2401_v20 }
 0x146   : > { %1618 = vmatmul.msk.f32.vlgmr.msrb.gmra.mxu3 %vm726_vm1, %v718_v22 }
 0x14a   : > { %v2407_v23 = vpop.f32.mrf.mxu2 }
 0x14b   : > { %v825_v30 = vsel %vm726_vm1, %v2407_v23, -inf }
 0x1bc   : > { %v2409_v24 = vpop.f32.mrf.mxu2 }
 0x1bd   : > { %v831_v25 = vsel %vm726_vm1, %v2409_v24, -inf }
 0x1be   : > { %832 = vmax.xlane.f32.xlu0 %v831_v25 }
 0x1c1   : > { %v2413_v26 = vpop.f32.mrf.mxu3 }
 0x1c2   : > { %v828_v27 = vsel %vm726_vm1, %v2413_v26, -inf }
 0x1c3   : > { %829 = vmax.xlane.f32.xlu2 %v828_v27 }
 0x1c9   : > { %v2417_v28 = vpop.f32.mrf.mxu3 }
 0x1ca   : > { %v834_v29 = vsel %vm726_vm1, %v2417_v28, -inf }
 0x1cb   : > { %835 = vmax.xlane.f32.xlu1 %v834_v29  ;;  %826 = vmax.xlane.f32.xlu2 %v825_v30 }
 0x231   : > { %v833_v33 = vpop.xlane.xlu0 %832 }
 0x232   : > { %vm839_vm2 = vcmp.eq.f32.partialorder %v2409_v24, %v833_v33 }
 0x233   : > { %v843_v34 = vsel %vm839_vm2, %v2423_v32, 8 }
 0x234   : > { %v875_v35 = vsel %vm726_vm1, %v843_v34, 2147483647 }
 0x235   : > { %v877_v36 = vshra.s32 %v875_v35, 16  ;;  %v876_v53 = vand.u32 65535, %v875_v35 }
 0x236   : > { %v830_v37 = vpop.xlane.xlu2 %829 }
 0x237   : > { %vm838_vm3 = vcmp.eq.f32.partialorder %v2413_v26, %v830_v37  ;;  %v879_v38 = vcvt.s32.f32 %v877_v36  ;;  %v878_v55 = vcvt.s32.f32 %v876_v53 }
 0x238   : > { %v842_v39 = vsel %vm838_vm3, %v2423_v32, 8 }
 0x239   : > { %v860_v40 = vsel %vm726_vm1, %v842_v39, 2147483647  ;;  %880 = vmin.xlane.f32.xlu0 %v879_v38 }
 0x23a   : > { %v862_v41 = vshra.s32 %v860_v40, 16  ;;  %v861_v57 = vand.u32 65535, %v860_v40 }
 0x23c   : > { %v864_v42 = vcvt.s32.f32 %v862_v41  ;;  %v863_v59 = vcvt.s32.f32 %v861_v57 }
 0x23e   : > { %v836_v43 = vpop.xlane.xlu1 %835  ;;  %865 = vmin.xlane.f32.xlu2 %v864_v42  ;;  %v827_v44 = vpop.xlane.xlu2 %826 }
 0x23f   : > { %vm840_vm4 = vcmp.eq.f32.partialorder %v2417_v28, %v836_v43  ;;  %vm837_vm5 = vcmp.eq.f32.partialorder %v2407_v23, %v827_v44 }
 0x240   : > { %v844_v45 = vsel %vm840_vm4, %v2423_v32, 8  ;;  %v841_v46 = vsel %vm837_vm5, %v2423_v32, 8 }
 0x241   : > { %v890_v47 = vsel %vm726_vm1, %v844_v45, 2147483647  ;;  %v845_v48 = vsel %vm726_vm1, %v841_v46, 2147483647 }
 0x242   : > { %v892_v49 = vshra.s32 %v890_v47, 16  ;;  %v847_v50 = vshra.s32 %v845_v48, 16  ;;  %v891_v60 = vand.u32 65535, %v890_v47  ;;  %v846_v2 = vand.u32 65535, %v845_v48 }
 0x244   : > { %v894_v51 = vcvt.s32.f32 %v892_v49  ;;  %v849_v52 = vcvt.s32.f32 %v847_v50  ;;  %v893_v63 = vcvt.s32.f32 %v891_v60  ;;  %v848_v3 = vcvt.s32.f32 %v846_v2 }
 0x246   : > { %895 = vmin.xlane.f32.xlu1 %v894_v51  ;;  %850 = vmin.xlane.f32.xlu2 %v849_v52 }
 0x2ac   : > { %v881_v54 = vpop.xlane.xlu0 %880 }
 0x2ad   : > { %vm882_vm6 = vcmp.eq.f32.partialorder %v879_v38, %v881_v54  ;;  %v887_v5 = vcvt.f32.s32 %v881_v54 }
 0x2ae   : > { %v883_v56 = vsel %vm882_vm6, %v878_v55, inf }
 0x2af   : > { %884 = vmin.xlane.f32.xlu0 %v883_v56  ;;  %v888_v7 = vshll.u32 %v887_v5, 16 }
 0x2b1   : > { %v866_v58 = vpop.xlane.xlu2 %865 }
 0x2b2   : > { %vm867_vm7 = vcmp.eq.f32.partialorder %v864_v42, %v866_v58  ;;  %v872_v11 = vcvt.f32.s32 %v866_v58 }
 0x2b3   : > { %v868_v61 = vsel %vm867_vm7, %v863_v59, inf }
 0x2b4   : > { %v873_v16 = vshll.u32 %v872_v11, 16 }
 0x2b7   : > { %869 = vmin.xlane.f32.xlu0 %v868_v61 }
 0x2b9   : > { %v896_v62 = vpop.xlane.xlu1 %895  ;;  %v851_v1 = vpop.xlane.xlu2 %850 }
 0x2ba   : > { %vm897_vm8 = vcmp.eq.f32.partialorder %v894_v51, %v896_v62  ;;  %vm852_vm9 = vcmp.eq.f32.partialorder %v849_v52, %v851_v1  ;;  %v902_v21 = vcvt.f32.s32 %v896_v62  ;;  %v857_v34 = vcvt.f32.s32 %v851_v1 }
 0x2bb   : > { %v898_v0 = vsel %vm897_vm8, %v893_v63, inf  ;;  %v853_v4 = vsel %vm852_vm9, %v848_v3, inf }
 0x2bc   : > { %899 = vmin.xlane.f32.xlu1 %v898_v0  ;;  %v903_v27 = vshll.u32 %v902_v21, 16  ;;  %v858_v38 = vshll.u32 %v857_v34, 16 }
 0x2c4   : > { %854 = vmin.xlane.f32.xlu1 %v853_v4 }
 0x322   : > { %v885_v6 = vpop.xlane.xlu0 %884 }
 0x323   : > { %v886_v9 = vcvt.f32.s32 %v885_v6 }
 0x325   : > { %v2437_v10 = vadd.s32 %v888_v7, %v886_v9 }
 0x327   : > { %vm907_vm10 = vcmp.eq.s32.totalorder %v2423_v32, %v2437_v10 }
 0x328   : > { %v2445_v12 = vsel %vm907_vm10, -inf, %v2409_v24 }
 0x329   : > { %v923_v13 = vsel %vm726_vm1, %v2445_v12, -inf }
 0x32a   : > { %924 = vmax.xlane.f32.xlu2 %v923_v13  ;;  %v870_v14 = vpop.xlane.xlu0 %869 }
 0x32b   : > { %v871_v19 = vcvt.f32.s32 %v870_v14 }
 0x32d   : > { %v2449_v22 = vadd.s32 %v873_v16, %v871_v19 }
 0x32f   : > { %v900_v25 = vpop.xlane.xlu1 %899  ;;  %vm906_vm11 = vcmp.eq.s32.totalorder %v2423_v32, %v2449_v22 }
 0x330   : > { %v901_v29 = vcvt.f32.s32 %v900_v25  ;;  %v2457_v30 = vsel %vm906_vm11, -inf, %v2413_v26 }
 0x331   : > { %v920_v31 = vsel %vm726_vm1, %v2457_v30, -inf }
 0x332   : > { %v2461_v33 = vadd.s32 %v903_v27, %v901_v29  ;;  %921 = vmax.xlane.f32.xlu1 %v920_v31 }
 0x334   : > { %vm908_vm12 = vcmp.eq.s32.totalorder %v2423_v32, %v2461_v33 }
 0x335   : > { %v2469_v35 = vsel %vm908_vm12, -inf, %v2417_v28 }
 0x336   : > { %v926_v36 = vsel %vm726_vm1, %v2469_v35, -inf }
 0x337   : > { %v855_v37 = vpop.xlane.xlu1 %854  ;;  %927 = vmax.xlane.f32.xlu0 %v926_v36 }
 0x338   : > { %v856_v39 = vcvt.f32.s32 %v855_v37  ;;  %v2170_v37 = vmov 0.0  }
 0x339   : > { %v910_v10 = vsel %vm906_vm11, 1.0, %v2170_v37 }
 0x33a   : > { %v2473_v40 = vadd.s32 %v858_v38, %v856_v39  ;;  %v911_v38 = vsel %vm907_vm10, 1.0, %v2170_v37 }
 0x33c   : > { %vm905_vm13 = vcmp.eq.s32.totalorder %v2423_v32, %v2473_v40 }
 0x33d   : > { %v2481_v41 = vsel %vm905_vm13, -inf, %v2407_v23 }
 0x33e   : > { %v917_v42 = vsel %vm726_vm1, %v2481_v41, -inf }
 0x33f   : > { %918 = vmax.xlane.f32.xlu2 %v917_v42 }
 0x39d   : > { %v925_v43 = vpop.xlane.xlu2 %924 }
 0x39e   : > { %vm931_vm14 = vcmp.eq.f32.partialorder %v2445_v12, %v925_v43 }
 0x39f   : > { %v935_v44 = vsel %vm931_vm14, %v2423_v32, 8 }
 0x3a0   : > { %v967_v45 = vsel %vm726_vm1, %v935_v44, 2147483647 }
 0x3a1   : > { %v969_v46 = vshra.s32 %v967_v45, 16  ;;  %v968_v63 = vand.u32 65535, %v967_v45 }
 0x3a3   : > { %v971_v47 = vcvt.s32.f32 %v969_v46  ;;  %v970_v1 = vcvt.s32.f32 %v968_v63 }
 0x3a5   : > { %972 = vmin.xlane.f32.xlu0 %v971_v47  ;;  %v922_v48 = vpop.xlane.xlu1 %921 }
 0x3a6   : > { %vm930_vm15 = vcmp.eq.f32.partialorder %v2457_v30, %v922_v48 }
 0x3a7   : > { %v934_v49 = vsel %vm930_vm15, %v2423_v32, 8 }
 0x3a8   : > { %v952_v50 = vsel %vm726_vm1, %v934_v49, 2147483647 }
 0x3a9   : > { %v954_v51 = vshra.s32 %v952_v50, 16  ;;  %v953_v3 = vand.u32 65535, %v952_v50 }
 0x3aa   : > { %v928_v52 = vpop.xlane.xlu0 %927 }
 0x3ab   : > { %vm932_vm2 = vcmp.eq.f32.partialorder %v2469_v35, %v928_v52  ;;  %v956_v53 = vcvt.s32.f32 %v954_v51  ;;  %v955_v5 = vcvt.s32.f32 %v953_v3 }
 0x3ac   : > { %v936_v54 = vsel %vm932_vm2, %v2423_v32, 8 }
 0x3ad   : > { %v982_v55 = vsel %vm726_vm1, %v936_v54, 2147483647  ;;  %957 = vmin.xlane.f32.xlu2 %v956_v53 }
 0x3ae   : > { %v984_v56 = vshra.s32 %v982_v55, 16  ;;  %v983_v6 = vand.u32 65535, %v982_v55 }
 0x3b0   : > { %v986_v57 = vcvt.s32.f32 %v984_v56  ;;  %v985_v11 = vcvt.s32.f32 %v983_v6  ;;  %v912_v56 = vsel %vm908_vm12, 1.0, %v2170_v37 }
 0x3b2   : > { %v919_v58 = vpop.xlane.xlu2 %918  ;;  %987 = vmin.xlane.f32.xlu1 %v986_v57 }
 0x3b3   : > { %vm929_vm3 = vcmp.eq.f32.partialorder %v2481_v41, %v919_v58 }
 0x3b4   : > { %v933_v59 = vsel %vm929_vm3, %v2423_v32, 8 }
 0x3b5   : > { %v937_v60 = vsel %vm726_vm1, %v933_v59, 2147483647 }
 0x3b6   : > { %v939_v61 = vshra.s32 %v937_v60, 16  ;;  %v938_v14 = vand.u32 65535, %v937_v60 }
 0x3b8   : > { %v941_v62 = vcvt.s32.f32 %v939_v61  ;;  %v940_v19 = vcvt.s32.f32 %v938_v14 }
 0x3ba   : > { %942 = vmin.xlane.f32.xlu2 %v941_v62 }
 0x418   : > { %v973_v0 = vpop.xlane.xlu0 %972 }
 0x419   : > { %vm974_vm4 = vcmp.eq.f32.partialorder %v971_v47, %v973_v0  ;;  %v979_v25 = vcvt.f32.s32 %v973_v0 }
 0x41a   : > { %v975_v2 = vsel %vm974_vm4, %v970_v1, inf }
 0x41b   : > { %976 = vmin.xlane.f32.xlu0 %v975_v2  ;;  %v980_v29 = vshll.u32 %v979_v25, 16 }
 0x420   : > { %v958_v4 = vpop.xlane.xlu2 %957 }
 0x421   : > { %vm959_vm5 = vcmp.eq.f32.partialorder %v956_v53, %v958_v4  ;;  %v964_v36 = vcvt.f32.s32 %v958_v4 }
 0x422   : > { %v960_v7 = vsel %vm959_vm5, %v955_v5, inf }
 0x423   : > { %961 = vmin.xlane.f32.xlu0 %v960_v7  ;;  %v965_v45 = vshll.u32 %v964_v36, 16 }
 0x425   : > { %v988_v9 = vpop.xlane.xlu1 %987 }
 0x426   : > { %vm989_vm6 = vcmp.eq.f32.partialorder %v986_v57, %v988_v9  ;;  %v994_v47 = vcvt.f32.s32 %v988_v9 }
 0x427   : > { %v990_v13 = vsel %vm989_vm6, %v985_v11, inf }
 0x428   : > { %991 = vmin.xlane.f32.xlu1 %v990_v13  ;;  %v995_v50 = vshll.u32 %v994_v47, 16 }
 0x42d   : > { %v943_v16 = vpop.xlane.xlu2 %942 }
 0x42e   : > { %vm944_vm7 = vcmp.eq.f32.partialorder %v941_v62, %v943_v16  ;;  %v949_v55 = vcvt.f32.s32 %v943_v16  ;;  %v909_v62 = vsel %vm905_vm13, 1.0, %v2170_v37 }
 0x42f   : > { %v945_v21 = vsel %vm944_vm7, %v940_v19, inf }
 0x430   : > { %946 = vmin.xlane.f32.xlu1 %v945_v21  ;;  %v950_v59 = vshll.u32 %v949_v55, 16 }
 0x48e   : > { %v977_v27 = vpop.xlane.xlu0 %976 }
 0x48f   : > { %v978_v31 = vcvt.f32.s32 %v977_v27 }
 0x491   : > { %v981_v34 = vadd.s32 %v980_v29, %v978_v31 }
 0x493   : > { %vm999_vm8 = vcmp.eq.s32.totalorder %v2423_v32, %v981_v34 }
 0x494   : > { %v1007_v39 = vsel %vm999_vm8, -inf, %v2445_v12  ;;  %v2502_v42 = vsel %vm999_vm8, 1.0, %v911_v38 }
 0x495   : > { %v1015_v43 = vsel %vm726_vm1, %v1007_v39, -inf }
 0x496   : > { %1016 = vmax.xlane.f32.xlu2 %v1015_v43  ;;  %v962_v44 = vpop.xlane.xlu0 %961 }
 0x497   : > { %v963_v46 = vcvt.f32.s32 %v962_v44 }
 0x499   : > { %v966_v48 = vadd.s32 %v965_v45, %v963_v46 }
 0x49b   : > { %v992_v49 = vpop.xlane.xlu1 %991  ;;  %vm998_vm9 = vcmp.eq.s32.totalorder %v2423_v32, %v966_v48 }
 0x49c   : > { %v993_v51 = vcvt.f32.s32 %v992_v49  ;;  %v1006_v12 = vsel %vm998_vm9, -inf, %v2457_v30  ;;  %v2510_v52 = vsel %vm998_vm9, 1.0, %v910_v10 }
 0x49d   : > { %v1012_v53 = vsel %vm726_vm1, %v1006_v12, -inf }
 0x49e   : > { %v996_v54 = vadd.s32 %v995_v50, %v993_v51  ;;  %1013 = vmax.xlane.f32.xlu1 %v1012_v53 }
 0x4a0   : > { %vm1000_vm10 = vcmp.eq.s32.totalorder %v2423_v32, %v996_v54 }
 0x4a1   : > { %v2517_v22 = vsel %vm1000_vm10, 1.0, %v912_v56  ;;  %v1008_v57 = vsel %vm1000_vm10, -inf, %v2469_v35 }
 0x4a2   : > { %v1018_v58 = vsel %vm726_vm1, %v1008_v57, -inf }
 0x4a3   : > { %v947_v30 = vpop.xlane.xlu1 %946  ;;  %1019 = vmax.xlane.f32.xlu0 %v1018_v58 }
 0x4a4   : > { %v948_v60 = vcvt.f32.s32 %v947_v30 }
 0x4a6   : > { %v951_v61 = vadd.s32 %v950_v59, %v948_v60 }
 0x4a8   : > { %vm997_vm11 = vcmp.eq.s32.totalorder %v2423_v32, %v951_v61 }
 0x4a9   : > { %v2525_v33 = vsel %vm997_vm11, 1.0, %v909_v62  ;;  %v1005_v63 = vsel %vm997_vm11, -inf, %v2481_v41 }
 0x4aa   : > { %v1009_v0 = vsel %vm726_vm1, %v1005_v63, -inf }
 0x4ab   : > { %1010 = vmax.xlane.f32.xlu2 %v1009_v0 }
 0x509   : > { %v1017_v35 = vpop.xlane.xlu2 %1016 }
 0x50a   : > { %vm1023_vm12 = vcmp.eq.f32.partialorder %v1007_v39, %v1017_v35 }
 0x50b   : > { %v1027_v1 = vsel %vm1023_vm12, %v2423_v32, 8 }
 0x50c   : > { %v1059_v2 = vsel %vm726_vm1, %v1027_v1, 2147483647 }
 0x50d   : > { %v1061_v3 = vshra.s32 %v1059_v2, 16  ;;  %v1060_v31 = vand.u32 65535, %v1059_v2 }
 0x50f   : > { %v1063_v4 = vcvt.s32.f32 %v1061_v3  ;;  %v1062_v36 = vcvt.s32.f32 %v1060_v31 }
 0x511   : > { %1064 = vmin.xlane.f32.xlu0 %v1063_v4  ;;  %v1014_v40 = vpop.xlane.xlu1 %1013 }
 0x512   : > { %vm1022_vm13 = vcmp.eq.f32.partialorder %v1006_v12, %v1014_v40 }
 0x513   : > { %v1026_v5 = vsel %vm1022_vm13, %v2423_v32, 8 }
 0x514   : > { %v1044_v6 = vsel %vm726_vm1, %v1026_v5, 2147483647 }
 0x515   : > { %v1046_v7 = vshra.s32 %v1044_v6, 16  ;;  %v1045_v38 = vand.u32 65535, %v1044_v6 }
 0x516   : > { %v1020_v41 = vpop.xlane.xlu0 %1019 }
 0x517   : > { %vm1024_vm14 = vcmp.eq.f32.partialorder %v1008_v57, %v1020_v41  ;;  %v1048_v9 = vcvt.s32.f32 %v1046_v7  ;;  %v1047_v43 = vcvt.s32.f32 %v1045_v38 }
 0x518   : > { %v1028_v11 = vsel %vm1024_vm14, %v2423_v32, 8  ;;  %vm1266_vm14 = vcmask 130048  }
 0x519   : > { %v1074_v13 = vsel %vm726_vm1, %v1028_v11, 2147483647  ;;  %1049 = vmin.xlane.f32.xlu2 %v1048_v9 }
 0x51a   : > { %v1076_v14 = vshra.s32 %v1074_v13, 16  ;;  %v1075_v44 = vand.u32 65535, %v1074_v13 }
 0x51c   : > { %v1078_v16 = vcvt.s32.f32 %v1076_v14  ;;  %v1077_v47 = vcvt.s32.f32 %v1075_v44  ;;  %v1757_v44 = vpack.i.bf16 %v2401_v20, %v2392_v17 }
 0x51e   : > { %v1011_v19 = vpop.xlane.xlu2 %1010  ;;  %1079 = vmin.xlane.f32.xlu1 %v1078_v16 }
 0x51f   : > { %vm1021_vm15 = vcmp.eq.f32.partialorder %v1005_v63, %v1011_v19 }
 0x520   : > { %v1025_v21 = vsel %vm1021_vm15, %v2423_v32, 8  ;;  %vm1268_vm15 = vcmask 195584  }
 0x521   : > { %v1029_v25 = vsel %vm726_vm1, %v1025_v21, 2147483647 }
 0x522   : > { %v1031_v27 = vshra.s32 %v1029_v25, 16  ;;  %v1030_v49 = vand.u32 65535, %v1029_v25 }
 0x524   : > { %v1033_v29 = vcvt.s32.f32 %v1031_v27  ;;  %v1032_v50 = vcvt.s32.f32 %v1030_v49 }
 0x526   : > { %1034 = vmin.xlane.f32.xlu2 %v1033_v29 }
 0x584   : > { %v1065_v34 = vpop.xlane.xlu0 %1064 }
 0x585   : > { %vm1066_vm2 = vcmp.eq.f32.partialorder %v1063_v4, %v1065_v34  ;;  %v1071_v12 = vcvt.f32.s32 %v1065_v34 }
 0x586   : > { %v1067_v37 = vsel %vm1066_vm2, %v1062_v36, inf }
 0x587   : > { %1068 = vmin.xlane.f32.xlu0 %v1067_v37  ;;  %v1072_v54 = vshll.u32 %v1071_v12, 16 }
 0x58c   : > { %v1050_v39 = vpop.xlane.xlu2 %1049 }
 0x58d   : > { %vm1051_vm3 = vcmp.eq.f32.partialorder %v1048_v9, %v1050_v39  ;;  %v1056_v57 = vcvt.f32.s32 %v1050_v39 }
 0x58e   : > { %v1052_v45 = vsel %vm1051_vm3, %v1047_v43, inf }
 0x58f   : > { %1053 = vmin.xlane.f32.xlu0 %v1052_v45  ;;  %v1057_v60 = vshll.u32 %v1056_v57, 16 }
 0x591   : > { %v1080_v46 = vpop.xlane.xlu1 %1079 }
 0x592   : > { %vm1081_vm4 = vcmp.eq.f32.partialorder %v1078_v16, %v1080_v46  ;;  %v1086_v63 = vcvt.f32.s32 %v1080_v46 }
 0x593   : > { %v1082_v48 = vsel %vm1081_vm4, %v1077_v47, inf }
 0x594   : > { %1083 = vmin.xlane.f32.xlu1 %v1082_v48  ;;  %v1087_v1 = vshll.u32 %v1086_v63, 16 }
 0x599   : > { %v1035_v10 = vpop.xlane.xlu2 %1034 }
 0x59a   : > { %vm1036_vm5 = vcmp.eq.f32.partialorder %v1033_v29, %v1035_v10  ;;  %v1041_v40 = vcvt.f32.s32 %v1035_v10 }
 0x59b   : > { %v1037_v51 = vsel %vm1036_vm5, %v1032_v50, inf }
 0x59c   : > { %1038 = vmin.xlane.f32.xlu1 %v1037_v51  ;;  %v1042_v41 = vshll.u32 %v1041_v40, 16 }
 0x5fa   : > { %v1069_v53 = vpop.xlane.xlu0 %1068 }
 0x5fb   : > { %v1070_v55 = vcvt.f32.s32 %v1069_v53 }
 0x5fd   : > { %v1073_v56 = vadd.s32 %v1072_v54, %v1070_v55 }
 0x5ff   : > { %vm1091_vm6 = vcmp.eq.s32.totalorder %v2423_v32, %v1073_v56 }
 0x600   : > { %v1095_v58 = vsel %vm1091_vm6, 1.0, %v2502_v42 }
 0x601   : > { %vm1099_vm7 = vcmp.gt.f32.partialorder %v1095_v58, 0.0 }
 0x602   : > { %v1054_v30 = vpop.xlane.xlu0 %1053  ;;  %v1103_v59 = vsel %vm1099_vm7, %v2409_v24, -inf }
 0x603   : > { %v1055_v61 = vcvt.f32.s32 %v1054_v30  ;;  %v1111_v62 = vsel %vm726_vm1, %v1103_v59, -inf }
 0x604   : > { %1112 = vmax.xlane.f32.xlu2 %v1111_v62 }
 0x605   : > { %v1058_v0 = vadd.s32 %v1057_v60, %v1055_v61 }
 0x607   : > { %v1084_v35 = vpop.xlane.xlu1 %1083  ;;  %vm1090_vm8 = vcmp.eq.s32.totalorder %v2423_v32, %v1058_v0 }
 0x608   : > { %v1085_v2 = vcvt.f32.s32 %v1084_v35  ;;  %v1094_v3 = vsel %vm1090_vm8, 1.0, %v2510_v52 }
 0x609   : > { %vm1098_vm9 = vcmp.gt.f32.partialorder %v1094_v3, 0.0 }
 0x60a   : > { %v1088_v42 = vadd.s32 %v1087_v1, %v1085_v2  ;;  %v1102_v4 = vsel %vm1098_vm9, %v2413_v26, -inf }
 0x60b   : > { %v1108_v24 = vsel %vm726_vm1, %v1102_v4, -inf }
 0x60c   : > { %1109 = vmax.xlane.f32.xlu1 %v1108_v24  ;;  %vm1092_vm10 = vcmp.eq.s32.totalorder %v2423_v32, %v1088_v42 }
 0x60d   : > { %v1096_v5 = vsel %vm1092_vm10, 1.0, %v2517_v22 }
 0x60e   : > { %vm1100_vm11 = vcmp.gt.f32.partialorder %v1096_v5, 0.0 }
 0x60f   : > { %v1039_v6 = vpop.xlane.xlu1 %1038  ;;  %v1104_v7 = vsel %vm1100_vm11, %v2417_v28, -inf }
 0x610   : > { %v1040_v9 = vcvt.f32.s32 %v1039_v6  ;;  %v1114_v52 = vsel %vm726_vm1, %v1104_v7, -inf }
 0x611   : > { %1115 = vmax.xlane.f32.xlu0 %v1114_v52 }
 0x612   : > { %v1043_v11 = vadd.s32 %v1042_v41, %v1040_v9 }
 0x614   : > { %vm1089_vm12 = vcmp.eq.s32.totalorder %v2423_v32, %v1043_v11 }
 0x615   : > { %v1093_v26 = vsel %vm1089_vm12, 1.0, %v2525_v33 }
 0x616   : > { %vm1097_vm13 = vcmp.gt.f32.partialorder %v1093_v26, 0.0 }
 0x617   : > { %v1101_v13 = vsel %vm1097_vm13, %v2407_v23, -inf }
 0x618   : > { %v1105_v14 = vsel %vm726_vm1, %v1101_v13, -inf }
 0x619   : > { %1106 = vmax.xlane.f32.xlu2 %v1105_v14  ;;  %v1312_v14 = vld [vmem:[#allocation10 + $0x10] sm:$0xff] }
 0x677   : > { %v1113_v22 = vpop.xlane.xlu2 %1112 }
 0x678   : > { %v1119_v16 = vsub.f32 %v1103_v59, %v1113_v22  ;;  %v1311_v22 = vld [vmem:[#allocation10 + $0x8] sm:$0xff] }
 0x67a   : > { %v1125_v19 = vmul.f32 1.442695, %v1119_v16  ;;  %v1310_v16 = vld [vmem:[#allocation10] sm:$0xff] }
 0x67c   : > { %1770 = vpow2.f32 %v1125_v19  ;;  %v1345_v19 = vld [vmem:[#allocation13 + $0x18] sm:$0xff] }
 0x67f   : > { %v1110_v28 = vpop.xlane.xlu1 %1109 }
 0x680   : > { %v1118_v21 = vsub.f32 %v1102_v4, %v1110_v28  ;;  %v2175_v4 = vmov 32.0  }
 0x682   : > { %v1771_v25 = vpop.eup %1770  ;;  %v1123_v27 = vmul.f32 1.442695, %v1118_v21 }
 0x683   : > { %v1135_v29 = vsel %vm726_vm1, %v1771_v25, 0.0 }
 0x684   : > { %1772 = vpow2.f32 %v1123_v27  ;;  %1136 = vadd.xlane.f32.xlu0 %v1135_v29  ;;  %v1116_v32 = vpop.xlane.xlu0 %1115 }
 0x685   : > { %v1120_v33 = vsub.f32 %v1104_v7, %v1116_v32 }
 0x687   : > { %v1127_v31 = vmul.f32 1.442695, %v1120_v33 }
 0x689   : > { %1774 = vpow2.f32 %v1127_v31 }
 0x68a   : > { %v1773_v23 = vpop.eup %1772 }
 0x68b   : > { %v1132_v34 = vsel %vm726_vm1, %v1773_v23, 0.0 }
 0x68c   : > { %v1107_v36 = vpop.xlane.xlu2 %1106  ;;  %1133 = vadd.xlane.f32.xlu2 %v1132_v34  ;;  %v1764_v34 = vld [vmem:[#allocation7] ss:$0 sm:$0xff] }
 0x68d   : > { %v1117_v37 = vsub.f32 %v1101_v13, %v1107_v36 }
 0x68f   : > { %v1775_v38 = vpop.eup %1774  ;;  %v1121_v39 = vmul.f32 1.442695, %v1117_v37 }
 0x690   : > { %v1138_v43 = vsel %vm726_vm1, %v1775_v38, 0.0 }
 0x691   : > { %1776 = vpow2.f32 %v1121_v39  ;;  %1139 = vadd.xlane.f32.xlu1 %v1138_v43 }
 0x697   : > { %v1777_v45 = vpop.eup %1776 }
 0x698   : > { %1758 = vrot.lane.b32.xlu0 %v1757_v44, %s2171_s24  ;;  %v1129_v46 = vsel %vm726_vm1, %v1777_v45, 0.0  ;;  %v1344_v44 = vld [vmem:[#allocation13 + $0x10] sm:$0xff] }
 0x699   : > { %1130 = vadd.xlane.f32.xlu2 %v1129_v46  ;;  %v1342_v46 = vld [vmem:[#allocation13] sm:$0xff] }
 0x6aa   : > { %1175 = vrot.lane.b32.xlu1 %v2394_v18, %s2171_s24 }
 0x6b1   : > { %1149 = vrot.lane.b32.xlu2 %v2384_v15, %s2171_s24 }
 0x6f7   : > { %v1137_v47 = vpop.xlane.xlu0 %1136 }
 0x6f8   : > { %1778 = vrcp.f32 %v1137_v47  ;;  %v1766_v47 = vld [vmem:[#allocation12] ss:$0 sm:$0xff] }
 0x6fe   : > { %v1779_v10 = vpop.eup %1778 }
 0x6ff   : > { %v1134_v48 = vpop.xlane.xlu2 %1133  ;;  %v1147_v20 = vmul.f32 %v1779_v10, %v1771_v25 }
 0x704   : > { %v1140_v49 = vpop.xlane.xlu1 %1139 }
 0x705   : > { %1780 = vrcp.f32 %v1140_v49 }
 0x70a   : > { %v1759_v50 = vpop.permute.xlu0 %1758 }
 0x70b   : > { %v1781_v51 = vpop.eup %1780  ;;  %v1761_v12 = vunpack.i.h.bf16 %v1759_v50  ;;  %v1760_v17 = vunpack.i.l.bf16 %v1759_v50  ;;  %v1767_v50 = vld [vmem:[#allocation15] ss:$0 sm:$0xff] }
 0x70c   : > { %v1148_v53 = vmul.f32 %v1781_v51, %v1775_v38  ;;  %v1131_v54 = vpop.xlane.xlu2 %1130  ;;  %v1765_v38 = vld [vmem:[#allocation9] ss:$0 sm:$0xff] }
 0x70d   : > { %1782 = vrcp.f32 %v1131_v54  ;;  %1222 = vmatpush.msra.mxu2 %v1760_v17  ;;  %1248 = vmatpush.msra.mxu3 %v1761_v12 }
 0x70e   : > { %1621 = vmatmul.msk.f32.vlgmr.msra.gmra.mxu2 %vm726_vm1, %v1147_v20  ;;  %1622 = vmatmul.msk.f32.vlgmr.msra.gmra.mxu3 %vm726_vm1, %v1148_v53  ;;  %1784 = vrcp.f32 %v1134_v48 }
 0x70f   : > { %1786 = vrcp.f32 %v2175_v4 }
 0x713   : > { %v1783_v15 = vpop.eup %1782 }
 0x714   : > { %v1150_v18 = vpop.permute.xlu2 %1149  ;;  %v1145_v55 = vmul.f32 %v1783_v15, %v1777_v45  ;;  %v1785_v56 = vpop.eup %1784  ;;  %v1343_v45 = vld [vmem:[#allocation13 + $0x8] sm:$0xff] }
 0x715   : > { %1170 = vmatpush.msrb.mxu0 %v1150_v18  ;;  %v1146_v58 = vmul.f32 %v1785_v56, %v1773_v23  ;;  %v1787_v24 = vpop.eup %1786 }
 0x716   : > { %1619 = vmatmul.msk.f32.vlgmr.msrb.gmra.mxu0 %vm726_vm1, %v1145_v55  ;;  %v1277_v40 = vmul.f32 32.0, %v1787_v24  ;;  %vm1281_vm2 = vweird.f32 %v1787_v24 }
 0x718   : > { %v1278_v5 = vsub.f32 1.0, %v1277_v40 }
 0x71a   : > { %v1279_v6 = vmul.f32 %v1787_v24, %v1278_v5 }
 0x71c   : > { %v1176_v57 = vpop.permute.xlu1 %1175  ;;  %v1280_v7 = vadd.f32 %v1787_v24, %v1279_v6 }
 0x71d   : > { %1196 = vmatpush.msrb.mxu1 %v1176_v57 }
 0x71e   : > { %1620 = vmatmul.msk.f32.vlgmr.msrb.gmra.mxu1 %vm726_vm1, %v1146_v58  ;;  %v1282_v41 = vsel %vm1281_vm2, %v1787_v24, %v1280_v7 }
 0x71f   : > { %1365 = vmatpush.msra.mxu1 %v1345_v19 }
 0x721   : > { %1366 = vmatpush.msra.mxu1 %v1344_v44 }
 0x723   : > { %1367 = vmatpush.msra.mxu1 %v1343_v45 }
 0x725   : > { %1368 = vmatpush.msra.mxu1 %v1342_v46 }
 0x791   : > { %v1224_v30 = vpop.f32.mrf.mxu2  ;;  %v1250_v60 = vpop.f32.mrf.mxu3 }
 0x792   : > { %1258 = vrot.lane.b32.xlu1 %v1224_v30, %s2172_s30 }
 0x793   : > { %v1172_v62 = vpop.f32.mrf.mxu0 }
 0x79b   : > { %v1198_v59 = vpop.f32.mrf.mxu1 }
 0x79c   : > { %1254 = vrot.lane.b32.xlu0 %v1198_v59, %s2173_s19 }
 0x7a4   : > { %1262 = vrot.lane.b32.xlu0 %v1250_v60, %s2174_s28 }
 0x804   : > { %v1259_v0 = vpop.permute.xlu1 %1258 }
 0x80e   : > { %v1255_v61 = vpop.permute.xlu0 %1254 }
 0x80f   : > { %v1265_v63 = vsel %vm726_vm1, %v1172_v62, %v1255_v61 }
 0x810   : > { %v1267_v1 = vsel %vm1266_vm14, %v1265_v63, %v1259_v0  ;;  %v1768_v0 = vld [vmem:[#allocation16] ss:$0 sm:$0xff] }
 0x816   : > { %v1263_v35 = vpop.permute.xlu0 %1262 }
 0x817   : > { %v1269_v2 = vsel %vm1268_vm15, %v1267_v1, %v1263_v35  ;;  %v1769_v1 = vld [vmem:[#allocation18] ss:$0 sm:$0xff] }
 0x818   : > { %v1270_v3 = vadd.f32 %v1269_v2, %v2379_v8  ;;  %v1313_v8 = vld [vmem:[#allocation10 + $0x18] sm:$0xff] }
 0x819   : > { %1333 = vmatpush.msra.mxu0 %v1313_v8 }
 0x81a   : > { %v1273_v42 = vsel %vm656_vm0, %v1270_v3, 0.0 }
 0x81b   : > { %1274 = vadd.xlane.f32.xlu1 %v1273_v42  ;;  %1334 = vmatpush.msra.mxu0 %v1312_v14 }
 0x81d   : > { %1335 = vmatpush.msra.mxu0 %v1311_v22 }
 0x81f   : > { %1336 = vmatpush.msra.mxu0 %v1310_v16 }
 0x88e   : > { %v1275_v9 = vpop.xlane.xlu1 %1274 }
 0x88f   : > { %v1283_v52 = vmul.f32 %v1282_v41, %v1275_v9 }
 0x891   : > { %v1284_v11 = vsub.f32 %v1270_v3, %v1283_v52 }
 0x893   : > { %v1285_v26 = vmul.f32 %v1284_v11, %v1284_v11 }
 0x895   : > { %v1286_v13 = vsel %vm656_vm0, %v1285_v26, 0.0 }
 0x896   : > { %1287 = vadd.xlane.f32.xlu0 %v1286_v13 }
 0x909   : > { %v1288_v28 = vpop.xlane.xlu0 %1287 }
 0x90a   : > { %v1289_v21 = vmul.f32 %v1288_v28, %v1282_v41 }
 0x90c   : > { %v1290_v25 = vadd.f32 1e-05, %v1289_v21 }
 0x90e   : > { %1788 = vrsqrt.f32 %v1290_v25  ;;  %vm1297_vm3 = vweird.f32 %v1290_v25 }
 0x914   : > { %v1789_v27 = vpop.eup %1788 }
 0x915   : > { %v1292_v29 = vmul.f32 %v1789_v27, %v1290_v25  ;;  %vm1298_vm1 = vweird.f32 %v1789_v27 }
 0x916   : > { %vm1299_vm4 = vmor %vm1297_vm3, %vm1298_vm1 }
 0x917   : > { %v1293_v32 = vmul.f32 %v1789_v27, %v1292_v29 }
 0x919   : > { %v1294_v33 = vmul.f32 0.5, %v1293_v32 }
 0x91b   : > { %v1295_v31 = vsub.f32 1.5, %v1294_v33 }
 0x91d   : > { %v1296_v23 = vmul.f32 %v1789_v27, %v1295_v31 }
 0x91f   : > { %v1300_v36 = vsel %vm1299_vm4, %v1789_v27, %v1296_v23 }
 0x920   : > { %v1301_v37 = vmul.f32 %v1300_v36, %v1284_v11 }
 0x922   : > { %v1305_v39 = vmul.f32 %v1764_v34, %v1301_v37 }
 0x924   : > { %v1309_v43 = vadd.f32 %v1765_v38, %v1305_v39 }
 0x926   : > { %1623 = vmatmul.msk.f32.vlgmr.msra.gmra.mxu0 %vm656_vm0, %v1309_v43 }
 0x9a3   : > { %v1338_v48 = vpop.f32.mrf.mxu0 }
 0x9a4   : > { %v1339_v49 = vadd.f32 %v1766_v47, %v1338_v48 }
 0x9a6   : > { %v1341_v10 = vmax.f32 %v1339_v49, 0.0 }
 0x9a8   : > { %1624 = vmatmul.msk.f32.vlgmr.msra.gmra.mxu1 %vm656_vm0, %v1341_v10 }
 0xa25   : > { %v1370_v51 = vpop.f32.mrf.mxu1 }
 0xa26   : > { %v1371_v12 = vadd.f32 %v1767_v50, %v1370_v51 }
 0xa28   : > { %v1373_v17 = vadd.f32 %v1371_v12, %v1309_v43 }
 0xa2a   : > { %v1376_v20 = vsel %vm656_vm0, %v1373_v17, 0.0 }
 0xa2b   : > { %1377 = vadd.xlane.f32.xlu2 %v1376_v20 }
 0xa9e   : > { %v1378_v53 = vpop.xlane.xlu2 %1377 }
 0xa9f   : > { %v1379_v54 = vmul.f32 %v1378_v53, %v1282_v41 }
 0xaa1   : > { %v1380_v15 = vsub.f32 %v1373_v17, %v1379_v54 }
 0xaa3   : > { %v1381_v18 = vmul.f32 %v1380_v15, %v1380_v15 }
 0xaa5   : > { %v1382_v55 = vsel %vm656_vm0, %v1381_v18, 0.0 }
 0xaa6   : > { %1383 = vadd.xlane.f32.xlu1 %v1382_v55 }
 0xb19   : > { %v1384_v56 = vpop.xlane.xlu1 %1383 }
 0xb1a   : > { %v1385_v57 = vmul.f32 %v1384_v56, %v1282_v41 }
 0xb1c   : > { %v1386_v58 = vadd.f32 1e-05, %v1385_v57 }
 0xb1e   : > { %1790 = vrsqrt.f32 %v1386_v58  ;;  %vm1393_vm6 = vweird.f32 %v1386_v58 }
 0xb24   : > { %v1791_v30 = vpop.eup %1790 }
 0xb25   : > { %v1388_v59 = vmul.f32 %v1791_v30, %v1386_v58  ;;  %vm1394_vm5 = vweird.f32 %v1791_v30 }
 0xb26   : > { %vm1395_vm7 = vmor %vm1393_vm6, %vm1394_vm5 }
 0xb27   : > { %v1389_v60 = vmul.f32 %v1791_v30, %v1388_v59 }
 0xb29   : > { %v1390_v61 = vmul.f32 0.5, %v1389_v60 }
 0xb2b   : > { %v1391_v62 = vsub.f32 1.5, %v1390_v61 }
 0xb2d   : > { %v1392_v63 = vmul.f32 %v1791_v30, %v1391_v62 }
 0xb2f   : > { %v1396_v35 = vsel %vm1395_vm7, %v1791_v30, %v1392_v63 }
 0xb30   : > { %v1397_v2 = vmul.f32 %v1396_v35, %v1380_v15 }
 0xb32   : > { %v1401_v3 = vmul.f32 %v1768_v0, %v1397_v2 }
 0xb34   : > { %v1405_v42 = vadd.f32 %v1769_v1, %v1401_v3 }
 0xb36   : > { %1406 = vst.msk [vmem:[%s645_s25] sm:$0xff] %vm656_vm0, %v1405_v42 }
 0xb37 PF: > { %s30_s29 = sadd.s32 1, %s2152_s29  }
 0xb38   : > { %p27_p7 = scmp.ge.s32.totalorder %s30_s29, 4  }
 0xb3a   :  { %29 = sbr.rel (!%p27_p7) target bundleno = 10 (0xa), region = 154 }
 0xb3f   :  { %1426 = vsyncpa [#allocation3], 1 }
 0xb40   :  { %1428 = vsyncpa [#allocation3 + $0x1], 1 }
 0xb41   :  { %1429 = vsyncpa [#allocation5], 1 }
 0xb42   :  { %1430 = vsyncpa [#allocation8], 1 }
 0xb43   :  { %1431 = vsyncpa [#allocation11], 1 }
 0xb44   :  { %1432 = vsyncpa [#allocation14], 1 }
 0xb45   :  { %1433 = vsyncpa [#allocation17], 1 }

// kernel: tag_encoder_fwd.25
= control target key start
LH: loop header
LB: loop body
LE: loop exit
PB: predicated region body
PF: predicated region fallthrough
CT: control target
= control target key end

     0   :  { %16 = vsyncpa [#allocation3], 0  ;;  %s1415_s0 = inlined_call_operand.vmem [shape: f32[8,8], index: 0, kind: input, shape index: {}]   ;;  %s1416_s1 = inlined_call_operand.vmem [shape: f32[2,8,32], index: 1, kind: input, shape index: {}, may-alias: {1,2}]   ;;  %s1417_s2 = inlined_call_operand.vmem [shape: f32[2,8,32], index: 2, kind: input, shape index: {}, may-alias: {1,2}]   ;;  %s1418_s3 = inlined_call_operand.hbm [shape: f32[1,32], index: 3, kind: input, shape index: {}]   ;;  %s1419_s4 = inlined_call_operand.hbm [shape: f32[1,32], index: 4, kind: input, shape index: {}]   ;;  %s1420_s5 = inlined_call_operand.hbm [shape: f32[32,32], index: 5, kind: input, shape index: {}]   ;;  %s1421_s6 = inlined_call_operand.hbm [shape: f32[1,32], index: 6, kind: input, shape index: {}]   ;;  %s1422_s7 = inlined_call_operand.hbm [shape: f32[32,32], index: 7, kind: input, shape index: {}]   ;;  %s1423_s8 = inlined_call_operand.hbm [shape: f32[1,32], index: 8, kind: input, shape index: {}]   ;;  %s1424_s9 = inlined_call_operand.hbm [shape: f32[1,32], index: 9, kind: input, shape index: {}]   ;;  %s1425_s10 = inlined_call_operand.hbm [shape: f32[1,32], index: 10, kind: input, shape index: {}]   ;;  %s1426_s11 = inlined_call_operand.vmem [shape: f32[2,8,32], index: 11, kind: output, shape index: {}]  }
   0x1   :  { %17 = vsyncpa [#allocation5], 0 }
   0x2   :  { %18 = vsyncpa [#allocation8], 0 }
   0x3   :  { %19 = vsyncpa [#allocation11], 0 }
   0x4   :  { %20 = vsyncpa [#allocation14], 0  ;;  %s1301_s17 = smov 0  }
   0x5 LB: > { %s325_s20 = sshll.u32 %s1419_s4, 4  ;;  %s1310_s21 = sadd.s32 4294967295, %s1228_s17   ;;  %s1228_s17 = sphi %s1301_s17, %s26_s17   ;;  %s326_s20 = int_to_ptr.hbm [resolvable:$true] %s325_s20 }
   0x6   : > { %p831_p0 = scmp.ge.s32.totalorder %s1228_s17, 1  ;;  %p298_p1 = scmp.lt.s32.totalorder %s1228_s17, 3 }
   0x7   : > { %p915_p2 = scmp.eq.s32.totalorder %s1310_s21, 0  ;;  %s1230_s23 = smov [#allocation4]  }
   0x8   : > { %p1315_p3 = pnand %p831_p0, %p298_p1  ;;  %s327_s24 = sshll.u32 %s1230_s23, 4  ;;  %s328_s24 = int_to_ptr.vmem [resolvable:$true] %s327_s24 }
   0x9   : > { %s351_s27 = sshll.u32 %s1421_s6, 4  ;;  %s377_s30 = sshll.u32 %s1423_s8, 4  ;;  %s352_s27 = int_to_ptr.hbm [resolvable:$true] %s351_s27  ;;  %s378_s30 = int_to_ptr.hbm [resolvable:$true] %s377_s30 }
   0xa   : > { %p890_p4 = pneg %p1315_p3  ;;  %s1231_s13 = smov [#allocation7]  }
   0xb   : > { %s353_s14 = sshll.u32 %s1231_s13, 4  ;;  %s1232_s15 = smov [#allocation10]   ;;  %s354_s14 = int_to_ptr.vmem [resolvable:$true] %s353_s14 }
   0xc   : > { %p1329_p5 = pnand %p915_p2, %p890_p4  ;;  %s379_s16 = sshll.u32 %s1232_s15, 4  ;;  %s380_s16 = int_to_ptr.vmem [resolvable:$true] %s379_s16 }
   0xd   : > { %s313_s23 = sshll.u32 %s1418_s3, 4  ;;  %s336_s28 = sshll.u32 %s1420_s5, 4  ;;  %s314_s23 = int_to_ptr.hbm [resolvable:$true] %s313_s23  ;;  %s337_s28 = int_to_ptr.hbm [resolvable:$true] %s336_s28 }
   0xe   : > { %896 = dma.hbm_to_vmem [thread:$0]  (!%p1329_p5), %s326_s20, 16, %s328_s24, [#allocation5]  }
   0xf   : > { %902 = dma.hbm_to_vmem [thread:$0]  (!%p1329_p5), %s352_s27, 16, %s354_s14, [#allocation8]  }
  0x10   : > { %908 = dma.hbm_to_vmem [thread:$0]  (!%p1329_p5), %s378_s30, 16, %s380_s16, [#allocation11]  }
  0x11   : > { %s1233_s29 = smov [#allocation2]   ;;  %s1234_s20 = smov [#allocation6]  }
  0x12   : > { %s315_s13 = sshll.u32 %s1233_s29, 4  ;;  %s338_s24 = sshll.u32 %s1234_s20, 4  ;;  %s316_s13 = int_to_ptr.vmem [resolvable:$true] %s315_s13  ;;  %s339_s24 = int_to_ptr.vmem [resolvable:$true] %s338_s24 }
  0x13   : > { %893 = dma.hbm_to_vmem [thread:$0]  (!%p1329_p5), %s314_s23, 16, %s316_s13, [#allocation3]  }
  0x14   : > { %s1235_s27 = smov 128   ;;  %s1236_s14 = smov 8  }
  0x15   : > { %899 = dma.hbm_to_vmem [thread:$0]  (!%p1329_p5), %s337_s28, 512, %s339_s24, [#allocation5], %s1235_s27, %s1235_s27, %s1236_s14  }
  0x16   : > { %s362_s16 = sshll.u32 %s1422_s7, 4  ;;  %s1237_s18 = smov [#allocation9]   ;;  %s363_s16 = int_to_ptr.hbm [resolvable:$true] %s362_s16 }
  0x17   : > { %s364_s19 = sshll.u32 %s1237_s18, 4  ;;  %s389_s23 = sshll.u32 %s1424_s9, 4  ;;  %s365_s19 = int_to_ptr.vmem [resolvable:$true] %s364_s19  ;;  %s390_s23 = int_to_ptr.hbm [resolvable:$true] %s389_s23 }
  0x18   : > { %905 = dma.hbm_to_vmem [thread:$0]  (!%p1329_p5), %s363_s16, 512, %s365_s19, [#allocation8], %s1235_s27, %s1235_s27, %s1236_s14  }
  0x19   : > { %s1238_s29 = smov [#allocation12]   ;;  %s401_s24 = sshll.u32 %s1425_s10, 4  ;;  %s402_s24 = int_to_ptr.hbm [resolvable:$true] %s401_s24 }
  0x1a   : > { %s391_s13 = sshll.u32 %s1238_s29, 4  ;;  %s1239_s30 = smov [#allocation13]   ;;  %s392_s13 = int_to_ptr.vmem [resolvable:$true] %s391_s13 }
  0x1b   : > { %911 = dma.hbm_to_vmem [thread:$0]  (!%p1329_p5), %s390_s23, 16, %s392_s13, [#allocation11]  }
  0x1c   : > { %s403_s15 = sshll.u32 %s1239_s30, 4  ;;  %430 = sbr.rel (%p1315_p3) target bundleno = 980 (0x3d4), region = 64  ;;  %s404_s15 = int_to_ptr.vmem [resolvable:$true] %s403_s15 }
  0x1d   : > { %914 = dma.hbm_to_vmem [thread:$0]  (!%p1329_p5), %s402_s24, 16, %s404_s15, [#allocation14]  }
  0x21   : > { %1207 = dma.done.wait (%p915_p2), [#allocation3], 16  }
  0x22   : > { %1209 = vsyncadd (%p915_p2), [#allocation3], 4294967280 }
  0x23   : > { %1211 = dma.done.wait (%p915_p2), [#allocation5], 528  }
  0x24   : > { %1213 = vsyncadd (%p915_p2), [#allocation5], 4294966768 }
  0x25   : > { %1215 = dma.done.wait (%p915_p2), [#allocation8], 528  }
  0x26   : > { %1217 = vsyncadd (%p915_p2), [#allocation8], 4294966768 }
  0x27   : > { %1219 = dma.done.wait (%p915_p2), [#allocation11], 32  }
  0x28   : > { %1221 = vsyncadd (%p915_p2), [#allocation11], 4294967264 }
  0x29   : > { %1223 = dma.done.wait (%p915_p2), [#allocation14], 16  }
  0x2a   : > { %1225 = vsyncadd (%p915_p2), [#allocation14], 4294967280  ;;  %p508_p6 = scmp.lt.s32.totalorder %s1310_s21, 1  ;;  %vm523_vm0 = vcmask 64512   ;;  %v522_v1 = vld [vmem:[%s1415_s0] sm:$0xff]  ;;  %vm550_vm1 = vcmask 261120  }
  0x2b   : > { %v1240_v6 = vmov 32.0   ;;  %v591_v18 = vld [vmem:[#allocation6 + $0x18] sm:$0xff]  ;;  %v590_v19 = vld [vmem:[#allocation6 + $0x10] sm:$0xff]  ;;  %v589_v20 = vld [vmem:[#allocation6 + $0x8] sm:$0xff] }
  0x2c   : > { %s1430_s21 = smov (!%p508_p6, %s1310_s21), 1  ;;  %956 = vrcp.f32 %v1240_v6  ;;  %611 = vmatpush.msra.mxu1 %v591_v18  ;;  %v588_v21 = vld [vmem:[#allocation6] sm:$0xff]  ;;  %v950_v32 = vld [vmem:[#allocation2] ss:$0 sm:$0xff]  ;;  %v951_v35 = vld [vmem:[#allocation4] ss:$0 sm:$0xff] }
  0x2d   : > { %s1388_s22 = sshll.u32 %s1430_s21, 3  ;;  %v623_v22 = vld [vmem:[#allocation9 + $0x18] sm:$0xff]  ;;  %v622_v38 = vld [vmem:[#allocation9 + $0x10] sm:$0xff]  ;;  %v621_v39 = vld [vmem:[#allocation9 + $0x8] sm:$0xff] }
  0x2e   : > { %s511_s14 = scalar_lea.vmem %s1416_s1, %s1388_s22  ;;  %s515_s26 = scalar_lea.vmem %s1417_s2, %s1388_s22  ;;  %612 = vmatpush.msra.mxu1 %v590_v19  ;;  %643 = vmatpush.msra.mxu2 %v623_v22  ;;  %v620_v40 = vld [vmem:[#allocation9] sm:$0xff]  ;;  %v952_v41 = vld [vmem:[#allocation7] ss:$0 sm:$0xff] }
  0x2f   : > { %v520_v0 = vld [vmem:[%s511_s14] sm:$0xff]  ;;  %s519_s29 = scalar_lea.vmem %s1426_s11, %s1388_s22 }
  0x30   : > { %542 = vmatpush.msra.mxu0 %v520_v0  ;;  %v521_v2 = vld [vmem:[%s515_s26] sm:$0xff]  ;;  %613 = vmatpush.msra.mxu1 %v589_v20  ;;  %v954_v0 = vld [vmem:[#allocation12] ss:$0 sm:$0xff] }
  0x31   : > { %853 = vmatmul.msk.f32.vlgmr.msra.gmra.mxu0 %vm523_vm0, %v522_v1  ;;  %644 = vmatpush.msra.mxu2 %v622_v38  ;;  %v953_v45 = vld [vmem:[#allocation10] ss:$0 sm:$0xff] }
  0x32   : > { %v957_v7 = vpop.eup %956  ;;  %614 = vmatpush.msra.mxu1 %v588_v21 }
  0x33   : > { %v555_v8 = vmul.f32 32.0, %v957_v7  ;;  %vm559_vm2 = vweird.f32 %v957_v7  ;;  %645 = vmatpush.msra.mxu2 %v621_v39 }
  0x35   : > { %v556_v9 = vsub.f32 1.0, %v555_v8  ;;  %646 = vmatpush.msra.mxu2 %v620_v40 }
  0x37   : > { %v557_v10 = vmul.f32 %v957_v7, %v556_v9 }
  0x39   : > { %v558_v11 = vadd.f32 %v957_v7, %v557_v10 }
  0x3b   : > { %v560_v12 = vsel %vm559_vm2, %v957_v7, %v558_v11 }
  0xae   : > { %v544_v3 = vpop.f32.mrf.mxu0 }
  0xaf   : > { %v547_v4 = vadd.f32 %v544_v3, %v521_v2  ;;  %v955_v2 = vld [vmem:[#allocation13] ss:$0 sm:$0xff] }
  0xb1   : > { %v551_v5 = vsel %vm550_vm1, %v547_v4, 0.0 }
  0xb2   : > { %552 = vadd.xlane.f32.xlu0 %v551_v5 }
 0x125   : > { %v553_v13 = vpop.xlane.xlu0 %552 }
 0x126   : > { %v561_v14 = vmul.f32 %v560_v12, %v553_v13 }
 0x128   : > { %v562_v15 = vsub.f32 %v547_v4, %v561_v14 }
 0x12a   : > { %v563_v16 = vmul.f32 %v562_v15, %v562_v15 }
 0x12c   : > { %v564_v17 = vsel %vm550_vm1, %v563_v16, 0.0 }
 0x12d   : > { %565 = vadd.xlane.f32.xlu0 %v564_v17 }
 0x1a0   : > { %v566_v23 = vpop.xlane.xlu0 %565 }
 0x1a1   : > { %v567_v24 = vmul.f32 %v566_v23, %v560_v12 }
 0x1a3   : > { %v568_v25 = vadd.f32 1e-05, %v567_v24 }
 0x1a5   : > { %958 = vrsqrt.f32 %v568_v25  ;;  %vm575_vm4 = vweird.f32 %v568_v25 }
 0x1ab   : > { %v959_v26 = vpop.eup %958 }
 0x1ac   : > { %v570_v27 = vmul.f32 %v959_v26, %v568_v25  ;;  %vm576_vm3 = vweird.f32 %v959_v26 }
 0x1ad   : > { %vm577_vm5 = vmor %vm575_vm4, %vm576_vm3 }
 0x1ae   : > { %v571_v28 = vmul.f32 %v959_v26, %v570_v27 }
 0x1b0   : > { %v572_v29 = vmul.f32 0.5, %v571_v28 }
 0x1b2   : > { %v573_v30 = vsub.f32 1.5, %v572_v29 }
 0x1b4   : > { %v574_v31 = vmul.f32 %v959_v26, %v573_v30 }
 0x1b6   : > { %v578_v33 = vsel %vm577_vm5, %v959_v26, %v574_v31 }
 0x1b7   : > { %v579_v34 = vmul.f32 %v578_v33, %v562_v15 }
 0x1b9   : > { %v583_v36 = vmul.f32 %v950_v32, %v579_v34 }
 0x1bb   : > { %v587_v37 = vadd.f32 %v951_v35, %v583_v36 }
 0x1bd   : > { %854 = vmatmul.msk.f32.vlgmr.msra.gmra.mxu1 %vm550_vm1, %v587_v37 }
 0x23a   : > { %v616_v42 = vpop.f32.mrf.mxu1 }
 0x23b   : > { %v617_v43 = vadd.f32 %v952_v41, %v616_v42 }
 0x23d   : > { %v619_v44 = vmax.f32 %v617_v43, 0.0 }
 0x23f   : > { %855 = vmatmul.msk.f32.vlgmr.msra.gmra.mxu2 %vm550_vm1, %v619_v44 }
 0x2c2   : > { %v648_v46 = vpop.f32.mrf.mxu2 }
 0x2c3   : > { %v649_v47 = vadd.f32 %v953_v45, %v648_v46 }
 0x2c5   : > { %v651_v48 = vadd.f32 %v649_v47, %v587_v37 }
 0x2c7   : > { %v654_v49 = vsel %vm550_vm1, %v651_v48, 0.0 }
 0x2c8   : > { %655 = vadd.xlane.f32.xlu1 %v654_v49 }
 0x33b   : > { %v656_v50 = vpop.xlane.xlu1 %655 }
 0x33c   : > { %v657_v51 = vmul.f32 %v656_v50, %v560_v12 }
 0x33e   : > { %v658_v52 = vsub.f32 %v651_v48, %v657_v51 }
 0x340   : > { %v659_v53 = vmul.f32 %v658_v52, %v658_v52 }
 0x342   : > { %v660_v54 = vsel %vm550_vm1, %v659_v53, 0.0 }
 0x343   : > { %661 = vadd.xlane.f32.xlu1 %v660_v54 }
 0x3b6   : > { %v662_v55 = vpop.xlane.xlu1 %661 }
 0x3b7   : > { %v663_v56 = vmul.f32 %v662_v55, %v560_v12 }
 0x3b9   : > { %v664_v57 = vadd.f32 1e-05, %v663_v56 }
 0x3bb   : > { %960 = vrsqrt.f32 %v664_v57  ;;  %vm671_vm7 = vweird.f32 %v664_v57 }
 0x3c1   : > { %v961_v58 = vpop.eup %960 }
 0x3c2   : > { %v666_v59 = vmul.f32 %v961_v58, %v664_v57  ;;  %vm672_vm6 = vweird.f32 %v961_v58 }
 0x3c3   : > { %vm673_vm8 = vmor %vm671_vm7, %vm672_vm6 }
 0x3c4   : > { %v667_v60 = vmul.f32 %v961_v58, %v666_v59 }
 0x3c6   : > { %v668_v61 = vmul.f32 0.5, %v667_v60 }
 0x3c8   : > { %v669_v62 = vsub.f32 1.5, %v668_v61 }
 0x3ca   : > { %v670_v63 = vmul.f32 %v961_v58, %v669_v62 }
 0x3cc   : > { %v674_v1 = vsel %vm673_vm8, %v961_v58, %v670_v63 }
 0x3cd   : > { %v675_v3 = vmul.f32 %v674_v1, %v658_v52 }
 0x3cf   : > { %v679_v4 = vmul.f32 %v954_v0, %v675_v3 }
 0x3d1   : > { %v683_v5 = vadd.f32 %v955_v2, %v679_v4 }
 0x3d3   : > { %684 = vst.msk [vmem:[%s519_s29] sm:$0xff] %vm550_vm1, %v683_v5 }
 0x3d4 PF: > { %s26_s17 = sadd.s32 1, %s1228_s17  }
 0x3d5   : > { %p23_p7 = scmp.ge.s32.totalorder %s26_s17, 4  }
 0x3d7   :  { %25 = sbr.rel (!%p23_p7) target bundleno = 5 (0x5), region = 130 }
 0x3dc   :  { %704 = vsyncpa [#allocation3], 1 }
 0x3dd   :  { %706 = vsyncpa [#allocation3 + $0x1], 1 }
 0x3de   :  { %707 = vsyncpa [#allocation5], 1 }
 0x3df   :  { %708 = vsyncpa [#allocation8], 1 }
 0x3e0   :  { %709 = vsyncpa [#allocation11], 1 }
 0x3e1   :  { %710 = vsyncpa [#allocation14], 1 }

// kernel: tag_encoder_fwd.27
= control target key start
LH: loop header
LB: loop body
LE: loop exit
PB: predicated region body
PF: predicated region fallthrough
CT: control target
= control target key end

     0   :  { %16 = vsyncpa [#allocation3], 0  ;;  %s1269_s0 = inlined_call_operand.vmem [shape: f32[8,8], index: 0, kind: input, shape index: {}]   ;;  %s1270_s1 = inlined_call_operand.vmem [shape: f32[2,8,32], index: 1, kind: input, shape index: {}]   ;;  %s1271_s2 = inlined_call_operand.vmem [shape: f32[2,8,32], index: 2, kind: input, shape index: {}]   ;;  %s1272_s3 = inlined_call_operand.vmem [shape: f32[1,32], index: 3, kind: input, shape index: {}]   ;;  %s1273_s4 = inlined_call_operand.vmem [shape: f32[1,32], index: 4, kind: input, shape index: {}]   ;;  %s1274_s5 = inlined_call_operand.hbm [shape: f32[32,32], index: 5, kind: input, shape index: {}]   ;;  %s1275_s6 = inlined_call_operand.hbm [shape: f32[1,32], index: 6, kind: input, shape index: {}]   ;;  %s1276_s7 = inlined_call_operand.hbm [shape: f32[32,32], index: 7, kind: input, shape index: {}]   ;;  %s1277_s8 = inlined_call_operand.hbm [shape: f32[1,32], index: 8, kind: input, shape index: {}]   ;;  %s1278_s9 = inlined_call_operand.hbm [shape: f32[1,32], index: 9, kind: input, shape index: {}]   ;;  %s1279_s10 = inlined_call_operand.hbm [shape: f32[1,32], index: 10, kind: input, shape index: {}]   ;;  %s1280_s11 = inlined_call_operand.vmem [shape: f32[2,8,32], index: 11, kind: output, shape index: {}]  }
   0x1   :  { %17 = vsyncpa [#allocation5], 0 }
   0x2   :  { %18 = vsyncpa [#allocation8], 0 }
   0x3   :  { %19 = vsyncpa [#allocation11], 0  ;;  %s1163_s17 = smov 0  }
   0x4 LB: > { %s332_s20 = sshll.u32 %s1275_s6, 4  ;;  %s1172_s21 = sadd.s32 4294967295, %s1092_s17   ;;  %s1092_s17 = sphi %s1163_s17, %s25_s17   ;;  %s333_s20 = int_to_ptr.hbm [resolvable:$true] %s332_s20 }
   0x5   : > { %p783_p0 = scmp.ge.s32.totalorder %s1092_s17, 1  ;;  %p297_p1 = scmp.lt.s32.totalorder %s1092_s17, 3 }
   0x6   : > { %p849_p2 = scmp.eq.s32.totalorder %s1172_s21, 0  ;;  %s1094_s23 = smov [#allocation4]  }
   0x7   : > { %p1177_p3 = pnand %p783_p0, %p297_p1  ;;  %s334_s24 = sshll.u32 %s1094_s23, 4  ;;  %s335_s24 = int_to_ptr.vmem [resolvable:$true] %s334_s24 }
   0x8   : > { %s358_s27 = sshll.u32 %s1277_s8, 4  ;;  %s317_s30 = sshll.u32 %s1274_s5, 4  ;;  %s359_s27 = int_to_ptr.hbm [resolvable:$true] %s358_s27  ;;  %s318_s30 = int_to_ptr.hbm [resolvable:$true] %s317_s30 }
   0x9   : > { %p830_p4 = pneg %p1177_p3  ;;  %s1095_s13 = smov [#allocation7]  }
   0xa   : > { %s360_s14 = sshll.u32 %s1095_s13, 4  ;;  %s1096_s15 = smov [#allocation2]   ;;  %s361_s14 = int_to_ptr.vmem [resolvable:$true] %s360_s14 }
   0xb   : > { %p1191_p5 = pnand %p849_p2, %p830_p4  ;;  %s319_s16 = sshll.u32 %s1096_s15, 4  ;;  %s320_s16 = int_to_ptr.vmem [resolvable:$true] %s319_s16 }
   0xc   : > { %s1097_s18 = smov 128   ;;  %s1098_s19 = smov 8  }
   0xd   : > { %836 = dma.hbm_to_vmem [thread:$0]  (!%p1191_p5), %s333_s20, 16, %s335_s24, [#allocation5]  }
   0xe   : > { %842 = dma.hbm_to_vmem [thread:$0]  (!%p1191_p5), %s359_s27, 16, %s361_s14, [#allocation8]  }
   0xf   : > { %833 = dma.hbm_to_vmem [thread:$0]  (!%p1191_p5), %s318_s30, 512, %s320_s16, [#allocation3], %s1097_s18, %s1097_s18, %s1098_s19  }
  0x10   : > { %s343_s26 = sshll.u32 %s1276_s7, 4  ;;  %s1099_s28 = smov [#allocation6]   ;;  %s344_s26 = int_to_ptr.hbm [resolvable:$true] %s343_s26 }
  0x11   : > { %s345_s29 = sshll.u32 %s1099_s28, 4  ;;  %s370_s27 = sshll.u32 %s1278_s9, 4  ;;  %s346_s29 = int_to_ptr.vmem [resolvable:$true] %s345_s29  ;;  %s371_s27 = int_to_ptr.hbm [resolvable:$true] %s370_s27 }
  0x12   : > { %839 = dma.hbm_to_vmem [thread:$0]  (!%p1191_p5), %s344_s26, 512, %s346_s29, [#allocation5], %s1097_s18, %s1097_s18, %s1098_s19  }
  0x13   : > { %s1100_s13 = smov [#allocation9]   ;;  %s382_s16 = sshll.u32 %s1279_s10, 4  ;;  %s383_s16 = int_to_ptr.hbm [resolvable:$true] %s382_s16 }
  0x14   : > { %s372_s14 = sshll.u32 %s1100_s13, 4  ;;  %s1101_s23 = smov [#allocation10]   ;;  %s373_s14 = int_to_ptr.vmem [resolvable:$true] %s372_s14 }
  0x15   : > { %845 = dma.hbm_to_vmem [thread:$0]  (!%p1191_p5), %s371_s27, 16, %s373_s14, [#allocation8]  }
  0x16   : > { %s384_s25 = sshll.u32 %s1101_s23, 4  ;;  %411 = sbr.rel (%p1177_p3) target bundleno = 972 (0x3cc), region = 64  ;;  %s385_s25 = int_to_ptr.vmem [resolvable:$true] %s384_s25 }
  0x17   : > { %848 = dma.hbm_to_vmem [thread:$0]  (!%p1191_p5), %s383_s16, 16, %s385_s25, [#allocation11]  }
  0x1b   : > { %1075 = dma.done.wait (%p849_p2), [#allocation3], 512  }
  0x1c   : > { %1077 = vsyncadd (%p849_p2), [#allocation3], 4294966784 }
  0x1d   : > { %1079 = dma.done.wait (%p849_p2), [#allocation5], 528  }
  0x1e   : > { %1081 = vsyncadd (%p849_p2), [#allocation5], 4294966768 }
  0x1f   : > { %1083 = dma.done.wait (%p849_p2), [#allocation8], 32  }
  0x20   : > { %1085 = vsyncadd (%p849_p2), [#allocation8], 4294967264 }
  0x21   : > { %1087 = dma.done.wait (%p849_p2), [#allocation11], 16  }
  0x22   : > { %1089 = vsyncadd (%p849_p2), [#allocation11], 4294967280  ;;  %p479_p6 = scmp.lt.s32.totalorder %s1172_s21, 1  ;;  %vm494_vm0 = vcmask 64512   ;;  %v493_v1 = vld [vmem:[%s1269_s0] sm:$0xff]  ;;  %vm521_vm1 = vcmask 261120  }
  0x23   : > { %v1102_v6 = vmov 32.0   ;;  %v562_v18 = vld [vmem:[#allocation2 + $0x18] sm:$0xff]  ;;  %v561_v19 = vld [vmem:[#allocation2 + $0x10] sm:$0xff]  ;;  %v560_v20 = vld [vmem:[#allocation2 + $0x8] sm:$0xff] }
  0x24   : > { %s1284_s21 = smov (!%p479_p6, %s1172_s21), 1  ;;  %884 = vrcp.f32 %v1102_v6  ;;  %582 = vmatpush.msra.mxu1 %v562_v18  ;;  %v559_v21 = vld [vmem:[#allocation2] sm:$0xff]  ;;  %v593_v38 = vld [vmem:[#allocation6 + $0x10] sm:$0xff]  ;;  %v592_v39 = vld [vmem:[#allocation6 + $0x8] sm:$0xff] }
  0x25   : > { %s1236_s22 = sshll.u32 %s1284_s21, 3  ;;  %v594_v22 = vld [vmem:[#allocation6 + $0x18] sm:$0xff]  ;;  %v591_v40 = vld [vmem:[#allocation6] sm:$0xff] }
  0x26   : > { %s482_s19 = scalar_lea.vmem %s1270_s1, %s1236_s22  ;;  %s486_s24 = scalar_lea.vmem %s1271_s2, %s1236_s22  ;;  %583 = vmatpush.msra.mxu1 %v561_v19  ;;  %614 = vmatpush.msra.mxu2 %v594_v22  ;;  %v878_v32 = vld [vmem:[%s1272_s3] ss:$0 sm:$0xff]  ;;  %v881_v45 = vld [vmem:[#allocation7] ss:$0 sm:$0xff] }
  0x27   : > { %v491_v0 = vld [vmem:[%s482_s19] sm:$0xff]  ;;  %s490_s16 = scalar_lea.vmem %s1280_s11, %s1236_s22 }
  0x28   : > { %513 = vmatpush.msra.mxu0 %v491_v0  ;;  %v492_v2 = vld [vmem:[%s486_s24] sm:$0xff]  ;;  %584 = vmatpush.msra.mxu1 %v560_v20 }
  0x29   : > { %801 = vmatmul.msk.f32.vlgmr.msra.gmra.mxu0 %vm494_vm0, %v493_v1  ;;  %v879_v35 = vld [vmem:[%s1273_s4] ss:$0 sm:$0xff]  ;;  %615 = vmatpush.msra.mxu2 %v593_v38  ;;  %v882_v0 = vld [vmem:[#allocation9] ss:$0 sm:$0xff] }
  0x2a   : > { %v885_v7 = vpop.eup %884  ;;  %585 = vmatpush.msra.mxu1 %v559_v21  ;;  %v880_v41 = vld [vmem:[#allocation4] ss:$0 sm:$0xff] }
  0x2b   : > { %v526_v8 = vmul.f32 32.0, %v885_v7  ;;  %vm530_vm2 = vweird.f32 %v885_v7  ;;  %616 = vmatpush.msra.mxu2 %v592_v39 }
  0x2d   : > { %v527_v9 = vsub.f32 1.0, %v526_v8  ;;  %617 = vmatpush.msra.mxu2 %v591_v40 }
  0x2f   : > { %v528_v10 = vmul.f32 %v885_v7, %v527_v9 }
  0x31   : > { %v529_v11 = vadd.f32 %v885_v7, %v528_v10 }
  0x33   : > { %v531_v12 = vsel %vm530_vm2, %v885_v7, %v529_v11 }
  0xa6   : > { %v515_v3 = vpop.f32.mrf.mxu0 }
  0xa7   : > { %v518_v4 = vadd.f32 %v515_v3, %v492_v2  ;;  %v883_v2 = vld [vmem:[#allocation10] ss:$0 sm:$0xff] }
  0xa9   : > { %v522_v5 = vsel %vm521_vm1, %v518_v4, 0.0 }
  0xaa   : > { %523 = vadd.xlane.f32.xlu0 %v522_v5 }
 0x11d   : > { %v524_v13 = vpop.xlane.xlu0 %523 }
 0x11e   : > { %v532_v14 = vmul.f32 %v531_v12, %v524_v13 }
 0x120   : > { %v533_v15 = vsub.f32 %v518_v4, %v532_v14 }
 0x122   : > { %v534_v16 = vmul.f32 %v533_v15, %v533_v15 }
 0x124   : > { %v535_v17 = vsel %vm521_vm1, %v534_v16, 0.0 }
 0x125   : > { %536 = vadd.xlane.f32.xlu0 %v535_v17 }
 0x198   : > { %v537_v23 = vpop.xlane.xlu0 %536 }
 0x199   : > { %v538_v24 = vmul.f32 %v537_v23, %v531_v12 }
 0x19b   : > { %v539_v25 = vadd.f32 1e-05, %v538_v24 }
 0x19d   : > { %886 = vrsqrt.f32 %v539_v25  ;;  %vm546_vm4 = vweird.f32 %v539_v25 }
 0x1a3   : > { %v887_v26 = vpop.eup %886 }
 0x1a4   : > { %v541_v27 = vmul.f32 %v887_v26, %v539_v25  ;;  %vm547_vm3 = vweird.f32 %v887_v26 }
 0x1a5   : > { %vm548_vm5 = vmor %vm546_vm4, %vm547_vm3 }
 0x1a6   : > { %v542_v28 = vmul.f32 %v887_v26, %v541_v27 }
 0x1a8   : > { %v543_v29 = vmul.f32 0.5, %v542_v28 }
 0x1aa   : > { %v544_v30 = vsub.f32 1.5, %v543_v29 }
 0x1ac   : > { %v545_v31 = vmul.f32 %v887_v26, %v544_v30 }
 0x1ae   : > { %v549_v33 = vsel %vm548_vm5, %v887_v26, %v545_v31 }
 0x1af   : > { %v550_v34 = vmul.f32 %v549_v33, %v533_v15 }
 0x1b1   : > { %v554_v36 = vmul.f32 %v878_v32, %v550_v34 }
 0x1b3   : > { %v558_v37 = vadd.f32 %v879_v35, %v554_v36 }
 0x1b5   : > { %802 = vmatmul.msk.f32.vlgmr.msra.gmra.mxu1 %vm521_vm1, %v558_v37 }
 0x232   : > { %v587_v42 = vpop.f32.mrf.mxu1 }
 0x233   : > { %v588_v43 = vadd.f32 %v880_v41, %v587_v42 }
 0x235   : > { %v590_v44 = vmax.f32 %v588_v43, 0.0 }
 0x237   : > { %803 = vmatmul.msk.f32.vlgmr.msra.gmra.mxu2 %vm521_vm1, %v590_v44 }
 0x2ba   : > { %v619_v46 = vpop.f32.mrf.mxu2 }
 0x2bb   : > { %v620_v47 = vadd.f32 %v881_v45, %v619_v46 }
 0x2bd   : > { %v622_v48 = vadd.f32 %v620_v47, %v558_v37 }
 0x2bf   : > { %v625_v49 = vsel %vm521_vm1, %v622_v48, 0.0 }
 0x2c0   : > { %626 = vadd.xlane.f32.xlu1 %v625_v49 }
 0x333   : > { %v627_v50 = vpop.xlane.xlu1 %626 }
 0x334   : > { %v628_v51 = vmul.f32 %v627_v50, %v531_v12 }
 0x336   : > { %v629_v52 = vsub.f32 %v622_v48, %v628_v51 }
 0x338   : > { %v630_v53 = vmul.f32 %v629_v52, %v629_v52 }
 0x33a   : > { %v631_v54 = vsel %vm521_vm1, %v630_v53, 0.0 }
 0x33b   : > { %632 = vadd.xlane.f32.xlu1 %v631_v54 }
 0x3ae   : > { %v633_v55 = vpop.xlane.xlu1 %632 }
 0x3af   : > { %v634_v56 = vmul.f32 %v633_v55, %v531_v12 }
 0x3b1   : > { %v635_v57 = vadd.f32 1e-05, %v634_v56 }
 0x3b3   : > { %888 = vrsqrt.f32 %v635_v57  ;;  %vm642_vm7 = vweird.f32 %v635_v57 }
 0x3b9   : > { %v889_v58 = vpop.eup %888 }
 0x3ba   : > { %v637_v59 = vmul.f32 %v889_v58, %v635_v57  ;;  %vm643_vm6 = vweird.f32 %v889_v58 }
 0x3bb   : > { %vm644_vm8 = vmor %vm642_vm7, %vm643_vm6 }
 0x3bc   : > { %v638_v60 = vmul.f32 %v889_v58, %v637_v59 }
 0x3be   : > { %v639_v61 = vmul.f32 0.5, %v638_v60 }
 0x3c0   : > { %v640_v62 = vsub.f32 1.5, %v639_v61 }
 0x3c2   : > { %v641_v63 = vmul.f32 %v889_v58, %v640_v62 }
 0x3c4   : > { %v645_v1 = vsel %vm644_vm8, %v889_v58, %v641_v63 }
 0x3c5   : > { %v646_v3 = vmul.f32 %v645_v1, %v629_v52 }
 0x3c7   : > { %v650_v4 = vmul.f32 %v882_v0, %v646_v3 }
 0x3c9   : > { %v654_v5 = vadd.f32 %v883_v2, %v650_v4 }
 0x3cb   : > { %655 = vst.msk [vmem:[%s490_s16] sm:$0xff] %vm521_vm1, %v654_v5 }
 0x3cc PF: > { %s25_s17 = sadd.s32 1, %s1092_s17  }
 0x3cd   : > { %p22_p7 = scmp.ge.s32.totalorder %s25_s17, 4  }
 0x3cf   :  { %24 = sbr.rel (!%p22_p7) target bundleno = 4 (0x4), region = 122 }
 0x3d4   :  { %675 = vsyncpa [#allocation3], 1 }
 0x3d5   :  { %677 = vsyncpa [#allocation3 + $0x1], 1 }
 0x3d6   :  { %678 = vsyncpa [#allocation5], 1 }
 0x3d7   :  { %679 = vsyncpa [#allocation8], 1 }
 0x3d8   :  { %680 = vsyncpa [#allocation11], 1 }

// kernel: tag_encoder_fwd.26
= control target key start
LH: loop header
LB: loop body
LE: loop exit
PB: predicated region body
PF: predicated region fallthrough
CT: control target
= control target key end

     0   :  { %s2664_s0 = inlined_call_operand.vmem [shape: f32[2,8,32], index: 0, kind: input, shape index: {}]   ;;  %s2665_s1 = inlined_call_operand.vmem [shape: f32[2,8,32], index: 1, kind: input, shape index: {}]   ;;  %s2666_s2 = inlined_call_operand.hbm [shape: f32[32,32], index: 2, kind: input, shape index: {}]   ;;  %s2667_s3 = inlined_call_operand.hbm [shape: f32[1,32], index: 3, kind: input, shape index: {}]   ;;  %s2668_s4 = inlined_call_operand.hbm [shape: f32[32,64], index: 4, kind: input, shape index: {}]   ;;  %s2669_s5 = inlined_call_operand.hbm [shape: f32[1,64], index: 5, kind: input, shape index: {}]   ;;  %s2670_s6 = inlined_call_operand.hbm [shape: f32[1,32], index: 6, kind: input, shape index: {}]   ;;  %s2671_s7 = inlined_call_operand.hbm [shape: f32[1,32], index: 7, kind: input, shape index: {}]   ;;  %s2672_s8 = inlined_call_operand.hbm [shape: f32[32,32], index: 8, kind: input, shape index: {}]   ;;  %s2673_s9 = inlined_call_operand.hbm [shape: f32[1,32], index: 9, kind: input, shape index: {}]   ;;  %s2674_s10 = inlined_call_operand.hbm [shape: f32[32,32], index: 10, kind: input, shape index: {}]   ;;  %s2675_s11 = inlined_call_operand.hbm [shape: f32[1,32], index: 11, kind: input, shape index: {}]   ;;  %s2676_s12 = inlined_call_operand.hbm [shape: f32[1,32], index: 12, kind: input, shape index: {}]   ;;  %s2677_s13 = inlined_call_operand.hbm [shape: f32[1,32], index: 13, kind: input, shape index: {}]   ;;  %s2678_s14 = inlined_call_operand.vmem [shape: f32[2,8,32], index: 14, kind: output, shape index: {}]  }
   0x1   :  { %2679 = sst [smem:[#allocation28_spill]] %s2667_s3 }
   0x2   :  { %2680 = sst [smem:[#allocation29_spill]] %s2669_s5 }
   0x3   :  { %2681 = sst [smem:[#allocation30_spill]] %s2671_s7 }
   0x4   :  { %19 = vsyncpa [#allocation3], 0 }
   0x5   :  { %20 = vsyncpa [#allocation5], 0 }
   0x6   :  { %21 = vsyncpa [#allocation8], 0 }
   0x7   :  { %22 = vsyncpa [#allocation11], 0 }
   0x8   :  { %23 = vsyncpa [#allocation14], 0 }
   0x9   :  { %24 = vsyncpa [#allocation17], 0 }
   0xa   :  { %25 = vsyncpa [#allocation20], 0  ;;  %s2325_s29 = smov 0  }
   0xb LB: > { %s2682_s3 = sld [smem:[#allocation28_spill]]  ;;  %s2334_s17 = sadd.s32 4294967295, %s2225_s29   ;;  %s2225_s29 = sphi %s2325_s29, %s31_s29  }
   0xc   : > { %p1608_p0 = scmp.ge.s32.totalorder %s2225_s29, 1  ;;  %p366_p1 = scmp.lt.s32.totalorder %s2225_s29, 3 }
   0xd   : > { %p1741_p2 = scmp.eq.s32.totalorder %s2334_s17, 0  ;;  %s2227_s19 = smov [#allocation4]  }
   0xe   : > { %p2339_p3 = pnand %p1608_p0, %p366_p1  ;;  %s394_s20 = sshll.u32 %s2227_s19, 4  ;;  %s395_s20 = int_to_ptr.vmem [resolvable:$true] %s394_s20 }
   0xf   : > { %s2684_s5 = sld [smem:[#allocation29_spill]]  ;;  %s2228_s28 = smov [#allocation7]  }
  0x10   : > { %p1704_p4 = pneg %p2339_p3  ;;  %s2685_s7 = sld [smem:[#allocation30_spill]] }
  0x11   : > { %s392_s16 = sshll.u32 %s2682_s3, 4  ;;  %s420_s30 = sshll.u32 %s2228_s28, 4  ;;  %s393_s16 = int_to_ptr.hbm [resolvable:$true] %s392_s16  ;;  %s421_s30 = int_to_ptr.vmem [resolvable:$true] %s420_s30 }
  0x12   : > { %p2353_p5 = pnand %p1741_p2, %p1704_p4  ;;  %s2229_s15 = smov [#allocation10]  }
  0x13   : > { %s444_s19 = sshll.u32 %s2229_s15, 4  ;;  %s468_s24 = sshll.u32 %s2673_s9, 4  ;;  %s445_s19 = int_to_ptr.vmem [resolvable:$true] %s444_s19  ;;  %s469_s24 = int_to_ptr.hbm [resolvable:$true] %s468_s24 }
  0x14   : > { %1710 = dma.hbm_to_vmem [thread:$0]  (!%p2353_p5), %s393_s16, 16, %s395_s20, [#allocation5]  }
  0x15   : > { %s418_s23 = sshll.u32 %s2684_s5, 4  ;;  %s494_s3 = sshll.u32 %s2675_s11, 4  ;;  %s419_s23 = int_to_ptr.hbm [resolvable:$true] %s418_s23  ;;  %s495_s3 = int_to_ptr.hbm [resolvable:$true] %s494_s3 }
  0x16   : > { %s442_s26 = sshll.u32 %s2685_s7, 4  ;;  %s2230_s5 = smov [#allocation13]   ;;  %s443_s26 = int_to_ptr.hbm [resolvable:$true] %s442_s26 }
  0x17   : > { %1716 = dma.hbm_to_vmem [thread:$0]  (!%p2353_p5), %s419_s23, 16, %s421_s30, [#allocation8]  }
  0x18   : > { %1722 = dma.hbm_to_vmem [thread:$0]  (!%p2353_p5), %s443_s26, 16, %s445_s19, [#allocation11]  }
  0x19   : > { %s470_s7 = sshll.u32 %s2230_s5, 4  ;;  %s2231_s16 = smov [#allocation16]   ;;  %s471_s7 = int_to_ptr.vmem [resolvable:$true] %s470_s7 }
  0x1a   : > { %1728 = dma.hbm_to_vmem [thread:$0]  (!%p2353_p5), %s469_s24, 16, %s471_s7, [#allocation14]  }
  0x1b   : > { %s496_s20 = sshll.u32 %s2231_s16, 4  ;;  %s377_s15 = sshll.u32 %s2666_s2, 4  ;;  %s497_s20 = int_to_ptr.vmem [resolvable:$true] %s496_s20  ;;  %s378_s15 = int_to_ptr.hbm [resolvable:$true] %s377_s15 }
  0x1c   : > { %1734 = dma.hbm_to_vmem [thread:$0]  (!%p2353_p5), %s495_s3, 16, %s497_s20, [#allocation17]  }
  0x1d   : > { %s2232_s26 = smov [#allocation2]   ;;  %s403_s22 = sshll.u32 %s2668_s4, 4  ;;  %s404_s22 = int_to_ptr.hbm [resolvable:$true] %s403_s22 }
  0x1e   : > { %s379_s19 = sshll.u32 %s2232_s26, 4  ;;  %s2233_s7 = smov 128   ;;  %s380_s19 = int_to_ptr.vmem [resolvable:$true] %s379_s19 }
  0x1f   : > { %s2234_s24 = smov 8   ;;  %s2235_s25 = smov [#allocation6]  }
  0x20   : > { %1707 = dma.hbm_to_vmem [thread:$0]  (!%p2353_p5), %s378_s15, 512, %s380_s19, [#allocation3], %s2233_s7, %s2233_s7, %s2234_s24  }
  0x21   : > { %s405_s28 = sshll.u32 %s2235_s25, 4  ;;  %s430_s20 = sshll.u32 %s2670_s6, 4  ;;  %s406_s28 = int_to_ptr.vmem [resolvable:$true] %s405_s28  ;;  %s431_s20 = int_to_ptr.hbm [resolvable:$true] %s430_s20 }
  0x22   : > { %1713 = dma.hbm_to_vmem [thread:$0]  (!%p2353_p5), %s404_s22, 512, %s406_s28, [#allocation5], %s2233_s7, %s2233_s7, %s2234_s24  }
  0x23   : > { %s453_s26 = sshll.u32 %s2672_s8, 4  ;;  %s2236_s15 = smov [#allocation9]   ;;  %s454_s26 = int_to_ptr.hbm [resolvable:$true] %s453_s26 }
  0x24   : > { %s432_s19 = sshll.u32 %s2236_s15, 4  ;;  %s2237_s5 = smov [#allocation12]   ;;  %s433_s19 = int_to_ptr.vmem [resolvable:$true] %s432_s19 }
  0x25   : > { %1719 = dma.hbm_to_vmem [thread:$0]  (!%p2353_p5), %s431_s20, 16, %s433_s19, [#allocation8]  }
  0x26   : > { %s455_s21 = sshll.u32 %s2237_s5, 4  ;;  %s479_s3 = sshll.u32 %s2674_s10, 4  ;;  %s456_s21 = int_to_ptr.vmem [resolvable:$true] %s455_s21  ;;  %s480_s3 = int_to_ptr.hbm [resolvable:$true] %s479_s3 }
  0x27   : > { %1725 = dma.hbm_to_vmem [thread:$0]  (!%p2353_p5), %s454_s26, 512, %s456_s21, [#allocation11], %s2233_s7, %s2233_s7, %s2234_s24  }
  0x28   : > { %s506_s23 = sshll.u32 %s2676_s12, 4  ;;  %s2238_s20 = smov [#allocation15]   ;;  %s507_s23 = int_to_ptr.hbm [resolvable:$true] %s506_s23 }
  0x29   : > { %s481_s30 = sshll.u32 %s2238_s20, 4  ;;  %s2239_s15 = smov [#allocation18]   ;;  %s482_s30 = int_to_ptr.vmem [resolvable:$true] %s481_s30 }
  0x2a   : > { %1731 = dma.hbm_to_vmem [thread:$0]  (!%p2353_p5), %s480_s3, 512, %s482_s30, [#allocation14], %s2233_s7, %s2233_s7, %s2234_s24  }
  0x2b   : > { %s508_s19 = sshll.u32 %s2239_s15, 4  ;;  %s518_s26 = sshll.u32 %s2677_s13, 4  ;;  %s509_s19 = int_to_ptr.vmem [resolvable:$true] %s508_s19  ;;  %s519_s26 = int_to_ptr.hbm [resolvable:$true] %s518_s26 }
  0x2c   : > { %1737 = dma.hbm_to_vmem [thread:$0]  (!%p2353_p5), %s507_s23, 16, %s509_s19, [#allocation17]  }
  0x2d   : > { %s2240_s21 = smov [#allocation19]   ;;  %547 = sbr.rel (%p2339_p3) target bundleno = 2876 (0xb3c), region = 76 }
  0x2e   : > { %s520_s16 = sshll.u32 %s2240_s21, 4  ;;  %s521_s16 = int_to_ptr.vmem [resolvable:$true] %s520_s16 }
  0x2f   : > { %1740 = dma.hbm_to_vmem [thread:$0]  (!%p2353_p5), %s519_s26, 16, %s521_s16, [#allocation20]  }
  0x32   : > { %2196 = dma.done.wait (%p1741_p2), [#allocation3], 512  }
  0x33   : > { %2198 = vsyncadd (%p1741_p2), [#allocation3], 4294966784 }
  0x34   : > { %2200 = dma.done.wait (%p1741_p2), [#allocation5], 528  }
  0x35   : > { %2202 = vsyncadd (%p1741_p2), [#allocation5], 4294966768 }
  0x36   : > { %2204 = dma.done.wait (%p1741_p2), [#allocation8], 32  }
  0x37   : > { %2206 = vsyncadd (%p1741_p2), [#allocation8], 4294967264 }
  0x38   : > { %2208 = dma.done.wait (%p1741_p2), [#allocation11], 528  }
  0x39   : > { %2210 = vsyncadd (%p1741_p2), [#allocation11], 4294966768 }
  0x3a   : > { %2212 = dma.done.wait (%p1741_p2), [#allocation14], 528  }
  0x3b   : > { %2214 = vsyncadd (%p1741_p2), [#allocation14], 4294966768 }
  0x3c   : > { %2216 = dma.done.wait (%p1741_p2), [#allocation17], 32  }
  0x3d   : > { %2218 = vsyncadd (%p1741_p2), [#allocation17], 4294967264 }
  0x3e   : > { %2220 = dma.done.wait (%p1741_p2), [#allocation20], 16  }
  0x3f   : > { %2222 = vsyncadd (%p1741_p2), [#allocation20], 4294967280  ;;  %p651_p6 = scmp.lt.s32.totalorder %s2334_s17, 1  ;;  %v668_v0 = vld [vmem:[#allocation2 + $0x18] sm:$0xff]  ;;  %v667_v2 = vld [vmem:[#allocation2 + $0x10] sm:$0xff]  ;;  %vm673_vm0 = vcmask 261120   ;;  %v840_v31 = vlaneseq }
  0x40   : > { %v701_v1 = vld [vmem:[#allocation6 + $0x18] sm:$0xff]  ;;  %689 = vmatpush.msra.mxu0 %v668_v0  ;;  %v700_v3 = vld [vmem:[#allocation6 + $0x10] sm:$0xff]  ;;  %v666_v4 = vld [vmem:[#allocation2 + $0x8] sm:$0xff]  ;;  %vm743_vm1 = vcmask 64512   ;;  %s2242_s23 = smov 120   ;;  %s2243_s20 = smov 104  }
  0x41   : > { %s2688_s17 = smov (!%p651_p6, %s2334_s17), 1  ;;  %721 = vmatpush.msra.mxu1 %v701_v1  ;;  %v699_v5 = vld [vmem:[#allocation6 + $0x8] sm:$0xff]  ;;  %v665_v6 = vld [vmem:[#allocation2] sm:$0xff]  ;;  %v2506_v32 = vand.u32 127, %v840_v31  ;;  %s2245_s30 = smov 96  }
  0x42   : > { %s2452_s18 = sshll.u32 %s2688_s17, 3  ;;  %v698_v7 = vld [vmem:[#allocation6] sm:$0xff]  ;;  %690 = vmatpush.msra.mxu0 %v667_v2  ;;  %v1801_v10 = vld [vmem:[#allocation4] ss:$0 sm:$0xff]  ;;  %s2241_s17 = smov 112  }
  0x43   : > { %s658_s24 = scalar_lea.vmem %s2665_s1, %s2452_s18  ;;  %s654_s28 = scalar_lea.vmem %s2664_s0, %s2452_s18  ;;  %722 = vmatpush.msra.mxu1 %v700_v3  ;;  %v1802_v11 = vld [vmem:[#allocation7] ss:$0 sm:$0xff] }
  0x44   : > { %v2462_v8 = vld [vmem:[%s658_s24] sm:$0xff]  ;;  %691 = vmatpush.msra.mxu0 %v666_v4  ;;  %s2246_s15 = smov 16   ;;  %s2247_s19 = smov 8  }
  0x45   : > { %v663_v9 = vld [vmem:[%s654_s28] sm:$0xff]  ;;  %723 = vmatpush.msra.mxu1 %v699_v5  ;;  %s2248_s5 = smov 24   ;;  %s662_s21 = scalar_lea.vmem %s2678_s14, %s2452_s18 }
  0x46   : > { %692 = vmatpush.msra.mxu0 %v665_v6 }
  0x47   : > { %724 = vmatpush.msra.mxu1 %v698_v7  ;;  %1638 = vmatmul.msk.f32.vlgmr.msra.gmra.mxu0 %vm673_vm0, %v2462_v8 }
  0x48   : > { %1639 = vmatmul.msk.f32.vlgmr.msra.gmra.mxu1 %vm673_vm0, %v663_v9 }
  0xc4   : > { %v694_v12 = vpop.f32.mrf.mxu0 }
  0xc5   : > { %v726_v13 = vpop.f32.mrf.mxu1  ;;  %v695_v14 = vadd.f32 %v1801_v10, %v694_v12 }
  0xc6   : > { %v2467_v15 = vadd.f32 %v1802_v11, %v726_v13 }
  0xc7   : > { %v697_v16 = vmul.f32 0.17677669, %v695_v14 }
  0xc8   : > { %739 = vrot.lane.b32.xlu1 %v2467_v15, %s2241_s17  ;;  %737 = vrot.lane.b32.xlu0 %v2467_v15, %s2242_s23 }
  0xc9   : > { %1640 = vmatpush.xpose.msk.msra.mxu2 %vm743_vm1, %v2467_v15  ;;  %732 = vrot.lane.b32.xlu2 %v697_v16, %s2241_s17 }
  0xcc   : > { %1641 = vmatmul.msk.f32.vlgmr.msra.gmra.mxu2 %vm743_vm1, %v697_v16 }
  0xd0   : > { %741 = vrot.lane.b32.xlu1 %v2467_v15, %s2243_s20  ;;  %730 = vrot.lane.b32.xlu0 %v697_v16, %s2242_s23 }
  0xd1   : > { %734 = vrot.lane.b32.xlu2 %v697_v16, %s2243_s20 }
 0x123   : > { %v733_v19 = vpop.permute.xlu2 %732 }
 0x12b   : > { %v735_v22 = vpop.permute.xlu2 %734 }
 0x13a   : > { %v2475_v17 = vpop.permute.xlu1 %739  ;;  %v2477_v18 = vpop.permute.xlu0 %737 }
 0x13b   : > { %1642 = vmatpush.xpose.msk.msra.mxu3 %vm743_vm1, %v2477_v18  ;;  %1644 = vmatpush.xpose.msk.msrb.mxu2 %vm743_vm1, %v2475_v17 }
 0x13e   : > { %1645 = vmatmul.msk.f32.vlgmr.msrb.gmra.mxu2 %vm743_vm1, %v733_v19 }
 0x142   : > { %v2484_v20 = vpop.permute.xlu1 %741  ;;  %v731_v21 = vpop.permute.xlu0 %730 }
 0x143   : > { %1643 = vmatmul.msk.f32.vlgmr.msra.gmra.mxu3 %vm743_vm1, %v731_v21 }
 0x144   : > { %1646 = vmatpush.xpose.msk.msrb.mxu3 %vm743_vm1, %v2484_v20 }
 0x14b   : > { %1647 = vmatmul.msk.f32.vlgmr.msrb.gmra.mxu3 %vm743_vm1, %v735_v22 }
 0x14f   : > { %v2490_v23 = vpop.f32.mrf.mxu2 }
 0x150   : > { %v842_v30 = vsel %vm743_vm1, %v2490_v23, -inf }
 0x1c1   : > { %v2492_v24 = vpop.f32.mrf.mxu2 }
 0x1c2   : > { %v848_v25 = vsel %vm743_vm1, %v2492_v24, -inf }
 0x1c3   : > { %849 = vmax.xlane.f32.xlu0 %v848_v25 }
 0x1c6   : > { %v2496_v26 = vpop.f32.mrf.mxu3 }
 0x1c7   : > { %v845_v27 = vsel %vm743_vm1, %v2496_v26, -inf }
 0x1c8   : > { %846 = vmax.xlane.f32.xlu2 %v845_v27 }
 0x1ce   : > { %v2500_v28 = vpop.f32.mrf.mxu3 }
 0x1cf   : > { %v851_v29 = vsel %vm743_vm1, %v2500_v28, -inf }
 0x1d0   : > { %852 = vmax.xlane.f32.xlu1 %v851_v29  ;;  %843 = vmax.xlane.f32.xlu2 %v842_v30 }
 0x236   : > { %v850_v33 = vpop.xlane.xlu0 %849 }
 0x237   : > { %vm856_vm2 = vcmp.eq.f32.partialorder %v2492_v24, %v850_v33 }
 0x238   : > { %v860_v34 = vsel %vm856_vm2, %v2506_v32, 8 }
 0x239   : > { %v892_v35 = vsel %vm743_vm1, %v860_v34, 2147483647 }
 0x23a   : > { %v894_v36 = vshra.s32 %v892_v35, 16  ;;  %v893_v53 = vand.u32 65535, %v892_v35 }
 0x23b   : > { %v847_v37 = vpop.xlane.xlu2 %846 }
 0x23c   : > { %vm855_vm3 = vcmp.eq.f32.partialorder %v2496_v26, %v847_v37  ;;  %v896_v38 = vcvt.s32.f32 %v894_v36  ;;  %v895_v55 = vcvt.s32.f32 %v893_v53 }
 0x23d   : > { %v859_v39 = vsel %vm855_vm3, %v2506_v32, 8 }
 0x23e   : > { %v877_v40 = vsel %vm743_vm1, %v859_v39, 2147483647  ;;  %897 = vmin.xlane.f32.xlu0 %v896_v38 }
 0x23f   : > { %v879_v41 = vshra.s32 %v877_v40, 16  ;;  %v878_v57 = vand.u32 65535, %v877_v40 }
 0x241   : > { %v881_v42 = vcvt.s32.f32 %v879_v41  ;;  %v880_v59 = vcvt.s32.f32 %v878_v57 }
 0x243   : > { %v853_v43 = vpop.xlane.xlu1 %852  ;;  %882 = vmin.xlane.f32.xlu2 %v881_v42  ;;  %v844_v44 = vpop.xlane.xlu2 %843 }
 0x244   : > { %vm857_vm4 = vcmp.eq.f32.partialorder %v2500_v28, %v853_v43  ;;  %vm854_vm5 = vcmp.eq.f32.partialorder %v2490_v23, %v844_v44 }
 0x245   : > { %v861_v45 = vsel %vm857_vm4, %v2506_v32, 8  ;;  %v858_v46 = vsel %vm854_vm5, %v2506_v32, 8 }
 0x246   : > { %v907_v47 = vsel %vm743_vm1, %v861_v45, 2147483647  ;;  %v862_v48 = vsel %vm743_vm1, %v858_v46, 2147483647 }
 0x247   : > { %v909_v49 = vshra.s32 %v907_v47, 16  ;;  %v864_v50 = vshra.s32 %v862_v48, 16  ;;  %v908_v60 = vand.u32 65535, %v907_v47  ;;  %v863_v2 = vand.u32 65535, %v862_v48 }
 0x249   : > { %v911_v51 = vcvt.s32.f32 %v909_v49  ;;  %v866_v52 = vcvt.s32.f32 %v864_v50  ;;  %v910_v63 = vcvt.s32.f32 %v908_v60  ;;  %v865_v3 = vcvt.s32.f32 %v863_v2 }
 0x24b   : > { %912 = vmin.xlane.f32.xlu1 %v911_v51  ;;  %867 = vmin.xlane.f32.xlu2 %v866_v52 }
 0x2b1   : > { %v898_v54 = vpop.xlane.xlu0 %897 }
 0x2b2   : > { %vm899_vm6 = vcmp.eq.f32.partialorder %v896_v38, %v898_v54  ;;  %v904_v5 = vcvt.f32.s32 %v898_v54 }
 0x2b3   : > { %v900_v56 = vsel %vm899_vm6, %v895_v55, inf }
 0x2b4   : > { %901 = vmin.xlane.f32.xlu0 %v900_v56  ;;  %v905_v7 = vshll.u32 %v904_v5, 16 }
 0x2b6   : > { %v883_v58 = vpop.xlane.xlu2 %882 }
 0x2b7   : > { %vm884_vm7 = vcmp.eq.f32.partialorder %v881_v42, %v883_v58  ;;  %v889_v11 = vcvt.f32.s32 %v883_v58 }
 0x2b8   : > { %v885_v61 = vsel %vm884_vm7, %v880_v59, inf }
 0x2b9   : > { %v890_v16 = vshll.u32 %v889_v11, 16 }
 0x2bc   : > { %886 = vmin.xlane.f32.xlu0 %v885_v61 }
 0x2be   : > { %v913_v62 = vpop.xlane.xlu1 %912  ;;  %v868_v1 = vpop.xlane.xlu2 %867 }
 0x2bf   : > { %vm914_vm8 = vcmp.eq.f32.partialorder %v911_v51, %v913_v62  ;;  %vm869_vm9 = vcmp.eq.f32.partialorder %v866_v52, %v868_v1  ;;  %v919_v21 = vcvt.f32.s32 %v913_v62  ;;  %v874_v34 = vcvt.f32.s32 %v868_v1 }
 0x2c0   : > { %v915_v0 = vsel %vm914_vm8, %v910_v63, inf  ;;  %v870_v4 = vsel %vm869_vm9, %v865_v3, inf }
 0x2c1   : > { %916 = vmin.xlane.f32.xlu1 %v915_v0  ;;  %v920_v27 = vshll.u32 %v919_v21, 16  ;;  %v875_v38 = vshll.u32 %v874_v34, 16 }
 0x2c9   : > { %871 = vmin.xlane.f32.xlu1 %v870_v4 }
 0x327   : > { %v902_v6 = vpop.xlane.xlu0 %901 }
 0x328   : > { %v903_v9 = vcvt.f32.s32 %v902_v6 }
 0x32a   : > { %v2520_v10 = vadd.s32 %v905_v7, %v903_v9 }
 0x32c   : > { %vm924_vm10 = vcmp.eq.s32.totalorder %v2506_v32, %v2520_v10 }
 0x32d   : > { %v2528_v12 = vsel %vm924_vm10, -inf, %v2492_v24 }
 0x32e   : > { %v940_v13 = vsel %vm743_vm1, %v2528_v12, -inf }
 0x32f   : > { %941 = vmax.xlane.f32.xlu2 %v940_v13  ;;  %v887_v14 = vpop.xlane.xlu0 %886 }
 0x330   : > { %v888_v19 = vcvt.f32.s32 %v887_v14 }
 0x332   : > { %v2532_v22 = vadd.s32 %v890_v16, %v888_v19 }
 0x334   : > { %v917_v25 = vpop.xlane.xlu1 %916  ;;  %vm923_vm11 = vcmp.eq.s32.totalorder %v2506_v32, %v2532_v22 }
 0x335   : > { %v918_v29 = vcvt.f32.s32 %v917_v25  ;;  %v2540_v30 = vsel %vm923_vm11, -inf, %v2496_v26 }
 0x336   : > { %v937_v31 = vsel %vm743_vm1, %v2540_v30, -inf }
 0x337   : > { %v2544_v33 = vadd.s32 %v920_v27, %v918_v29  ;;  %938 = vmax.xlane.f32.xlu1 %v937_v31 }
 0x339   : > { %vm925_vm12 = vcmp.eq.s32.totalorder %v2506_v32, %v2544_v33 }
 0x33a   : > { %v2552_v35 = vsel %vm925_vm12, -inf, %v2500_v28 }
 0x33b   : > { %v943_v36 = vsel %vm743_vm1, %v2552_v35, -inf }
 0x33c   : > { %v872_v37 = vpop.xlane.xlu1 %871  ;;  %944 = vmax.xlane.f32.xlu0 %v943_v36 }
 0x33d   : > { %v873_v39 = vcvt.f32.s32 %v872_v37  ;;  %v2244_v37 = vmov 0.0  }
 0x33e   : > { %v927_v10 = vsel %vm923_vm11, 1.0, %v2244_v37 }
 0x33f   : > { %v2556_v40 = vadd.s32 %v875_v38, %v873_v39  ;;  %v928_v38 = vsel %vm924_vm10, 1.0, %v2244_v37 }
 0x341   : > { %vm922_vm13 = vcmp.eq.s32.totalorder %v2506_v32, %v2556_v40 }
 0x342   : > { %v2564_v41 = vsel %vm922_vm13, -inf, %v2490_v23 }
 0x343   : > { %v934_v42 = vsel %vm743_vm1, %v2564_v41, -inf }
 0x344   : > { %935 = vmax.xlane.f32.xlu2 %v934_v42 }
 0x3a2   : > { %v942_v43 = vpop.xlane.xlu2 %941 }
 0x3a3   : > { %vm948_vm14 = vcmp.eq.f32.partialorder %v2528_v12, %v942_v43 }
 0x3a4   : > { %v952_v44 = vsel %vm948_vm14, %v2506_v32, 8 }
 0x3a5   : > { %v984_v45 = vsel %vm743_vm1, %v952_v44, 2147483647 }
 0x3a6   : > { %v986_v46 = vshra.s32 %v984_v45, 16  ;;  %v985_v63 = vand.u32 65535, %v984_v45 }
 0x3a8   : > { %v988_v47 = vcvt.s32.f32 %v986_v46  ;;  %v987_v1 = vcvt.s32.f32 %v985_v63 }
 0x3aa   : > { %989 = vmin.xlane.f32.xlu0 %v988_v47  ;;  %v939_v48 = vpop.xlane.xlu1 %938 }
 0x3ab   : > { %vm947_vm15 = vcmp.eq.f32.partialorder %v2540_v30, %v939_v48 }
 0x3ac   : > { %v951_v49 = vsel %vm947_vm15, %v2506_v32, 8 }
 0x3ad   : > { %v969_v50 = vsel %vm743_vm1, %v951_v49, 2147483647 }
 0x3ae   : > { %v971_v51 = vshra.s32 %v969_v50, 16  ;;  %v970_v3 = vand.u32 65535, %v969_v50 }
 0x3af   : > { %v945_v52 = vpop.xlane.xlu0 %944 }
 0x3b0   : > { %vm949_vm2 = vcmp.eq.f32.partialorder %v2552_v35, %v945_v52  ;;  %v973_v53 = vcvt.s32.f32 %v971_v51  ;;  %v972_v5 = vcvt.s32.f32 %v970_v3 }
 0x3b1   : > { %v953_v54 = vsel %vm949_vm2, %v2506_v32, 8 }
 0x3b2   : > { %v999_v55 = vsel %vm743_vm1, %v953_v54, 2147483647  ;;  %974 = vmin.xlane.f32.xlu2 %v973_v53 }
 0x3b3   : > { %v1001_v56 = vshra.s32 %v999_v55, 16  ;;  %v1000_v6 = vand.u32 65535, %v999_v55 }
 0x3b5   : > { %v1003_v57 = vcvt.s32.f32 %v1001_v56  ;;  %v1002_v11 = vcvt.s32.f32 %v1000_v6  ;;  %v929_v56 = vsel %vm925_vm12, 1.0, %v2244_v37 }
 0x3b7   : > { %v936_v58 = vpop.xlane.xlu2 %935  ;;  %1004 = vmin.xlane.f32.xlu1 %v1003_v57 }
 0x3b8   : > { %vm946_vm3 = vcmp.eq.f32.partialorder %v2564_v41, %v936_v58 }
 0x3b9   : > { %v950_v59 = vsel %vm946_vm3, %v2506_v32, 8 }
 0x3ba   : > { %v954_v60 = vsel %vm743_vm1, %v950_v59, 2147483647 }
 0x3bb   : > { %v956_v61 = vshra.s32 %v954_v60, 16  ;;  %v955_v14 = vand.u32 65535, %v954_v60 }
 0x3bd   : > { %v958_v62 = vcvt.s32.f32 %v956_v61  ;;  %v957_v19 = vcvt.s32.f32 %v955_v14 }
 0x3bf   : > { %959 = vmin.xlane.f32.xlu2 %v958_v62 }
 0x41d   : > { %v990_v0 = vpop.xlane.xlu0 %989 }
 0x41e   : > { %vm991_vm4 = vcmp.eq.f32.partialorder %v988_v47, %v990_v0  ;;  %v996_v25 = vcvt.f32.s32 %v990_v0 }
 0x41f   : > { %v992_v2 = vsel %vm991_vm4, %v987_v1, inf }
 0x420   : > { %993 = vmin.xlane.f32.xlu0 %v992_v2  ;;  %v997_v29 = vshll.u32 %v996_v25, 16 }
 0x425   : > { %v975_v4 = vpop.xlane.xlu2 %974 }
 0x426   : > { %vm976_vm5 = vcmp.eq.f32.partialorder %v973_v53, %v975_v4  ;;  %v981_v36 = vcvt.f32.s32 %v975_v4 }
 0x427   : > { %v977_v7 = vsel %vm976_vm5, %v972_v5, inf }
 0x428   : > { %978 = vmin.xlane.f32.xlu0 %v977_v7  ;;  %v982_v45 = vshll.u32 %v981_v36, 16 }
 0x42a   : > { %v1005_v9 = vpop.xlane.xlu1 %1004 }
 0x42b   : > { %vm1006_vm6 = vcmp.eq.f32.partialorder %v1003_v57, %v1005_v9  ;;  %v1011_v47 = vcvt.f32.s32 %v1005_v9 }
 0x42c   : > { %v1007_v13 = vsel %vm1006_vm6, %v1002_v11, inf }
 0x42d   : > { %1008 = vmin.xlane.f32.xlu1 %v1007_v13  ;;  %v1012_v50 = vshll.u32 %v1011_v47, 16 }
 0x432   : > { %v960_v16 = vpop.xlane.xlu2 %959 }
 0x433   : > { %vm961_vm7 = vcmp.eq.f32.partialorder %v958_v62, %v960_v16  ;;  %v966_v55 = vcvt.f32.s32 %v960_v16  ;;  %v926_v62 = vsel %vm922_vm13, 1.0, %v2244_v37 }
 0x434   : > { %v962_v21 = vsel %vm961_vm7, %v957_v19, inf }
 0x435   : > { %963 = vmin.xlane.f32.xlu1 %v962_v21  ;;  %v967_v59 = vshll.u32 %v966_v55, 16 }
 0x493   : > { %v994_v27 = vpop.xlane.xlu0 %993 }
 0x494   : > { %v995_v31 = vcvt.f32.s32 %v994_v27 }
 0x496   : > { %v998_v34 = vadd.s32 %v997_v29, %v995_v31 }
 0x498   : > { %vm1016_vm8 = vcmp.eq.s32.totalorder %v2506_v32, %v998_v34 }
 0x499   : > { %v1024_v39 = vsel %vm1016_vm8, -inf, %v2528_v12  ;;  %v2585_v42 = vsel %vm1016_vm8, 1.0, %v928_v38 }
 0x49a   : > { %v1032_v43 = vsel %vm743_vm1, %v1024_v39, -inf }
 0x49b   : > { %1033 = vmax.xlane.f32.xlu2 %v1032_v43  ;;  %v979_v44 = vpop.xlane.xlu0 %978 }
 0x49c   : > { %v980_v46 = vcvt.f32.s32 %v979_v44 }
 0x49e   : > { %v983_v48 = vadd.s32 %v982_v45, %v980_v46 }
 0x4a0   : > { %v1009_v49 = vpop.xlane.xlu1 %1008  ;;  %vm1015_vm9 = vcmp.eq.s32.totalorder %v2506_v32, %v983_v48 }
 0x4a1   : > { %v1010_v51 = vcvt.f32.s32 %v1009_v49  ;;  %v1023_v12 = vsel %vm1015_vm9, -inf, %v2540_v30  ;;  %v2593_v52 = vsel %vm1015_vm9, 1.0, %v927_v10 }
 0x4a2   : > { %v1029_v53 = vsel %vm743_vm1, %v1023_v12, -inf }
 0x4a3   : > { %v1013_v54 = vadd.s32 %v1012_v50, %v1010_v51  ;;  %1030 = vmax.xlane.f32.xlu1 %v1029_v53 }
 0x4a5   : > { %vm1017_vm10 = vcmp.eq.s32.totalorder %v2506_v32, %v1013_v54 }
 0x4a6   : > { %v2600_v22 = vsel %vm1017_vm10, 1.0, %v929_v56  ;;  %v1025_v57 = vsel %vm1017_vm10, -inf, %v2552_v35 }
 0x4a7   : > { %v1035_v58 = vsel %vm743_vm1, %v1025_v57, -inf }
 0x4a8   : > { %v964_v30 = vpop.xlane.xlu1 %963  ;;  %1036 = vmax.xlane.f32.xlu0 %v1035_v58 }
 0x4a9   : > { %v965_v60 = vcvt.f32.s32 %v964_v30 }
 0x4ab   : > { %v968_v61 = vadd.s32 %v967_v59, %v965_v60 }
 0x4ad   : > { %vm1014_vm11 = vcmp.eq.s32.totalorder %v2506_v32, %v968_v61 }
 0x4ae   : > { %v2608_v33 = vsel %vm1014_vm11, 1.0, %v926_v62  ;;  %v1022_v63 = vsel %vm1014_vm11, -inf, %v2564_v41 }
 0x4af   : > { %v1026_v0 = vsel %vm743_vm1, %v1022_v63, -inf }
 0x4b0   : > { %1027 = vmax.xlane.f32.xlu2 %v1026_v0 }
 0x50e   : > { %v1034_v35 = vpop.xlane.xlu2 %1033 }
 0x50f   : > { %vm1040_vm12 = vcmp.eq.f32.partialorder %v1024_v39, %v1034_v35 }
 0x510   : > { %v1044_v1 = vsel %vm1040_vm12, %v2506_v32, 8 }
 0x511   : > { %v1076_v2 = vsel %vm743_vm1, %v1044_v1, 2147483647 }
 0x512   : > { %v1078_v3 = vshra.s32 %v1076_v2, 16  ;;  %v1077_v31 = vand.u32 65535, %v1076_v2 }
 0x514   : > { %v1080_v4 = vcvt.s32.f32 %v1078_v3  ;;  %v1079_v36 = vcvt.s32.f32 %v1077_v31 }
 0x516   : > { %1081 = vmin.xlane.f32.xlu0 %v1080_v4  ;;  %v1031_v40 = vpop.xlane.xlu1 %1030 }
 0x517   : > { %vm1039_vm13 = vcmp.eq.f32.partialorder %v1023_v12, %v1031_v40 }
 0x518   : > { %v1043_v5 = vsel %vm1039_vm13, %v2506_v32, 8 }
 0x519   : > { %v1061_v6 = vsel %vm743_vm1, %v1043_v5, 2147483647 }
 0x51a   : > { %v1063_v7 = vshra.s32 %v1061_v6, 16  ;;  %v1062_v38 = vand.u32 65535, %v1061_v6 }
 0x51b   : > { %v1037_v41 = vpop.xlane.xlu0 %1036 }
 0x51c   : > { %vm1041_vm14 = vcmp.eq.f32.partialorder %v1025_v57, %v1037_v41  ;;  %v1065_v9 = vcvt.s32.f32 %v1063_v7  ;;  %v1064_v43 = vcvt.s32.f32 %v1062_v38 }
 0x51d   : > { %v1045_v11 = vsel %vm1041_vm14, %v2506_v32, 8  ;;  %vm1283_vm14 = vcmask 130048  }
 0x51e   : > { %v1091_v13 = vsel %vm743_vm1, %v1045_v11, 2147483647  ;;  %1066 = vmin.xlane.f32.xlu2 %v1065_v9 }
 0x51f   : > { %v1093_v14 = vshra.s32 %v1091_v13, 16  ;;  %v1092_v44 = vand.u32 65535, %v1091_v13 }
 0x521   : > { %v1095_v16 = vcvt.s32.f32 %v1093_v14  ;;  %v1094_v47 = vcvt.s32.f32 %v1092_v44  ;;  %v1796_v44 = vpack.i.bf16 %v2484_v20, %v2475_v17 }
 0x523   : > { %v1028_v19 = vpop.xlane.xlu2 %1027  ;;  %1096 = vmin.xlane.f32.xlu1 %v1095_v16 }
 0x524   : > { %vm1038_vm15 = vcmp.eq.f32.partialorder %v1022_v63, %v1028_v19 }
 0x525   : > { %v1042_v21 = vsel %vm1038_vm15, %v2506_v32, 8  ;;  %vm1285_vm15 = vcmask 195584  }
 0x526   : > { %v1046_v25 = vsel %vm743_vm1, %v1042_v21, 2147483647 }
 0x527   : > { %v1048_v27 = vshra.s32 %v1046_v25, 16  ;;  %v1047_v49 = vand.u32 65535, %v1046_v25 }
 0x529   : > { %v1050_v29 = vcvt.s32.f32 %v1048_v27  ;;  %v1049_v50 = vcvt.s32.f32 %v1047_v49 }
 0x52b   : > { %1051 = vmin.xlane.f32.xlu2 %v1050_v29 }
 0x589   : > { %v1082_v34 = vpop.xlane.xlu0 %1081 }
 0x58a   : > { %vm1083_vm2 = vcmp.eq.f32.partialorder %v1080_v4, %v1082_v34  ;;  %v1088_v12 = vcvt.f32.s32 %v1082_v34 }
 0x58b   : > { %v1084_v37 = vsel %vm1083_vm2, %v1079_v36, inf }
 0x58c   : > { %1085 = vmin.xlane.f32.xlu0 %v1084_v37  ;;  %v1089_v54 = vshll.u32 %v1088_v12, 16 }
 0x591   : > { %v1067_v39 = vpop.xlane.xlu2 %1066 }
 0x592   : > { %vm1068_vm3 = vcmp.eq.f32.partialorder %v1065_v9, %v1067_v39  ;;  %v1073_v57 = vcvt.f32.s32 %v1067_v39 }
 0x593   : > { %v1069_v45 = vsel %vm1068_vm3, %v1064_v43, inf }
 0x594   : > { %1070 = vmin.xlane.f32.xlu0 %v1069_v45  ;;  %v1074_v60 = vshll.u32 %v1073_v57, 16 }
 0x596   : > { %v1097_v46 = vpop.xlane.xlu1 %1096 }
 0x597   : > { %vm1098_vm4 = vcmp.eq.f32.partialorder %v1095_v16, %v1097_v46  ;;  %v1103_v63 = vcvt.f32.s32 %v1097_v46 }
 0x598   : > { %v1099_v48 = vsel %vm1098_vm4, %v1094_v47, inf }
 0x599   : > { %1100 = vmin.xlane.f32.xlu1 %v1099_v48  ;;  %v1104_v1 = vshll.u32 %v1103_v63, 16 }
 0x59e   : > { %v1052_v10 = vpop.xlane.xlu2 %1051 }
 0x59f   : > { %vm1053_vm5 = vcmp.eq.f32.partialorder %v1050_v29, %v1052_v10  ;;  %v1058_v40 = vcvt.f32.s32 %v1052_v10 }
 0x5a0   : > { %v1054_v51 = vsel %vm1053_vm5, %v1049_v50, inf }
 0x5a1   : > { %1055 = vmin.xlane.f32.xlu1 %v1054_v51  ;;  %v1059_v41 = vshll.u32 %v1058_v40, 16 }
 0x5ff   : > { %v1086_v53 = vpop.xlane.xlu0 %1085 }
 0x600   : > { %v1087_v55 = vcvt.f32.s32 %v1086_v53 }
 0x602   : > { %v1090_v56 = vadd.s32 %v1089_v54, %v1087_v55 }
 0x604   : > { %vm1108_vm6 = vcmp.eq.s32.totalorder %v2506_v32, %v1090_v56 }
 0x605   : > { %v1112_v58 = vsel %vm1108_vm6, 1.0, %v2585_v42 }
 0x606   : > { %vm1116_vm7 = vcmp.gt.f32.partialorder %v1112_v58, 0.0 }
 0x607   : > { %v1071_v30 = vpop.xlane.xlu0 %1070  ;;  %v1120_v59 = vsel %vm1116_vm7, %v2492_v24, -inf }
 0x608   : > { %v1072_v61 = vcvt.f32.s32 %v1071_v30  ;;  %v1128_v62 = vsel %vm743_vm1, %v1120_v59, -inf }
 0x609   : > { %1129 = vmax.xlane.f32.xlu2 %v1128_v62 }
 0x60a   : > { %v1075_v0 = vadd.s32 %v1074_v60, %v1072_v61 }
 0x60c   : > { %v1101_v35 = vpop.xlane.xlu1 %1100  ;;  %vm1107_vm8 = vcmp.eq.s32.totalorder %v2506_v32, %v1075_v0 }
 0x60d   : > { %v1102_v2 = vcvt.f32.s32 %v1101_v35  ;;  %v1111_v3 = vsel %vm1107_vm8, 1.0, %v2593_v52 }
 0x60e   : > { %vm1115_vm9 = vcmp.gt.f32.partialorder %v1111_v3, 0.0 }
 0x60f   : > { %v1105_v42 = vadd.s32 %v1104_v1, %v1102_v2  ;;  %v1119_v4 = vsel %vm1115_vm9, %v2496_v26, -inf }
 0x610   : > { %v1125_v24 = vsel %vm743_vm1, %v1119_v4, -inf }
 0x611   : > { %1126 = vmax.xlane.f32.xlu1 %v1125_v24  ;;  %vm1109_vm10 = vcmp.eq.s32.totalorder %v2506_v32, %v1105_v42 }
 0x612   : > { %v1113_v5 = vsel %vm1109_vm10, 1.0, %v2600_v22 }
 0x613   : > { %vm1117_vm11 = vcmp.gt.f32.partialorder %v1113_v5, 0.0 }
 0x614   : > { %v1056_v6 = vpop.xlane.xlu1 %1055  ;;  %v1121_v7 = vsel %vm1117_vm11, %v2500_v28, -inf }
 0x615   : > { %v1057_v9 = vcvt.f32.s32 %v1056_v6  ;;  %v1131_v52 = vsel %vm743_vm1, %v1121_v7, -inf }
 0x616   : > { %1132 = vmax.xlane.f32.xlu0 %v1131_v52 }
 0x617   : > { %v1060_v11 = vadd.s32 %v1059_v41, %v1057_v9 }
 0x619   : > { %vm1106_vm12 = vcmp.eq.s32.totalorder %v2506_v32, %v1060_v11 }
 0x61a   : > { %v1110_v26 = vsel %vm1106_vm12, 1.0, %v2608_v33 }
 0x61b   : > { %vm1114_vm13 = vcmp.gt.f32.partialorder %v1110_v26, 0.0 }
 0x61c   : > { %v1118_v13 = vsel %vm1114_vm13, %v2490_v23, -inf }
 0x61d   : > { %v1122_v14 = vsel %vm743_vm1, %v1118_v13, -inf }
 0x61e   : > { %1123 = vmax.xlane.f32.xlu2 %v1122_v14  ;;  %v1329_v14 = vld [vmem:[#allocation12 + $0x10] sm:$0xff] }
 0x67c   : > { %v1130_v22 = vpop.xlane.xlu2 %1129 }
 0x67d   : > { %v1136_v16 = vsub.f32 %v1120_v59, %v1130_v22  ;;  %v1328_v22 = vld [vmem:[#allocation12 + $0x8] sm:$0xff] }
 0x67f   : > { %v1142_v19 = vmul.f32 1.442695, %v1136_v16  ;;  %v1327_v16 = vld [vmem:[#allocation12] sm:$0xff] }
 0x681   : > { %1809 = vpow2.f32 %v1142_v19  ;;  %v1362_v19 = vld [vmem:[#allocation15 + $0x18] sm:$0xff] }
 0x684   : > { %v1127_v28 = vpop.xlane.xlu1 %1126 }
 0x685   : > { %v1135_v21 = vsub.f32 %v1119_v4, %v1127_v28  ;;  %v2249_v4 = vmov 32.0  }
 0x687   : > { %v1810_v25 = vpop.eup %1809  ;;  %v1140_v27 = vmul.f32 1.442695, %v1135_v21 }
 0x688   : > { %v1152_v29 = vsel %vm743_vm1, %v1810_v25, 0.0 }
 0x689   : > { %1811 = vpow2.f32 %v1140_v27  ;;  %1153 = vadd.xlane.f32.xlu0 %v1152_v29  ;;  %v1133_v32 = vpop.xlane.xlu0 %1132 }
 0x68a   : > { %v1137_v33 = vsub.f32 %v1121_v7, %v1133_v32 }
 0x68c   : > { %v1144_v31 = vmul.f32 1.442695, %v1137_v33 }
 0x68e   : > { %1813 = vpow2.f32 %v1144_v31 }
 0x68f   : > { %v1812_v23 = vpop.eup %1811 }
 0x690   : > { %v1149_v34 = vsel %vm743_vm1, %v1812_v23, 0.0 }
 0x691   : > { %v1124_v36 = vpop.xlane.xlu2 %1123  ;;  %1150 = vadd.xlane.f32.xlu2 %v1149_v34  ;;  %v1803_v34 = vld [vmem:[#allocation9] ss:$0 sm:$0xff] }
 0x692   : > { %v1134_v37 = vsub.f32 %v1118_v13, %v1124_v36 }
 0x694   : > { %v1814_v38 = vpop.eup %1813  ;;  %v1138_v39 = vmul.f32 1.442695, %v1134_v37 }
 0x695   : > { %v1155_v43 = vsel %vm743_vm1, %v1814_v38, 0.0 }
 0x696   : > { %1815 = vpow2.f32 %v1138_v39  ;;  %1156 = vadd.xlane.f32.xlu1 %v1155_v43 }
 0x69c   : > { %v1816_v45 = vpop.eup %1815 }
 0x69d   : > { %1797 = vrot.lane.b32.xlu0 %v1796_v44, %s2245_s30  ;;  %v1146_v46 = vsel %vm743_vm1, %v1816_v45, 0.0  ;;  %v1361_v44 = vld [vmem:[#allocation15 + $0x10] sm:$0xff] }
 0x69e   : > { %1147 = vadd.xlane.f32.xlu2 %v1146_v46  ;;  %v1359_v46 = vld [vmem:[#allocation15] sm:$0xff] }
 0x6af   : > { %1192 = vrot.lane.b32.xlu1 %v2477_v18, %s2245_s30 }
 0x6b6   : > { %1166 = vrot.lane.b32.xlu2 %v2467_v15, %s2245_s30 }
 0x6fc   : > { %v1154_v47 = vpop.xlane.xlu0 %1153 }
 0x6fd   : > { %1817 = vrcp.f32 %v1154_v47  ;;  %v1805_v47 = vld [vmem:[#allocation13] ss:$0 sm:$0xff] }
 0x703   : > { %v1818_v10 = vpop.eup %1817 }
 0x704   : > { %v1151_v48 = vpop.xlane.xlu2 %1150  ;;  %v1164_v20 = vmul.f32 %v1818_v10, %v1810_v25 }
 0x709   : > { %v1157_v49 = vpop.xlane.xlu1 %1156 }
 0x70a   : > { %1819 = vrcp.f32 %v1157_v49 }
 0x70f   : > { %v1798_v50 = vpop.permute.xlu0 %1797 }
 0x710   : > { %v1820_v51 = vpop.eup %1819  ;;  %v1800_v12 = vunpack.i.h.bf16 %v1798_v50  ;;  %v1799_v17 = vunpack.i.l.bf16 %v1798_v50  ;;  %v1806_v50 = vld [vmem:[#allocation16] ss:$0 sm:$0xff] }
 0x711   : > { %v1165_v53 = vmul.f32 %v1820_v51, %v1814_v38  ;;  %v1148_v54 = vpop.xlane.xlu2 %1147  ;;  %v1804_v38 = vld [vmem:[#allocation10] ss:$0 sm:$0xff] }
 0x712   : > { %1821 = vrcp.f32 %v1148_v54  ;;  %1239 = vmatpush.msra.mxu2 %v1799_v17  ;;  %1265 = vmatpush.msra.mxu3 %v1800_v12 }
 0x713   : > { %1650 = vmatmul.msk.f32.vlgmr.msra.gmra.mxu2 %vm743_vm1, %v1164_v20  ;;  %1651 = vmatmul.msk.f32.vlgmr.msra.gmra.mxu3 %vm743_vm1, %v1165_v53  ;;  %1823 = vrcp.f32 %v1151_v48 }
 0x714   : > { %1825 = vrcp.f32 %v2249_v4 }
 0x718   : > { %v1822_v15 = vpop.eup %1821 }
 0x719   : > { %v1167_v18 = vpop.permute.xlu2 %1166  ;;  %v1162_v55 = vmul.f32 %v1822_v15, %v1816_v45  ;;  %v1824_v56 = vpop.eup %1823  ;;  %v1360_v45 = vld [vmem:[#allocation15 + $0x8] sm:$0xff] }
 0x71a   : > { %1187 = vmatpush.msrb.mxu0 %v1167_v18  ;;  %v1163_v58 = vmul.f32 %v1824_v56, %v1812_v23  ;;  %v1826_v24 = vpop.eup %1825 }
 0x71b   : > { %1648 = vmatmul.msk.f32.vlgmr.msrb.gmra.mxu0 %vm743_vm1, %v1162_v55  ;;  %v1294_v40 = vmul.f32 32.0, %v1826_v24  ;;  %vm1298_vm2 = vweird.f32 %v1826_v24 }
 0x71d   : > { %v1295_v5 = vsub.f32 1.0, %v1294_v40 }
 0x71f   : > { %v1296_v6 = vmul.f32 %v1826_v24, %v1295_v5 }
 0x721   : > { %v1193_v57 = vpop.permute.xlu1 %1192  ;;  %v1297_v7 = vadd.f32 %v1826_v24, %v1296_v6 }
 0x722   : > { %1213 = vmatpush.msrb.mxu1 %v1193_v57 }
 0x723   : > { %1649 = vmatmul.msk.f32.vlgmr.msrb.gmra.mxu1 %vm743_vm1, %v1163_v58  ;;  %v1299_v41 = vsel %vm1298_vm2, %v1826_v24, %v1297_v7 }
 0x724   : > { %1382 = vmatpush.msra.mxu1 %v1362_v19 }
 0x726   : > { %1383 = vmatpush.msra.mxu1 %v1361_v44 }
 0x728   : > { %1384 = vmatpush.msra.mxu1 %v1360_v45 }
 0x72a   : > { %1385 = vmatpush.msra.mxu1 %v1359_v46 }
 0x796   : > { %v1241_v30 = vpop.f32.mrf.mxu2  ;;  %v1267_v60 = vpop.f32.mrf.mxu3 }
 0x797   : > { %1275 = vrot.lane.b32.xlu1 %v1241_v30, %s2246_s15 }
 0x798   : > { %v1189_v62 = vpop.f32.mrf.mxu0 }
 0x7a0   : > { %v1215_v59 = vpop.f32.mrf.mxu1 }
 0x7a1   : > { %1271 = vrot.lane.b32.xlu0 %v1215_v59, %s2247_s19 }
 0x7a9   : > { %1279 = vrot.lane.b32.xlu0 %v1267_v60, %s2248_s5 }
 0x809   : > { %v1276_v0 = vpop.permute.xlu1 %1275 }
 0x813   : > { %v1272_v61 = vpop.permute.xlu0 %1271 }
 0x814   : > { %v1282_v63 = vsel %vm743_vm1, %v1189_v62, %v1272_v61 }
 0x815   : > { %v1284_v1 = vsel %vm1283_vm14, %v1282_v63, %v1276_v0  ;;  %v1807_v0 = vld [vmem:[#allocation18] ss:$0 sm:$0xff] }
 0x81b   : > { %v1280_v35 = vpop.permute.xlu0 %1279 }
 0x81c   : > { %v1286_v2 = vsel %vm1285_vm15, %v1284_v1, %v1280_v35  ;;  %v1808_v1 = vld [vmem:[#allocation19] ss:$0 sm:$0xff] }
 0x81d   : > { %v1287_v3 = vadd.f32 %v1286_v2, %v2462_v8  ;;  %v1330_v8 = vld [vmem:[#allocation12 + $0x18] sm:$0xff] }
 0x81e   : > { %1350 = vmatpush.msra.mxu0 %v1330_v8 }
 0x81f   : > { %v1290_v42 = vsel %vm673_vm0, %v1287_v3, 0.0 }
 0x820   : > { %1291 = vadd.xlane.f32.xlu1 %v1290_v42  ;;  %1351 = vmatpush.msra.mxu0 %v1329_v14 }
 0x822   : > { %1352 = vmatpush.msra.mxu0 %v1328_v22 }
 0x824   : > { %1353 = vmatpush.msra.mxu0 %v1327_v16 }
 0x893   : > { %v1292_v9 = vpop.xlane.xlu1 %1291 }
 0x894   : > { %v1300_v52 = vmul.f32 %v1299_v41, %v1292_v9 }
 0x896   : > { %v1301_v11 = vsub.f32 %v1287_v3, %v1300_v52 }
 0x898   : > { %v1302_v26 = vmul.f32 %v1301_v11, %v1301_v11 }
 0x89a   : > { %v1303_v13 = vsel %vm673_vm0, %v1302_v26, 0.0 }
 0x89b   : > { %1304 = vadd.xlane.f32.xlu0 %v1303_v13 }
 0x90e   : > { %v1305_v28 = vpop.xlane.xlu0 %1304 }
 0x90f   : > { %v1306_v21 = vmul.f32 %v1305_v28, %v1299_v41 }
 0x911   : > { %v1307_v25 = vadd.f32 1e-05, %v1306_v21 }
 0x913   : > { %1827 = vrsqrt.f32 %v1307_v25  ;;  %vm1314_vm3 = vweird.f32 %v1307_v25 }
 0x919   : > { %v1828_v27 = vpop.eup %1827 }
 0x91a   : > { %v1309_v29 = vmul.f32 %v1828_v27, %v1307_v25  ;;  %vm1315_vm1 = vweird.f32 %v1828_v27 }
 0x91b   : > { %vm1316_vm4 = vmor %vm1314_vm3, %vm1315_vm1 }
 0x91c   : > { %v1310_v32 = vmul.f32 %v1828_v27, %v1309_v29 }
 0x91e   : > { %v1311_v33 = vmul.f32 0.5, %v1310_v32 }
 0x920   : > { %v1312_v31 = vsub.f32 1.5, %v1311_v33 }
 0x922   : > { %v1313_v23 = vmul.f32 %v1828_v27, %v1312_v31 }
 0x924   : > { %v1317_v36 = vsel %vm1316_vm4, %v1828_v27, %v1313_v23 }
 0x925   : > { %v1318_v37 = vmul.f32 %v1317_v36, %v1301_v11 }
 0x927   : > { %v1322_v39 = vmul.f32 %v1803_v34, %v1318_v37 }
 0x929   : > { %v1326_v43 = vadd.f32 %v1804_v38, %v1322_v39 }
 0x92b   : > { %1652 = vmatmul.msk.f32.vlgmr.msra.gmra.mxu0 %vm673_vm0, %v1326_v43 }
 0x9a8   : > { %v1355_v48 = vpop.f32.mrf.mxu0 }
 0x9a9   : > { %v1356_v49 = vadd.f32 %v1805_v47, %v1355_v48 }
 0x9ab   : > { %v1358_v10 = vmax.f32 %v1356_v49, 0.0 }
 0x9ad   : > { %1653 = vmatmul.msk.f32.vlgmr.msra.gmra.mxu1 %vm673_vm0, %v1358_v10 }
 0xa2a   : > { %v1387_v51 = vpop.f32.mrf.mxu1 }
 0xa2b   : > { %v1388_v12 = vadd.f32 %v1806_v50, %v1387_v51 }
 0xa2d   : > { %v1390_v17 = vadd.f32 %v1388_v12, %v1326_v43 }
 0xa2f   : > { %v1393_v20 = vsel %vm673_vm0, %v1390_v17, 0.0 }
 0xa30   : > { %1394 = vadd.xlane.f32.xlu2 %v1393_v20 }
 0xaa3   : > { %v1395_v53 = vpop.xlane.xlu2 %1394 }
 0xaa4   : > { %v1396_v54 = vmul.f32 %v1395_v53, %v1299_v41 }
 0xaa6   : > { %v1397_v15 = vsub.f32 %v1390_v17, %v1396_v54 }
 0xaa8   : > { %v1398_v18 = vmul.f32 %v1397_v15, %v1397_v15 }
 0xaaa   : > { %v1399_v55 = vsel %vm673_vm0, %v1398_v18, 0.0 }
 0xaab   : > { %1400 = vadd.xlane.f32.xlu1 %v1399_v55 }
 0xb1e   : > { %v1401_v56 = vpop.xlane.xlu1 %1400 }
 0xb1f   : > { %v1402_v57 = vmul.f32 %v1401_v56, %v1299_v41 }
 0xb21   : > { %v1403_v58 = vadd.f32 1e-05, %v1402_v57 }
 0xb23   : > { %1829 = vrsqrt.f32 %v1403_v58  ;;  %vm1410_vm6 = vweird.f32 %v1403_v58 }
 0xb29   : > { %v1830_v30 = vpop.eup %1829 }
 0xb2a   : > { %v1405_v59 = vmul.f32 %v1830_v30, %v1403_v58  ;;  %vm1411_vm5 = vweird.f32 %v1830_v30 }
 0xb2b   : > { %vm1412_vm7 = vmor %vm1410_vm6, %vm1411_vm5 }
 0xb2c   : > { %v1406_v60 = vmul.f32 %v1830_v30, %v1405_v59 }
 0xb2e   : > { %v1407_v61 = vmul.f32 0.5, %v1406_v60 }
 0xb30   : > { %v1408_v62 = vsub.f32 1.5, %v1407_v61 }
 0xb32   : > { %v1409_v63 = vmul.f32 %v1830_v30, %v1408_v62 }
 0xb34   : > { %v1413_v35 = vsel %vm1412_vm7, %v1830_v30, %v1409_v63 }
 0xb35   : > { %v1414_v2 = vmul.f32 %v1413_v35, %v1397_v15 }
 0xb37   : > { %v1418_v3 = vmul.f32 %v1807_v0, %v1414_v2 }
 0xb39   : > { %v1422_v42 = vadd.f32 %v1808_v1, %v1418_v3 }
 0xb3b   : > { %1423 = vst.msk [vmem:[%s662_s21] sm:$0xff] %vm673_vm0, %v1422_v42 }
 0xb3c PF: > { %s31_s29 = sadd.s32 1, %s2225_s29  }
 0xb3d   : > { %p28_p7 = scmp.ge.s32.totalorder %s31_s29, 4  }
 0xb3f   :  { %30 = sbr.rel (!%p28_p7) target bundleno = 11 (0xb), region = 158 }
 0xb44   :  { %1443 = vsyncpa [#allocation3], 1 }
 0xb45   :  { %1445 = vsyncpa [#allocation3 + $0x1], 1 }
 0xb46   :  { %1446 = vsyncpa [#allocation5], 1 }
 0xb47   :  { %1447 = vsyncpa [#allocation8], 1 }
 0xb48   :  { %1448 = vsyncpa [#allocation11], 1 }
 0xb49   :  { %1449 = vsyncpa [#allocation14], 1 }
 0xb4a   :  { %1450 = vsyncpa [#allocation17], 1 }
 0xb4b   :  { %1451 = vsyncpa [#allocation20], 1 }

// kernel: tag_encoder_fwd.35
= control target key start
LH: loop header
LB: loop body
LE: loop exit
PB: predicated region body
PF: predicated region fallthrough
CT: control target
= control target key end

     0   :  { %s240_s0 = inlined_call_operand.vmem [shape: f32[16,32], index: 0, kind: input, shape index: {}]   ;;  %s241_s1 = inlined_call_operand.vmem [shape: f32[32,32], index: 1, kind: input, shape index: {}]   ;;  %s242_s2 = inlined_call_operand.vmem [shape: f32[1,32], index: 2, kind: input, shape index: {}]   ;;  %s243_s3 = inlined_call_operand.vmem [shape: f32[32,16], index: 3, kind: input, shape index: {}]   ;;  %s244_s4 = inlined_call_operand.vmem [shape: f32[1,16], index: 4, kind: input, shape index: {}]   ;;  %s245_s5 = inlined_call_operand.hbm [shape: f32[16,16], index: 5, kind: output, shape index: {}]  }
   0x1   :  { %v26_v0 = vld [vmem:[%s241_s1 + $0x18] sm:$0xff]  ;;  %v25_v1 = vld [vmem:[%s241_s1 + $0x10] sm:$0xff]  ;;  %v24_v2 = vld [vmem:[%s241_s1 + $0x8] sm:$0xff] }
   0x2   :  { %125 = vmatpush.msra.mxu2 %v26_v0  ;;  %50 = vmatpush.msra.mxu0 %v26_v0  ;;  %v66_v3 = vld [vmem:[%s243_s3 + $0x18] sm:$0xff] }
   0x4   :  { %126 = vmatpush.msra.mxu2 %v25_v1  ;;  %51 = vmatpush.msra.mxu0 %v25_v1 }
   0x5   :  { %10 = vsyncpa [#allocation3], 0  ;;  %v23_v4 = vld [vmem:[%s241_s1] sm:$0xff]  ;;  %129 = vmatpush.msra.mxu3 %v66_v3  ;;  %89 = vmatpush.msra.mxu1 %v66_v3  ;;  %v22_v5 = vld [vmem:[%s240_s0 + $0x8] sm:$0xff]  ;;  %vm31_vm0 = vcmask 261120   ;;  %vm100_vm1 = vcmask 130048  }
   0x6   :  { %127 = vmatpush.msra.mxu2 %v24_v2  ;;  %52 = vmatpush.msra.mxu0 %v24_v2  ;;  %v21_v6 = vld [vmem:[%s240_s0] sm:$0xff]  ;;  %v65_v7 = vld [vmem:[%s243_s3 + $0x10] sm:$0xff]  ;;  %v64_v8 = vld [vmem:[%s243_s3 + $0x8] sm:$0xff]  ;;  %s109_s17 = sshll.u32 %s245_s5, 4  ;;  %s165_s18 = smov 128   ;;  %s110_s17 = int_to_ptr.hbm [resolvable:$true] %s109_s17 }
   0x7   :  { %130 = vmatpush.msra.mxu3 %v65_v7  ;;  %90 = vmatpush.msra.mxu1 %v65_v7  ;;  %v63_v9 = vld [vmem:[%s243_s3] sm:$0xff]  ;;  %s164_s3 = smov [#allocation2]   ;;  %s166_s19 = smov 8  }
   0x8   :  { %128 = vmatpush.msra.mxu2 %v23_v4  ;;  %53 = vmatpush.msra.mxu0 %v23_v4  ;;  %v136_v10 = vld [vmem:[%s242_s2] ss:$0 sm:$0xff]  ;;  %s107_s2 = sshll.u32 %s164_s3, 4  ;;  %s108_s2 = int_to_ptr.vmem [resolvable:$true] %s107_s2 }
   0x9   :  { %122 = vmatmul.msk.f32.vlgmr.msra.gmra.mxu2 %vm31_vm0, %v22_v5  ;;  %121 = vmatmul.msk.f32.vlgmr.msra.gmra.mxu0 %vm31_vm0, %v21_v6  ;;  %v137_v17 = vld [vmem:[%s244_s4] ss:$0 sm:$0xff] }
   0xa   :  { %131 = vmatpush.msra.mxu3 %v64_v8  ;;  %91 = vmatpush.msra.mxu1 %v64_v8 }
   0xc   :  { %132 = vmatpush.msra.mxu3 %v63_v9  ;;  %92 = vmatpush.msra.mxu1 %v63_v9 }
  0x86   :  { %v55_v11 = vpop.f32.mrf.mxu0 }
  0x87   :  { %v56_v12 = vadd.f32 %v136_v10, %v55_v11 }
  0x89   :  { %v61_v13 = vmax.f32 %v56_v12, 0.0 }
  0x8b   :  { %123 = vmatmul.msk.f32.vlgmr.msra.gmra.mxu1 %vm31_vm0, %v61_v13 }
  0x8c   :  { %v58_v14 = vpop.f32.mrf.mxu2 }
  0x8d   :  { %v59_v15 = vadd.f32 %v136_v10, %v58_v14 }
  0x8f   :  { %v62_v16 = vmax.f32 %v59_v15, 0.0 }
  0x91   :  { %124 = vmatmul.msk.f32.vlgmr.msra.gmra.mxu3 %vm31_vm0, %v62_v16 }
 0x108   :  { %v94_v18 = vpop.f32.mrf.mxu1 }
 0x109   :  { %v95_v19 = vadd.f32 %v137_v17, %v94_v18 }
 0x10b   :  { %101 = vst.msk [vmem:[#allocation2] sm:$0xff] %vm100_vm1, %v95_v19 }
 0x114   :  { %v97_v20 = vpop.f32.mrf.mxu3 }
 0x115   :  { %v98_v21 = vadd.f32 %v137_v17, %v97_v20 }
 0x117   :  { %102 = vst.msk [vmem:[#allocation2 + $0x8] sm:$0xff] %vm100_vm1, %v98_v21 }
 0x118   :  { %115 = dma.vmem_to_hbm [thread:$0]  %s108_s2, 256, %s110_s17, [#allocation3], %s165_s18, %s165_s18, %s166_s19  }
 0x119   :  { %162 = dma.done.wait [#allocation3], 256  }
 0x11a   :  { %163 = vsyncadd [#allocation3], 4294967040 }
 0x11b   :  { %120 = vsyncpa [#allocation3], 1 }

// kernel: tag_encoder_fwd.31
= control target key start
LH: loop header
LB: loop body
LE: loop exit
PB: predicated region body
PF: predicated region fallthrough
CT: control target
= control target key end

     0   :  { %s1337_s0 = inlined_call_operand.vmem [shape: f32[8,8], index: 0, kind: input, shape index: {}]   ;;  %s1338_s1 = inlined_call_operand.vmem [shape: f32[2,8,32], index: 1, kind: input, shape index: {}, may-alias: {1,2}]   ;;  %s1339_s2 = inlined_call_operand.vmem [shape: f32[2,8,32], index: 2, kind: input, shape index: {}, may-alias: {1,2}]   ;;  %s1340_s3 = inlined_call_operand.vmem [shape: f32[1,32], index: 3, kind: input, shape index: {}]   ;;  %s1341_s4 = inlined_call_operand.hbm [shape: f32[1,32], index: 4, kind: input, shape index: {}]   ;;  %s1342_s5 = inlined_call_operand.hbm [shape: f32[32,32], index: 5, kind: input, shape index: {}]   ;;  %s1343_s6 = inlined_call_operand.hbm [shape: f32[1,32], index: 6, kind: input, shape index: {}]   ;;  %s1344_s7 = inlined_call_operand.hbm [shape: f32[32,32], index: 7, kind: input, shape index: {}]   ;;  %s1345_s8 = inlined_call_operand.hbm [shape: f32[1,32], index: 8, kind: input, shape index: {}]   ;;  %s1346_s9 = inlined_call_operand.hbm [shape: f32[1,32], index: 9, kind: input, shape index: {}]   ;;  %s1347_s10 = inlined_call_operand.hbm [shape: f32[1,32], index: 10, kind: input, shape index: {}]   ;;  %s1348_s11 = inlined_call_operand.vmem [shape: f32[2,8,32], index: 11, kind: output, shape index: {}]  }
   0x1   :  { %1349 = sst [smem:[#allocation17_spill]] %s1342_s5 }
   0x2   :  { %16 = vsyncpa [#allocation3], 0 }
   0x3   :  { %17 = vsyncpa [#allocation5], 0 }
   0x4   :  { %18 = vsyncpa [#allocation8], 0 }
   0x5   :  { %19 = vsyncpa [#allocation11], 0  ;;  %s1229_s17 = smov 0  }
   0x6 LB: > { %s1350_s5 = sld [smem:[#allocation17_spill]]  ;;  %s1238_s21 = sadd.s32 4294967295, %s1157_s17   ;;  %s1157_s17 = sphi %s1229_s17, %s25_s17  }
   0x7   : > { %p806_p0 = scmp.ge.s32.totalorder %s1157_s17, 1  ;;  %p297_p1 = scmp.lt.s32.totalorder %s1157_s17, 3 }
   0x8   : > { %p881_p2 = scmp.eq.s32.totalorder %s1238_s21, 0  ;;  %s1159_s23 = smov [#allocation4]  }
   0x9   : > { %p1243_p3 = pnand %p806_p0, %p297_p1  ;;  %s328_s24 = sshll.u32 %s1159_s23, 4  ;;  %s329_s24 = int_to_ptr.vmem [resolvable:$true] %s328_s24 }
   0xa   : > { %s352_s27 = sshll.u32 %s1344_s7, 4  ;;  %s1160_s29 = smov [#allocation7]   ;;  %s353_s27 = int_to_ptr.hbm [resolvable:$true] %s352_s27 }
   0xb   : > { %p859_p4 = pneg %p1243_p3  ;;  %s354_s30 = sshll.u32 %s1160_s29, 4  ;;  %s355_s30 = int_to_ptr.vmem [resolvable:$true] %s354_s30 }
   0xc   : > { %s326_s20 = sshll.u32 %s1350_s5, 4  ;;  %s379_s14 = sshll.u32 %s1346_s9, 4  ;;  %s327_s20 = int_to_ptr.hbm [resolvable:$true] %s326_s20  ;;  %s380_s14 = int_to_ptr.hbm [resolvable:$true] %s379_s14 }
   0xd   : > { %p1254_p5 = pnand %p881_p2, %p859_p4  ;;  %s1161_s15 = smov 128  }
   0xe   : > { %s1162_s16 = smov 8   ;;  %s1163_s18 = smov [#allocation10]  }
   0xf   : > { %865 = dma.hbm_to_vmem [thread:$0]  (!%p1254_p5), %s327_s20, 512, %s329_s24, [#allocation5], %s1161_s15, %s1161_s15, %s1162_s16  }
  0x10   : > { %871 = dma.hbm_to_vmem [thread:$0]  (!%p1254_p5), %s353_s27, 512, %s355_s30, [#allocation8], %s1161_s15, %s1161_s15, %s1162_s16  }
  0x11   : > { %s381_s19 = sshll.u32 %s1163_s18, 4  ;;  %s315_s26 = sshll.u32 %s1341_s4, 4  ;;  %s382_s19 = int_to_ptr.vmem [resolvable:$true] %s381_s19  ;;  %s316_s26 = int_to_ptr.hbm [resolvable:$true] %s315_s26 }
  0x12   : > { %877 = dma.hbm_to_vmem [thread:$0]  (!%p1254_p5), %s380_s14, 16, %s382_s19, [#allocation11]  }
  0x13   : > { %s341_s13 = sshll.u32 %s1343_s6, 4  ;;  %s1164_s5 = smov [#allocation2]   ;;  %s342_s13 = int_to_ptr.hbm [resolvable:$true] %s341_s13 }
  0x14   : > { %s317_s20 = sshll.u32 %s1164_s5, 4  ;;  %s1165_s24 = smov [#allocation6]   ;;  %s318_s20 = int_to_ptr.vmem [resolvable:$true] %s317_s20 }
  0x15   : > { %862 = dma.hbm_to_vmem [thread:$0]  (!%p1254_p5), %s316_s26, 16, %s318_s20, [#allocation3]  }
  0x16   : > { %s343_s27 = sshll.u32 %s1165_s24, 4  ;;  %s367_s16 = sshll.u32 %s1345_s8, 4  ;;  %s344_s27 = int_to_ptr.vmem [resolvable:$true] %s343_s27  ;;  %s368_s16 = int_to_ptr.hbm [resolvable:$true] %s367_s16 }
  0x17   : > { %868 = dma.hbm_to_vmem [thread:$0]  (!%p1254_p5), %s342_s13, 16, %s344_s27, [#allocation5]  }
  0x18   : > { %s391_s19 = sshll.u32 %s1347_s10, 4  ;;  %s1166_s5 = smov [#allocation9]   ;;  %s392_s19 = int_to_ptr.hbm [resolvable:$true] %s391_s19 }
  0x19   : > { %s369_s23 = sshll.u32 %s1166_s5, 4  ;;  %s1167_s25 = smov [#allocation12]   ;;  %s370_s23 = int_to_ptr.vmem [resolvable:$true] %s369_s23 }
  0x1a   : > { %874 = dma.hbm_to_vmem [thread:$0]  (!%p1254_p5), %s368_s16, 16, %s370_s23, [#allocation8]  }
  0x1b   : > { %s393_s26 = sshll.u32 %s1167_s25, 4  ;;  %420 = sbr.rel (%p1243_p3) target bundleno = 977 (0x3d1), region = 64  ;;  %s394_s26 = int_to_ptr.vmem [resolvable:$true] %s393_s26 }
  0x1c   : > { %880 = dma.hbm_to_vmem [thread:$0]  (!%p1254_p5), %s392_s19, 16, %s394_s26, [#allocation11]  }
  0x20   : > { %1140 = dma.done.wait (%p881_p2), [#allocation3], 16  }
  0x21   : > { %1142 = vsyncadd (%p881_p2), [#allocation3], 4294967280 }
  0x22   : > { %1144 = dma.done.wait (%p881_p2), [#allocation5], 528  }
  0x23   : > { %1146 = vsyncadd (%p881_p2), [#allocation5], 4294966768 }
  0x24   : > { %1148 = dma.done.wait (%p881_p2), [#allocation8], 528  }
  0x25   : > { %1150 = vsyncadd (%p881_p2), [#allocation8], 4294966768 }
  0x26   : > { %1152 = dma.done.wait (%p881_p2), [#allocation11], 32  }
  0x27   : > { %1154 = vsyncadd (%p881_p2), [#allocation11], 4294967264  ;;  %p493_p6 = scmp.lt.s32.totalorder %s1238_s21, 1  ;;  %vm508_vm0 = vcmask 64512   ;;  %v507_v1 = vld [vmem:[%s1337_s0] sm:$0xff]  ;;  %vm535_vm1 = vcmask 261120  }
  0x28   : > { %v1168_v6 = vmov 32.0   ;;  %v576_v18 = vld [vmem:[#allocation4 + $0x18] sm:$0xff]  ;;  %v575_v19 = vld [vmem:[#allocation4 + $0x10] sm:$0xff]  ;;  %v574_v20 = vld [vmem:[#allocation4 + $0x8] sm:$0xff] }
  0x29   : > { %s1354_s21 = smov (!%p493_p6, %s1238_s21), 1  ;;  %919 = vrcp.f32 %v1168_v6  ;;  %596 = vmatpush.msra.mxu1 %v576_v18  ;;  %v573_v21 = vld [vmem:[#allocation4] sm:$0xff]  ;;  %v913_v32 = vld [vmem:[%s1340_s3] ss:$0 sm:$0xff]  ;;  %v607_v38 = vld [vmem:[#allocation7 + $0x10] sm:$0xff] }
  0x2a   : > { %s1307_s22 = sshll.u32 %s1354_s21, 3  ;;  %v608_v22 = vld [vmem:[#allocation7 + $0x18] sm:$0xff]  ;;  %v606_v39 = vld [vmem:[#allocation7 + $0x8] sm:$0xff]  ;;  %v605_v40 = vld [vmem:[#allocation7] sm:$0xff] }
  0x2b   : > { %s496_s12 = scalar_lea.vmem %s1338_s1, %s1307_s22  ;;  %s500_s30 = scalar_lea.vmem %s1339_s2, %s1307_s22  ;;  %597 = vmatpush.msra.mxu1 %v575_v19  ;;  %628 = vmatpush.msra.mxu2 %v608_v22  ;;  %v914_v35 = vld [vmem:[#allocation2] ss:$0 sm:$0xff]  ;;  %v915_v41 = vld [vmem:[#allocation6] ss:$0 sm:$0xff]  ;;  %v916_v45 = vld [vmem:[#allocation9] ss:$0 sm:$0xff] }
  0x2c   : > { %v505_v0 = vld [vmem:[%s496_s12] sm:$0xff]  ;;  %s504_s18 = scalar_lea.vmem %s1348_s11, %s1307_s22 }
  0x2d   : > { %527 = vmatpush.msra.mxu0 %v505_v0  ;;  %v506_v2 = vld [vmem:[%s500_s30] sm:$0xff]  ;;  %598 = vmatpush.msra.mxu1 %v574_v20 }
  0x2e   : > { %826 = vmatmul.msk.f32.vlgmr.msra.gmra.mxu0 %vm508_vm0, %v507_v1  ;;  %629 = vmatpush.msra.mxu2 %v607_v38  ;;  %v917_v0 = vld [vmem:[#allocation10] ss:$0 sm:$0xff] }
  0x2f   : > { %v920_v7 = vpop.eup %919  ;;  %599 = vmatpush.msra.mxu1 %v573_v21 }
  0x30   : > { %v540_v8 = vmul.f32 32.0, %v920_v7  ;;  %vm544_vm2 = vweird.f32 %v920_v7  ;;  %630 = vmatpush.msra.mxu2 %v606_v39 }
  0x32   : > { %v541_v9 = vsub.f32 1.0, %v540_v8  ;;  %631 = vmatpush.msra.mxu2 %v605_v40 }
  0x34   : > { %v542_v10 = vmul.f32 %v920_v7, %v541_v9 }
  0x36   : > { %v543_v11 = vadd.f32 %v920_v7, %v542_v10 }
  0x38   : > { %v545_v12 = vsel %vm544_vm2, %v920_v7, %v543_v11 }
  0xab   : > { %v529_v3 = vpop.f32.mrf.mxu0 }
  0xac   : > { %v532_v4 = vadd.f32 %v529_v3, %v506_v2  ;;  %v918_v2 = vld [vmem:[#allocation12] ss:$0 sm:$0xff] }
  0xae   : > { %v536_v5 = vsel %vm535_vm1, %v532_v4, 0.0 }
  0xaf   : > { %537 = vadd.xlane.f32.xlu0 %v536_v5 }
 0x122   : > { %v538_v13 = vpop.xlane.xlu0 %537 }
 0x123   : > { %v546_v14 = vmul.f32 %v545_v12, %v538_v13 }
 0x125   : > { %v547_v15 = vsub.f32 %v532_v4, %v546_v14 }
 0x127   : > { %v548_v16 = vmul.f32 %v547_v15, %v547_v15 }
 0x129   : > { %v549_v17 = vsel %vm535_vm1, %v548_v16, 0.0 }
 0x12a   : > { %550 = vadd.xlane.f32.xlu0 %v549_v17 }
 0x19d   : > { %v551_v23 = vpop.xlane.xlu0 %550 }
 0x19e   : > { %v552_v24 = vmul.f32 %v551_v23, %v545_v12 }
 0x1a0   : > { %v553_v25 = vadd.f32 1e-05, %v552_v24 }
 0x1a2   : > { %921 = vrsqrt.f32 %v553_v25  ;;  %vm560_vm4 = vweird.f32 %v553_v25 }
 0x1a8   : > { %v922_v26 = vpop.eup %921 }
 0x1a9   : > { %v555_v27 = vmul.f32 %v922_v26, %v553_v25  ;;  %vm561_vm3 = vweird.f32 %v922_v26 }
 0x1aa   : > { %vm562_vm5 = vmor %vm560_vm4, %vm561_vm3 }
 0x1ab   : > { %v556_v28 = vmul.f32 %v922_v26, %v555_v27 }
 0x1ad   : > { %v557_v29 = vmul.f32 0.5, %v556_v28 }
 0x1af   : > { %v558_v30 = vsub.f32 1.5, %v557_v29 }
 0x1b1   : > { %v559_v31 = vmul.f32 %v922_v26, %v558_v30 }
 0x1b3   : > { %v563_v33 = vsel %vm562_vm5, %v922_v26, %v559_v31 }
 0x1b4   : > { %v564_v34 = vmul.f32 %v563_v33, %v547_v15 }
 0x1b6   : > { %v568_v36 = vmul.f32 %v913_v32, %v564_v34 }
 0x1b8   : > { %v572_v37 = vadd.f32 %v914_v35, %v568_v36 }
 0x1ba   : > { %827 = vmatmul.msk.f32.vlgmr.msra.gmra.mxu1 %vm535_vm1, %v572_v37 }
 0x237   : > { %v601_v42 = vpop.f32.mrf.mxu1 }
 0x238   : > { %v602_v43 = vadd.f32 %v915_v41, %v601_v42 }
 0x23a   : > { %v604_v44 = vmax.f32 %v602_v43, 0.0 }
 0x23c   : > { %828 = vmatmul.msk.f32.vlgmr.msra.gmra.mxu2 %vm535_vm1, %v604_v44 }
 0x2bf   : > { %v633_v46 = vpop.f32.mrf.mxu2 }
 0x2c0   : > { %v634_v47 = vadd.f32 %v916_v45, %v633_v46 }
 0x2c2   : > { %v636_v48 = vadd.f32 %v634_v47, %v572_v37 }
 0x2c4   : > { %v639_v49 = vsel %vm535_vm1, %v636_v48, 0.0 }
 0x2c5   : > { %640 = vadd.xlane.f32.xlu1 %v639_v49 }
 0x338   : > { %v641_v50 = vpop.xlane.xlu1 %640 }
 0x339   : > { %v642_v51 = vmul.f32 %v641_v50, %v545_v12 }
 0x33b   : > { %v643_v52 = vsub.f32 %v636_v48, %v642_v51 }
 0x33d   : > { %v644_v53 = vmul.f32 %v643_v52, %v643_v52 }
 0x33f   : > { %v645_v54 = vsel %vm535_vm1, %v644_v53, 0.0 }
 0x340   : > { %646 = vadd.xlane.f32.xlu1 %v645_v54 }
 0x3b3   : > { %v647_v55 = vpop.xlane.xlu1 %646 }
 0x3b4   : > { %v648_v56 = vmul.f32 %v647_v55, %v545_v12 }
 0x3b6   : > { %v649_v57 = vadd.f32 1e-05, %v648_v56 }
 0x3b8   : > { %923 = vrsqrt.f32 %v649_v57  ;;  %vm656_vm7 = vweird.f32 %v649_v57 }
 0x3be   : > { %v924_v58 = vpop.eup %923 }
 0x3bf   : > { %v651_v59 = vmul.f32 %v924_v58, %v649_v57  ;;  %vm657_vm6 = vweird.f32 %v924_v58 }
 0x3c0   : > { %vm658_vm8 = vmor %vm656_vm7, %vm657_vm6 }
 0x3c1   : > { %v652_v60 = vmul.f32 %v924_v58, %v651_v59 }
 0x3c3   : > { %v653_v61 = vmul.f32 0.5, %v652_v60 }
 0x3c5   : > { %v654_v62 = vsub.f32 1.5, %v653_v61 }
 0x3c7   : > { %v655_v63 = vmul.f32 %v924_v58, %v654_v62 }
 0x3c9   : > { %v659_v1 = vsel %vm658_vm8, %v924_v58, %v655_v63 }
 0x3ca   : > { %v660_v3 = vmul.f32 %v659_v1, %v643_v52 }
 0x3cc   : > { %v664_v4 = vmul.f32 %v917_v0, %v660_v3 }
 0x3ce   : > { %v668_v5 = vadd.f32 %v918_v2, %v664_v4 }
 0x3d0   : > { %669 = vst.msk [vmem:[%s504_s18] sm:$0xff] %vm535_vm1, %v668_v5 }
 0x3d1 PF: > { %s25_s17 = sadd.s32 1, %s1157_s17  }
 0x3d2   : > { %p22_p7 = scmp.ge.s32.totalorder %s25_s17, 4  }
 0x3d4   :  { %24 = sbr.rel (!%p22_p7) target bundleno = 6 (0x6), region = 126 }
 0x3d9   :  { %689 = vsyncpa [#allocation3], 1 }
 0x3da   :  { %691 = vsyncpa [#allocation3 + $0x1], 1 }
 0x3db   :  { %692 = vsyncpa [#allocation5], 1 }
 0x3dc   :  { %693 = vsyncpa [#allocation8], 1 }
 0x3dd   :  { %694 = vsyncpa [#allocation11], 1 }

// kernel: tag_encoder_fwd.32
= control target key start
LH: loop header
LB: loop body
LE: loop exit
PB: predicated region body
PF: predicated region fallthrough
CT: control target
= control target key end

     0   :  { %s2586_s0 = inlined_call_operand.vmem [shape: f32[2,8,32], index: 0, kind: input, shape index: {}]   ;;  %s2587_s1 = inlined_call_operand.vmem [shape: f32[2,8,32], index: 1, kind: input, shape index: {}]   ;;  %s2588_s2 = inlined_call_operand.hbm [shape: f32[32,32], index: 2, kind: input, shape index: {}]   ;;  %s2589_s3 = inlined_call_operand.vmem [shape: f32[1,32], index: 3, kind: input, shape index: {}]   ;;  %s2590_s4 = inlined_call_operand.hbm [shape: f32[32,64], index: 4, kind: input, shape index: {}]   ;;  %s2591_s5 = inlined_call_operand.hbm [shape: f32[1,64], index: 5, kind: input, shape index: {}]   ;;  %s2592_s6 = inlined_call_operand.hbm [shape: f32[1,32], index: 6, kind: input, shape index: {}]   ;;  %s2593_s7 = inlined_call_operand.hbm [shape: f32[1,32], index: 7, kind: input, shape index: {}]   ;;  %s2594_s8 = inlined_call_operand.hbm [shape: f32[32,32], index: 8, kind: input, shape index: {}]   ;;  %s2595_s9 = inlined_call_operand.hbm [shape: f32[1,32], index: 9, kind: input, shape index: {}]   ;;  %s2596_s10 = inlined_call_operand.hbm [shape: f32[32,32], index: 10, kind: input, shape index: {}]   ;;  %s2597_s11 = inlined_call_operand.hbm [shape: f32[1,32], index: 11, kind: input, shape index: {}]   ;;  %s2598_s12 = inlined_call_operand.hbm [shape: f32[1,32], index: 12, kind: input, shape index: {}]   ;;  %s2599_s13 = inlined_call_operand.hbm [shape: f32[1,32], index: 13, kind: input, shape index: {}]   ;;  %s2600_s14 = inlined_call_operand.vmem [shape: f32[2,8,32], index: 14, kind: output, shape index: {}]  }
   0x1   :  { %2601 = sst [smem:[#allocation25_spill]] %s2590_s4 }
   0x2   :  { %2602 = sst [smem:[#allocation26_spill]] %s2592_s6 }
   0x3   :  { %2603 = sst [smem:[#allocation27_spill]] %s2594_s8 }
   0x4   :  { %19 = vsyncpa [#allocation3], 0 }
   0x5   :  { %20 = vsyncpa [#allocation5], 0 }
   0x6   :  { %21 = vsyncpa [#allocation8], 0 }
   0x7   :  { %22 = vsyncpa [#allocation11], 0 }
   0x8   :  { %23 = vsyncpa [#allocation14], 0 }
   0x9   :  { %24 = vsyncpa [#allocation17], 0  ;;  %s2253_s29 = smov 0  }
   0xa LB: > { %s2259_s30 = sadd.s32 4294967295, %s2154_s29   ;;  %p1583_p0 = scmp.ge.s32.totalorder %s2154_s29, 1  ;;  %s2154_s29 = sphi %s2253_s29, %s30_s29  }
   0xb   : > { %p365_p1 = scmp.lt.s32.totalorder %s2154_s29, 3  ;;  %p1707_p2 = scmp.eq.s32.totalorder %s2259_s30, 0 }
   0xc   : > { %s2604_s4 = sld [smem:[#allocation25_spill]]  ;;  %s2156_s22 = smov [#allocation4]  }
   0xd   : > { %p2267_p3 = pnand %p1583_p0, %p365_p1  ;;  %s2606_s6 = sld [smem:[#allocation26_spill]] }
   0xe   : > { %s395_s23 = sshll.u32 %s2156_s22, 4  ;;  %s2157_s25 = smov [#allocation7]   ;;  %s396_s23 = int_to_ptr.vmem [resolvable:$true] %s395_s23 }
   0xf   : > { %p1673_p4 = pneg %p2267_p3  ;;  %s422_s26 = sshll.u32 %s2157_s25, 4  ;;  %s423_s26 = int_to_ptr.vmem [resolvable:$true] %s422_s26 }
  0x10   : > { %s2608_s8 = sld [smem:[#allocation27_spill]]  ;;  %s2158_s16 = smov 128  }
  0x11   : > { %p2278_p5 = pnand %p1707_p2, %p1673_p4  ;;  %s2159_s19 = smov 8  }
  0x12   : > { %s393_s17 = sshll.u32 %s2604_s4, 4  ;;  %s2160_s20 = smov [#allocation10]   ;;  %s394_s17 = int_to_ptr.hbm [resolvable:$true] %s393_s17 }
  0x13   : > { %s420_s21 = sshll.u32 %s2606_s6, 4  ;;  %s445_s22 = sshll.u32 %s2160_s20, 4  ;;  %s421_s21 = int_to_ptr.hbm [resolvable:$true] %s420_s21  ;;  %s446_s22 = int_to_ptr.vmem [resolvable:$true] %s445_s22 }
  0x14   : > { %1679 = dma.hbm_to_vmem [thread:$0]  (!%p2278_p5), %s394_s17, 512, %s396_s23, [#allocation5], %s2158_s16, %s2158_s16, %s2159_s19  }
  0x15   : > { %1685 = dma.hbm_to_vmem [thread:$0]  (!%p2278_p5), %s421_s21, 16, %s423_s26, [#allocation8]  }
  0x16   : > { %s443_s15 = sshll.u32 %s2608_s8, 4  ;;  %s469_s27 = sshll.u32 %s2596_s10, 4  ;;  %s444_s15 = int_to_ptr.hbm [resolvable:$true] %s443_s15  ;;  %s470_s27 = int_to_ptr.hbm [resolvable:$true] %s469_s27 }
  0x17   : > { %1691 = dma.hbm_to_vmem [thread:$0]  (!%p2278_p5), %s444_s15, 512, %s446_s22, [#allocation11], %s2158_s16, %s2158_s16, %s2159_s19  }
  0x18   : > { %s496_s17 = sshll.u32 %s2598_s12, 4  ;;  %s2161_s21 = smov [#allocation13]   ;;  %s497_s17 = int_to_ptr.hbm [resolvable:$true] %s496_s17 }
  0x19   : > { %s471_s23 = sshll.u32 %s2161_s21, 4  ;;  %s2162_s4 = smov [#allocation16]   ;;  %s472_s23 = int_to_ptr.vmem [resolvable:$true] %s471_s23 }
  0x1a   : > { %1697 = dma.hbm_to_vmem [thread:$0]  (!%p2278_p5), %s470_s27, 512, %s472_s23, [#allocation14], %s2158_s16, %s2158_s16, %s2159_s19  }
  0x1b   : > { %s498_s26 = sshll.u32 %s2162_s4, 4  ;;  %s376_s15 = sshll.u32 %s2588_s2, 4  ;;  %s499_s26 = int_to_ptr.vmem [resolvable:$true] %s498_s26  ;;  %s377_s15 = int_to_ptr.hbm [resolvable:$true] %s376_s15 }
  0x1c   : > { %1703 = dma.hbm_to_vmem [thread:$0]  (!%p2278_p5), %s497_s17, 16, %s499_s26, [#allocation17]  }
  0x1d   : > { %s408_s28 = sshll.u32 %s2591_s5, 4  ;;  %s2163_s21 = smov [#allocation2]   ;;  %s409_s28 = int_to_ptr.hbm [resolvable:$true] %s408_s28 }
  0x1e   : > { %s378_s8 = sshll.u32 %s2163_s21, 4  ;;  %s2164_s27 = smov [#allocation6]   ;;  %s379_s8 = int_to_ptr.vmem [resolvable:$true] %s378_s8 }
  0x1f   : > { %1676 = dma.hbm_to_vmem [thread:$0]  (!%p2278_p5), %s377_s15, 512, %s379_s8, [#allocation3], %s2158_s16, %s2158_s16, %s2159_s19  }
  0x20   : > { %s410_s23 = sshll.u32 %s2164_s27, 4  ;;  %s432_s17 = sshll.u32 %s2593_s7, 4  ;;  %s411_s23 = int_to_ptr.vmem [resolvable:$true] %s410_s23  ;;  %s433_s17 = int_to_ptr.hbm [resolvable:$true] %s432_s17 }
  0x21   : > { %1682 = dma.hbm_to_vmem [thread:$0]  (!%p2278_p5), %s409_s28, 16, %s411_s23, [#allocation5]  }
  0x22   : > { %s458_s6 = sshll.u32 %s2595_s9, 4  ;;  %s2165_s22 = smov [#allocation9]   ;;  %s459_s6 = int_to_ptr.hbm [resolvable:$true] %s458_s6 }
  0x23   : > { %s434_s21 = sshll.u32 %s2165_s22, 4  ;;  %s2166_s8 = smov [#allocation12]   ;;  %s435_s21 = int_to_ptr.vmem [resolvable:$true] %s434_s21 }
  0x24   : > { %1688 = dma.hbm_to_vmem [thread:$0]  (!%p2278_p5), %s433_s17, 16, %s435_s21, [#allocation8]  }
  0x25   : > { %s460_s16 = sshll.u32 %s2166_s8, 4  ;;  %s484_s27 = sshll.u32 %s2597_s11, 4  ;;  %s461_s16 = int_to_ptr.vmem [resolvable:$true] %s460_s16  ;;  %s485_s27 = int_to_ptr.hbm [resolvable:$true] %s484_s27 }
  0x26   : > { %1694 = dma.hbm_to_vmem [thread:$0]  (!%p2278_p5), %s459_s6, 16, %s461_s16, [#allocation11]  }
  0x27   : > { %s508_s4 = sshll.u32 %s2599_s13, 4  ;;  %s2167_s20 = smov [#allocation15]   ;;  %s509_s4 = int_to_ptr.hbm [resolvable:$true] %s508_s4 }
  0x28   : > { %s486_s26 = sshll.u32 %s2167_s20, 4  ;;  %s2168_s17 = smov [#allocation18]   ;;  %s487_s26 = int_to_ptr.vmem [resolvable:$true] %s486_s26 }
  0x29   : > { %1700 = dma.hbm_to_vmem [thread:$0]  (!%p2278_p5), %s485_s27, 16, %s487_s26, [#allocation14]  }
  0x2a   : > { %s510_s25 = sshll.u32 %s2168_s17, 4  ;;  %537 = sbr.rel (%p2267_p3) target bundleno = 2871 (0xb37), region = 76  ;;  %s511_s25 = int_to_ptr.vmem [resolvable:$true] %s510_s25 }
  0x2b   : > { %1706 = dma.hbm_to_vmem [thread:$0]  (!%p2278_p5), %s509_s4, 16, %s511_s25, [#allocation17]  }
  0x2f   : > { %2129 = dma.done.wait (%p1707_p2), [#allocation3], 512  }
  0x30   : > { %2131 = vsyncadd (%p1707_p2), [#allocation3], 4294966784 }
  0x31   : > { %2133 = dma.done.wait (%p1707_p2), [#allocation5], 528  }
  0x32   : > { %2135 = vsyncadd (%p1707_p2), [#allocation5], 4294966768 }
  0x33   : > { %2137 = dma.done.wait (%p1707_p2), [#allocation8], 32  }
  0x34   : > { %2139 = vsyncadd (%p1707_p2), [#allocation8], 4294967264 }
  0x35   : > { %2141 = dma.done.wait (%p1707_p2), [#allocation11], 528  }
  0x36   : > { %2143 = vsyncadd (%p1707_p2), [#allocation11], 4294966768 }
  0x37   : > { %2145 = dma.done.wait (%p1707_p2), [#allocation14], 528  }
  0x38   : > { %2147 = vsyncadd (%p1707_p2), [#allocation14], 4294966768 }
  0x39   : > { %2149 = dma.done.wait (%p1707_p2), [#allocation17], 32  }
  0x3a   : > { %2151 = vsyncadd (%p1707_p2), [#allocation17], 4294967264  ;;  %p636_p6 = scmp.lt.s32.totalorder %s2259_s30, 1  ;;  %v653_v0 = vld [vmem:[#allocation2 + $0x18] sm:$0xff]  ;;  %v652_v2 = vld [vmem:[#allocation2 + $0x10] sm:$0xff]  ;;  %vm658_vm0 = vcmask 261120   ;;  %v825_v31 = vlaneseq }
  0x3b   : > { %v686_v1 = vld [vmem:[#allocation4 + $0x18] sm:$0xff]  ;;  %674 = vmatpush.msra.mxu0 %v653_v0  ;;  %v685_v3 = vld [vmem:[#allocation4 + $0x10] sm:$0xff]  ;;  %v651_v4 = vld [vmem:[#allocation2 + $0x8] sm:$0xff]  ;;  %vm728_vm1 = vcmask 64512   ;;  %s2169_s15 = smov 112   ;;  %s2170_s27 = smov 120  }
  0x3c   : > { %s2610_s30 = smov (!%p636_p6, %s2259_s30), 1  ;;  %706 = vmatpush.msra.mxu1 %v686_v1  ;;  %v684_v5 = vld [vmem:[#allocation4 + $0x8] sm:$0xff]  ;;  %v650_v6 = vld [vmem:[#allocation2] sm:$0xff]  ;;  %s2171_s28 = smov 104   ;;  %v2428_v32 = vand.u32 127, %v825_v31 }
  0x3d   : > { %s2371_s18 = sshll.u32 %s2610_s30, 3  ;;  %v683_v7 = vld [vmem:[#allocation4] sm:$0xff]  ;;  %675 = vmatpush.msra.mxu0 %v652_v2  ;;  %s2173_s23 = smov 96  }
  0x3e   : > { %s643_s22 = scalar_lea.vmem %s2587_s1, %s2371_s18  ;;  %s639_s16 = scalar_lea.vmem %s2586_s0, %s2371_s18  ;;  %707 = vmatpush.msra.mxu1 %v685_v3  ;;  %v1764_v10 = vld [vmem:[%s2589_s3] ss:$0 sm:$0xff] }
  0x3f   : > { %v2381_v8 = vld [vmem:[%s643_s22] sm:$0xff]  ;;  %676 = vmatpush.msra.mxu0 %v651_v4  ;;  %s2174_s4 = smov 16   ;;  %s2175_s20 = smov 8  }
  0x40   : > { %v648_v9 = vld [vmem:[%s639_s16] sm:$0xff]  ;;  %708 = vmatpush.msra.mxu1 %v684_v5  ;;  %s2176_s26 = smov 24   ;;  %s647_s24 = scalar_lea.vmem %s2600_s14, %s2371_s18 }
  0x41   : > { %677 = vmatpush.msra.mxu0 %v650_v6  ;;  %v1765_v11 = vld [vmem:[#allocation6] ss:$0 sm:$0xff] }
  0x42   : > { %709 = vmatpush.msra.mxu1 %v683_v7  ;;  %1611 = vmatmul.msk.f32.vlgmr.msra.gmra.mxu0 %vm658_vm0, %v2381_v8 }
  0x43   : > { %1612 = vmatmul.msk.f32.vlgmr.msra.gmra.mxu1 %vm658_vm0, %v648_v9 }
  0xbf   : > { %v679_v12 = vpop.f32.mrf.mxu0 }
  0xc0   : > { %v711_v13 = vpop.f32.mrf.mxu1  ;;  %v680_v14 = vadd.f32 %v1764_v10, %v679_v12 }
  0xc1   : > { %v2389_v15 = vadd.f32 %v1765_v11, %v711_v13 }
  0xc2   : > { %v682_v16 = vmul.f32 0.17677669, %v680_v14 }
  0xc3   : > { %724 = vrot.lane.b32.xlu1 %v2389_v15, %s2169_s15  ;;  %722 = vrot.lane.b32.xlu0 %v2389_v15, %s2170_s27 }
  0xc4   : > { %1613 = vmatpush.xpose.msk.msra.mxu2 %vm728_vm1, %v2389_v15  ;;  %717 = vrot.lane.b32.xlu2 %v682_v16, %s2169_s15 }
  0xc7   : > { %1614 = vmatmul.msk.f32.vlgmr.msra.gmra.mxu2 %vm728_vm1, %v682_v16 }
  0xcb   : > { %726 = vrot.lane.b32.xlu1 %v2389_v15, %s2171_s28  ;;  %715 = vrot.lane.b32.xlu0 %v682_v16, %s2170_s27 }
  0xcc   : > { %719 = vrot.lane.b32.xlu2 %v682_v16, %s2171_s28 }
 0x11e   : > { %v718_v19 = vpop.permute.xlu2 %717 }
 0x126   : > { %v720_v22 = vpop.permute.xlu2 %719 }
 0x135   : > { %v2397_v17 = vpop.permute.xlu1 %724  ;;  %v2399_v18 = vpop.permute.xlu0 %722 }
 0x136   : > { %1615 = vmatpush.xpose.msk.msra.mxu3 %vm728_vm1, %v2399_v18  ;;  %1617 = vmatpush.xpose.msk.msrb.mxu2 %vm728_vm1, %v2397_v17 }
 0x139   : > { %1618 = vmatmul.msk.f32.vlgmr.msrb.gmra.mxu2 %vm728_vm1, %v718_v19 }
 0x13d   : > { %v2406_v20 = vpop.permute.xlu1 %726  ;;  %v716_v21 = vpop.permute.xlu0 %715 }
 0x13e   : > { %1616 = vmatmul.msk.f32.vlgmr.msra.gmra.mxu3 %vm728_vm1, %v716_v21 }
 0x13f   : > { %1619 = vmatpush.xpose.msk.msrb.mxu3 %vm728_vm1, %v2406_v20 }
 0x146   : > { %1620 = vmatmul.msk.f32.vlgmr.msrb.gmra.mxu3 %vm728_vm1, %v720_v22 }
 0x14a   : > { %v2412_v23 = vpop.f32.mrf.mxu2 }
 0x14b   : > { %v827_v30 = vsel %vm728_vm1, %v2412_v23, -inf }
 0x1bc   : > { %v2414_v24 = vpop.f32.mrf.mxu2 }
 0x1bd   : > { %v833_v25 = vsel %vm728_vm1, %v2414_v24, -inf }
 0x1be   : > { %834 = vmax.xlane.f32.xlu0 %v833_v25 }
 0x1c1   : > { %v2418_v26 = vpop.f32.mrf.mxu3 }
 0x1c2   : > { %v830_v27 = vsel %vm728_vm1, %v2418_v26, -inf }
 0x1c3   : > { %831 = vmax.xlane.f32.xlu2 %v830_v27 }
 0x1c9   : > { %v2422_v28 = vpop.f32.mrf.mxu3 }
 0x1ca   : > { %v836_v29 = vsel %vm728_vm1, %v2422_v28, -inf }
 0x1cb   : > { %837 = vmax.xlane.f32.xlu1 %v836_v29  ;;  %828 = vmax.xlane.f32.xlu2 %v827_v30 }
 0x231   : > { %v835_v33 = vpop.xlane.xlu0 %834 }
 0x232   : > { %vm841_vm2 = vcmp.eq.f32.partialorder %v2414_v24, %v835_v33 }
 0x233   : > { %v845_v34 = vsel %vm841_vm2, %v2428_v32, 8 }
 0x234   : > { %v877_v35 = vsel %vm728_vm1, %v845_v34, 2147483647 }
 0x235   : > { %v879_v36 = vshra.s32 %v877_v35, 16  ;;  %v878_v53 = vand.u32 65535, %v877_v35 }
 0x236   : > { %v832_v37 = vpop.xlane.xlu2 %831 }
 0x237   : > { %vm840_vm3 = vcmp.eq.f32.partialorder %v2418_v26, %v832_v37  ;;  %v881_v38 = vcvt.s32.f32 %v879_v36  ;;  %v880_v55 = vcvt.s32.f32 %v878_v53 }
 0x238   : > { %v844_v39 = vsel %vm840_vm3, %v2428_v32, 8 }
 0x239   : > { %v862_v40 = vsel %vm728_vm1, %v844_v39, 2147483647  ;;  %882 = vmin.xlane.f32.xlu0 %v881_v38 }
 0x23a   : > { %v864_v41 = vshra.s32 %v862_v40, 16  ;;  %v863_v57 = vand.u32 65535, %v862_v40 }
 0x23c   : > { %v866_v42 = vcvt.s32.f32 %v864_v41  ;;  %v865_v59 = vcvt.s32.f32 %v863_v57 }
 0x23e   : > { %v838_v43 = vpop.xlane.xlu1 %837  ;;  %867 = vmin.xlane.f32.xlu2 %v866_v42  ;;  %v829_v44 = vpop.xlane.xlu2 %828 }
 0x23f   : > { %vm842_vm4 = vcmp.eq.f32.partialorder %v2422_v28, %v838_v43  ;;  %vm839_vm5 = vcmp.eq.f32.partialorder %v2412_v23, %v829_v44 }
 0x240   : > { %v846_v45 = vsel %vm842_vm4, %v2428_v32, 8  ;;  %v843_v46 = vsel %vm839_vm5, %v2428_v32, 8 }
 0x241   : > { %v892_v47 = vsel %vm728_vm1, %v846_v45, 2147483647  ;;  %v847_v48 = vsel %vm728_vm1, %v843_v46, 2147483647 }
 0x242   : > { %v894_v49 = vshra.s32 %v892_v47, 16  ;;  %v849_v50 = vshra.s32 %v847_v48, 16  ;;  %v893_v60 = vand.u32 65535, %v892_v47  ;;  %v848_v2 = vand.u32 65535, %v847_v48 }
 0x244   : > { %v896_v51 = vcvt.s32.f32 %v894_v49  ;;  %v851_v52 = vcvt.s32.f32 %v849_v50  ;;  %v895_v63 = vcvt.s32.f32 %v893_v60  ;;  %v850_v3 = vcvt.s32.f32 %v848_v2 }
 0x246   : > { %897 = vmin.xlane.f32.xlu1 %v896_v51  ;;  %852 = vmin.xlane.f32.xlu2 %v851_v52 }
 0x2ac   : > { %v883_v54 = vpop.xlane.xlu0 %882 }
 0x2ad   : > { %vm884_vm6 = vcmp.eq.f32.partialorder %v881_v38, %v883_v54  ;;  %v889_v5 = vcvt.f32.s32 %v883_v54 }
 0x2ae   : > { %v885_v56 = vsel %vm884_vm6, %v880_v55, inf }
 0x2af   : > { %886 = vmin.xlane.f32.xlu0 %v885_v56  ;;  %v890_v7 = vshll.u32 %v889_v5, 16 }
 0x2b1   : > { %v868_v58 = vpop.xlane.xlu2 %867 }
 0x2b2   : > { %vm869_vm7 = vcmp.eq.f32.partialorder %v866_v42, %v868_v58  ;;  %v874_v11 = vcvt.f32.s32 %v868_v58 }
 0x2b3   : > { %v870_v61 = vsel %vm869_vm7, %v865_v59, inf }
 0x2b4   : > { %v875_v16 = vshll.u32 %v874_v11, 16 }
 0x2b7   : > { %871 = vmin.xlane.f32.xlu0 %v870_v61 }
 0x2b9   : > { %v898_v62 = vpop.xlane.xlu1 %897  ;;  %v853_v1 = vpop.xlane.xlu2 %852 }
 0x2ba   : > { %vm899_vm8 = vcmp.eq.f32.partialorder %v896_v51, %v898_v62  ;;  %vm854_vm9 = vcmp.eq.f32.partialorder %v851_v52, %v853_v1  ;;  %v904_v21 = vcvt.f32.s32 %v898_v62  ;;  %v859_v34 = vcvt.f32.s32 %v853_v1 }
 0x2bb   : > { %v900_v0 = vsel %vm899_vm8, %v895_v63, inf  ;;  %v855_v4 = vsel %vm854_vm9, %v850_v3, inf }
 0x2bc   : > { %901 = vmin.xlane.f32.xlu1 %v900_v0  ;;  %v905_v27 = vshll.u32 %v904_v21, 16  ;;  %v860_v38 = vshll.u32 %v859_v34, 16 }
 0x2c4   : > { %856 = vmin.xlane.f32.xlu1 %v855_v4 }
 0x322   : > { %v887_v6 = vpop.xlane.xlu0 %886 }
 0x323   : > { %v888_v9 = vcvt.f32.s32 %v887_v6 }
 0x325   : > { %v2442_v10 = vadd.s32 %v890_v7, %v888_v9 }
 0x327   : > { %vm909_vm10 = vcmp.eq.s32.totalorder %v2428_v32, %v2442_v10 }
 0x328   : > { %v2450_v12 = vsel %vm909_vm10, -inf, %v2414_v24 }
 0x329   : > { %v925_v13 = vsel %vm728_vm1, %v2450_v12, -inf }
 0x32a   : > { %926 = vmax.xlane.f32.xlu2 %v925_v13  ;;  %v872_v14 = vpop.xlane.xlu0 %871 }
 0x32b   : > { %v873_v19 = vcvt.f32.s32 %v872_v14 }
 0x32d   : > { %v2454_v22 = vadd.s32 %v875_v16, %v873_v19 }
 0x32f   : > { %v902_v25 = vpop.xlane.xlu1 %901  ;;  %vm908_vm11 = vcmp.eq.s32.totalorder %v2428_v32, %v2454_v22 }
 0x330   : > { %v903_v29 = vcvt.f32.s32 %v902_v25  ;;  %v2462_v30 = vsel %vm908_vm11, -inf, %v2418_v26 }
 0x331   : > { %v922_v31 = vsel %vm728_vm1, %v2462_v30, -inf }
 0x332   : > { %v2466_v33 = vadd.s32 %v905_v27, %v903_v29  ;;  %923 = vmax.xlane.f32.xlu1 %v922_v31 }
 0x334   : > { %vm910_vm12 = vcmp.eq.s32.totalorder %v2428_v32, %v2466_v33 }
 0x335   : > { %v2474_v35 = vsel %vm910_vm12, -inf, %v2422_v28 }
 0x336   : > { %v928_v36 = vsel %vm728_vm1, %v2474_v35, -inf }
 0x337   : > { %v857_v37 = vpop.xlane.xlu1 %856  ;;  %929 = vmax.xlane.f32.xlu0 %v928_v36 }
 0x338   : > { %v858_v39 = vcvt.f32.s32 %v857_v37  ;;  %v2172_v37 = vmov 0.0  }
 0x339   : > { %v912_v10 = vsel %vm908_vm11, 1.0, %v2172_v37 }
 0x33a   : > { %v2478_v40 = vadd.s32 %v860_v38, %v858_v39  ;;  %v913_v38 = vsel %vm909_vm10, 1.0, %v2172_v37 }
 0x33c   : > { %vm907_vm13 = vcmp.eq.s32.totalorder %v2428_v32, %v2478_v40 }
 0x33d   : > { %v2486_v41 = vsel %vm907_vm13, -inf, %v2412_v23 }
 0x33e   : > { %v919_v42 = vsel %vm728_vm1, %v2486_v41, -inf }
 0x33f   : > { %920 = vmax.xlane.f32.xlu2 %v919_v42 }
 0x39d   : > { %v927_v43 = vpop.xlane.xlu2 %926 }
 0x39e   : > { %vm933_vm14 = vcmp.eq.f32.partialorder %v2450_v12, %v927_v43 }
 0x39f   : > { %v937_v44 = vsel %vm933_vm14, %v2428_v32, 8 }
 0x3a0   : > { %v969_v45 = vsel %vm728_vm1, %v937_v44, 2147483647 }
 0x3a1   : > { %v971_v46 = vshra.s32 %v969_v45, 16  ;;  %v970_v63 = vand.u32 65535, %v969_v45 }
 0x3a3   : > { %v973_v47 = vcvt.s32.f32 %v971_v46  ;;  %v972_v1 = vcvt.s32.f32 %v970_v63 }
 0x3a5   : > { %974 = vmin.xlane.f32.xlu0 %v973_v47  ;;  %v924_v48 = vpop.xlane.xlu1 %923 }
 0x3a6   : > { %vm932_vm15 = vcmp.eq.f32.partialorder %v2462_v30, %v924_v48 }
 0x3a7   : > { %v936_v49 = vsel %vm932_vm15, %v2428_v32, 8 }
 0x3a8   : > { %v954_v50 = vsel %vm728_vm1, %v936_v49, 2147483647 }
 0x3a9   : > { %v956_v51 = vshra.s32 %v954_v50, 16  ;;  %v955_v3 = vand.u32 65535, %v954_v50 }
 0x3aa   : > { %v930_v52 = vpop.xlane.xlu0 %929 }
 0x3ab   : > { %vm934_vm2 = vcmp.eq.f32.partialorder %v2474_v35, %v930_v52  ;;  %v958_v53 = vcvt.s32.f32 %v956_v51  ;;  %v957_v5 = vcvt.s32.f32 %v955_v3 }
 0x3ac   : > { %v938_v54 = vsel %vm934_vm2, %v2428_v32, 8 }
 0x3ad   : > { %v984_v55 = vsel %vm728_vm1, %v938_v54, 2147483647  ;;  %959 = vmin.xlane.f32.xlu2 %v958_v53 }
 0x3ae   : > { %v986_v56 = vshra.s32 %v984_v55, 16  ;;  %v985_v6 = vand.u32 65535, %v984_v55 }
 0x3b0   : > { %v988_v57 = vcvt.s32.f32 %v986_v56  ;;  %v987_v11 = vcvt.s32.f32 %v985_v6  ;;  %v914_v56 = vsel %vm910_vm12, 1.0, %v2172_v37 }
 0x3b2   : > { %v921_v58 = vpop.xlane.xlu2 %920  ;;  %989 = vmin.xlane.f32.xlu1 %v988_v57 }
 0x3b3   : > { %vm931_vm3 = vcmp.eq.f32.partialorder %v2486_v41, %v921_v58 }
 0x3b4   : > { %v935_v59 = vsel %vm931_vm3, %v2428_v32, 8 }
 0x3b5   : > { %v939_v60 = vsel %vm728_vm1, %v935_v59, 2147483647 }
 0x3b6   : > { %v941_v61 = vshra.s32 %v939_v60, 16  ;;  %v940_v14 = vand.u32 65535, %v939_v60 }
 0x3b8   : > { %v943_v62 = vcvt.s32.f32 %v941_v61  ;;  %v942_v19 = vcvt.s32.f32 %v940_v14 }
 0x3ba   : > { %944 = vmin.xlane.f32.xlu2 %v943_v62 }
 0x418   : > { %v975_v0 = vpop.xlane.xlu0 %974 }
 0x419   : > { %vm976_vm4 = vcmp.eq.f32.partialorder %v973_v47, %v975_v0  ;;  %v981_v25 = vcvt.f32.s32 %v975_v0 }
 0x41a   : > { %v977_v2 = vsel %vm976_vm4, %v972_v1, inf }
 0x41b   : > { %978 = vmin.xlane.f32.xlu0 %v977_v2  ;;  %v982_v29 = vshll.u32 %v981_v25, 16 }
 0x420   : > { %v960_v4 = vpop.xlane.xlu2 %959 }
 0x421   : > { %vm961_vm5 = vcmp.eq.f32.partialorder %v958_v53, %v960_v4  ;;  %v966_v36 = vcvt.f32.s32 %v960_v4 }
 0x422   : > { %v962_v7 = vsel %vm961_vm5, %v957_v5, inf }
 0x423   : > { %963 = vmin.xlane.f32.xlu0 %v962_v7  ;;  %v967_v45 = vshll.u32 %v966_v36, 16 }
 0x425   : > { %v990_v9 = vpop.xlane.xlu1 %989 }
 0x426   : > { %vm991_vm6 = vcmp.eq.f32.partialorder %v988_v57, %v990_v9  ;;  %v996_v47 = vcvt.f32.s32 %v990_v9 }
 0x427   : > { %v992_v13 = vsel %vm991_vm6, %v987_v11, inf }
 0x428   : > { %993 = vmin.xlane.f32.xlu1 %v992_v13  ;;  %v997_v50 = vshll.u32 %v996_v47, 16 }
 0x42d   : > { %v945_v16 = vpop.xlane.xlu2 %944 }
 0x42e   : > { %vm946_vm7 = vcmp.eq.f32.partialorder %v943_v62, %v945_v16  ;;  %v951_v55 = vcvt.f32.s32 %v945_v16  ;;  %v911_v62 = vsel %vm907_vm13, 1.0, %v2172_v37 }
 0x42f   : > { %v947_v21 = vsel %vm946_vm7, %v942_v19, inf }
 0x430   : > { %948 = vmin.xlane.f32.xlu1 %v947_v21  ;;  %v952_v59 = vshll.u32 %v951_v55, 16 }
 0x48e   : > { %v979_v27 = vpop.xlane.xlu0 %978 }
 0x48f   : > { %v980_v31 = vcvt.f32.s32 %v979_v27 }
 0x491   : > { %v983_v34 = vadd.s32 %v982_v29, %v980_v31 }
 0x493   : > { %vm1001_vm8 = vcmp.eq.s32.totalorder %v2428_v32, %v983_v34 }
 0x494   : > { %v1009_v39 = vsel %vm1001_vm8, -inf, %v2450_v12  ;;  %v2507_v42 = vsel %vm1001_vm8, 1.0, %v913_v38 }
 0x495   : > { %v1017_v43 = vsel %vm728_vm1, %v1009_v39, -inf }
 0x496   : > { %1018 = vmax.xlane.f32.xlu2 %v1017_v43  ;;  %v964_v44 = vpop.xlane.xlu0 %963 }
 0x497   : > { %v965_v46 = vcvt.f32.s32 %v964_v44 }
 0x499   : > { %v968_v48 = vadd.s32 %v967_v45, %v965_v46 }
 0x49b   : > { %v994_v49 = vpop.xlane.xlu1 %993  ;;  %vm1000_vm9 = vcmp.eq.s32.totalorder %v2428_v32, %v968_v48 }
 0x49c   : > { %v995_v51 = vcvt.f32.s32 %v994_v49  ;;  %v1008_v12 = vsel %vm1000_vm9, -inf, %v2462_v30  ;;  %v2515_v52 = vsel %vm1000_vm9, 1.0, %v912_v10 }
 0x49d   : > { %v1014_v53 = vsel %vm728_vm1, %v1008_v12, -inf }
 0x49e   : > { %v998_v54 = vadd.s32 %v997_v50, %v995_v51  ;;  %1015 = vmax.xlane.f32.xlu1 %v1014_v53 }
 0x4a0   : > { %vm1002_vm10 = vcmp.eq.s32.totalorder %v2428_v32, %v998_v54 }
 0x4a1   : > { %v2522_v22 = vsel %vm1002_vm10, 1.0, %v914_v56  ;;  %v1010_v57 = vsel %vm1002_vm10, -inf, %v2474_v35 }
 0x4a2   : > { %v1020_v58 = vsel %vm728_vm1, %v1010_v57, -inf }
 0x4a3   : > { %v949_v30 = vpop.xlane.xlu1 %948  ;;  %1021 = vmax.xlane.f32.xlu0 %v1020_v58 }
 0x4a4   : > { %v950_v60 = vcvt.f32.s32 %v949_v30 }
 0x4a6   : > { %v953_v61 = vadd.s32 %v952_v59, %v950_v60 }
 0x4a8   : > { %vm999_vm11 = vcmp.eq.s32.totalorder %v2428_v32, %v953_v61 }
 0x4a9   : > { %v2530_v33 = vsel %vm999_vm11, 1.0, %v911_v62  ;;  %v1007_v63 = vsel %vm999_vm11, -inf, %v2486_v41 }
 0x4aa   : > { %v1011_v0 = vsel %vm728_vm1, %v1007_v63, -inf }
 0x4ab   : > { %1012 = vmax.xlane.f32.xlu2 %v1011_v0 }
 0x509   : > { %v1019_v35 = vpop.xlane.xlu2 %1018 }
 0x50a   : > { %vm1025_vm12 = vcmp.eq.f32.partialorder %v1009_v39, %v1019_v35 }
 0x50b   : > { %v1029_v1 = vsel %vm1025_vm12, %v2428_v32, 8 }
 0x50c   : > { %v1061_v2 = vsel %vm728_vm1, %v1029_v1, 2147483647 }
 0x50d   : > { %v1063_v3 = vshra.s32 %v1061_v2, 16  ;;  %v1062_v31 = vand.u32 65535, %v1061_v2 }
 0x50f   : > { %v1065_v4 = vcvt.s32.f32 %v1063_v3  ;;  %v1064_v36 = vcvt.s32.f32 %v1062_v31 }
 0x511   : > { %1066 = vmin.xlane.f32.xlu0 %v1065_v4  ;;  %v1016_v40 = vpop.xlane.xlu1 %1015 }
 0x512   : > { %vm1024_vm13 = vcmp.eq.f32.partialorder %v1008_v12, %v1016_v40 }
 0x513   : > { %v1028_v5 = vsel %vm1024_vm13, %v2428_v32, 8 }
 0x514   : > { %v1046_v6 = vsel %vm728_vm1, %v1028_v5, 2147483647 }
 0x515   : > { %v1048_v7 = vshra.s32 %v1046_v6, 16  ;;  %v1047_v38 = vand.u32 65535, %v1046_v6 }
 0x516   : > { %v1022_v41 = vpop.xlane.xlu0 %1021 }
 0x517   : > { %vm1026_vm14 = vcmp.eq.f32.partialorder %v1010_v57, %v1022_v41  ;;  %v1050_v9 = vcvt.s32.f32 %v1048_v7  ;;  %v1049_v43 = vcvt.s32.f32 %v1047_v38 }
 0x518   : > { %v1030_v11 = vsel %vm1026_vm14, %v2428_v32, 8  ;;  %vm1268_vm14 = vcmask 130048  }
 0x519   : > { %v1076_v13 = vsel %vm728_vm1, %v1030_v11, 2147483647  ;;  %1051 = vmin.xlane.f32.xlu2 %v1050_v9 }
 0x51a   : > { %v1078_v14 = vshra.s32 %v1076_v13, 16  ;;  %v1077_v44 = vand.u32 65535, %v1076_v13 }
 0x51c   : > { %v1080_v16 = vcvt.s32.f32 %v1078_v14  ;;  %v1079_v47 = vcvt.s32.f32 %v1077_v44  ;;  %v1759_v44 = vpack.i.bf16 %v2406_v20, %v2397_v17 }
 0x51e   : > { %v1013_v19 = vpop.xlane.xlu2 %1012  ;;  %1081 = vmin.xlane.f32.xlu1 %v1080_v16 }
 0x51f   : > { %vm1023_vm15 = vcmp.eq.f32.partialorder %v1007_v63, %v1013_v19 }
 0x520   : > { %v1027_v21 = vsel %vm1023_vm15, %v2428_v32, 8  ;;  %vm1270_vm15 = vcmask 195584  }
 0x521   : > { %v1031_v25 = vsel %vm728_vm1, %v1027_v21, 2147483647 }
 0x522   : > { %v1033_v27 = vshra.s32 %v1031_v25, 16  ;;  %v1032_v49 = vand.u32 65535, %v1031_v25 }
 0x524   : > { %v1035_v29 = vcvt.s32.f32 %v1033_v27  ;;  %v1034_v50 = vcvt.s32.f32 %v1032_v49 }
 0x526   : > { %1036 = vmin.xlane.f32.xlu2 %v1035_v29 }
 0x584   : > { %v1067_v34 = vpop.xlane.xlu0 %1066 }
 0x585   : > { %vm1068_vm2 = vcmp.eq.f32.partialorder %v1065_v4, %v1067_v34  ;;  %v1073_v12 = vcvt.f32.s32 %v1067_v34 }
 0x586   : > { %v1069_v37 = vsel %vm1068_vm2, %v1064_v36, inf }
 0x587   : > { %1070 = vmin.xlane.f32.xlu0 %v1069_v37  ;;  %v1074_v54 = vshll.u32 %v1073_v12, 16 }
 0x58c   : > { %v1052_v39 = vpop.xlane.xlu2 %1051 }
 0x58d   : > { %vm1053_vm3 = vcmp.eq.f32.partialorder %v1050_v9, %v1052_v39  ;;  %v1058_v57 = vcvt.f32.s32 %v1052_v39 }
 0x58e   : > { %v1054_v45 = vsel %vm1053_vm3, %v1049_v43, inf }
 0x58f   : > { %1055 = vmin.xlane.f32.xlu0 %v1054_v45  ;;  %v1059_v60 = vshll.u32 %v1058_v57, 16 }
 0x591   : > { %v1082_v46 = vpop.xlane.xlu1 %1081 }
 0x592   : > { %vm1083_vm4 = vcmp.eq.f32.partialorder %v1080_v16, %v1082_v46  ;;  %v1088_v63 = vcvt.f32.s32 %v1082_v46 }
 0x593   : > { %v1084_v48 = vsel %vm1083_vm4, %v1079_v47, inf }
 0x594   : > { %1085 = vmin.xlane.f32.xlu1 %v1084_v48  ;;  %v1089_v1 = vshll.u32 %v1088_v63, 16 }
 0x599   : > { %v1037_v10 = vpop.xlane.xlu2 %1036 }
 0x59a   : > { %vm1038_vm5 = vcmp.eq.f32.partialorder %v1035_v29, %v1037_v10  ;;  %v1043_v40 = vcvt.f32.s32 %v1037_v10 }
 0x59b   : > { %v1039_v51 = vsel %vm1038_vm5, %v1034_v50, inf }
 0x59c   : > { %1040 = vmin.xlane.f32.xlu1 %v1039_v51  ;;  %v1044_v41 = vshll.u32 %v1043_v40, 16 }
 0x5fa   : > { %v1071_v53 = vpop.xlane.xlu0 %1070 }
 0x5fb   : > { %v1072_v55 = vcvt.f32.s32 %v1071_v53 }
 0x5fd   : > { %v1075_v56 = vadd.s32 %v1074_v54, %v1072_v55 }
 0x5ff   : > { %vm1093_vm6 = vcmp.eq.s32.totalorder %v2428_v32, %v1075_v56 }
 0x600   : > { %v1097_v58 = vsel %vm1093_vm6, 1.0, %v2507_v42 }
 0x601   : > { %vm1101_vm7 = vcmp.gt.f32.partialorder %v1097_v58, 0.0 }
 0x602   : > { %v1056_v30 = vpop.xlane.xlu0 %1055  ;;  %v1105_v59 = vsel %vm1101_vm7, %v2414_v24, -inf }
 0x603   : > { %v1057_v61 = vcvt.f32.s32 %v1056_v30  ;;  %v1113_v62 = vsel %vm728_vm1, %v1105_v59, -inf }
 0x604   : > { %1114 = vmax.xlane.f32.xlu2 %v1113_v62 }
 0x605   : > { %v1060_v0 = vadd.s32 %v1059_v60, %v1057_v61 }
 0x607   : > { %v1086_v35 = vpop.xlane.xlu1 %1085  ;;  %vm1092_vm8 = vcmp.eq.s32.totalorder %v2428_v32, %v1060_v0 }
 0x608   : > { %v1087_v2 = vcvt.f32.s32 %v1086_v35  ;;  %v1096_v3 = vsel %vm1092_vm8, 1.0, %v2515_v52 }
 0x609   : > { %vm1100_vm9 = vcmp.gt.f32.partialorder %v1096_v3, 0.0 }
 0x60a   : > { %v1090_v42 = vadd.s32 %v1089_v1, %v1087_v2  ;;  %v1104_v4 = vsel %vm1100_vm9, %v2418_v26, -inf }
 0x60b   : > { %v1110_v24 = vsel %vm728_vm1, %v1104_v4, -inf }
 0x60c   : > { %1111 = vmax.xlane.f32.xlu1 %v1110_v24  ;;  %vm1094_vm10 = vcmp.eq.s32.totalorder %v2428_v32, %v1090_v42 }
 0x60d   : > { %v1098_v5 = vsel %vm1094_vm10, 1.0, %v2522_v22 }
 0x60e   : > { %vm1102_vm11 = vcmp.gt.f32.partialorder %v1098_v5, 0.0 }
 0x60f   : > { %v1041_v6 = vpop.xlane.xlu1 %1040  ;;  %v1106_v7 = vsel %vm1102_vm11, %v2422_v28, -inf }
 0x610   : > { %v1042_v9 = vcvt.f32.s32 %v1041_v6  ;;  %v1116_v52 = vsel %vm728_vm1, %v1106_v7, -inf }
 0x611   : > { %1117 = vmax.xlane.f32.xlu0 %v1116_v52 }
 0x612   : > { %v1045_v11 = vadd.s32 %v1044_v41, %v1042_v9 }
 0x614   : > { %vm1091_vm12 = vcmp.eq.s32.totalorder %v2428_v32, %v1045_v11 }
 0x615   : > { %v1095_v26 = vsel %vm1091_vm12, 1.0, %v2530_v33 }
 0x616   : > { %vm1099_vm13 = vcmp.gt.f32.partialorder %v1095_v26, 0.0 }
 0x617   : > { %v1103_v13 = vsel %vm1099_vm13, %v2412_v23, -inf }
 0x618   : > { %v1107_v14 = vsel %vm728_vm1, %v1103_v13, -inf }
 0x619   : > { %1108 = vmax.xlane.f32.xlu2 %v1107_v14  ;;  %v1314_v14 = vld [vmem:[#allocation10 + $0x10] sm:$0xff] }
 0x677   : > { %v1115_v22 = vpop.xlane.xlu2 %1114 }
 0x678   : > { %v1121_v16 = vsub.f32 %v1105_v59, %v1115_v22  ;;  %v1313_v22 = vld [vmem:[#allocation10 + $0x8] sm:$0xff] }
 0x67a   : > { %v1127_v19 = vmul.f32 1.442695, %v1121_v16  ;;  %v1312_v16 = vld [vmem:[#allocation10] sm:$0xff] }
 0x67c   : > { %1772 = vpow2.f32 %v1127_v19  ;;  %v1347_v19 = vld [vmem:[#allocation13 + $0x18] sm:$0xff] }
 0x67f   : > { %v1112_v28 = vpop.xlane.xlu1 %1111 }
 0x680   : > { %v1120_v21 = vsub.f32 %v1104_v4, %v1112_v28  ;;  %v2177_v4 = vmov 32.0  }
 0x682   : > { %v1773_v25 = vpop.eup %1772  ;;  %v1125_v27 = vmul.f32 1.442695, %v1120_v21 }
 0x683   : > { %v1137_v29 = vsel %vm728_vm1, %v1773_v25, 0.0 }
 0x684   : > { %1774 = vpow2.f32 %v1125_v27  ;;  %1138 = vadd.xlane.f32.xlu0 %v1137_v29  ;;  %v1118_v32 = vpop.xlane.xlu0 %1117 }
 0x685   : > { %v1122_v33 = vsub.f32 %v1106_v7, %v1118_v32 }
 0x687   : > { %v1129_v31 = vmul.f32 1.442695, %v1122_v33 }
 0x689   : > { %1776 = vpow2.f32 %v1129_v31 }
 0x68a   : > { %v1775_v23 = vpop.eup %1774 }
 0x68b   : > { %v1134_v34 = vsel %vm728_vm1, %v1775_v23, 0.0 }
 0x68c   : > { %v1109_v36 = vpop.xlane.xlu2 %1108  ;;  %1135 = vadd.xlane.f32.xlu2 %v1134_v34  ;;  %v1766_v34 = vld [vmem:[#allocation7] ss:$0 sm:$0xff] }
 0x68d   : > { %v1119_v37 = vsub.f32 %v1103_v13, %v1109_v36 }
 0x68f   : > { %v1777_v38 = vpop.eup %1776  ;;  %v1123_v39 = vmul.f32 1.442695, %v1119_v37 }
 0x690   : > { %v1140_v43 = vsel %vm728_vm1, %v1777_v38, 0.0 }
 0x691   : > { %1778 = vpow2.f32 %v1123_v39  ;;  %1141 = vadd.xlane.f32.xlu1 %v1140_v43 }
 0x697   : > { %v1779_v45 = vpop.eup %1778 }
 0x698   : > { %1760 = vrot.lane.b32.xlu0 %v1759_v44, %s2173_s23  ;;  %v1131_v46 = vsel %vm728_vm1, %v1779_v45, 0.0  ;;  %v1346_v44 = vld [vmem:[#allocation13 + $0x10] sm:$0xff] }
 0x699   : > { %1132 = vadd.xlane.f32.xlu2 %v1131_v46  ;;  %v1344_v46 = vld [vmem:[#allocation13] sm:$0xff] }
 0x6aa   : > { %1177 = vrot.lane.b32.xlu1 %v2399_v18, %s2173_s23 }
 0x6b1   : > { %1151 = vrot.lane.b32.xlu2 %v2389_v15, %s2173_s23 }
 0x6f7   : > { %v1139_v47 = vpop.xlane.xlu0 %1138 }
 0x6f8   : > { %1780 = vrcp.f32 %v1139_v47  ;;  %v1768_v47 = vld [vmem:[#allocation12] ss:$0 sm:$0xff] }
 0x6fe   : > { %v1781_v10 = vpop.eup %1780 }
 0x6ff   : > { %v1136_v48 = vpop.xlane.xlu2 %1135  ;;  %v1149_v20 = vmul.f32 %v1781_v10, %v1773_v25 }
 0x704   : > { %v1142_v49 = vpop.xlane.xlu1 %1141 }
 0x705   : > { %1782 = vrcp.f32 %v1142_v49 }
 0x70a   : > { %v1761_v50 = vpop.permute.xlu0 %1760 }
 0x70b   : > { %v1783_v51 = vpop.eup %1782  ;;  %v1763_v12 = vunpack.i.h.bf16 %v1761_v50  ;;  %v1762_v17 = vunpack.i.l.bf16 %v1761_v50  ;;  %v1769_v50 = vld [vmem:[#allocation15] ss:$0 sm:$0xff] }
 0x70c   : > { %v1150_v53 = vmul.f32 %v1783_v51, %v1777_v38  ;;  %v1133_v54 = vpop.xlane.xlu2 %1132  ;;  %v1767_v38 = vld [vmem:[#allocation9] ss:$0 sm:$0xff] }
 0x70d   : > { %1784 = vrcp.f32 %v1133_v54  ;;  %1224 = vmatpush.msra.mxu2 %v1762_v17  ;;  %1250 = vmatpush.msra.mxu3 %v1763_v12 }
 0x70e   : > { %1623 = vmatmul.msk.f32.vlgmr.msra.gmra.mxu2 %vm728_vm1, %v1149_v20  ;;  %1624 = vmatmul.msk.f32.vlgmr.msra.gmra.mxu3 %vm728_vm1, %v1150_v53  ;;  %1786 = vrcp.f32 %v1136_v48 }
 0x70f   : > { %1788 = vrcp.f32 %v2177_v4 }
 0x713   : > { %v1785_v15 = vpop.eup %1784 }
 0x714   : > { %v1152_v18 = vpop.permute.xlu2 %1151  ;;  %v1147_v55 = vmul.f32 %v1785_v15, %v1779_v45  ;;  %v1787_v56 = vpop.eup %1786  ;;  %v1345_v45 = vld [vmem:[#allocation13 + $0x8] sm:$0xff] }
 0x715   : > { %1172 = vmatpush.msrb.mxu0 %v1152_v18  ;;  %v1148_v58 = vmul.f32 %v1787_v56, %v1775_v23  ;;  %v1789_v24 = vpop.eup %1788 }
 0x716   : > { %1621 = vmatmul.msk.f32.vlgmr.msrb.gmra.mxu0 %vm728_vm1, %v1147_v55  ;;  %v1279_v40 = vmul.f32 32.0, %v1789_v24  ;;  %vm1283_vm2 = vweird.f32 %v1789_v24 }
 0x718   : > { %v1280_v5 = vsub.f32 1.0, %v1279_v40 }
 0x71a   : > { %v1281_v6 = vmul.f32 %v1789_v24, %v1280_v5 }
 0x71c   : > { %v1178_v57 = vpop.permute.xlu1 %1177  ;;  %v1282_v7 = vadd.f32 %v1789_v24, %v1281_v6 }
 0x71d   : > { %1198 = vmatpush.msrb.mxu1 %v1178_v57 }
 0x71e   : > { %1622 = vmatmul.msk.f32.vlgmr.msrb.gmra.mxu1 %vm728_vm1, %v1148_v58  ;;  %v1284_v41 = vsel %vm1283_vm2, %v1789_v24, %v1282_v7 }
 0x71f   : > { %1367 = vmatpush.msra.mxu1 %v1347_v19 }
 0x721   : > { %1368 = vmatpush.msra.mxu1 %v1346_v44 }
 0x723   : > { %1369 = vmatpush.msra.mxu1 %v1345_v45 }
 0x725   : > { %1370 = vmatpush.msra.mxu1 %v1344_v46 }
 0x791   : > { %v1226_v30 = vpop.f32.mrf.mxu2  ;;  %v1252_v60 = vpop.f32.mrf.mxu3 }
 0x792   : > { %1260 = vrot.lane.b32.xlu1 %v1226_v30, %s2174_s4 }
 0x793   : > { %v1174_v62 = vpop.f32.mrf.mxu0 }
 0x79b   : > { %v1200_v59 = vpop.f32.mrf.mxu1 }
 0x79c   : > { %1256 = vrot.lane.b32.xlu0 %v1200_v59, %s2175_s20 }
 0x7a4   : > { %1264 = vrot.lane.b32.xlu0 %v1252_v60, %s2176_s26 }
 0x804   : > { %v1261_v0 = vpop.permute.xlu1 %1260 }
 0x80e   : > { %v1257_v61 = vpop.permute.xlu0 %1256 }
 0x80f   : > { %v1267_v63 = vsel %vm728_vm1, %v1174_v62, %v1257_v61 }
 0x810   : > { %v1269_v1 = vsel %vm1268_vm14, %v1267_v63, %v1261_v0  ;;  %v1770_v0 = vld [vmem:[#allocation16] ss:$0 sm:$0xff] }
 0x816   : > { %v1265_v35 = vpop.permute.xlu0 %1264 }
 0x817   : > { %v1271_v2 = vsel %vm1270_vm15, %v1269_v1, %v1265_v35  ;;  %v1771_v1 = vld [vmem:[#allocation18] ss:$0 sm:$0xff] }
 0x818   : > { %v1272_v3 = vadd.f32 %v1271_v2, %v2381_v8  ;;  %v1315_v8 = vld [vmem:[#allocation10 + $0x18] sm:$0xff] }
 0x819   : > { %1335 = vmatpush.msra.mxu0 %v1315_v8 }
 0x81a   : > { %v1275_v42 = vsel %vm658_vm0, %v1272_v3, 0.0 }
 0x81b   : > { %1276 = vadd.xlane.f32.xlu1 %v1275_v42  ;;  %1336 = vmatpush.msra.mxu0 %v1314_v14 }
 0x81d   : > { %1337 = vmatpush.msra.mxu0 %v1313_v22 }
 0x81f   : > { %1338 = vmatpush.msra.mxu0 %v1312_v16 }
 0x88e   : > { %v1277_v9 = vpop.xlane.xlu1 %1276 }
 0x88f   : > { %v1285_v52 = vmul.f32 %v1284_v41, %v1277_v9 }
 0x891   : > { %v1286_v11 = vsub.f32 %v1272_v3, %v1285_v52 }
 0x893   : > { %v1287_v26 = vmul.f32 %v1286_v11, %v1286_v11 }
 0x895   : > { %v1288_v13 = vsel %vm658_vm0, %v1287_v26, 0.0 }
 0x896   : > { %1289 = vadd.xlane.f32.xlu0 %v1288_v13 }
 0x909   : > { %v1290_v28 = vpop.xlane.xlu0 %1289 }
 0x90a   : > { %v1291_v21 = vmul.f32 %v1290_v28, %v1284_v41 }
 0x90c   : > { %v1292_v25 = vadd.f32 1e-05, %v1291_v21 }
 0x90e   : > { %1790 = vrsqrt.f32 %v1292_v25  ;;  %vm1299_vm3 = vweird.f32 %v1292_v25 }
 0x914   : > { %v1791_v27 = vpop.eup %1790 }
 0x915   : > { %v1294_v29 = vmul.f32 %v1791_v27, %v1292_v25  ;;  %vm1300_vm1 = vweird.f32 %v1791_v27 }
 0x916   : > { %vm1301_vm4 = vmor %vm1299_vm3, %vm1300_vm1 }
 0x917   : > { %v1295_v32 = vmul.f32 %v1791_v27, %v1294_v29 }
 0x919   : > { %v1296_v33 = vmul.f32 0.5, %v1295_v32 }
 0x91b   : > { %v1297_v31 = vsub.f32 1.5, %v1296_v33 }
 0x91d   : > { %v1298_v23 = vmul.f32 %v1791_v27, %v1297_v31 }
 0x91f   : > { %v1302_v36 = vsel %vm1301_vm4, %v1791_v27, %v1298_v23 }
 0x920   : > { %v1303_v37 = vmul.f32 %v1302_v36, %v1286_v11 }
 0x922   : > { %v1307_v39 = vmul.f32 %v1766_v34, %v1303_v37 }
 0x924   : > { %v1311_v43 = vadd.f32 %v1767_v38, %v1307_v39 }
 0x926   : > { %1625 = vmatmul.msk.f32.vlgmr.msra.gmra.mxu0 %vm658_vm0, %v1311_v43 }
 0x9a3   : > { %v1340_v48 = vpop.f32.mrf.mxu0 }
 0x9a4   : > { %v1341_v49 = vadd.f32 %v1768_v47, %v1340_v48 }
 0x9a6   : > { %v1343_v10 = vmax.f32 %v1341_v49, 0.0 }
 0x9a8   : > { %1626 = vmatmul.msk.f32.vlgmr.msra.gmra.mxu1 %vm658_vm0, %v1343_v10 }
 0xa25   : > { %v1372_v51 = vpop.f32.mrf.mxu1 }
 0xa26   : > { %v1373_v12 = vadd.f32 %v1769_v50, %v1372_v51 }
 0xa28   : > { %v1375_v17 = vadd.f32 %v1373_v12, %v1311_v43 }
 0xa2a   : > { %v1378_v20 = vsel %vm658_vm0, %v1375_v17, 0.0 }
 0xa2b   : > { %1379 = vadd.xlane.f32.xlu2 %v1378_v20 }
 0xa9e   : > { %v1380_v53 = vpop.xlane.xlu2 %1379 }
 0xa9f   : > { %v1381_v54 = vmul.f32 %v1380_v53, %v1284_v41 }
 0xaa1   : > { %v1382_v15 = vsub.f32 %v1375_v17, %v1381_v54 }
 0xaa3   : > { %v1383_v18 = vmul.f32 %v1382_v15, %v1382_v15 }
 0xaa5   : > { %v1384_v55 = vsel %vm658_vm0, %v1383_v18, 0.0 }
 0xaa6   : > { %1385 = vadd.xlane.f32.xlu1 %v1384_v55 }
 0xb19   : > { %v1386_v56 = vpop.xlane.xlu1 %1385 }
 0xb1a   : > { %v1387_v57 = vmul.f32 %v1386_v56, %v1284_v41 }
 0xb1c   : > { %v1388_v58 = vadd.f32 1e-05, %v1387_v57 }
 0xb1e   : > { %1792 = vrsqrt.f32 %v1388_v58  ;;  %vm1395_vm6 = vweird.f32 %v1388_v58 }
 0xb24   : > { %v1793_v30 = vpop.eup %1792 }
 0xb25   : > { %v1390_v59 = vmul.f32 %v1793_v30, %v1388_v58  ;;  %vm1396_vm5 = vweird.f32 %v1793_v30 }
 0xb26   : > { %vm1397_vm7 = vmor %vm1395_vm6, %vm1396_vm5 }
 0xb27   : > { %v1391_v60 = vmul.f32 %v1793_v30, %v1390_v59 }
 0xb29   : > { %v1392_v61 = vmul.f32 0.5, %v1391_v60 }
 0xb2b   : > { %v1393_v62 = vsub.f32 1.5, %v1392_v61 }
 0xb2d   : > { %v1394_v63 = vmul.f32 %v1793_v30, %v1393_v62 }
 0xb2f   : > { %v1398_v35 = vsel %vm1397_vm7, %v1793_v30, %v1394_v63 }
 0xb30   : > { %v1399_v2 = vmul.f32 %v1398_v35, %v1382_v15 }
 0xb32   : > { %v1403_v3 = vmul.f32 %v1770_v0, %v1399_v2 }
 0xb34   : > { %v1407_v42 = vadd.f32 %v1771_v1, %v1403_v3 }
 0xb36   : > { %1408 = vst.msk [vmem:[%s647_s24] sm:$0xff] %vm658_vm0, %v1407_v42 }
 0xb37 PF: > { %s30_s29 = sadd.s32 1, %s2154_s29  }
 0xb38   : > { %p27_p7 = scmp.ge.s32.totalorder %s30_s29, 4  }
 0xb3a   :  { %29 = sbr.rel (!%p27_p7) target bundleno = 10 (0xa), region = 154 }
 0xb3f   :  { %1428 = vsyncpa [#allocation3], 1 }
 0xb40   :  { %1430 = vsyncpa [#allocation3 + $0x1], 1 }
 0xb41   :  { %1431 = vsyncpa [#allocation5], 1 }
 0xb42   :  { %1432 = vsyncpa [#allocation8], 1 }
 0xb43   :  { %1433 = vsyncpa [#allocation11], 1 }
 0xb44   :  { %1434 = vsyncpa [#allocation14], 1 }
 0xb45   :  { %1435 = vsyncpa [#allocation17], 1 }

</bundles_post_ra>
